<compile_context>
chip_gen: v5e
topology: v5e:2x2
jax: 0.10.0
libtpu: 0.0.40
codegen_flags: <defaults>
</compile_context>

<pallas_src>
import functools
import math

import jax
import jax.numpy as jnp
from jax import lax
from jax.experimental import pallas as pl
from jax.experimental.pallas import tpu as pltpu


def _self_attention_kernel(x_ref, wqkv_ref, wm_ref, bqkv_ref, bm_ref,
                           seg3_ref, seg3t_ref, hmask_ref, sega_ref, segat_ref,
                           o_ref, *, num_heads, head_dim, mxu_dtype):
    f32 = jnp.float32
    tbt, seq, c = x_ref.shape
    rows = tbt * seq
    hs = num_heads * seq
    eps2 = 1e-24                       # (F.normalize eps = 1e-12) ** 2

    # ---- fused q|k|v projection: ONE (rows, c) @ (c, 3c) MXU matmul ----------
    x2d = x_ref[...].reshape(rows, c)                       # leading-dim merge only
    qkv = jnp.dot(x2d, wqkv_ref[...], preferred_element_type=f32)
    qkv = qkv + bqkv_ref[...].astype(f32)                   # (rows, 3c) f32

    # ---- per-head L2 normalize, full channel width ----------------------------
    # Per-(projection, head) sum of squares via one small matmul against a static
    # 0/1 segment matrix + broadcast-back matmul (no per-head lane slicing, no XLU
    # lane reductions); rsqrt runs on the EUP instead of sqrt + divide.
    sumsq_h = jnp.dot(qkv * qkv, seg3_ref[...], preferred_element_type=f32)   # (rows, 3H)
    inv_h = lax.rsqrt(jnp.maximum(sumsq_h, eps2))                             # (rows, 3H)
    scale = jnp.dot(inv_h, seg3t_ref[...], preferred_element_type=f32)        # (rows, 3c)
    qkv_n = qkv * scale

    q3 = qkv_n[:, :c].reshape(tbt, seq, c)
    k3 = qkv_n[:, c:2 * c].reshape(tbt, seq, c)
    v3 = qkv_n[:, 2 * c:].reshape(tbt, seq, c)

    # ---- block-diagonal (head-expanded) K / V ---------------------------------
    # k_exp[b, h*seq + j, :] = k[b, j, :] masked to head h's channels (same for v),
    # so scores s[b, i, h*seq + j] = q_h[b, i] . k_h[b, j] come from ONE batched
    # matmul with contraction dim c and lane dim num_heads*seq (=128 for the demo),
    # replacing the previous 8x-unrolled (16x16x4) per-head einsums.
    hmask = hmask_ref[...]                                          # (H, c) 0/1 f32
    k_exp = (k3[:, None, :, :] * hmask[None, :, None, :]).reshape(tbt, hs, c)
    v_exp = (v3[:, None, :, :] * hmask[None, :, None, :]).reshape(tbt, hs, c)

    inv_sqrt_d = 1.0 / math.sqrt(head_dim)
    s = jnp.einsum("bqc,bkc->bqk", q3.astype(mxu_dtype), k_exp.astype(mxu_dtype),
                   preferred_element_type=f32) * inv_sqrt_d         # (tbt, seq, H*seq)

    # q and k are unit-normalized, so |s| <= 1/sqrt(head_dim) <= 1 and exp cannot
    # overflow: the usual max-subtraction is intentionally skipped.  Do NOT reuse
    # this for un-normalized attention scores.
    p = jnp.exp(s)

    # Per-head softmax denominator: segment-sum matmul + broadcast-back matmul.
    p2 = p.reshape(rows, hs)
    denom_h = jnp.dot(p2, sega_ref[...], preferred_element_type=f32)          # (rows, H)
    # approx=True would push the reciprocal onto the EUP; kept exact for parity
    # with the reference at atol=1e-4.
    inv_denom = jnp.dot(pl.reciprocal(denom_h, approx=False), segat_ref[...],
                        preferred_element_type=f32)                           # (rows, H*seq)
    p_n = (p2 * inv_denom).reshape(tbt, seq, hs)

    o = jnp.einsum("bqk,bkc->bqc", p_n.astype(mxu_dtype), v_exp.astype(mxu_dtype),
                   preferred_element_type=f32)                                # (tbt, seq, c)

    # ---- output projection `m` -------------------------------------------------
    y = jnp.dot(o.reshape(rows, c).astype(mxu_dtype), wm_ref[...],
                preferred_element_type=f32) + bm_ref[...].astype(f32)
    # TODO(synk): nn.Dropout (drop1/drop2) omitted -- inference/eval semantics.
    o_ref[...] = y.reshape(tbt, seq, c).astype(o_ref.dtype)


def _device_kind():
    try:
        return jax.devices()[0].device_kind.lower()
    except Exception:
        return "unknown"


def _vmem_limit_bytes(kind):
    # v5e / v6e (and v5p): 128 MiB VMEM per TensorCore -> generous limit.
    if "v5" in kind or "v6" in kind:
        return 100 * 1024 * 1024
    # v7x has only 64 MiB per TensorCore; unknown chips get the conservative cap.
    return 56 * 1024 * 1024


def _estimate_vmem_bytes(bt_tile, seq, c, num_heads, itemsize):
    """Rough per-grid-step VMEM footprint (blocks + resident weights + f32 temps)."""
    rows = bt_tile * seq
    hs = num_heads * seq
    blocks = 2 * (2 * rows * c * itemsize)                # x in + out, double-buffered
    weights = 2 * (4 * c * c + 4 * c) * itemsize          # wqkv + wm (+ biases)
    consts = (2 * (3 * c) * (3 * num_heads) + num_heads * c + 2 * num_heads * hs) * 4
    temps = rows * (3 * (3 * c)           # qkv / squares / normalized
                    + 2 * num_heads * c   # k_exp + v_exp
                    + 3 * hs              # scores, probs, denom broadcast
                    + 2 * c) * 4          # attention output + projected output
    return blocks + weights + consts + temps


def _choose_bt_tile(bt, seq, c, num_heads, itemsize, kind):
    """Largest bt tile that fits the per-generation VMEM budget.  Only on v7x
    (2 TensorCores/chip) do we force >= 2 grid steps so the "parallel" axis feeds
    both cores; on single-core v5e/v6e extra grid steps are pure serial overhead."""
    budget = int(0.75 * _vmem_limit_bytes(kind))
    need_two_steps = (("v7" in kind) or ("7x" in kind)) and bt >= 2
    for cand in range(bt, 0, -1):
        if bt % cand:
            continue
        if need_two_steps and (bt // cand) < 2:
            continue
        if cand > 1 and _estimate_vmem_bytes(cand, seq, c, num_heads, itemsize) > budget:
            continue
        return cand
    return 1


def self_attention(x, wq, bq, wkv, bkv, wm, bm, *, num_heads=8, bt_tile=None):
    """Forward pass of SelfAttention (eval mode).

    x: (b, t, l, c); wq/bq, wkv/bkv, wm/bm are the PyTorch nn.Linear parameters
    (weights stored (out, in)).  Returns (b, t, l, c).
    """
    b, t, seq, c = x.shape
    assert c % num_heads == 0, "in_planes must be divisible by num_heads"
    head_dim = c // num_heads
    assert wq.shape == (c, c) and bq.shape == (c,)
    assert wkv.shape == (2 * c, c) and bkv.shape == (2 * c,)
    assert wm.shape == (c, c) and bm.shape == (c,)

    f32 = jnp.float32
    dtype = x.dtype
    itemsize = jnp.dtype(dtype).itemsize
    bt = b * t
    kind = _device_kind()
    if bt_tile is None:
        bt_tile = _choose_bt_tile(bt, seq, c, num_heads, itemsize, kind)
    assert bt % bt_tile == 0

    # Leading-dim merge only -- no transpose / pad / copy passes in the wrapper.
    x3 = x.reshape(bt, seq, c)

    # PyTorch Linear stores W as (out, in); fuse q|k|v into one (c, 3c) weight and
    # one (1, 3c) bias so the kernel does a single projection matmul.  MXU weights
    # stay in the model dtype (bf16 stays bf16); biases are applied in f32.
    wqkv_t = jnp.concatenate([jnp.transpose(wq), jnp.transpose(wkv)], axis=1).astype(dtype)
    wm_t = jnp.transpose(wm).astype(dtype)
    bqkv2 = jnp.concatenate([bq, bkv]).reshape(1, 3 * c).astype(f32)
    bm2 = bm.reshape(1, c).astype(f32)

    # Static 0/1 segment matrices (DMA'd once, resident in VMEM):
    #   seg3 / seg3t : per-(projection, head) sum-of-squares + broadcast back
    #   hmask        : head channel mask for the block-diagonal K/V expansion
    #   sega / segat : per-head softmax denominator + broadcast back
    grp3 = jnp.arange(3 * c) // head_dim
    seg3 = (grp3[:, None] == jnp.arange(3 * num_heads)[None, :]).astype(f32)
    seg3t = jnp.transpose(seg3)
    chan_head = jnp.arange(c) // head_dim
    hmask = (jnp.arange(num_heads)[:, None] == chan_head[None, :]).astype(f32)
    slot_head = jnp.arange(num_heads * seq) // seq
    sega = (slot_head[:, None] == jnp.arange(num_heads)[None, :]).astype(f32)
    segat = jnp.transpose(sega)

    rows = bt * seq
    hs = num_heads * seq
    flops = (2 * rows * c * 3 * c                     # fused qkv projection
             + 4 * rows * (3 * c) * (3 * num_heads)   # normalize segment matmuls
             + 4 * rows * hs * c                      # q@k^T and attn@v
             + 4 * rows * hs * num_heads              # softmax segment matmuls
             + 2 * rows * c * c)                      # output projection
    cost = pl.CostEstimate(
        flops=flops,
        transcendentals=rows * (hs + 4 * num_heads),
        bytes_accessed=2 * rows * c * itemsize + (4 * c * c + 4 * c) * itemsize)

    kernel = functools.partial(_self_attention_kernel, num_heads=num_heads,
                               head_dim=head_dim, mxu_dtype=dtype)

    def run(single_buffer_weights):
        const_kw = {"pipeline_mode": pl.Buffered(1)} if single_buffer_weights else {}
        full = lambda i: (0, 0)

        def const_spec(shape):
            return pl.BlockSpec(shape, full, **const_kw)

        fn = pl.pallas_call(
            kernel,
            out_shape=jax.ShapeDtypeStruct((bt, seq, c), dtype),
            grid_spec=pltpu.PrefetchScalarGridSpec(
                num_scalar_prefetch=0,
                grid=(bt // bt_tile,),
                in_specs=[
                    pl.BlockSpec((bt_tile, seq, c), lambda i: (i, 0, 0)),  # x block
                    const_spec((c, 3 * c)),                  # Wq^T | Wk^T | Wv^T
                    const_spec((c, c)),                      # Wm^T
                    const_spec((1, 3 * c)),                  # bq | bk | bv
                    const_spec((1, c)),                      # bm
                    const_spec((3 * c, 3 * num_heads)),      # seg3
                    const_spec((3 * num_heads, 3 * c)),      # seg3^T
                    const_spec((num_heads, c)),              # head channel mask
                    const_spec((hs, num_heads)),             # sega
                    const_spec((num_heads, hs)),             # sega^T
                ],
                out_specs=pl.BlockSpec((bt_tile, seq, c), lambda i: (i, 0, 0)),
            ),
            compiler_params=pltpu.CompilerParams(
                dimension_semantics=("parallel",),
                vmem_limit_bytes=_vmem_limit_bytes(kind),
            ),
            cost_estimate=cost,
        )
        out = fn(x3, wqkv_t, wm_t, bqkv2, bm2, seg3, seg3t, hmask, sega, segat)
        return jax.block_until_ready(out)

    # Single-buffering the constant-index weight/bias/segment blocks halves their
    # resident VMEM (a v7x win).  Fall back to default double-buffering if this
    # jax version rejects pipeline_mode / Buffered(1).
    try:
        out = run(True)
    except Exception:
        out = run(False)

    return out.reshape(b, t, seq, c)


def _reference(x, wq, bq, wkv, bkv, wm, bm, num_heads):
    """Pure-JAX mirror of the PyTorch forward (eval mode)."""
    b, t, seq, c = x.shape
    hd = c // num_heads
    eps = 1e-12

    def norm(a):
        return a / jnp.maximum(jnp.sqrt(jnp.sum(a * a, axis=-1, keepdims=True)), eps)

    q = jnp.einsum("btlc,oc->btlo", x, wq) + bq
    q = jnp.transpose(q.reshape(b, t, seq, num_heads, hd), (0, 1, 3, 2, 4))
    q = norm(q)
    kv = jnp.einsum("btlc,oc->btlo", x, wkv) + bkv
    kv = jnp.transpose(kv.reshape(b, t, seq, 2 * num_heads, hd), (0, 1, 3, 2, 4))
    k, v = norm(kv[:, :, :num_heads]), norm(kv[:, :, num_heads:])
    att = jnp.einsum("bthqd,bthkd->bthqk", q, k) / math.sqrt(hd)
    att = jax.nn.softmax(att, axis=-1)
    y = jnp.einsum("bthqk,bthkd->bthqd", att, v)
    y = jnp.transpose(y, (0, 1, 3, 2, 4)).reshape(b, t, seq, c)
    return jnp.einsum("btlc,oc->btlo", y, wm) + bm


if __name__ == "__main__":
    key = jax.random.PRNGKey(0)
    keys = jax.random.split(key, 7)

    B, T, L, C = 2, 4, 16, 32        # in_planes = 32
    NUM_HEADS = 8                    # head_dim = 4

    x = jax.random.normal(keys[0], (B, T, L, C), dtype=jnp.float32)

    bound = 1.0 / math.sqrt(C)       # nn.Linear-style uniform init bound
    wq = jax.random.uniform(keys[1], (C, C), jnp.float32, -bound, bound)
    bq = jax.random.uniform(keys[2], (C,), jnp.float32, -bound, bound)
    wkv = jax.random.uniform(keys[3], (2 * C, C), jnp.float32, -bound, bound)
    bkv = jax.random.uniform(keys[4], (2 * C,), jnp.float32, -bound, bound)
    wm = jax.random.uniform(keys[5], (C, C), jnp.float32, -bound, bound)
    bm = jax.random.uniform(keys[6], (C,), jnp.float32, -bound, bound)

    out = self_attention(x, wq, bq, wkv, bkv, wm, bm, num_heads=NUM_HEADS)
    jax.block_until_ready(out)

    ref = _reference(x, wq, bq, wkv, bkv, wm, bm, NUM_HEADS)
    assert out.shape == (B, T, L, C)
    assert jnp.allclose(out, ref, atol=1e-4, rtol=1e-4), (
        float(jnp.max(jnp.abs(out - ref))))

    print("KERNEL_OK")
</pallas_src>

<mosaic_0001>
module attributes {stable_mosaic.version = 11 : i64} {
  func.func @_self_attention_kernel(%arg0: i32, %arg1: memref<8x16x32xf32, #tpu.memory_space<vmem>>, %arg2: memref<32x96xf32, #tpu.memory_space<vmem>>, %arg3: memref<32x32xf32, #tpu.memory_space<vmem>>, %arg4: memref<1x96xf32, #tpu.memory_space<vmem>>, %arg5: memref<1x32xf32, #tpu.memory_space<vmem>>, %arg6: memref<96x24xf32, #tpu.memory_space<vmem>>, %arg7: memref<24x96xf32, #tpu.memory_space<vmem>>, %arg8: memref<8x32xf32, #tpu.memory_space<vmem>>, %arg9: memref<128x8xf32, #tpu.memory_space<vmem>>, %arg10: memref<8x128xf32, #tpu.memory_space<vmem>>, %arg11: memref<8x16x32xf32, #tpu.memory_space<vmem>>) attributes {dimension_semantics = [#tpu.dimension_semantics<parallel>], iteration_bounds = array<i64: 1>, scalar_prefetch = 0 : i64, scratch_operands = 0 : i64, tpu.core_type = #tpu.core_type<tc>, window_params = [{transform_indices = @transform_0, window_bounds = array<i64: 8, 16, 32>}, {pipeline_mode = #tpu.pipeline_mode<synchronous>, transform_indices = @transform_1, window_bounds = array<i64: 32, 96>}, {pipeline_mode = #tpu.pipeline_mode<synchronous>, transform_indices = @transform_2, window_bounds = array<i64: 32, 32>}, {pipeline_mode = #tpu.pipeline_mode<synchronous>, transform_indices = @transform_3, window_bounds = array<i64: 1, 96>}, {pipeline_mode = #tpu.pipeline_mode<synchronous>, transform_indices = @transform_4, window_bounds = array<i64: 1, 32>}, {pipeline_mode = #tpu.pipeline_mode<synchronous>, transform_indices = @transform_5, window_bounds = array<i64: 96, 24>}, {pipeline_mode = #tpu.pipeline_mode<synchronous>, transform_indices = @transform_6, window_bounds = array<i64: 24, 96>}, {pipeline_mode = #tpu.pipeline_mode<synchronous>, transform_indices = @transform_7, window_bounds = array<i64: 8, 32>}, {pipeline_mode = #tpu.pipeline_mode<synchronous>, transform_indices = @transform_8, window_bounds = array<i64: 128, 8>}, {pipeline_mode = #tpu.pipeline_mode<synchronous>, transform_indices = @transform_9, window_bounds = array<i64: 8, 128>}, {transform_indices = @transform_10, window_bounds = array<i64: 8, 16, 32>}]} {
    %c0 = arith.constant 0 : index
    %c0_0 = arith.constant 0 : index
    %c0_1 = arith.constant 0 : index
    %0 = vector.load %arg1[%c0, %c0_0, %c0_1] : memref<8x16x32xf32, #tpu.memory_space<vmem>>, vector<8x16x32xf32>
    %1 = vector.shape_cast %0 : vector<8x16x32xf32> to vector<128x32xf32>
    %c0_2 = arith.constant 0 : index
    %c0_3 = arith.constant 0 : index
    %2 = vector.load %arg2[%c0_2, %c0_3] : memref<32x96xf32, #tpu.memory_space<vmem>>, vector<32x96xf32>
    %cst = arith.constant dense<0.000000e+00> : vector<128x96xf32>
    %3 = tpu.matmul %1, %2, %cst {dimension_numbers = #tpu.dot_dimension_numbers<[1], [0], [0], [1], [0, 0, 1, 1], [], []>} : vector<128x32xf32>, vector<32x96xf32>, vector<128x96xf32> -> vector<128x96xf32>
    %c0_4 = arith.constant 0 : index
    %c0_5 = arith.constant 0 : index
    %4 = vector.load %arg4[%c0_4, %c0_5] : memref<1x96xf32, #tpu.memory_space<vmem>>, vector<1x96xf32>
    %5 = vector.broadcast %4 : vector<1x96xf32> to vector<128x96xf32>
    %6 = arith.addf %3, %5 : vector<128x96xf32>
    %7 = arith.mulf %6, %6 : vector<128x96xf32>
    %c0_6 = arith.constant 0 : index
    %c0_7 = arith.constant 0 : index
    %8 = vector.load %arg6[%c0_6, %c0_7] : memref<96x24xf32, #tpu.memory_space<vmem>>, vector<96x24xf32>
    %cst_8 = arith.constant dense<0.000000e+00> : vector<128x24xf32>
    %9 = tpu.matmul %7, %8, %cst_8 {dimension_numbers = #tpu.dot_dimension_numbers<[1], [0], [0], [1], [0, 0, 1, 1], [], []>} : vector<128x96xf32>, vector<96x24xf32>, vector<128x24xf32> -> vector<128x24xf32>
    %cst_9 = arith.constant 1.000000e-24 : f32
    %10 = vector.broadcast %cst_9 : f32 to vector<128x24xf32>
    %11 = arith.maximumf %9, %10 : vector<128x24xf32>
    %12 = math.rsqrt %11 : vector<128x24xf32>
    %c0_10 = arith.constant 0 : index
    %c0_11 = arith.constant 0 : index
    %13 = vector.load %arg7[%c0_10, %c0_11] : memref<24x96xf32, #tpu.memory_space<vmem>>, vector<24x96xf32>
    %cst_12 = arith.constant dense<0.000000e+00> : vector<128x96xf32>
    %14 = tpu.matmul %12, %13, %cst_12 {dimension_numbers = #tpu.dot_dimension_numbers<[1], [0], [0], [1], [0, 0, 1, 1], [], []>} : vector<128x24xf32>, vector<24x96xf32>, vector<128x96xf32> -> vector<128x96xf32>
    %15 = arith.mulf %6, %14 : vector<128x96xf32>
    %16 = vector.extract_strided_slice %15 {offsets = [0, 0], sizes = [128, 32], strides = [1, 1]} : vector<128x96xf32> to vector<128x32xf32>
    %17 = vector.shape_cast %16 : vector<128x32xf32> to vector<8x16x32xf32>
    %18 = vector.extract_strided_slice %15 {offsets = [0, 32], sizes = [128, 32], strides = [1, 1]} : vector<128x96xf32> to vector<128x32xf32>
    %19 = vector.shape_cast %18 : vector<128x32xf32> to vector<8x16x32xf32>
    %20 = vector.extract_strided_slice %15 {offsets = [0, 64], sizes = [128, 32], strides = [1, 1]} : vector<128x96xf32> to vector<128x32xf32>
    %21 = vector.shape_cast %20 : vector<128x32xf32> to vector<8x16x32xf32>
    %c0_13 = arith.constant 0 : index
    %c0_14 = arith.constant 0 : index
    %22 = vector.load %arg8[%c0_13, %c0_14] : memref<8x32xf32, #tpu.memory_space<vmem>>, vector<8x32xf32>
    %23 = vector.shape_cast %19 : vector<8x16x32xf32> to vector<8x1x16x32xf32>
    %24 = vector.shape_cast %22 : vector<8x32xf32> to vector<1x8x1x32xf32>
    %25 = vector.broadcast %23 : vector<8x1x16x32xf32> to vector<8x8x16x32xf32>
    %26 = vector.broadcast %24 : vector<1x8x1x32xf32> to vector<8x8x16x32xf32>
    %27 = arith.mulf %25, %26 : vector<8x8x16x32xf32>
    %28 = vector.shape_cast %27 : vector<8x8x16x32xf32> to vector<8x128x32xf32>
    %29 = vector.shape_cast %21 : vector<8x16x32xf32> to vector<8x1x16x32xf32>
    %30 = vector.shape_cast %22 : vector<8x32xf32> to vector<1x8x1x32xf32>
    %31 = vector.broadcast %29 : vector<8x1x16x32xf32> to vector<8x8x16x32xf32>
    %32 = vector.broadcast %30 : vector<1x8x1x32xf32> to vector<8x8x16x32xf32>
    %33 = arith.mulf %31, %32 : vector<8x8x16x32xf32>
    %34 = vector.shape_cast %33 : vector<8x8x16x32xf32> to vector<8x128x32xf32>
    "tpu.trace_start"() <{level = 10 : i32, message = "bqc,bkc->bqk"}> : () -> ()
    %cst_15 = arith.constant dense<0.000000e+00> : vector<8x16x128xf32>
    %35 = tpu.matmul %17, %28, %cst_15 {dimension_numbers = #tpu.dot_dimension_numbers<[2], [2], [1], [1], [0, 0, 0, 1, 1, 1], [0], [0]>} : vector<8x16x32xf32>, vector<8x128x32xf32>, vector<8x16x128xf32> -> vector<8x16x128xf32>
    "tpu.trace_stop"() : () -> ()
    %cst_16 = arith.constant 5.000000e-01 : f32
    %36 = vector.broadcast %cst_16 : f32 to vector<8x16x128xf32>
    %37 = arith.mulf %35, %36 : vector<8x16x128xf32>
    %38 = math.exp %37 : vector<8x16x128xf32>
    %39 = vector.shape_cast %38 : vector<8x16x128xf32> to vector<128x128xf32>
    %c0_17 = arith.constant 0 : index
    %c0_18 = arith.constant 0 : index
    %40 = vector.load %arg9[%c0_17, %c0_18] : memref<128x8xf32, #tpu.memory_space<vmem>>, vector<128x8xf32>
    %cst_19 = arith.constant dense<0.000000e+00> : vector<128x8xf32>
    %41 = tpu.matmul %39, %40, %cst_19 {dimension_numbers = #tpu.dot_dimension_numbers<[1], [0], [0], [1], [0, 0, 1, 1], [], []>} : vector<128x128xf32>, vector<128x8xf32>, vector<128x8xf32> -> vector<128x8xf32>
    %42 = tpu.reciprocal %41 : vector<128x8xf32> -> vector<128x8xf32>
    %c0_20 = arith.constant 0 : index
    %c0_21 = arith.constant 0 : index
    %43 = vector.load %arg10[%c0_20, %c0_21] : memref<8x128xf32, #tpu.memory_space<vmem>>, vector<8x128xf32>
    %cst_22 = arith.constant dense<0.000000e+00> : vector<128x128xf32>
    %44 = tpu.matmul %42, %43, %cst_22 {dimension_numbers = #tpu.dot_dimension_numbers<[1], [0], [0], [1], [0, 0, 1, 1], [], []>} : vector<128x8xf32>, vector<8x128xf32>, vector<128x128xf32> -> vector<128x128xf32>
    %45 = arith.mulf %39, %44 : vector<128x128xf32>
    %46 = vector.shape_cast %45 : vector<128x128xf32> to vector<8x16x128xf32>
    "tpu.trace_start"() <{level = 10 : i32, message = "bqk,bkc->bqc"}> : () -> ()
    %cst_23 = arith.constant dense<0.000000e+00> : vector<8x16x32xf32>
    %47 = tpu.matmul %46, %34, %cst_23 {dimension_numbers = #tpu.dot_dimension_numbers<[2], [1], [1], [2], [0, 0, 0, 1, 1, 2], [0], [0]>} : vector<8x16x128xf32>, vector<8x128x32xf32>, vector<8x16x32xf32> -> vector<8x16x32xf32>
    "tpu.trace_stop"() : () -> ()
    %48 = vector.shape_cast %47 : vector<8x16x32xf32> to vector<128x32xf32>
    %c0_24 = arith.constant 0 : index
    %c0_25 = arith.constant 0 : index
    %49 = vector.load %arg3[%c0_24, %c0_25] : memref<32x32xf32, #tpu.memory_space<vmem>>, vector<32x32xf32>
    %cst_26 = arith.constant dense<0.000000e+00> : vector<128x32xf32>
    %50 = tpu.matmul %48, %49, %cst_26 {dimension_numbers = #tpu.dot_dimension_numbers<[1], [0], [0], [1], [0, 0, 1, 1], [], []>} : vector<128x32xf32>, vector<32x32xf32>, vector<128x32xf32> -> vector<128x32xf32>
    %c0_27 = arith.constant 0 : index
    %c0_28 = arith.constant 0 : index
    %51 = vector.load %arg5[%c0_27, %c0_28] : memref<1x32xf32, #tpu.memory_space<vmem>>, vector<1x32xf32>
    %52 = vector.broadcast %51 : vector<1x32xf32> to vector<128x32xf32>
    %53 = arith.addf %50, %52 : vector<128x32xf32>
    %54 = vector.shape_cast %53 : vector<128x32xf32> to vector<8x16x32xf32>
    %c0_29 = arith.constant 0 : index
    %c0_30 = arith.constant 0 : index
    %c0_31 = arith.constant 0 : index
    %55 = vector.load %arg11[%c0_29, %c0_30, %c0_31] : memref<8x16x32xf32, #tpu.memory_space<vmem>>, vector<8x16x32xf32>
    tpu.vector_store %arg11[%c0_29, %c0_30, %c0_31], %54 {strides = array<i32>} : memref<8x16x32xf32, #tpu.memory_space<vmem>>, vector<8x16x32xf32>,
    return
  }
  func.func @transform_0(%arg0: i32) -> (i32, i32, i32) {
    %c0_i32 = arith.constant 0 : i32
    %c0_i32_0 = arith.constant 0 : i32
    %c0_i32_1 = arith.constant 0 : i32
    return %arg0, %c0_i32, %c0_i32_0 : i32, i32, i32
  }
  func.func @transform_1(%arg0: i32) -> (i32, i32) {
    %c0_i32 = arith.constant 0 : i32
    %c0_i32_0 = arith.constant 0 : i32
    %c0_i32_1 = arith.constant 0 : i32
    return %c0_i32, %c0_i32_0 : i32, i32
  }
  func.func @transform_2(%arg0: i32) -> (i32, i32) {
    %c0_i32 = arith.constant 0 : i32
    %c0_i32_0 = arith.constant 0 : i32
    %c0_i32_1 = arith.constant 0 : i32
    return %c0_i32, %c0_i32_0 : i32, i32
  }
  func.func @transform_3(%arg0: i32) -> (i32, i32) {
    %c0_i32 = arith.constant 0 : i32
    %c0_i32_0 = arith.constant 0 : i32
    %c0_i32_1 = arith.constant 0 : i32
    return %c0_i32, %c0_i32_0 : i32, i32
  }
  func.func @transform_4(%arg0: i32) -> (i32, i32) {
    %c0_i32 = arith.constant 0 : i32
    %c0_i32_0 = arith.constant 0 : i32
    %c0_i32_1 = arith.constant 0 : i32
    return %c0_i32, %c0_i32_0 : i32, i32
  }
  func.func @transform_5(%arg0: i32) -> (i32, i32) {
    %c0_i32 = arith.constant 0 : i32
    %c0_i32_0 = arith.constant 0 : i32
    %c0_i32_1 = arith.constant 0 : i32
    return %c0_i32, %c0_i32_0 : i32, i32
  }
  func.func @transform_6(%arg0: i32) -> (i32, i32) {
    %c0_i32 = arith.constant 0 : i32
    %c0_i32_0 = arith.constant 0 : i32
    %c0_i32_1 = arith.constant 0 : i32
    return %c0_i32, %c0_i32_0 : i32, i32
  }
  func.func @transform_7(%arg0: i32) -> (i32, i32) {
    %c0_i32 = arith.constant 0 : i32
    %c0_i32_0 = arith.constant 0 : i32
    %c0_i32_1 = arith.constant 0 : i32
    return %c0_i32, %c0_i32_0 : i32, i32
  }
  func.func @transform_8(%arg0: i32) -> (i32, i32) {
    %c0_i32 = arith.constant 0 : i32
    %c0_i32_0 = arith.constant 0 : i32
    %c0_i32_1 = arith.constant 0 : i32
    return %c0_i32, %c0_i32_0 : i32, i32
  }
  func.func @transform_9(%arg0: i32) -> (i32, i32) {
    %c0_i32 = arith.constant 0 : i32
    %c0_i32_0 = arith.constant 0 : i32
    %c0_i32_1 = arith.constant 0 : i32
    return %c0_i32, %c0_i32_0 : i32, i32
  }
  func.func @transform_10(%arg0: i32) -> (i32, i32, i32) {
    %c0_i32 = arith.constant 0 : i32
    %c0_i32_0 = arith.constant 0 : i32
    %c0_i32_1 = arith.constant 0 : i32
    return %arg0, %c0_i32, %c0_i32_0 : i32, i32, i32
  }
}

module attributes {stable_mosaic.version = 11 : i64} {
  func.func @_self_attention_kernel(%arg0: i32, %arg1: memref<8x16x32xf32, #tpu.memory_space<vmem>>, %arg2: memref<32x96xf32, #tpu.memory_space<vmem>>, %arg3: memref<32x32xf32, #tpu.memory_space<vmem>>, %arg4: memref<1x96xf32, #tpu.memory_space<vmem>>, %arg5: memref<1x32xf32, #tpu.memory_space<vmem>>, %arg6: memref<96x24xf32, #tpu.memory_space<vmem>>, %arg7: memref<24x96xf32, #tpu.memory_space<vmem>>, %arg8: memref<8x32xf32, #tpu.memory_space<vmem>>, %arg9: memref<128x8xf32, #tpu.memory_space<vmem>>, %arg10: memref<8x128xf32, #tpu.memory_space<vmem>>, %arg11: memref<8x16x32xf32, #tpu.memory_space<vmem>>) attributes {dimension_semantics = [#tpu.dimension_semantics<parallel>], iteration_bounds = array<i64: 1>, scalar_prefetch = 0 : i64, scratch_operands = 0 : i64, tpu.core_type = #tpu.core_type<tc>, window_params = [{transform_indices = @transform_0, window_bounds = array<i64: 8, 16, 32>}, {pipeline_mode = #tpu.pipeline_mode<synchronous>, transform_indices = @transform_1, window_bounds = array<i64: 32, 96>}, {pipeline_mode = #tpu.pipeline_mode<synchronous>, transform_indices = @transform_2, window_bounds = array<i64: 32, 32>}, {pipeline_mode = #tpu.pipeline_mode<synchronous>, transform_indices = @transform_3, window_bounds = array<i64: 1, 96>}, {pipeline_mode = #tpu.pipeline_mode<synchronous>, transform_indices = @transform_4, window_bounds = array<i64: 1, 32>}, {pipeline_mode = #tpu.pipeline_mode<synchronous>, transform_indices = @transform_5, window_bounds = array<i64: 96, 24>}, {pipeline_mode = #tpu.pipeline_mode<synchronous>, transform_indices = @transform_6, window_bounds = array<i64: 24, 96>}, {pipeline_mode = #tpu.pipeline_mode<synchronous>, transform_indices = @transform_7, window_bounds = array<i64: 8, 32>}, {pipeline_mode = #tpu.pipeline_mode<synchronous>, transform_indices = @transform_8, window_bounds = array<i64: 128, 8>}, {pipeline_mode = #tpu.pipeline_mode<synchronous>, transform_indices = @transform_9, window_bounds = array<i64: 8, 128>}, {transform_indices = @transform_10, window_bounds = array<i64: 8, 16, 32>}]} {
    %c0 = arith.constant 0 : index
    %c0_0 = arith.constant 0 : index
    %c0_1 = arith.constant 0 : index
    %0 = vector.load %arg1[%c0, %c0_0, %c0_1] : memref<8x16x32xf32, #tpu.memory_space<vmem>>, vector<8x16x32xf32>
    %1 = vector.shape_cast %0 : vector<8x16x32xf32> to vector<128x32xf32>
    %c0_2 = arith.constant 0 : index
    %c0_3 = arith.constant 0 : index
    %2 = vector.load %arg2[%c0_2, %c0_3] : memref<32x96xf32, #tpu.memory_space<vmem>>, vector<32x96xf32>
    %cst = arith.constant dense<0.000000e+00> : vector<128x96xf32>
    %3 = tpu.matmul %1, %2, %cst {dimension_numbers = #tpu.dot_dimension_numbers<[1], [0], [0], [1], [0, 0, 1, 1], [], []>} : vector<128x32xf32>, vector<32x96xf32>, vector<128x96xf32> -> vector<128x96xf32>
    %c0_4 = arith.constant 0 : index
    %c0_5 = arith.constant 0 : index
    %4 = vector.load %arg4[%c0_4, %c0_5] : memref<1x96xf32, #tpu.memory_space<vmem>>, vector<1x96xf32>
    %5 = vector.broadcast %4 : vector<1x96xf32> to vector<128x96xf32>
    %6 = arith.addf %3, %5 : vector<128x96xf32>
    %7 = arith.mulf %6, %6 : vector<128x96xf32>
    %c0_6 = arith.constant 0 : index
    %c0_7 = arith.constant 0 : index
    %8 = vector.load %arg6[%c0_6, %c0_7] : memref<96x24xf32, #tpu.memory_space<vmem>>, vector<96x24xf32>
    %cst_8 = arith.constant dense<0.000000e+00> : vector<128x24xf32>
    %9 = tpu.matmul %7, %8, %cst_8 {dimension_numbers = #tpu.dot_dimension_numbers<[1], [0], [0], [1], [0, 0, 1, 1], [], []>} : vector<128x96xf32>, vector<96x24xf32>, vector<128x24xf32> -> vector<128x24xf32>
    %cst_9 = arith.constant 1.000000e-24 : f32
    %10 = vector.broadcast %cst_9 : f32 to vector<128x24xf32>
    %11 = arith.maximumf %9, %10 : vector<128x24xf32>
    %12 = math.rsqrt %11 : vector<128x24xf32>
    %c0_10 = arith.constant 0 : index
    %c0_11 = arith.constant 0 : index
    %13 = vector.load %arg7[%c0_10, %c0_11] : memref<24x96xf32, #tpu.memory_space<vmem>>, vector<24x96xf32>
    %cst_12 = arith.constant dense<0.000000e+00> : vector<128x96xf32>
    %14 = tpu.matmul %12, %13, %cst_12 {dimension_numbers = #tpu.dot_dimension_numbers<[1], [0], [0], [1], [0, 0, 1, 1], [], []>} : vector<128x24xf32>, vector<24x96xf32>, vector<128x96xf32> -> vector<128x96xf32>
    %15 = arith.mulf %6, %14 : vector<128x96xf32>
    %16 = vector.extract_strided_slice %15 {offsets = [0, 0], sizes = [128, 32], strides = [1, 1]} : vector<128x96xf32> to vector<128x32xf32>
    %17 = vector.shape_cast %16 : vector<128x32xf32> to vector<8x16x32xf32>
    %18 = vector.extract_strided_slice %15 {offsets = [0, 32], sizes = [128, 32], strides = [1, 1]} : vector<128x96xf32> to vector<128x32xf32>
    %19 = vector.shape_cast %18 : vector<128x32xf32> to vector<8x16x32xf32>
    %20 = vector.extract_strided_slice %15 {offsets = [0, 64], sizes = [128, 32], strides = [1, 1]} : vector<128x96xf32> to vector<128x32xf32>
    %21 = vector.shape_cast %20 : vector<128x32xf32> to vector<8x16x32xf32>
    %c0_13 = arith.constant 0 : index
    %c0_14 = arith.constant 0 : index
    %22 = vector.load %arg8[%c0_13, %c0_14] : memref<8x32xf32, #tpu.memory_space<vmem>>, vector<8x32xf32>
    %23 = vector.shape_cast %19 : vector<8x16x32xf32> to vector<8x1x16x32xf32>
    %24 = vector.shape_cast %22 : vector<8x32xf32> to vector<1x8x1x32xf32>
    %25 = vector.broadcast %23 : vector<8x1x16x32xf32> to vector<8x8x16x32xf32>
    %26 = vector.broadcast %24 : vector<1x8x1x32xf32> to vector<8x8x16x32xf32>
    %27 = arith.mulf %25, %26 : vector<8x8x16x32xf32>
    %28 = vector.shape_cast %27 : vector<8x8x16x32xf32> to vector<8x128x32xf32>
    %29 = vector.shape_cast %21 : vector<8x16x32xf32> to vector<8x1x16x32xf32>
    %30 = vector.shape_cast %22 : vector<8x32xf32> to vector<1x8x1x32xf32>
    %31 = vector.broadcast %29 : vector<8x1x16x32xf32> to vector<8x8x16x32xf32>
    %32 = vector.broadcast %30 : vector<1x8x1x32xf32> to vector<8x8x16x32xf32>
    %33 = arith.mulf %31, %32 : vector<8x8x16x32xf32>
    %34 = vector.shape_cast %33 : vector<8x8x16x32xf32> to vector<8x128x32xf32>
    "tpu.trace_start"() <{level = 10 : i32, message = "bqc,bkc->bqk"}> : () -> ()
    %cst_15 = arith.constant dense<0.000000e+00> : vector<8x16x128xf32>
    %35 = tpu.matmul %17, %28, %cst_15 {dimension_numbers = #tpu.dot_dimension_numbers<[2], [2], [1], [1], [0, 0, 0, 1, 1, 1], [0], [0]>} : vector<8x16x32xf32>, vector<8x128x32xf32>, vector<8x16x128xf32> -> vector<8x16x128xf32>
    "tpu.trace_stop"() : () -> ()
    %cst_16 = arith.constant 5.000000e-01 : f32
    %36 = vector.broadcast %cst_16 : f32 to vector<8x16x128xf32>
    %37 = arith.mulf %35, %36 : vector<8x16x128xf32>
    %38 = math.exp %37 : vector<8x16x128xf32>
    %39 = vector.shape_cast %38 : vector<8x16x128xf32> to vector<128x128xf32>
    %c0_17 = arith.constant 0 : index
    %c0_18 = arith.constant 0 : index
    %40 = vector.load %arg9[%c0_17, %c0_18] : memref<128x8xf32, #tpu.memory_space<vmem>>, vector<128x8xf32>
    %cst_19 = arith.constant dense<0.000000e+00> : vector<128x8xf32>
    %41 = tpu.matmul %39, %40, %cst_19 {dimension_numbers = #tpu.dot_dimension_numbers<[1], [0], [0], [1], [0, 0, 1, 1], [], []>} : vector<128x128xf32>, vector<128x8xf32>, vector<128x8xf32> -> vector<128x8xf32>
    %42 = tpu.reciprocal %41 : vector<128x8xf32> -> vector<128x8xf32>
    %c0_20 = arith.constant 0 : index
    %c0_21 = arith.constant 0 : index
    %43 = vector.load %arg10[%c0_20, %c0_21] : memref<8x128xf32, #tpu.memory_space<vmem>>, vector<8x128xf32>
    %cst_22 = arith.constant dense<0.000000e+00> : vector<128x128xf32>
    %44 = tpu.matmul %42, %43, %cst_22 {dimension_numbers = #tpu.dot_dimension_numbers<[1], [0], [0], [1], [0, 0, 1, 1], [], []>} : vector<128x8xf32>, vector<8x128xf32>, vector<128x128xf32> -> vector<128x128xf32>
    %45 = arith.mulf %39, %44 : vector<128x128xf32>
    %46 = vector.shape_cast %45 : vector<128x128xf32> to vector<8x16x128xf32>
    "tpu.trace_start"() <{level = 10 : i32, message = "bqk,bkc->bqc"}> : () -> ()
    %cst_23 = arith.constant dense<0.000000e+00> : vector<8x16x32xf32>
    %47 = tpu.matmul %46, %34, %cst_23 {dimension_numbers = #tpu.dot_dimension_numbers<[2], [1], [1], [2], [0, 0, 0, 1, 1, 2], [0], [0]>} : vector<8x16x128xf32>, vector<8x128x32xf32>, vector<8x16x32xf32> -> vector<8x16x32xf32>
    "tpu.trace_stop"() : () -> ()
    %48 = vector.shape_cast %47 : vector<8x16x32xf32> to vector<128x32xf32>
    %c0_24 = arith.constant 0 : index
    %c0_25 = arith.constant 0 : index
    %49 = vector.load %arg3[%c0_24, %c0_25] : memref<32x32xf32, #tpu.memory_space<vmem>>, vector<32x32xf32>
    %cst_26 = arith.constant dense<0.000000e+00> : vector<128x32xf32>
    %50 = tpu.matmul %48, %49, %cst_26 {dimension_numbers = #tpu.dot_dimension_numbers<[1], [0], [0], [1], [0, 0, 1, 1], [], []>} : vector<128x32xf32>, vector<32x32xf32>, vector<128x32xf32> -> vector<128x32xf32>
    %c0_27 = arith.constant 0 : index
    %c0_28 = arith.constant 0 : index
    %51 = vector.load %arg5[%c0_27, %c0_28] : memref<1x32xf32, #tpu.memory_space<vmem>>, vector<1x32xf32>
    %52 = vector.broadcast %51 : vector<1x32xf32> to vector<128x32xf32>
    %53 = arith.addf %50, %52 : vector<128x32xf32>
    %54 = vector.shape_cast %53 : vector<128x32xf32> to vector<8x16x32xf32>
    %c0_29 = arith.constant 0 : index
    %c0_30 = arith.constant 0 : index
    %c0_31 = arith.constant 0 : index
    %55 = vector.load %arg11[%c0_29, %c0_30, %c0_31] : memref<8x16x32xf32, #tpu.memory_space<vmem>>, vector<8x16x32xf32>
    tpu.vector_store %arg11[%c0_29, %c0_30, %c0_31], %54 {strides = array<i32>} : memref<8x16x32xf32, #tpu.memory_space<vmem>>, vector<8x16x32xf32>,
    return
  }
  func.func @transform_0(%arg0: i32) -> (i32, i32, i32) {
    %c0_i32 = arith.constant 0 : i32
    %c0_i32_0 = arith.constant 0 : i32
    %c0_i32_1 = arith.constant 0 : i32
    return %arg0, %c0_i32, %c0_i32_0 : i32, i32, i32
  }
  func.func @transform_1(%arg0: i32) -> (i32, i32) {
    %c0_i32 = arith.constant 0 : i32
    %c0_i32_0 = arith.constant 0 : i32
    %c0_i32_1 = arith.constant 0 : i32
    return %c0_i32, %c0_i32_0 : i32, i32
  }
  func.func @transform_2(%arg0: i32) -> (i32, i32) {
    %c0_i32 = arith.constant 0 : i32
    %c0_i32_0 = arith.constant 0 : i32
    %c0_i32_1 = arith.constant 0 : i32
    return %c0_i32, %c0_i32_0 : i32, i32
  }
  func.func @transform_3(%arg0: i32) -> (i32, i32) {
    %c0_i32 = arith.constant 0 : i32
    %c0_i32_0 = arith.constant 0 : i32
    %c0_i32_1 = arith.constant 0 : i32
    return %c0_i32, %c0_i32_0 : i32, i32
  }
  func.func @transform_4(%arg0: i32) -> (i32, i32) {
    %c0_i32 = arith.constant 0 : i32
    %c0_i32_0 = arith.constant 0 : i32
    %c0_i32_1 = arith.constant 0 : i32
    return %c0_i32, %c0_i32_0 : i32, i32
  }
  func.func @transform_5(%arg0: i32) -> (i32, i32) {
    %c0_i32 = arith.constant 0 : i32
    %c0_i32_0 = arith.constant 0 : i32
    %c0_i32_1 = arith.constant 0 : i32
    return %c0_i32, %c0_i32_0 : i32, i32
  }
  func.func @transform_6(%arg0: i32) -> (i32, i32) {
    %c0_i32 = arith.constant 0 : i32
    %c0_i32_0 = arith.constant 0 : i32
    %c0_i32_1 = arith.constant 0 : i32
    return %c0_i32, %c0_i32_0 : i32, i32
  }
  func.func @transform_7(%arg0: i32) -> (i32, i32) {
    %c0_i32 = arith.constant 0 : i32
    %c0_i32_0 = arith.constant 0 : i32
    %c0_i32_1 = arith.constant 0 : i32
    return %c0_i32, %c0_i32_0 : i32, i32
  }
  func.func @transform_8(%arg0: i32) -> (i32, i32) {
    %c0_i32 = arith.constant 0 : i32
    %c0_i32_0 = arith.constant 0 : i32
    %c0_i32_1 = arith.constant 0 : i32
    return %c0_i32, %c0_i32_0 : i32, i32
  }
  func.func @transform_9(%arg0: i32) -> (i32, i32) {
    %c0_i32 = arith.constant 0 : i32
    %c0_i32_0 = arith.constant 0 : i32
    %c0_i32_1 = arith.constant 0 : i32
    return %c0_i32, %c0_i32_0 : i32, i32
  }
  func.func @transform_10(%arg0: i32) -> (i32, i32, i32) {
    %c0_i32 = arith.constant 0 : i32
    %c0_i32_0 = arith.constant 0 : i32
    %c0_i32_1 = arith.constant 0 : i32
    return %arg0, %c0_i32, %c0_i32_0 : i32, i32, i32
  }
}

</mosaic_0001>

<bundles_post_ra>
// kernel: tpu_custom_call.1
= control target key start
LH: loop header
LB: loop body
LE: loop exit
PB: predicated region body
PF: predicated region fallthrough
CT: control target
= control target key end

     0   :  { %s5757_s0 = inlined_call_operand.vmem [shape: f32[8,16,32], index: 0, kind: input, shape index: {}]   ;;  %s5758_s1 = inlined_call_operand.vmem [shape: f32[32,96], index: 1, kind: input, shape index: {}]   ;;  %s5759_s2 = inlined_call_operand.vmem [shape: f32[32,32], index: 2, kind: input, shape index: {}]   ;;  %s5760_s3 = inlined_call_operand.vmem [shape: f32[1,96], index: 3, kind: input, shape index: {}]   ;;  %s5761_s4 = inlined_call_operand.vmem [shape: f32[1,32], index: 4, kind: input, shape index: {}]   ;;  %s5762_s5 = inlined_call_operand.vmem [shape: f32[96,24], index: 5, kind: input, shape index: {}]   ;;  %s5763_s6 = inlined_call_operand.vmem [shape: f32[24,96], index: 6, kind: input, shape index: {}]   ;;  %s5764_s7 = inlined_call_operand.vmem [shape: f32[8,32], index: 7, kind: input, shape index: {}]   ;;  %s5765_s8 = inlined_call_operand.vmem [shape: f32[128,8], index: 8, kind: input, shape index: {}]   ;;  %s5766_s9 = inlined_call_operand.vmem [shape: f32[8,128], index: 9, kind: input, shape index: {}]   ;;  %s5767_s10 = inlined_call_operand.hbm [shape: f32[8,16,32], index: 10, kind: output, shape index: {}]  }
   0x1   :  { %v55_v0 = vld [vmem:[%s5758_s1 + $0x18] sm:$0xff]  ;;  %v54_v1 = vld [vmem:[%s5758_s1 + $0x10] sm:$0xff]  ;;  %v53_v2 = vld [vmem:[%s5758_s1 + $0x8] sm:$0xff] }
   0x2   :  { %121 = vmatpush.msra.mxu0 %v55_v0  ;;  %3377 = vmatpush.msra.mxu1 %v55_v0 }
   0x3   :  { %3378 = vmatpush.msra.mxu2 %v55_v0 }
   0x4   :  { %122 = vmatpush.msra.mxu0 %v54_v1  ;;  %3379 = vmatpush.msra.mxu1 %v54_v1 }
   0x5   :  { %15 = vsyncpa [#allocation3], 0  ;;  %v52_v3 = vld [vmem:[%s5758_s1] sm:$0xff]  ;;  %3380 = vmatpush.msra.mxu2 %v54_v1  ;;  %vm60_vm0 = vcmask 261120   ;;  %v37_v5 = vld [vmem:[%s5757_s0 + $0x8] sm:$0xff]  ;;  %vm202_vm1 = vcmask 785408  }
   0x6   :  { %123 = vmatpush.msra.mxu0 %v53_v2  ;;  %v36_v4 = vld [vmem:[%s5757_s0] sm:$0xff]  ;;  %3381 = vmatpush.msra.mxu1 %v53_v2  ;;  %v38_v6 = vld [vmem:[%s5757_s0 + $0x10] sm:$0xff]  ;;  %v39_v7 = vld [vmem:[%s5757_s0 + $0x18] sm:$0xff]  ;;  %vm495_vm4 = vcmask 195584   ;;  %s3837_s21 = smov 64   ;;  %s3141_s16 = sshll.u32 %s5767_s10, 4  ;;  %s3142_s16 = int_to_ptr.hbm [resolvable:$true] %s3141_s16 }
   0x7   :  { %3382 = vmatpush.msra.mxu2 %v53_v2  ;;  %v44_v8 = vld [vmem:[%s5757_s0 + $0x40] sm:$0xff]  ;;  %v201_v9 = vld [vmem:[%s5762_s5 + $0x58] sm:$0xff]  ;;  %v200_v10 = vld [vmem:[%s5762_s5 + $0x50] sm:$0xff]  ;;  %s3839_s17 = smov 128   ;;  %s3840_s18 = smov 8  }
   0x8   :  { %124 = vmatpush.msra.mxu0 %v52_v3  ;;  %3383 = vmatpush.msra.mxu1 %v52_v3  ;;  %v199_v11 = vld [vmem:[%s5762_s5 + $0x48] sm:$0xff]  ;;  %v40_v12 = vld [vmem:[%s5757_s0 + $0x20] sm:$0xff]  ;;  %v197_v15 = vld [vmem:[%s5762_s5 + $0x38] sm:$0xff] }
   0x9   :  { %3153 = vmatmul.msk.f32.vlgmr.msra.gmra.mxu0 %vm60_vm0, %v36_v4  ;;  %3384 = vmatpush.msra.mxu2 %v52_v3  ;;  %v198_v13 = vld [vmem:[%s5762_s5 + $0x40] sm:$0xff]  ;;  %v45_v14 = vld [vmem:[%s5757_s0 + $0x48] sm:$0xff]  ;;  %v50_v16 = vld [vmem:[%s5757_s0 + $0x70] sm:$0xff] }
   0xa   :  { %3161 = vmatmul.msk.f32.vlgmr.msra.gmra.mxu1 %vm60_vm0, %v44_v8  ;;  %v196_v17 = vld [vmem:[%s5762_s5 + $0x30] sm:$0xff]  ;;  %3167 = vmatmul.msk.f32.vlgmr.msra.gmra.mxu2 %vm60_vm0, %v50_v16  ;;  %v195_v18 = vld [vmem:[%s5762_s5 + $0x28] sm:$0xff]  ;;  %v194_v20 = vld [vmem:[%s5762_s5 + $0x20] sm:$0xff] }
   0xb   :  { %255 = vmatpush.msrb.mxu1 %v201_v9  ;;  %v41_v19 = vld [vmem:[%s5757_s0 + $0x28] sm:$0xff]  ;;  %v46_v21 = vld [vmem:[%s5757_s0 + $0x50] sm:$0xff]  ;;  %v51_v22 = vld [vmem:[%s5757_s0 + $0x78] sm:$0xff] }
   0xc   :  { %v193_v23 = vld [vmem:[%s5762_s5 + $0x18] sm:$0xff]  ;;  %v42_v24 = vld [vmem:[%s5757_s0 + $0x30] sm:$0xff]  ;;  %v48_v27 = vld [vmem:[%s5757_s0 + $0x60] sm:$0xff] }
   0xd   :  { %256 = vmatpush.msrb.mxu1 %v200_v10  ;;  %v47_v25 = vld [vmem:[%s5757_s0 + $0x58] sm:$0xff]  ;;  %v49_v28 = vld [vmem:[%s5757_s0 + $0x68] sm:$0xff]  ;;  %v192_v29 = vld [vmem:[%s5762_s5 + $0x10] sm:$0xff] }
   0xe   :  { %v43_v26 = vld [vmem:[%s5757_s0 + $0x38] sm:$0xff]  ;;  %v191_v30 = vld [vmem:[%s5762_s5 + $0x8] sm:$0xff]  ;;  %v190_v31 = vld [vmem:[%s5762_s5] sm:$0xff] }
   0xf   :  { %257 = vmatpush.msrb.mxu1 %v199_v11  ;;  %v4011_v32 = vld [vmem:[%s5760_s3] ss:$0 sm:$0xff]  ;;  %v493_v16 = vld [vmem:[%s5763_s6 + $0x8] sm:$0xff] }
  0x11   :  { %3154 = vmatmul.msk.f32.gmra.mxu0 %vm60_vm0, %v37_v5  ;;  %258 = vmatpush.msrb.mxu1 %v198_v13 }
  0x12   :  { %3162 = vmatmul.msk.f32.gmra.mxu1 %vm60_vm0, %v45_v14  ;;  %3168 = vmatmul.msk.f32.gmra.mxu2 %vm60_vm0, %v51_v22  ;;  %v494_v14 = vld [vmem:[%s5763_s6 + $0x10] sm:$0xff] }
  0x13   :  { %259 = vmatpush.msrb.mxu1 %v197_v15  ;;  %557 = vmatpush.msrb.mxu2 %v494_v14 }
  0x15   :  { %260 = vmatpush.msrb.mxu1 %v196_v17  ;;  %558 = vmatpush.msrb.mxu2 %v493_v16 }
  0x17   :  { %261 = vmatpush.msrb.mxu1 %v195_v18  ;;  %v492_v18 = vld [vmem:[%s5763_s6] sm:$0xff]  ;;  %s3835_s6 = smov 32  }
  0x18   :  { %559 = vmatpush.msrb.mxu2 %v492_v18 }
  0x19   :  { %3155 = vmatmul.msk.f32.gmra.mxu0 %vm60_vm0, %v38_v6  ;;  %262 = vmatpush.msrb.mxu1 %v194_v20  ;;  %v4121_v20 = vld [vmem:[%s5764_s7] sm:$0xff]  ;;  %s3836_s7 = smov 96  }
  0x1a   :  { %3163 = vmatmul.msk.f32.gmra.mxu1 %vm60_vm0, %v46_v21  ;;  %v633_v21 = vrot.slane %v4121_v20, 7  ;;  %v631_v22 = vrot.slane %v4121_v20, 5 }
  0x1b   :  { %263 = vmatpush.msrb.mxu1 %v193_v23 }
  0x1c   :  { %v4125_v23 = vperm.slane %v633_v21, 0 }
  0x1d   :  { %264 = vmatpush.msrb.mxu1 %v192_v29  ;;  %v629_v29 = vrot.slane %v4121_v20, 3 }
  0x1e   :  { %656 = vrot.lane.b32.xlu0 %v4125_v23, %s3835_s6 }
  0x1f   :  { %265 = vmatpush.msrb.mxu1 %v191_v30 }
  0x21   :  { %3156 = vmatmul.msk.f32.gmra.mxu0 %vm60_vm0, %v39_v7  ;;  %266 = vmatpush.msrb.mxu1 %v190_v31 }
  0x22   :  { %3164 = vmatmul.msk.f32.gmra.mxu1 %vm60_vm0, %v47_v25 }
  0x29   :  { %3157 = vmatmul.msk.f32.gmra.mxu0 %vm60_vm0, %v40_v12 }
  0x2a   :  { %3165 = vmatmul.msk.f32.gmra.mxu1 %vm60_vm0, %v48_v27  ;;  %v632_v27 = vrot.slane %v4121_v20, 6 }
  0x2c   :  { %v4136_v30 = vperm.slane %v632_v27, 0 }
  0x2e   :  { %654 = vrot.lane.b32.xlu0 %v4136_v30, %s3835_s6 }
  0x31   :  { %3158 = vmatmul.msk.f32.gmra.mxu0 %vm60_vm0, %v41_v19 }
  0x32   :  { %3166 = vmatmul.msk.f32.gmra.mxu1 %vm60_vm0, %v49_v28  ;;  %v630_v28 = vrot.slane %v4121_v20, 4 }
  0x34   :  { %v4138_v31 = vperm.slane %v630_v28, 0 }
  0x39   :  { %3159 = vmatmul.msk.f32.gmra.mxu0 %vm60_vm0, %v42_v24  ;;  %v4127_v24 = vperm.slane %v631_v22, 0 }
  0x3b   :  { %652 = vrot.lane.b32.xlu1 %v4127_v24, %s3835_s6 }
  0x41   :  { %3160 = vmatmul.msk.f32.gmra.mxu0 %vm60_vm0, %v43_v26 }
  0x43   :  { %650 = vrot.lane.b32.xlu1 %v4138_v31, %s3835_s6 }
  0x86   :  { %v126_v33 = vpop.f32.mrf.mxu0 }
  0x87   :  { %v4014_v34 = vadd.f32 %v4011_v32, %v126_v33  ;;  %v150_v52 = vpop.f32.mrf.mxu1 }
  0x88   :  { %v4062_v59 = vadd.f32 %v4011_v32, %v150_v52 }
  0x89   :  { %v174_v35 = vmul.f32 %v4014_v34, %v4014_v34 }
  0x8a   :  { %v182_v60 = vmul.f32 %v4062_v59, %v4062_v59 }
  0x8b   :  { %3169 = vmatmul.msk.f32.vlgmr.msrb.gmra.mxu1 %vm202_vm1, %v174_v35 }
  0x8d   :  { %v168_v10 = vpop.f32.mrf.mxu2 }
  0x8e   :  { %v129_v36 = vpop.f32.mrf.mxu0  ;;  %v4098_v12 = vadd.f32 %v4011_v32, %v168_v10 }
  0x8f   :  { %v4020_v37 = vadd.f32 %v4011_v32, %v129_v36  ;;  %v153_v57 = vpop.f32.mrf.mxu1 }
  0x90   :  { %v4068_v62 = vadd.f32 %v4011_v32, %v153_v57  ;;  %v188_v13 = vmul.f32 %v4098_v12, %v4098_v12  ;;  %v627_v57 = vrot.slane %v4121_v20, 1 }
  0x91   :  { %v175_v38 = vmul.f32 %v4020_v37, %v4020_v37 }
  0x92   :  { %v183_v63 = vmul.f32 %v4068_v62, %v4068_v62 }
  0x93   :  { %3170 = vmatmul.msk.f32.gmra.mxu1 %vm202_vm1, %v175_v38 }
  0x95   :  { %v171_v15 = vpop.f32.mrf.mxu2 }
  0x96   :  { %v132_v39 = vpop.f32.mrf.mxu0  ;;  %v4110_v17 = vadd.f32 %v4011_v32, %v171_v15 }
  0x97   :  { %v4026_v40 = vadd.f32 %v4011_v32, %v132_v39  ;;  %v156_v61 = vpop.f32.mrf.mxu1 }
  0x98   :  { %v4074_v0 = vadd.f32 %v4011_v32, %v156_v61  ;;  %v189_v19 = vmul.f32 %v4110_v17, %v4110_v17 }
  0x99   :  { %v176_v41 = vmul.f32 %v4026_v40, %v4026_v40 }
  0x9a   :  { %v184_v2 = vmul.f32 %v4074_v0, %v4074_v0 }
  0x9b   :  { %3171 = vmatmul.msk.f32.gmra.mxu1 %vm202_vm1, %v176_v41  ;;  %v628_v41 = vrot.slane %v4121_v20, 2 }
  0x9e   :  { %v135_v42 = vpop.f32.mrf.mxu0 }
  0x9f   :  { %v4032_v43 = vadd.f32 %v4011_v32, %v135_v42  ;;  %v159_v1 = vpop.f32.mrf.mxu1 }
  0xa0   :  { %v4080_v3 = vadd.f32 %v4011_v32, %v159_v1 }
  0xa1   :  { %v177_v44 = vmul.f32 %v4032_v43, %v4032_v43 }
  0xa2   :  { %v185_v5 = vmul.f32 %v4080_v3, %v4080_v3 }
  0xa3   :  { %3172 = vmatmul.msk.f32.gmra.mxu1 %vm202_vm1, %v177_v44  ;;  %v4149_v44 = vperm.slane %v628_v41, 0 }
  0xa6   :  { %v138_v45 = vpop.f32.mrf.mxu0 }
  0xa7   :  { %v4038_v46 = vadd.f32 %v4011_v32, %v138_v45  ;;  %v162_v4 = vpop.f32.mrf.mxu1 }
  0xa8   :  { %v4086_v6 = vadd.f32 %v4011_v32, %v162_v4 }
  0xa9   :  { %v178_v47 = vmul.f32 %v4038_v46, %v4038_v46 }
  0xaa   :  { %v186_v7 = vmul.f32 %v4086_v6, %v4086_v6 }
  0xab   :  { %3173 = vmatmul.msk.f32.gmra.mxu1 %vm202_vm1, %v178_v47 }
  0xae   :  { %v141_v48 = vpop.f32.mrf.mxu0 }
  0xaf   :  { %v4044_v49 = vadd.f32 %v4011_v32, %v141_v48  ;;  %v165_v8 = vpop.f32.mrf.mxu1 }
  0xb0   :  { %v4092_v9 = vadd.f32 %v4011_v32, %v165_v8 }
  0xb1   :  { %v179_v50 = vmul.f32 %v4044_v49, %v4044_v49 }
  0xb2   :  { %v187_v11 = vmul.f32 %v4092_v9, %v4092_v9 }
  0xb3   :  { %3174 = vmatmul.msk.f32.gmra.mxu1 %vm202_vm1, %v179_v50 }
  0xb6   :  { %v144_v51 = vpop.f32.mrf.mxu0 }
  0xb7   :  { %v4050_v53 = vadd.f32 %v4011_v32, %v144_v51 }
  0xb9   :  { %v180_v54 = vmul.f32 %v4050_v53, %v4050_v53 }
  0xbb   :  { %3175 = vmatmul.msk.f32.gmra.mxu1 %vm202_vm1, %v180_v54 }
  0xbe   :  { %v147_v55 = vpop.f32.mrf.mxu0 }
  0xbf   :  { %v4056_v56 = vadd.f32 %v4011_v32, %v147_v55  ;;  %v4140_v32 = vperm.slane %v629_v29, 0 }
  0xc1   :  { %v181_v58 = vmul.f32 %v4056_v56, %v4056_v56  ;;  %648 = vrot.lane.b32.xlu2 %v4140_v32, %s3835_s6 }
  0xc3   :  { %3176 = vmatmul.msk.f32.gmra.mxu1 %vm202_vm1, %v181_v58 }
  0xc9   :  { %646 = vrot.lane.b32.xlu2 %v4149_v44, %s3835_s6 }
  0xcb   :  { %3177 = vmatmul.msk.f32.gmra.mxu1 %vm202_vm1, %v182_v60  ;;  %v4155_v60 = vperm.slane %v627_v57, 0 }
  0xd1   :  { %644 = vrot.lane.b32.xlu2 %v4155_v60, %s3835_s6 }
  0xd3   :  { %3178 = vmatmul.msk.f32.gmra.mxu1 %vm202_vm1, %v183_v63 }
  0xdb   :  { %3179 = vmatmul.msk.f32.gmra.mxu1 %vm202_vm1, %v184_v2 }
  0xe3   :  { %3180 = vmatmul.msk.f32.gmra.mxu1 %vm202_vm1, %v185_v5 }
  0xeb   :  { %3181 = vmatmul.msk.f32.gmra.mxu1 %vm202_vm1, %v186_v7 }
  0xf3   :  { %3182 = vmatmul.msk.f32.gmra.mxu1 %vm202_vm1, %v187_v11  ;;  %v634_v11 = vperm.slane %v4121_v20, 0 }
  0xf5   :  { %642 = vrot.lane.b32.xlu2 %v634_v11, %s3835_s6 }
  0xfb   :  { %3183 = vmatmul.msk.f32.gmra.mxu1 %vm202_vm1, %v188_v13 }
 0x103   :  { %3184 = vmatmul.msk.f32.gmra.mxu1 %vm202_vm1, %v189_v19 }
 0x108   :  { %v268_v25 = vpop.f32.mrf.mxu1 }
 0x109   :  { %v316_v26 = vmax.f32 %v268_v25, 1e-24 }
 0x10b   :  { %3713 = vrsqrt.f32 %v316_v26  ;;  %vm338_vm3 = vweird.f32 %v316_v26 }
 0x110   :  { %v271_v33 = vpop.f32.mrf.mxu1 }
 0x111   :  { %v3714_v35 = vpop.eup %3713  ;;  %v317_v36 = vmax.f32 %v271_v33, 1e-24 }
 0x112   :  { %v333_v38 = vmul.f32 %v3714_v35, %v316_v26  ;;  %vm339_vm2 = vweird.f32 %v3714_v35 }
 0x113   :  { %3715 = vrsqrt.f32 %v317_v36  ;;  %vm340_vm5 = vmor %vm338_vm3, %vm339_vm2  ;;  %vm348_vm7 = vweird.f32 %v317_v36 }
 0x114   :  { %v334_v39 = vmul.f32 %v3714_v35, %v333_v38 }
 0x116   :  { %v335_v42 = vmul.f32 0.5, %v334_v39 }
 0x118   :  { %v336_v45 = vsub.f32 1.5, %v335_v42  ;;  %v274_v47 = vpop.f32.mrf.mxu1 }
 0x119   :  { %v3716_v48 = vpop.eup %3715  ;;  %v318_v50 = vmax.f32 %v274_v47, 1e-24 }
 0x11a   :  { %v343_v51 = vmul.f32 %v3716_v48, %v317_v36  ;;  %v337_v52 = vmul.f32 %v3714_v35, %v336_v45  ;;  %vm349_vm6 = vweird.f32 %v3716_v48 }
 0x11b   :  { %3717 = vrsqrt.f32 %v318_v50  ;;  %vm350_vm8 = vmor %vm348_vm7, %vm349_vm6  ;;  %vm358_vm9 = vweird.f32 %v318_v50 }
 0x11c   :  { %v344_v54 = vmul.f32 %v3716_v48, %v343_v51  ;;  %v341_v55 = vsel %vm340_vm5, %v3714_v35, %v337_v52 }
 0x11d   :  { %3185 = vmatmul.msk.f32.vlgmr.msrb.gmra.mxu2 %vm495_vm4, %v341_v55 }
 0x11e   :  { %v345_v58 = vmul.f32 0.5, %v344_v54 }
 0x120   :  { %v277_v61 = vpop.f32.mrf.mxu1  ;;  %v346_v63 = vsub.f32 1.5, %v345_v58 }
 0x121   :  { %v3718_v1 = vpop.eup %3717  ;;  %v319_v2 = vmax.f32 %v277_v61, 1e-24 }
 0x122   :  { %v353_v4 = vmul.f32 %v3718_v1, %v318_v50  ;;  %v347_v5 = vmul.f32 %v3716_v48, %v346_v63  ;;  %vm359_vm10 = vweird.f32 %v3718_v1 }
 0x123   :  { %3719 = vrsqrt.f32 %v319_v2  ;;  %vm360_vm11 = vmor %vm358_vm9, %vm359_vm10  ;;  %vm368_vm12 = vweird.f32 %v319_v2 }
 0x124   :  { %v354_v7 = vmul.f32 %v3718_v1, %v353_v4  ;;  %v351_v8 = vsel %vm350_vm8, %v3716_v48, %v347_v5 }
 0x125   :  { %3186 = vmatmul.msk.f32.gmra.mxu2 %vm495_vm4, %v351_v8 }
 0x126   :  { %v355_v10 = vmul.f32 0.5, %v354_v7 }
 0x128   :  { %v280_v13 = vpop.f32.mrf.mxu1  ;;  %v356_v14 = vsub.f32 1.5, %v355_v10 }
 0x129   :  { %v3720_v15 = vpop.eup %3719  ;;  %v320_v16 = vmax.f32 %v280_v13, 1e-24 }
 0x12a   :  { %v363_v18 = vmul.f32 %v3720_v15, %v319_v2  ;;  %v357_v19 = vmul.f32 %v3718_v1, %v356_v14  ;;  %vm369_vm13 = vweird.f32 %v3720_v15 }
 0x12b   :  { %3721 = vrsqrt.f32 %v320_v16  ;;  %vm370_vm14 = vmor %vm368_vm12, %vm369_vm13  ;;  %vm378_vm15 = vweird.f32 %v320_v16 }
 0x12c   :  { %v364_v21 = vmul.f32 %v3720_v15, %v363_v18  ;;  %v361_v22 = vsel %vm360_vm11, %v3718_v1, %v357_v19 }
 0x12d   :  { %3187 = vmatmul.msk.f32.gmra.mxu2 %vm495_vm4, %v361_v22 }
 0x12e   :  { %v365_v25 = vmul.f32 0.5, %v364_v21 }
 0x130   :  { %v283_v26 = vpop.f32.mrf.mxu1  ;;  %v366_v27 = vsub.f32 1.5, %v365_v25 }
 0x131   :  { %v3722_v28 = vpop.eup %3721  ;;  %v321_v29 = vmax.f32 %v283_v26, 1e-24 }
 0x132   :  { %v373_v33 = vmul.f32 %v3722_v28, %v320_v16  ;;  %v367_v35 = vmul.f32 %v3720_v15, %v366_v27  ;;  %vm379_vm1 = vweird.f32 %v3722_v28 }
 0x133   :  { %3723 = vrsqrt.f32 %v321_v29  ;;  %vm380_vm2 = vmor %vm378_vm15, %vm379_vm1  ;;  %vm388_vm3 = vweird.f32 %v321_v29 }
 0x134   :  { %v374_v36 = vmul.f32 %v3722_v28, %v373_v33  ;;  %v371_v38 = vsel %vm370_vm14, %v3720_v15, %v367_v35 }
 0x135   :  { %3188 = vmatmul.msk.f32.gmra.mxu2 %vm495_vm4, %v371_v38 }
 0x136   :  { %v375_v39 = vmul.f32 0.5, %v374_v36 }
 0x138   :  { %v286_v41 = vpop.f32.mrf.mxu1  ;;  %v376_v42 = vsub.f32 1.5, %v375_v39 }
 0x139   :  { %v3724_v45 = vpop.eup %3723  ;;  %v322_v47 = vmax.f32 %v286_v41, 1e-24 }
 0x13a   :  { %v383_v48 = vmul.f32 %v3724_v45, %v321_v29  ;;  %v377_v50 = vmul.f32 %v3722_v28, %v376_v42  ;;  %vm389_vm5 = vweird.f32 %v3724_v45 }
 0x13b   :  { %3725 = vrsqrt.f32 %v322_v47  ;;  %vm390_vm6 = vmor %vm388_vm3, %vm389_vm5  ;;  %vm398_vm7 = vweird.f32 %v322_v47 }
 0x13c   :  { %v384_v51 = vmul.f32 %v3724_v45, %v383_v48  ;;  %v381_v52 = vsel %vm380_vm2, %v3722_v28, %v377_v50 }
 0x13d   :  { %3189 = vmatmul.msk.f32.gmra.mxu2 %vm495_vm4, %v381_v52 }
 0x13e   :  { %v385_v54 = vmul.f32 0.5, %v384_v51 }
 0x140   :  { %v289_v55 = vpop.f32.mrf.mxu1  ;;  %v386_v57 = vsub.f32 1.5, %v385_v54 }
 0x141   :  { %v3726_v58 = vpop.eup %3725  ;;  %v323_v61 = vmax.f32 %v289_v55, 1e-24 }
 0x142   :  { %v393_v63 = vmul.f32 %v3726_v58, %v322_v47  ;;  %v387_v1 = vmul.f32 %v3724_v45, %v386_v57  ;;  %vm399_vm8 = vweird.f32 %v3726_v58 }
 0x143   :  { %3727 = vrsqrt.f32 %v323_v61  ;;  %vm400_vm9 = vmor %vm398_vm7, %vm399_vm8  ;;  %vm408_vm10 = vweird.f32 %v323_v61 }
 0x144   :  { %v394_v2 = vmul.f32 %v3726_v58, %v393_v63  ;;  %v391_v4 = vsel %vm390_vm6, %v3724_v45, %v387_v1 }
 0x145   :  { %3190 = vmatmul.msk.f32.gmra.mxu2 %vm495_vm4, %v391_v4 }
 0x146   :  { %v395_v5 = vmul.f32 0.5, %v394_v2 }
 0x148   :  { %v292_v7 = vpop.f32.mrf.mxu1  ;;  %v396_v8 = vsub.f32 1.5, %v395_v5 }
 0x149   :  { %v3728_v10 = vpop.eup %3727  ;;  %v324_v13 = vmax.f32 %v292_v7, 1e-24 }
 0x14a   :  { %v403_v14 = vmul.f32 %v3728_v10, %v323_v61  ;;  %v397_v15 = vmul.f32 %v3726_v58, %v396_v8  ;;  %vm409_vm11 = vweird.f32 %v3728_v10 }
 0x14b   :  { %3729 = vrsqrt.f32 %v324_v13  ;;  %vm410_vm12 = vmor %vm408_vm10, %vm409_vm11  ;;  %vm418_vm13 = vweird.f32 %v324_v13 }
 0x14c   :  { %v404_v16 = vmul.f32 %v3728_v10, %v403_v14  ;;  %v401_v18 = vsel %vm400_vm9, %v3726_v58, %v397_v15 }
 0x14d   :  { %3191 = vmatmul.msk.f32.gmra.mxu2 %vm495_vm4, %v401_v18 }
 0x14e   :  { %v405_v19 = vmul.f32 0.5, %v404_v16 }
 0x150   :  { %v295_v21 = vpop.f32.mrf.mxu1  ;;  %v406_v22 = vsub.f32 1.5, %v405_v19 }
 0x151   :  { %v3730_v25 = vpop.eup %3729  ;;  %v325_v26 = vmax.f32 %v295_v21, 1e-24 }
 0x152   :  { %v413_v27 = vmul.f32 %v3730_v25, %v324_v13  ;;  %v407_v28 = vmul.f32 %v3728_v10, %v406_v22  ;;  %vm419_vm14 = vweird.f32 %v3730_v25 }
 0x153   :  { %3731 = vrsqrt.f32 %v325_v26  ;;  %vm420_vm15 = vmor %vm418_vm13, %vm419_vm14  ;;  %vm428_vm1 = vweird.f32 %v325_v26 }
 0x154   :  { %v414_v29 = vmul.f32 %v3730_v25, %v413_v27  ;;  %v411_v33 = vsel %vm410_vm12, %v3728_v10, %v407_v28 }
 0x155   :  { %3192 = vmatmul.msk.f32.gmra.mxu2 %vm495_vm4, %v411_v33 }
 0x156   :  { %v415_v35 = vmul.f32 0.5, %v414_v29 }
 0x158   :  { %v298_v36 = vpop.f32.mrf.mxu1  ;;  %v416_v38 = vsub.f32 1.5, %v415_v35 }
 0x159   :  { %v3732_v39 = vpop.eup %3731  ;;  %v326_v41 = vmax.f32 %v298_v36, 1e-24 }
 0x15a   :  { %v423_v42 = vmul.f32 %v3732_v39, %v325_v26  ;;  %v417_v45 = vmul.f32 %v3730_v25, %v416_v38  ;;  %vm429_vm2 = vweird.f32 %v3732_v39 }
 0x15b   :  { %3733 = vrsqrt.f32 %v326_v41  ;;  %vm430_vm3 = vmor %vm428_vm1, %vm429_vm2  ;;  %vm438_vm5 = vweird.f32 %v326_v41 }
 0x15c   :  { %v424_v47 = vmul.f32 %v3732_v39, %v423_v42  ;;  %v421_v48 = vsel %vm420_vm15, %v3730_v25, %v417_v45 }
 0x15d   :  { %3193 = vmatmul.msk.f32.gmra.mxu2 %vm495_vm4, %v421_v48 }
 0x15e   :  { %v425_v50 = vmul.f32 0.5, %v424_v47 }
 0x160   :  { %v301_v51 = vpop.f32.mrf.mxu1  ;;  %v426_v52 = vsub.f32 1.5, %v425_v50 }
 0x161   :  { %v3734_v54 = vpop.eup %3733  ;;  %v327_v55 = vmax.f32 %v301_v51, 1e-24 }
 0x162   :  { %v433_v57 = vmul.f32 %v3734_v54, %v326_v41  ;;  %v427_v58 = vmul.f32 %v3732_v39, %v426_v52  ;;  %vm439_vm6 = vweird.f32 %v3734_v54 }
 0x163   :  { %3735 = vrsqrt.f32 %v327_v55  ;;  %vm440_vm7 = vmor %vm438_vm5, %vm439_vm6  ;;  %vm448_vm8 = vweird.f32 %v327_v55 }
 0x164   :  { %v434_v61 = vmul.f32 %v3734_v54, %v433_v57  ;;  %v431_v63 = vsel %vm430_vm3, %v3732_v39, %v427_v58 }
 0x165   :  { %3194 = vmatmul.msk.f32.gmra.mxu2 %vm495_vm4, %v431_v63 }
 0x166   :  { %v435_v1 = vmul.f32 0.5, %v434_v61 }
 0x168   :  { %v304_v2 = vpop.f32.mrf.mxu1  ;;  %v436_v4 = vsub.f32 1.5, %v435_v1 }
 0x169   :  { %v3736_v5 = vpop.eup %3735  ;;  %v328_v7 = vmax.f32 %v304_v2, 1e-24 }
 0x16a   :  { %v443_v8 = vmul.f32 %v3736_v5, %v327_v55  ;;  %v437_v10 = vmul.f32 %v3734_v54, %v436_v4  ;;  %vm449_vm9 = vweird.f32 %v3736_v5 }
 0x16b   :  { %3737 = vrsqrt.f32 %v328_v7  ;;  %vm450_vm10 = vmor %vm448_vm8, %vm449_vm9  ;;  %vm458_vm11 = vweird.f32 %v328_v7 }
 0x16c   :  { %v444_v13 = vmul.f32 %v3736_v5, %v443_v8  ;;  %v441_v14 = vsel %vm440_vm7, %v3734_v54, %v437_v10  ;;  %v4177_v10 = vpop.permute.xlu2 %648 }
 0x16d   :  { %3195 = vmatmul.msk.f32.gmra.mxu2 %vm495_vm4, %v441_v14 }
 0x16e   :  { %v445_v15 = vmul.f32 0.5, %v444_v13 }
 0x170   :  { %v307_v16 = vpop.f32.mrf.mxu1  ;;  %v446_v18 = vsub.f32 1.5, %v445_v15  ;;  %v4180_v15 = vpop.permute.xlu1 %652 }
 0x171   :  { %v3738_v19 = vpop.eup %3737  ;;  %v329_v21 = vmax.f32 %v307_v16, 1e-24 }
 0x172   :  { %v453_v22 = vmul.f32 %v3738_v19, %v328_v7  ;;  %v447_v25 = vmul.f32 %v3736_v5, %v446_v18  ;;  %vm459_vm12 = vweird.f32 %v3738_v19  ;;  %v4184_v18 = vpop.permute.xlu0 %656 }
 0x173   :  { %3739 = vrsqrt.f32 %v329_v21  ;;  %vm460_vm13 = vmor %vm458_vm11, %vm459_vm12  ;;  %vm468_vm14 = vweird.f32 %v329_v21  ;;  %vm2172_vm11 = vcmask 64512  }
 0x174   :  { %v454_v26 = vmul.f32 %v3738_v19, %v453_v22  ;;  %v451_v27 = vsel %vm450_vm10, %v3736_v5, %v447_v25  ;;  %v4182_v16 = vpop.permute.xlu2 %646 }
 0x175   :  { %3196 = vmatmul.msk.f32.gmra.mxu2 %vm495_vm4, %v451_v27 }
 0x176   :  { %v455_v28 = vmul.f32 0.5, %v454_v26 }
 0x178   :  { %v456_v29 = vsub.f32 1.5, %v455_v28  ;;  %v310_v33 = vpop.f32.mrf.mxu1 }
 0x179   :  { %v3740_v35 = vpop.eup %3739  ;;  %v330_v36 = vmax.f32 %v310_v33, 1e-24 }
 0x17a   :  { %v463_v38 = vmul.f32 %v3740_v35, %v329_v21  ;;  %v457_v39 = vmul.f32 %v3738_v19, %v456_v29  ;;  %vm469_vm15 = vweird.f32 %v3740_v35  ;;  %v4186_v21 = vpop.permute.xlu1 %650 }
 0x17b   :  { %3741 = vrsqrt.f32 %v330_v36  ;;  %vm470_vm1 = vmor %vm468_vm14, %vm469_vm15  ;;  %vm478_vm2 = vweird.f32 %v330_v36 }
 0x17c   :  { %v464_v41 = vmul.f32 %v3740_v35, %v463_v38  ;;  %v461_v42 = vsel %vm460_vm13, %v3738_v19, %v457_v39  ;;  %v4199_v28 = vpop.permute.xlu2 %644 }
 0x17d   :  { %3197 = vmatmul.msk.f32.gmra.mxu2 %vm495_vm4, %v461_v42 }
 0x17e   :  { %v465_v45 = vmul.f32 0.5, %v464_v41 }
 0x180   :  { %v466_v47 = vsub.f32 1.5, %v465_v45  ;;  %v313_v48 = vpop.f32.mrf.mxu1 }
 0x181   :  { %v3742_v50 = vpop.eup %3741  ;;  %v331_v51 = vmax.f32 %v313_v48, 1e-24 }
 0x182   :  { %v473_v52 = vmul.f32 %v3742_v50, %v330_v36  ;;  %v467_v54 = vmul.f32 %v3740_v35, %v466_v47  ;;  %vm479_vm3 = vweird.f32 %v3742_v50 }
 0x183   :  { %3743 = vrsqrt.f32 %v331_v51  ;;  %vm480_vm5 = vmor %vm478_vm2, %vm479_vm3  ;;  %vm488_vm6 = vweird.f32 %v331_v51 }
 0x184   :  { %v474_v55 = vmul.f32 %v3742_v50, %v473_v52  ;;  %v471_v57 = vsel %vm470_vm1, %v3740_v35, %v467_v54  ;;  %v4216_v39 = vpop.permute.xlu2 %642 }
 0x185   :  { %3198 = vmatmul.msk.f32.gmra.mxu2 %vm495_vm4, %v471_v57 }
 0x186   :  { %v475_v58 = vmul.f32 0.5, %v474_v55 }
 0x188   :  { %v476_v61 = vsub.f32 1.5, %v475_v58 }
 0x189   :  { %v3744_v63 = vpop.eup %3743 }
 0x18a   :  { %v483_v1 = vmul.f32 %v3744_v63, %v331_v51  ;;  %v477_v2 = vmul.f32 %v3742_v50, %v476_v61  ;;  %vm489_vm7 = vweird.f32 %v3744_v63 }
 0x18b   :  { %vm490_vm8 = vmor %vm488_vm6, %vm489_vm7 }
 0x18c   :  { %v484_v4 = vmul.f32 %v3744_v63, %v483_v1  ;;  %v481_v5 = vsel %vm480_vm5, %v3742_v50, %v477_v2 }
 0x18d   :  { %3199 = vmatmul.msk.f32.gmra.mxu2 %vm495_vm4, %v481_v5 }
 0x18e   :  { %v485_v7 = vmul.f32 0.5, %v484_v4 }
 0x190   :  { %v486_v8 = vsub.f32 1.5, %v485_v7 }
 0x192   :  { %v487_v13 = vmul.f32 %v3744_v63, %v486_v8 }
 0x194   :  { %v491_v14 = vsel %vm490_vm8, %v3744_v63, %v487_v13 }
 0x195   :  { %3200 = vmatmul.msk.f32.gmra.mxu2 %vm495_vm4, %v491_v14 }
 0x1a0   :  { %v561_v19 = vpop.f32.mrf.mxu2 }
 0x1a1   :  { %v4189_v22 = vmul.f32 %v561_v19, %v4014_v34  ;;  %v4202_v34 = vpop.permute.xlu0 %654 }
 0x1a3   :  { %v680_v25 = vmul.f32 %v4184_v18, %v4189_v22  ;;  %v676_v26 = vmul.f32 %v4180_v15, %v4189_v22  ;;  %v674_v27 = vmul.f32 %v4186_v21, %v4189_v22  ;;  %v678_v35 = vmul.f32 %v4202_v34, %v4189_v22 }
 0x1a4   :  { %v672_v36 = vmul.f32 %v4177_v10, %v4189_v22  ;;  %v666_v41 = vmul.f32 %v4216_v39, %v4189_v22  ;;  %v668_v45 = vmul.f32 %v4199_v28, %v4189_v22 }
 0x1a5   :  { %990 = vrot.lane.b32.xlu1 %v680_v25, %s3836_s7  ;;  %982 = vrot.lane.b32.xlu2 %v676_v26, %s3836_s7 }
 0x1a6   :  { %978 = vrot.lane.b32.xlu0 %v674_v27, %s3836_s7 }
 0x1a8   :  { %v564_v29 = vpop.f32.mrf.mxu2 }
 0x1a9   :  { %v4205_v33 = vmul.f32 %v564_v29, %v4020_v37  ;;  %v670_v37 = vmul.f32 %v4182_v16, %v4189_v22 }
 0x1ab   :  { %v681_v38 = vmul.f32 %v4184_v18, %v4205_v33  ;;  %v679_v42 = vmul.f32 %v4202_v34, %v4205_v33  ;;  %v675_v47 = vmul.f32 %v4186_v21, %v4205_v33  ;;  %v677_v50 = vmul.f32 %v4180_v15, %v4205_v33 }
 0x1ac   :  { %v673_v52 = vmul.f32 %v4177_v10, %v4205_v33  ;;  %v667_v55 = vmul.f32 %v4216_v39, %v4205_v33  ;;  %v671_v57 = vmul.f32 %v4182_v16, %v4205_v33  ;;  %v669_v1 = vmul.f32 %v4199_v28, %v4205_v33 }
 0x1ad   :  { %986 = vrot.lane.b32.xlu1 %v678_v35, %s3836_s7  ;;  %974 = vrot.lane.b32.xlu2 %v672_v36, %s3836_s7 }
 0x1ae   :  { %992 = vrot.lane.b32.xlu0 %v681_v38, %s3836_s7 }
 0x1b0   :  { %v567_v48 = vpop.f32.mrf.mxu2 }
 0x1b1   :  { %v4237_v51 = vmul.f32 %v567_v48, %v4026_v40 }
 0x1b3   :  { %v694_v54 = vmul.f32 %v4202_v34, %v4237_v51  ;;  %v682_v40 = vmul.f32 %v4216_v39, %v4237_v51  ;;  %v696_v61 = vmul.f32 %v4184_v18, %v4237_v51  ;;  %v692_v4 = vmul.f32 %v4180_v15, %v4237_v51 }
 0x1b4   :  { %v686_v5 = vmul.f32 %v4182_v16, %v4237_v51  ;;  %v690_v8 = vmul.f32 %v4186_v21, %v4237_v51  ;;  %v684_v14 = vmul.f32 %v4199_v28, %v4237_v51  ;;  %v688_v25 = vmul.f32 %v4177_v10, %v4237_v51 }
 0x1b5   :  { %970 = vrot.lane.b32.xlu2 %v670_v37, %s3836_s7  ;;  %962 = vrot.lane.b32.xlu1 %v666_v41, %s3836_s7 }
 0x1b6   :  { %988 = vrot.lane.b32.xlu0 %v679_v42, %s3836_s7 }
 0x1b8   :  { %v570_v58 = vpop.f32.mrf.mxu2 }
 0x1b9   :  { %v4258_v63 = vmul.f32 %v570_v58, %v4032_v43 }
 0x1bb   :  { %v697_v2 = vmul.f32 %v4184_v18, %v4258_v63  ;;  %v687_v43 = vmul.f32 %v4182_v16, %v4258_v63  ;;  %v695_v26 = vmul.f32 %v4202_v34, %v4258_v63  ;;  %v693_v27 = vmul.f32 %v4180_v15, %v4258_v63 }
 0x1bc   :  { %v685_v29 = vmul.f32 %v4199_v28, %v4258_v63  ;;  %v691_v38 = vmul.f32 %v4186_v21, %v4258_v63 }
 0x1bd   :  { %966 = vrot.lane.b32.xlu2 %v668_v45, %s3836_s7  ;;  %980 = vrot.lane.b32.xlu1 %v675_v47, %s3836_s7  ;;  %v689_v45 = vmul.f32 %v4177_v10, %v4258_v63 }
 0x1be   :  { %984 = vrot.lane.b32.xlu0 %v677_v50, %s3836_s7  ;;  %v683_v50 = vmul.f32 %v4216_v39, %v4258_v63 }
 0x1c0   :  { %v573_v7 = vpop.f32.mrf.mxu2 }
 0x1c1   :  { %v4279_v13 = vmul.f32 %v573_v7, %v4038_v46 }
 0x1c3   :  { %v712_v19 = vmul.f32 %v4184_v18, %v4279_v13  ;;  %v710_v46 = vmul.f32 %v4202_v34, %v4279_v13  ;;  %v708_v35 = vmul.f32 %v4180_v15, %v4279_v13  ;;  %v702_v41 = vmul.f32 %v4182_v16, %v4279_v13 }
 0x1c5   :  { %976 = vrot.lane.b32.xlu2 %v673_v52, %s3836_s7  ;;  %1095 = vrot.lane.b32.xlu1 %v694_v54, %s3836_s7 }
 0x1c6   :  { %964 = vrot.lane.b32.xlu0 %v667_v55, %s3836_s7 }
 0x1c8   :  { %v576_v36 = vpop.f32.mrf.mxu2 }
 0x1c9   :  { %v4309_v37 = vmul.f32 %v576_v36, %v4044_v49  ;;  %v698_v49 = vmul.f32 %v4216_v39, %v4279_v13 }
 0x1cb   :  { %v713_v42 = vmul.f32 %v4184_v18, %v4309_v37  ;;  %v711_v48 = vmul.f32 %v4202_v34, %v4309_v37  ;;  %v709_v54 = vmul.f32 %v4180_v15, %v4309_v37  ;;  %v707_v55 = vmul.f32 %v4186_v21, %v4309_v37 }
 0x1cc   :  { %v703_v58 = vmul.f32 %v4182_v16, %v4309_v37 }
 0x1cd   :  { %972 = vrot.lane.b32.xlu2 %v671_v57, %s3836_s7  ;;  %1071 = vrot.lane.b32.xlu1 %v682_v40, %s3836_s7  ;;  %v706_v57 = vmul.f32 %v4186_v21, %v4279_v13 }
 0x1ce   :  { %1099 = vrot.lane.b32.xlu0 %v696_v61, %s3836_s7  ;;  %v701_v61 = vmul.f32 %v4199_v28, %v4309_v37 }
 0x1d5   :  { %968 = vrot.lane.b32.xlu2 %v669_v1, %s3836_s7  ;;  %1101 = vrot.lane.b32.xlu1 %v697_v2, %s3836_s7  ;;  %v579_v1 = vpop.f32.mrf.mxu2  ;;  %v704_v2 = vmul.f32 %v4177_v10, %v4279_v13 }
 0x1d6   :  { %1091 = vrot.lane.b32.xlu0 %v692_v4, %s3836_s7  ;;  %v4354_v4 = vmul.f32 %v579_v1, %v4050_v53 }
 0x1dd   :  { %1079 = vrot.lane.b32.xlu2 %v686_v5, %s3836_s7  ;;  %1081 = vrot.lane.b32.xlu1 %v687_v43, %s3836_s7 }
 0x1de   :  { %1087 = vrot.lane.b32.xlu0 %v690_v8, %s3836_s7  ;;  %v699_v8 = vmul.f32 %v4216_v39, %v4309_v37 }
 0x1e5   :  { %1075 = vrot.lane.b32.xlu2 %v684_v14, %s3836_s7  ;;  %1208 = vrot.lane.b32.xlu1 %v712_v19, %s3836_s7  ;;  %v724_v14 = vmul.f32 %v4180_v15, %v4354_v4  ;;  %v700_v19 = vmul.f32 %v4199_v28, %v4279_v13 }
 0x1e6   :  { %1083 = vrot.lane.b32.xlu0 %v688_v25, %s3836_s7 }
 0x1ed   :  { %1097 = vrot.lane.b32.xlu2 %v695_v26, %s3836_s7  ;;  %1204 = vrot.lane.b32.xlu1 %v710_v46, %s3836_s7  ;;  %v726_v46 = vmul.f32 %v4202_v34, %v4354_v4 }
 0x1ee   :  { %1093 = vrot.lane.b32.xlu0 %v693_v27, %s3836_s7  ;;  %v705_v27 = vmul.f32 %v4177_v10, %v4309_v37 }
 0x1f5   :  { %1077 = vrot.lane.b32.xlu2 %v685_v29, %s3836_s7  ;;  %1200 = vrot.lane.b32.xlu1 %v708_v35, %s3836_s7  ;;  %v718_v29 = vmul.f32 %v4182_v16, %v4354_v4  ;;  %v582_v35 = vpop.f32.mrf.mxu2 }
 0x1f6   :  { %1089 = vrot.lane.b32.xlu0 %v691_v38, %s3836_s7 }
 0x1fd   :  { %1188 = vrot.lane.b32.xlu2 %v702_v41, %s3836_s7  ;;  %1210 = vrot.lane.b32.xlu1 %v713_v42, %s3836_s7  ;;  %v4381_v41 = vmul.f32 %v582_v35, %v4056_v56 }
 0x1fe   :  { %1085 = vrot.lane.b32.xlu0 %v689_v45, %s3836_s7  ;;  %v722_v45 = vmul.f32 %v4186_v21, %v4354_v4 }
 0x1ff   :  { %v4320_v47 = vpop.permute.xlu2 %982 }
 0x205   :  { %1180 = vrot.lane.b32.xlu2 %v698_v49, %s3836_s7  ;;  %1206 = vrot.lane.b32.xlu1 %v711_v48, %s3836_s7  ;;  %v728_v49 = vmul.f32 %v4184_v18, %v4354_v4  ;;  %v729_v48 = vmul.f32 %v4184_v18, %v4381_v41 }
 0x206   :  { %1073 = vrot.lane.b32.xlu0 %v683_v50, %s3836_s7 }
 0x207   :  { %v4331_v52 = vpop.permute.xlu2 %974 }
 0x20d   :  { %1202 = vrot.lane.b32.xlu1 %v709_v54, %s3836_s7  ;;  %1198 = vrot.lane.b32.xlu2 %v707_v55, %s3836_s7  ;;  %v716_v55 = vmul.f32 %v4199_v28, %v4354_v4 }
 0x20e   :  { %1196 = vrot.lane.b32.xlu0 %v706_v57, %s3836_s7  ;;  %v720_v57 = vmul.f32 %v4177_v10, %v4354_v4 }
 0x20f   :  { %v4342_v40 = vpop.permute.xlu2 %970 }
 0x215   :  { %1190 = vrot.lane.b32.xlu1 %v703_v58, %s3836_s7  ;;  %1186 = vrot.lane.b32.xlu2 %v701_v61, %s3836_s7  ;;  %v721_v58 = vmul.f32 %v4177_v10, %v4381_v41 }
 0x216   :  { %1192 = vrot.lane.b32.xlu0 %v704_v2, %s3836_s7 }
 0x217   :  { %v991_v5 = vpop.permute.xlu1 %990  ;;  %v4356_v43 = vpop.permute.xlu2 %966 }
 0x218   :  { %v979_v7 = vpop.permute.xlu0 %978 }
 0x21d   :  { %1182 = vrot.lane.b32.xlu1 %v699_v8, %s3836_s7  ;;  %1309 = vrot.lane.b32.xlu2 %v724_v14, %s3836_s7  ;;  %v714_v8 = vmul.f32 %v4216_v39, %v4354_v4  ;;  %v585_v14 = vpop.f32.mrf.mxu2 }
 0x21e   :  { %1184 = vrot.lane.b32.xlu0 %v700_v19, %s3836_s7 }
 0x21f   :  { %v987_v53 = vpop.permute.xlu1 %986  ;;  %v977_v25 = vpop.permute.xlu2 %976 }
 0x220   :  { %v993_v26 = vpop.permute.xlu0 %992 }
 0x221   :  { %3201 = vmatpush.xpose.msk.msra.mxu3 %vm60_vm0, %v993_v26  ;;  %v4426_v26 = vmul.f32 %v585_v14, %v4062_v59 }
 0x225   :  { %3202 = vmatpush.xpose.msk.msra.mxu3 %vm60_vm0, %v991_v5  ;;  %1313 = vrot.lane.b32.xlu1 %v726_v46, %s3836_s7  ;;  %v727_v5 = vmul.f32 %v4202_v34, %v4381_v41 }
 0x226   :  { %1194 = vrot.lane.b32.xlu0 %v705_v27, %s3836_s7  ;;  %1297 = vrot.lane.b32.xlu2 %v718_v29, %s3836_s7  ;;  %v725_v27 = vmul.f32 %v4180_v15, %v4381_v41  ;;  %v742_v29 = vmul.f32 %v4202_v34, %v4426_v26 }
 0x227   :  { %v4378_v36 = vpop.permute.xlu1 %962  ;;  %v973_v38 = vpop.permute.xlu2 %972 }
 0x228   :  { %v989_v42 = vpop.permute.xlu0 %988 }
 0x229   :  { %3203 = vmatpush.xpose.msk.msra.mxu3 %vm60_vm0, %v989_v42  ;;  %v719_v42 = vmul.f32 %v4182_v16, %v4381_v41 }
 0x22d   :  { %3204 = vmatpush.xpose.msk.msra.mxu3 %vm60_vm0, %v987_v53  ;;  %1305 = vrot.lane.b32.xlu1 %v722_v45, %s3836_s7  ;;  %v717_v45 = vmul.f32 %v4199_v28, %v4381_v41 }
 0x22e   :  { %1317 = vrot.lane.b32.xlu0 %v728_v49, %s3836_s7  ;;  %1319 = vrot.lane.b32.xlu2 %v729_v48, %s3836_s7 }
 0x22f   :  { %v981_v56 = vpop.permute.xlu1 %980  ;;  %v969_v50 = vpop.permute.xlu2 %968 }
 0x230   :  { %v985_v54 = vpop.permute.xlu0 %984 }
 0x231   :  { %3205 = vmatpush.xpose.msk.msra.mxu3 %vm60_vm0, %v985_v54  ;;  %v732_v54 = vmul.f32 %v4199_v28, %v4426_v26 }
 0x235   :  { %3206 = vmatpush.xpose.msk.msra.mxu3 %vm60_vm0, %v4320_v47  ;;  %1293 = vrot.lane.b32.xlu1 %v716_v55, %s3836_s7  ;;  %v715_v47 = vmul.f32 %v4216_v39, %v4381_v41  ;;  %v588_v55 = vpop.f32.mrf.mxu2 }
 0x236   :  { %1301 = vrot.lane.b32.xlu0 %v720_v57, %s3836_s7  ;;  %1303 = vrot.lane.b32.xlu2 %v721_v58, %s3836_s7 }
 0x237   :  { %v4406_v61 = vpop.permute.xlu1 %1095  ;;  %v4408_v1 = vpop.permute.xlu2 %1079 }
 0x238   :  { %v965_v2 = vpop.permute.xlu0 %964 }
 0x239   :  { %3207 = vmatpush.xpose.msk.msra.mxu3 %vm60_vm0, %v981_v56  ;;  %v740_v56 = vmul.f32 %v4180_v15, %v4426_v26 }
 0x23d   :  { %3208 = vmatpush.xpose.msk.msra.mxu3 %vm60_vm0, %v979_v7  ;;  %1315 = vrot.lane.b32.xlu1 %v727_v5, %s3836_s7  ;;  %v723_v7 = vmul.f32 %v4186_v21, %v4381_v41  ;;  %v4477_v5 = vmul.f32 %v588_v55, %v4068_v62 }
 0x23e   :  { %1289 = vrot.lane.b32.xlu0 %v714_v8, %s3836_s7  ;;  %1291 = vrot.lane.b32.xlu2 %v715_v47, %s3836_s7  ;;  %v738_v8 = vmul.f32 %v4186_v21, %v4426_v26 }
 0x23f   :  { %v4421_v19 = vpop.permute.xlu2 %1075  ;;  %v4423_v53 = vpop.permute.xlu1 %1071  ;;  %v745_v47 = vmul.f32 %v4184_v18, %v4477_v5 }
 0x240   :  { %v1100_v46 = vpop.permute.xlu0 %1099 }
 0x241   :  { %3209 = vmatpush.xpose.msk.msra.mxu3 %vm60_vm0, %v977_v25 }
 0x245   :  { %3210 = vmatpush.xpose.msk.msra.mxu3 %vm60_vm0, %v4331_v52  ;;  %1311 = vrot.lane.b32.xlu1 %v725_v27, %s3836_s7  ;;  %v736_v52 = vmul.f32 %v4177_v10, %v4426_v26  ;;  %v591_v27 = vpop.f32.mrf.mxu2 }
 0x246   :  { %1307 = vrot.lane.b32.xlu0 %v723_v7, %s3836_s7  ;;  %1422 = vrot.lane.b32.xlu2 %v742_v29, %s3836_s7  ;;  %v741_v7 = vmul.f32 %v4180_v15, %v4477_v5  ;;  %v739_v29 = vmul.f32 %v4186_v21, %v4477_v5 }
 0x247   :  { %v1102_v59 = vpop.permute.xlu1 %1101  ;;  %v1098_v25 = vpop.permute.xlu2 %1097 }
 0x248   :  { %v4440_v35 = vpop.permute.xlu0 %1091 }
 0x249   :  { %3211 = vmatpush.xpose.msk.msra.mxu3 %vm60_vm0, %v973_v38 }
 0x24d   :  { %3212 = vmatpush.xpose.msk.msra.mxu3 %vm60_vm0, %v4342_v40  ;;  %1299 = vrot.lane.b32.xlu1 %v719_v42, %s3836_s7  ;;  %v744_v40 = vmul.f32 %v4184_v18, %v4426_v26 }
 0x24e   :  { %1295 = vrot.lane.b32.xlu0 %v717_v45, %s3836_s7  ;;  %1410 = vrot.lane.b32.xlu2 %v736_v52, %s3836_s7  ;;  %v4510_v45 = vmul.f32 %v591_v27, %v4074_v0  ;;  %v743_v52 = vmul.f32 %v4202_v34, %v4477_v5 }
 0x24f   :  { %v4454_v49 = vpop.permute.xlu1 %1081  ;;  %v4456_v38 = vpop.permute.xlu2 %1077 }
 0x250   :  { %v4458_v48 = vpop.permute.xlu0 %1087 }
 0x251   :  { %3213 = vmatpush.xpose.msk.msra.mxu3 %vm60_vm0, %v969_v50 }
 0x255   :  { %3214 = vmatpush.xpose.msk.msra.mxu3 %vm60_vm0, %v4356_v43  ;;  %1418 = vrot.lane.b32.xlu1 %v740_v56, %s3836_s7  ;;  %v734_v43 = vmul.f32 %v4182_v16, %v4426_v26  ;;  %v752_v56 = vmul.f32 %v4177_v10, %v4510_v45 }
 0x256   :  { %1426 = vrot.lane.b32.xlu0 %v744_v40, %s3836_s7  ;;  %1402 = vrot.lane.b32.xlu2 %v732_v54, %s3836_s7  ;;  %v594_v40 = vpop.f32.mrf.mxu2 }
 0x257   :  { %v1209_v50 = vpop.permute.xlu1 %1208  ;;  %v4472_v57 = vpop.permute.xlu2 %1188  ;;  %v4528_v55 = vmul.f32 %v594_v40, %v4080_v3 }
 0x258   :  { %v4474_v58 = vpop.permute.xlu0 %1083 }
 0x259   :  { %3215 = vmatpush.xpose.msk.msra.mxu3 %vm60_vm0, %v965_v2  ;;  %v755_v27 = vmul.f32 %v4186_v21, %v4528_v55 }
 0x25d   :  { %3216 = vmatpush.xpose.msk.msra.mxu3 %vm60_vm0, %v4378_v36  ;;  %1406 = vrot.lane.b32.xlu1 %v734_v43, %s3836_s7  ;;  %v730_v36 = vmul.f32 %v4216_v39, %v4426_v26  ;;  %v737_v43 = vmul.f32 %v4177_v10, %v4477_v5 }
 0x25e   :  { %1414 = vrot.lane.b32.xlu0 %v738_v8, %s3836_s7  ;;  %1428 = vrot.lane.b32.xlu2 %v745_v47, %s3836_s7  ;;  %v731_v8 = vmul.f32 %v4216_v39, %v4477_v5  ;;  %v759_v47 = vmul.f32 %v4202_v34, %v4528_v55 }
 0x25f   :  { %v1205_v62 = vpop.permute.xlu1 %1204  ;;  %v4492_v2 = vpop.permute.xlu2 %1180 }
 0x260   :  { %3217 = vmatmul.msk.f32.vlgmr.msra.gmra.mxu3 %vm60_vm0, %v4189_v22  ;;  %v1094_v14 = vpop.permute.xlu0 %1093 }
 0x261   :  { %3219 = vmatpush.xpose.msk.msrb.mxu3 %vm60_vm0, %v1102_v59 }
 0x265   :  { %3220 = vmatpush.xpose.msk.msrb.mxu3 %vm60_vm0, %v1100_v46  ;;  %1398 = vrot.lane.b32.xlu1 %v730_v36, %s3836_s7  ;;  %v758_v36 = vmul.f32 %v4202_v34, %v4510_v45 }
 0x266   :  { %1420 = vrot.lane.b32.xlu0 %v741_v7, %s3836_s7  ;;  %1416 = vrot.lane.b32.xlu2 %v739_v29, %s3836_s7 }
 0x267   :  { %v1201_v59 = vpop.permute.xlu1 %1200  ;;  %v1199_v46 = vpop.permute.xlu2 %1198 }
 0x268   :  { %3218 = vmatmul.msk.f32.gmra.mxu3 %vm60_vm0, %v4205_v33  ;;  %v1090_v42 = vpop.permute.xlu0 %1089 }
 0x269   :  { %3221 = vmatpush.xpose.msk.msrb.mxu3 %vm60_vm0, %v1098_v25  ;;  %v735_v25 = vmul.f32 %v4182_v16, %v4477_v5 }
 0x26d   :  { %3222 = vmatpush.xpose.msk.msrb.mxu3 %vm60_vm0, %v4406_v61  ;;  %1424 = vrot.lane.b32.xlu1 %v743_v52, %s3836_s7  ;;  %v749_v52 = vmul.f32 %v4199_v28, %v4528_v55 }
 0x26e   :  { %1408 = vrot.lane.b32.xlu0 %v735_v25, %s3836_s7  ;;  %1519 = vrot.lane.b32.xlu2 %v752_v56, %s3836_s7  ;;  %v597_v25 = vpop.f32.mrf.mxu2 }
 0x26f   :  { %v1211_v0 = vpop.permute.xlu1 %1210  ;;  %v4524_v61 = vpop.permute.xlu2 %1186 }
 0x270   :  { %v1086_v54 = vpop.permute.xlu0 %1085  ;;  %3237 = vmatpush.xpose.msk.msra.mxu2 %vm60_vm0, %v1211_v0  ;;  %v748_v0 = vmul.f32 %v4199_v28, %v4510_v45 }
 0x271   :  { %3223 = vmatpush.xpose.msk.msrb.mxu3 %vm60_vm0, %v1094_v14 }
 0x274   :  { %3238 = vmatpush.xpose.msk.msra.mxu2 %vm60_vm0, %v1209_v50  ;;  %v733_v50 = vmul.f32 %v4199_v28, %v4477_v5 }
 0x275   :  { %3224 = vmatpush.xpose.msk.msrb.mxu3 %vm60_vm0, %v4440_v35  ;;  %1412 = vrot.lane.b32.xlu1 %v737_v43, %s3836_s7 }
 0x276   :  { %1400 = vrot.lane.b32.xlu0 %v731_v8, %s3836_s7  ;;  %1533 = vrot.lane.b32.xlu2 %v759_v47, %s3836_s7  ;;  %v600_v43 = vpop.f32.mrf.mxu2  ;;  %v750_v8 = vmul.f32 %v4182_v16, %v4510_v45  ;;  %v761_v47 = vmul.f32 %v4184_v18, %v4528_v55 }
 0x277   :  { %v1207_v3 = vpop.permute.xlu1 %1206  ;;  %v4543_v35 = vpop.permute.xlu2 %1309 }
 0x278   :  { %v1074_v14 = vpop.permute.xlu0 %1073  ;;  %3239 = vmatpush.xpose.msk.msra.mxu2 %vm60_vm0, %v1207_v3 }
 0x279   :  { %3225 = vmatpush.xpose.msk.msrb.mxu3 %vm60_vm0, %v1090_v42  ;;  %v754_v42 = vmul.f32 %v4186_v21, %v4510_v45 }
 0x27c   :  { %3240 = vmatpush.xpose.msk.msra.mxu2 %vm60_vm0, %v1205_v62  ;;  %v760_v62 = vmul.f32 %v4184_v18, %v4510_v45 }
 0x27d   :  { %3226 = vmatpush.xpose.msk.msrb.mxu3 %vm60_vm0, %v4458_v48  ;;  %1404 = vrot.lane.b32.xlu1 %v733_v50, %s3836_s7 }
 0x27e   :  { %1531 = vrot.lane.b32.xlu0 %v758_v36, %s3836_s7  ;;  %1525 = vrot.lane.b32.xlu2 %v755_v27, %s3836_s7  ;;  %v4612_v36 = vmul.f32 %v600_v43, %v4092_v9  ;;  %v603_v27 = vpop.f32.mrf.mxu2 }
 0x27f   :  { %v1203_v48 = vpop.permute.xlu1 %1202 }
 0x280   :  { %v1197_v7 = vpop.permute.xlu0 %1196  ;;  %v4559_v29 = vpop.permute.xlu2 %1297  ;;  %3241 = vmatpush.xpose.msk.msra.mxu2 %vm60_vm0, %v1203_v48  ;;  %v753_v48 = vmul.f32 %v4177_v10, %v4528_v55  ;;  %v773_v9 = vmul.f32 %v4180_v15, %v4612_v36 }
 0x281   :  { %3227 = vmatpush.xpose.msk.msrb.mxu3 %vm60_vm0, %v1086_v54 }
 0x284   :  { %3242 = vmatpush.xpose.msk.msra.mxu2 %vm60_vm0, %v1201_v59  ;;  %v4578_v59 = vmul.f32 %v597_v25, %v4086_v6 }
 0x285   :  { %3228 = vmatpush.xpose.msk.msrb.mxu3 %vm60_vm0, %v4474_v58  ;;  %1535 = vrot.lane.b32.xlu1 %v760_v62, %s3836_s7 }
 0x286   :  { %1523 = vrot.lane.b32.xlu0 %v754_v42, %s3836_s7  ;;  %1513 = vrot.lane.b32.xlu2 %v749_v52, %s3836_s7  ;;  %v4632_v42 = vmul.f32 %v603_v27, %v4098_v12  ;;  %v751_v52 = vmul.f32 %v4182_v16, %v4528_v55  ;;  %v774_v25 = vmul.f32 %v4202_v34, %v4578_v59 }
 0x287   :  { %v1191_v58 = vpop.permute.xlu1 %1190  ;;  %v769_v27 = vmul.f32 %v4177_v10, %v4612_v36 }
 0x288   :  { %v1193_v56 = vpop.permute.xlu0 %1192  ;;  %v1320_v40 = vpop.permute.xlu2 %1319  ;;  %3243 = vmatpush.xpose.msk.msra.mxu2 %vm60_vm0, %v1199_v46  ;;  %v776_v46 = vmul.f32 %v4184_v18, %v4578_v59  ;;  %5782 = vst [vmem:[#allocation5_spill] sm:$0xff] %v4632_v42  ;;  %v790_v12 = vmul.f32 %v4202_v34, %v4632_v42 }
 0x289   :  { %3229 = vmatpush.xpose.msk.msrb.mxu3 %vm60_vm0, %v4454_v49  ;;  %3255 = vmatpush.xpose.msk.msrb.mxu0 %vm60_vm0, %v1320_v40  ;;  %v756_v49 = vmul.f32 %v4180_v15, %v4510_v45 }
 0x28c   :  { %3244 = vmatpush.xpose.msk.msra.mxu2 %vm60_vm0, %v1197_v7 }
 0x28d   :  { %3230 = vmatpush.xpose.msk.msrb.mxu3 %vm60_vm0, %v4408_v1  ;;  %1527 = vrot.lane.b32.xlu1 %v756_v49, %s3836_s7 }
 0x28e   :  { %1511 = vrot.lane.b32.xlu0 %v748_v0, %s3836_s7  ;;  %1644 = vrot.lane.b32.xlu2 %v776_v46, %s3836_s7  ;;  %v777_v46 = vmul.f32 %v4184_v18, %v4612_v36 }
 0x28f   :  { %v1183_v6 = vpop.permute.xlu1 %1182 }
 0x290   :  { %v1185_v1 = vpop.permute.xlu0 %1184  ;;  %v4595_v54 = vpop.permute.xlu2 %1303 }
 0x291   :  { %3231 = vmatpush.xpose.msk.msrb.mxu3 %vm60_vm0, %v4456_v38  ;;  %v770_v38 = vmul.f32 %v4186_v21, %v4578_v59 }
 0x295   :  { %3232 = vmatpush.xpose.msk.msrb.mxu3 %vm60_vm0, %v4421_v19  ;;  %1515 = vrot.lane.b32.xlu1 %v750_v8, %s3836_s7 }
 0x296   :  { %1537 = vrot.lane.b32.xlu0 %v761_v47, %s3836_s7  ;;  %1632 = vrot.lane.b32.xlu2 %v770_v38, %s3836_s7  ;;  %v775_v47 = vmul.f32 %v4202_v34, %v4612_v36  ;;  %v788_v38 = vmul.f32 %v4180_v15, %v4632_v42 }
 0x297   :  { %v1314_v3 = vpop.permute.xlu1 %1313 }
 0x298   :  { %v1195_v50 = vpop.permute.xlu0 %1194  ;;  %v4609_v19 = vpop.permute.xlu2 %1291 }
 0x299   :  { %3233 = vmatpush.xpose.msk.msrb.mxu3 %vm60_vm0, %v1074_v14  ;;  %3245 = vmatpush.xpose.msk.msra.mxu2 %vm60_vm0, %v1195_v50  ;;  %v757_v14 = vmul.f32 %v4180_v15, %v4528_v55 }
 0x29d   :  { %3234 = vmatpush.xpose.msk.msrb.mxu3 %vm60_vm0, %v4423_v53  ;;  %3246 = vmatpush.xpose.msk.msra.mxu2 %vm60_vm0, %v1193_v56  ;;  %v606_v56 = vpop.f32.mrf.mxu2 }
 0x29e   :  { %1529 = vrot.lane.b32.xlu0 %v757_v14, %s3836_s7  ;;  %1521 = vrot.lane.b32.xlu1 %v753_v48, %s3836_s7  ;;  %v4654_v0 = vmul.f32 %v606_v56, %v4110_v17 }
 0x29f   :  { %1638 = vrot.lane.b32.xlu2 %v773_v9, %s3836_s7  ;;  %v1306_v53 = vpop.permute.xlu1 %1305 }
 0x2a0   :  { %3235 = vmatmul.msk.f32.vlgmr.msrb.gmra.mxu3 %vm60_vm0, %v4237_v51  ;;  %v1318_v7 = vpop.permute.xlu0 %1317  ;;  %v4629_v62 = vpop.permute.xlu2 %1422  ;;  %v793_v43 = vmul.f32 %v4184_v18, %v4654_v0  ;;  %v789_v14 = vmul.f32 %v4180_v15, %v4654_v0  ;;  %v791_v56 = vmul.f32 %v4202_v34, %v4654_v0  ;;  %v746_v34 = vmul.f32 %v4216_v39, %v4510_v45 }
 0x2a1   :  { %3247 = vmatpush.xpose.msk.msra.mxu2 %vm60_vm0, %v1191_v58  ;;  %3256 = vmatpush.xpose.msk.msrb.mxu0 %vm60_vm0, %v1318_v7  ;;  %v792_v7 = vmul.f32 %v4184_v18, %v4632_v42  ;;  %v747_v18 = vmul.f32 %v4216_v39, %v4528_v55 }
 0x2a5   :  { %3248 = vmatpush.xpose.msk.msra.mxu2 %vm60_vm0, %v4472_v57  ;;  %v772_v57 = vmul.f32 %v4180_v15, %v4578_v59  ;;  %v767_v15 = vmul.f32 %v4182_v16, %v4612_v36 }
 0x2a6   :  { %1517 = vrot.lane.b32.xlu0 %v751_v52, %s3836_s7  ;;  %1640 = vrot.lane.b32.xlu1 %v774_v25, %s3836_s7  ;;  %v787_v52 = vmul.f32 %v4186_v21, %v4654_v0 }
 0x2a7   :  { %1749 = vrot.lane.b32.xlu2 %v790_v12, %s3836_s7  ;;  %v4649_v58 = vpop.permute.xlu1 %1293 }
 0x2a8   :  { %3236 = vmatmul.msk.f32.gmra.mxu3 %vm60_vm0, %v4258_v63  ;;  %v1302_v40 = vpop.permute.xlu0 %1301  ;;  %v4651_v49 = vpop.permute.xlu2 %1410 }
 0x2a9   :  { %3249 = vmatpush.xpose.msk.msra.mxu2 %vm60_vm0, %v4524_v61 }
 0x2ad   :  { %3250 = vmatpush.xpose.msk.msra.mxu2 %vm60_vm0, %v1185_v1  ;;  %v768_v1 = vmul.f32 %v4177_v10, %v4578_v59 }
 0x2ae   :  { %1636 = vrot.lane.b32.xlu0 %v772_v57, %s3836_s7  ;;  %1646 = vrot.lane.b32.xlu1 %v777_v46, %s3836_s7  ;;  %v764_v57 = vmul.f32 %v4199_v28, %v4578_v59 }
 0x2af   :  { %1755 = vrot.lane.b32.xlu2 %v793_v43, %s3836_s7  ;;  %v1316_v17 = vpop.permute.xlu1 %1315  ;;  %v766_v43 = vmul.f32 %v4182_v16, %v4578_v59 }
 0x2b0   :  { %v4668_v8 = vpop.permute.xlu0 %1289  ;;  %v4670_v61 = vpop.permute.xlu2 %1402  ;;  %3257 = vmatpush.xpose.msk.msrb.mxu0 %vm60_vm0, %v1316_v17  ;;  %v784_v17 = vmul.f32 %v4177_v10, %v4632_v42 }
 0x2b1   :  { %3251 = vmatpush.xpose.msk.msra.mxu2 %vm60_vm0, %v1183_v6 }
 0x2b4   :  { %3258 = vmatpush.xpose.msk.msrb.mxu0 %vm60_vm0, %v1314_v3 }
 0x2b5   :  { %3252 = vmatpush.xpose.msk.msra.mxu2 %vm60_vm0, %v4492_v2  ;;  %v771_v2 = vmul.f32 %v4186_v21, %v4612_v36 }
 0x2b6   :  { %1628 = vrot.lane.b32.xlu1 %v768_v1, %s3836_s7  ;;  %1642 = vrot.lane.b32.xlu0 %v775_v47, %s3836_s7 }
 0x2b7   :  { %1745 = vrot.lane.b32.xlu2 %v788_v38, %s3836_s7  ;;  %v1312_v6 = vpop.permute.xlu1 %1311  ;;  %v765_v38 = vmul.f32 %v4199_v28, %v4612_v36 }
 0x2b8   :  { %v1308_v3 = vpop.permute.xlu0 %1307  ;;  %3253 = vmatmul.msk.f32.vlgmr.msra.gmra.mxu2 %vm60_vm0, %v4279_v13  ;;  %3259 = vmatpush.xpose.msk.msrb.mxu0 %vm60_vm0, %v1312_v6  ;;  %v1429_v50 = vpop.permute.xlu2 %1428  ;;  %v786_v6 = vmul.f32 %v4186_v21, %v4632_v42  ;;  %v763_v21 = vmul.f32 %v4216_v39, %v4612_v36 }
 0x2b9   :  { %3273 = vmatpush.xpose.msk.msra.mxu1 %vm60_vm0, %v1429_v50 }
 0x2bc   :  { %3260 = vmatpush.xpose.msk.msrb.mxu0 %vm60_vm0, %v4543_v35 }
 0x2be   :  { %1634 = vrot.lane.b32.xlu1 %v771_v2, %s3836_s7  ;;  %1630 = vrot.lane.b32.xlu0 %v769_v27, %s3836_s7  ;;  %v785_v27 = vmul.f32 %v4177_v10, %v4654_v0  ;;  %v762_v10 = vmul.f32 %v4216_v39, %v4578_v59 }
 0x2bf   :  { %1747 = vrot.lane.b32.xlu2 %v789_v14, %s3836_s7  ;;  %v1300_v48 = vpop.permute.xlu1 %1299  ;;  %v779_v14 = vmul.f32 %v4216_v39, %v4654_v0 }
 0x2c0   :  { %v1296_v9 = vpop.permute.xlu0 %1295  ;;  %3254 = vmatmul.msk.f32.gmra.mxu2 %vm60_vm0, %v4309_v37  ;;  %3261 = vmatpush.xpose.msk.msrb.mxu0 %vm60_vm0, %v1308_v3  ;;  %v4704_v35 = vpop.permute.xlu2 %1416  ;;  %v782_v3 = vmul.f32 %v4182_v16, %v4632_v42 }
 0x2c4   :  { %3262 = vmatpush.xpose.msk.msrb.mxu0 %vm60_vm0, %v1306_v53 }
 0x2c6   :  { %1626 = vrot.lane.b32.xlu1 %v767_v15, %s3836_s7  ;;  %1753 = vrot.lane.b32.xlu0 %v792_v7, %s3836_s7 }
 0x2c7   :  { %1743 = vrot.lane.b32.xlu2 %v787_v52, %s3836_s7  ;;  %v1419_v25 = vpop.permute.xlu1 %1418  ;;  %v781_v52 = vmul.f32 %v4199_v28, %v4654_v0 }
 0x2c8   :  { %v1427_v12 = vpop.permute.xlu0 %1426  ;;  %3263 = vmatpush.xpose.msk.msrb.mxu0 %vm60_vm0, %v4595_v54  ;;  %v4718_v53 = vpop.permute.xlu2 %1519 }
 0x2c9   :  { %3274 = vmatpush.xpose.msk.msra.mxu1 %vm60_vm0, %v1427_v12  ;;  %v778_v12 = vmul.f32 %v4216_v39, %v4632_v42 }
 0x2cc   :  { %3264 = vmatpush.xpose.msk.msrb.mxu0 %vm60_vm0, %v1302_v40 }
 0x2ce   :  { %1509 = vrot.lane.b32.xlu0 %v747_v18, %s3836_s7  ;;  %1751 = vrot.lane.b32.xlu1 %v791_v56, %s3836_s7 }
 0x2cf   :  { %1620 = vrot.lane.b32.xlu2 %v764_v57, %s3836_s7  ;;  %v4731_v54 = vpop.permute.xlu1 %1406 }
 0x2d0   :  { %v1415_v46 = vpop.permute.xlu0 %1414  ;;  %3265 = vmatpush.xpose.msk.msrb.mxu0 %vm60_vm0, %v1300_v48  ;;  %v4734_v40 = vpop.permute.xlu2 %1533  ;;  %v783_v48 = vmul.f32 %v4182_v16, %v4654_v0  ;;  %v780_v16 = vmul.f32 %v4199_v28, %v4632_v42 }
 0x2d4   :  { %3266 = vmatpush.xpose.msk.msrb.mxu0 %vm60_vm0, %v4559_v29 }
 0x2d6   :  { %1507 = vrot.lane.b32.xlu0 %v746_v34, %s3836_s7  ;;  %1624 = vrot.lane.b32.xlu1 %v766_v43, %s3836_s7  ;;  %v1875_v43 = vld [vmem:[%s5765_s8 + $0x48] sm:$0xff] }
 0x2d7   :  { %1737 = vrot.lane.b32.xlu2 %v784_v17, %s3836_s7  ;;  %v4747_v1 = vpop.permute.xlu1 %1398 }
 0x2d8   :  { %v1421_v47 = vpop.permute.xlu0 %1420  ;;  %3267 = vmatpush.xpose.msk.msrb.mxu0 %vm60_vm0, %v1296_v9  ;;  %v4750_v29 = vpop.permute.xlu2 %1525 }
 0x2dc   :  { %3268 = vmatpush.xpose.msk.msrb.mxu0 %vm60_vm0, %v4649_v58 }
 0x2de   :  { %1622 = vrot.lane.b32.xlu0 %v765_v38, %s3836_s7  ;;  %1741 = vrot.lane.b32.xlu1 %v786_v6, %s3836_s7  ;;  %v1874_v38 = vld [vmem:[%s5765_s8 + $0x40] sm:$0xff]  ;;  %v1873_v6 = vld [vmem:[%s5765_s8 + $0x38] sm:$0xff] }
 0x2df   :  { %1733 = vrot.lane.b32.xlu2 %v782_v3, %s3836_s7  ;;  %v1425_v50 = vpop.permute.xlu1 %1424  ;;  %v1872_v3 = vld [vmem:[%s5765_s8 + $0x30] sm:$0xff] }
 0x2e0   :  { %v1409_v2 = vpop.permute.xlu0 %1408  ;;  %3269 = vmatpush.xpose.msk.msrb.mxu0 %vm60_vm0, %v4609_v19  ;;  %3275 = vmatpush.xpose.msk.msra.mxu1 %vm60_vm0, %v1425_v50  ;;  %v4766_v58 = vpop.permute.xlu2 %1513 }
 0x2e3   :  { %v1049_v34 = vpop.f32.mrf.mxu3 }
 0x2e4   :  { %3270 = vmatpush.xpose.msk.msrb.mxu0 %vm60_vm0, %v4668_v8  ;;  %3276 = vmatpush.xpose.msk.msra.mxu1 %vm60_vm0, %v4629_v62  ;;  %v1818_v50 = vmul.f32 0.5, %v1049_v34 }
 0x2e6   :  { %1618 = vrot.lane.b32.xlu1 %v763_v21, %s3836_s7  ;;  %1739 = vrot.lane.b32.xlu0 %v785_v27, %s3836_s7 }
 0x2e7   :  { %1727 = vrot.lane.b32.xlu2 %v779_v14, %s3836_s7  ;;  %3271 = vmatmul.msk.f32.vlgmr.msrb.gmra.mxu0 %vm60_vm0, %v4354_v4  ;;  %v1413_v19 = vpop.permute.xlu1 %1412 }
 0x2e8   :  { %v1401_v62 = vpop.permute.xlu0 %1400  ;;  %3277 = vmatpush.xpose.msk.msra.mxu1 %vm60_vm0, %v1421_v47  ;;  %v4784_v8 = vpop.permute.xlu2 %1644 }
 0x2ec   :  { %3278 = vmatpush.xpose.msk.msra.mxu1 %vm60_vm0, %v1419_v25 }
 0x2ee   :  { %1616 = vrot.lane.b32.xlu0 %v762_v10, %s3836_s7  ;;  %1735 = vrot.lane.b32.xlu1 %v783_v48, %s3836_s7  ;;  %v1868_v10 = vld [vmem:[%s5765_s8 + $0x10] sm:$0xff] }
 0x2ef   :  { %806 = vrot.lane.b32.xlu2 %v4136_v30, %s3837_s21  ;;  %3272 = vmatmul.msk.f32.gmra.mxu0 %vm60_vm0, %v4381_v41  ;;  %v1405_v9 = vpop.permute.xlu1 %1404 }
 0x2f0   :  { %v1532_v15 = vpop.permute.xlu0 %1531  ;;  %3279 = vmatpush.xpose.msk.msra.mxu1 %vm60_vm0, %v4704_v35  ;;  %v4799_v7 = vpop.permute.xlu2 %1632 }
 0x2f4   :  { %3280 = vmatpush.xpose.msk.msra.mxu1 %vm60_vm0, %v1415_v46  ;;  %v1877_v46 = vld [vmem:[%s5765_s8 + $0x58] sm:$0xff] }
 0x2f6   :  { %1729 = vrot.lane.b32.xlu1 %v780_v16, %s3836_s7  ;;  %1731 = vrot.lane.b32.xlu0 %v781_v52, %s3836_s7 }
 0x2f7   :  { %800 = vrot.lane.b32.xlu2 %v4140_v32, %s3837_s21  ;;  %v1536_v30 = vpop.permute.xlu1 %1535 }
 0x2f8   :  { %v1524_v25 = vpop.permute.xlu0 %1523  ;;  %3281 = vmatpush.xpose.msk.msra.mxu1 %vm60_vm0, %v1413_v19  ;;  %v1870_v19 = vld [vmem:[%s5765_s8 + $0x20] sm:$0xff] }
 0x2f9   :  { %v4811_v35 = vpop.permute.xlu2 %1638 }
 0x2fc   :  { %3282 = vmatpush.xpose.msk.msra.mxu1 %vm60_vm0, %v4651_v49  ;;  %v1881_v49 = vld [vmem:[%s5765_s8 + $0x78] sm:$0xff] }
 0x2fe   :  { %808 = vrot.lane.b32.xlu1 %v4125_v23, %s3837_s21  ;;  %1725 = vrot.lane.b32.xlu0 %v778_v12, %s3836_s7 }
 0x2ff   :  { %794 = vrot.lane.b32.xlu2 %v634_v11, %s3837_s21  ;;  %v1528_v32 = vpop.permute.xlu1 %1527 }
 0x300   :  { %v4823_v28 = vpop.permute.xlu0 %1511  ;;  %3283 = vmatpush.xpose.msk.msra.mxu1 %vm60_vm0, %v1409_v2  ;;  %v1052_v2 = vpop.f32.mrf.mxu3 }
 0x301   :  { %v4826_v18 = vpop.permute.xlu2 %1749  ;;  %v1819_v48 = vmul.f32 0.5, %v1052_v2 }
 0x304   :  { %3284 = vmatpush.xpose.msk.msra.mxu1 %vm60_vm0, %v4731_v54  ;;  %v1878_v54 = vld [vmem:[%s5765_s8 + $0x60] sm:$0xff] }
 0x306   :  { %802 = vrot.lane.b32.xlu1 %v4138_v31, %s3837_s21  ;;  %804 = vrot.lane.b32.xlu0 %v4127_v24, %s3837_s21 }
 0x307   :  { %v4834_v23 = vpop.permute.xlu1 %1515 }
 0x308   :  { %v1538_v20 = vpop.permute.xlu0 %1537  ;;  %3285 = vmatpush.xpose.msk.msra.mxu1 %vm60_vm0, %v1405_v9  ;;  %v1867_v9 = vld [vmem:[%s5765_s8 + $0x8] sm:$0xff] }
 0x309   :  { %v1756_v11 = vpop.permute.xlu2 %1755  ;;  %3291 = vmatpush.xpose.msk.msra.mxu3 %vm60_vm0, %v1538_v20 }
 0x30a   :  { %3327 = vmatpush.xpose.msk.msra.mxu0 %vm60_vm0, %v1756_v11 }
 0x30c   :  { %3286 = vmatpush.xpose.msk.msra.mxu1 %vm60_vm0, %v4670_v61 }
 0x30d   :  { %3292 = vmatpush.xpose.msk.msra.mxu3 %vm60_vm0, %v1536_v30 }
 0x30e   :  { %796 = vrot.lane.b32.xlu1 %v4155_v60, %s3837_s21  ;;  %798 = vrot.lane.b32.xlu0 %v4149_v44, %s3837_s21  ;;  %v1880_v44 = vld [vmem:[%s5765_s8 + $0x70] sm:$0xff]  ;;  %v1879_v60 = vld [vmem:[%s5765_s8 + $0x68] sm:$0xff] }
 0x310   :  { %v1530_v24 = vpop.permute.xlu0 %1529  ;;  %v1522_v31 = vpop.permute.xlu1 %1521  ;;  %3287 = vmatpush.xpose.msk.msra.mxu1 %vm60_vm0, %v1401_v62  ;;  %v1834_v62 = vmul.f32 1.442695, %v1818_v50 }
 0x311   :  { %v4847_v39 = vpop.permute.xlu2 %1745  ;;  %3293 = vmatpush.xpose.msk.msra.mxu3 %vm60_vm0, %v4734_v40  ;;  %v1876_v40 = vld [vmem:[%s5765_s8 + $0x50] sm:$0xff] }
 0x312   :  { %3745 = vpow2.f32 %v1834_v62 }
 0x314   :  { %3288 = vmatpush.xpose.msk.msra.mxu1 %vm60_vm0, %v4747_v1 }
 0x315   :  { %3294 = vmatpush.xpose.msk.msra.mxu3 %vm60_vm0, %v1532_v15 }
 0x317   :  { %3289 = vmatmul.msk.f32.vlgmr.msra.gmra.mxu1 %vm60_vm0, %v4426_v26 }
 0x318   :  { %1882 = vmatpush.msrb.mxu1 %v1881_v49  ;;  %v1518_v61 = vpop.permute.xlu0 %1517  ;;  %v1641_v56 = vpop.permute.xlu1 %1640 }
 0x319   :  { %v4865_v57 = vpop.permute.xlu2 %1747  ;;  %3295 = vmatpush.xpose.msk.msra.mxu3 %vm60_vm0, %v1530_v24  ;;  %v4930_v12 = vpop.eup %3745 }
 0x31a   :  { %1883 = vmatpush.msrb.mxu1 %v1880_v44  ;;  %5783 = vst [vmem:[#allocation6_spill] sm:$0xff] %v4930_v12 }
 0x31c   :  { %1884 = vmatpush.msrb.mxu1 %v1879_v60 }
 0x31d   :  { %3296 = vmatpush.xpose.msk.msra.mxu3 %vm60_vm0, %v1528_v32 }
 0x31e   :  { %1885 = vmatpush.msrb.mxu1 %v1878_v54 }
 0x31f   :  { %3290 = vmatmul.msk.f32.gmra.mxu1 %vm60_vm0, %v4477_v5 }
 0x320   :  { %1886 = vmatpush.msrb.mxu1 %v1877_v46  ;;  %v1637_v17 = vpop.permute.xlu0 %1636  ;;  %v1647_v1 = vpop.permute.xlu1 %1646 }
 0x321   :  { %v4883_v47 = vpop.permute.xlu2 %1743  ;;  %3297 = vmatpush.xpose.msk.msra.mxu3 %vm60_vm0, %v4750_v29  ;;  %3309 = vmatpush.xpose.msk.msrb.mxu2 %vm60_vm0, %v1647_v1  ;;  %v1871_v29 = vld [vmem:[%s5765_s8 + $0x28] sm:$0xff] }
 0x322   :  { %1887 = vmatpush.msrb.mxu1 %v1876_v40 }
 0x323   :  { %v1158_v15 = vpop.f32.mrf.mxu3 }
 0x324   :  { %1888 = vmatpush.msrb.mxu1 %v1875_v43  ;;  %v1820_v32 = vmul.f32 0.5, %v1158_v15 }
 0x325   :  { %3298 = vmatpush.xpose.msk.msra.mxu3 %vm60_vm0, %v1524_v25  ;;  %3310 = vmatpush.xpose.msk.msrb.mxu2 %vm60_vm0, %v4784_v8  ;;  %v1869_v8 = vld [vmem:[%s5765_s8 + $0x18] sm:$0xff]  ;;  %v1836_v25 = vmul.f32 1.442695, %v1819_v48 }
 0x326   :  { %1889 = vmatpush.msrb.mxu1 %v1874_v38 }
 0x327   :  { %3747 = vpow2.f32 %v1836_v25 }
 0x328   :  { %1890 = vmatpush.msrb.mxu1 %v1873_v6  ;;  %v1643_v21 = vpop.permute.xlu0 %1642  ;;  %v1629_v27 = vpop.permute.xlu1 %1628 }
 0x329   :  { %v4903_v14 = vpop.permute.xlu2 %1620  ;;  %3299 = vmatpush.xpose.msk.msra.mxu3 %vm60_vm0, %v1522_v31  ;;  %3311 = vmatpush.xpose.msk.msrb.mxu2 %vm60_vm0, %v1643_v21 }
 0x32a   :  { %1891 = vmatpush.msrb.mxu1 %v1872_v3 }
 0x32b   :  { %v1161_v31 = vpop.f32.mrf.mxu3 }
 0x32c   :  { %1892 = vmatpush.msrb.mxu1 %v1871_v29  ;;  %v1821_v49 = vmul.f32 0.5, %v1161_v31 }
 0x32d   :  { %3300 = vmatpush.xpose.msk.msra.mxu3 %vm60_vm0, %v4718_v53  ;;  %3312 = vmatpush.xpose.msk.msrb.mxu2 %vm60_vm0, %v1641_v56  ;;  %v1866_v53 = vld [vmem:[%s5765_s8] sm:$0xff] }
 0x32e   :  { %1893 = vmatpush.msrb.mxu1 %v1870_v19  ;;  %v1840_v56 = vmul.f32 1.442695, %v1821_v49 }
 0x330   :  { %1894 = vmatpush.msrb.mxu1 %v1869_v8  ;;  %v1631_v16 = vpop.permute.xlu0 %1630  ;;  %v1635_v52 = vpop.permute.xlu1 %1634 }
 0x331   :  { %v4922_v30 = vpop.permute.xlu2 %1737  ;;  %3301 = vmatpush.xpose.msk.msra.mxu3 %vm60_vm0, %v1518_v61  ;;  %3313 = vmatpush.xpose.msk.msrb.mxu2 %vm60_vm0, %v4811_v35  ;;  %v1838_v35 = vmul.f32 1.442695, %v1820_v32 }
 0x332   :  { %1895 = vmatpush.msrb.mxu1 %v1868_v10 }
 0x333   :  { %3749 = vpow2.f32 %v1838_v35 }
 0x334   :  { %1896 = vmatpush.msrb.mxu1 %v1867_v9  ;;  %3751 = vpow2.f32 %v1840_v56 }
 0x335   :  { %3302 = vmatpush.xpose.msk.msra.mxu3 %vm60_vm0, %v4834_v23  ;;  %3314 = vmatpush.xpose.msk.msrb.mxu2 %vm60_vm0, %v1637_v17  ;;  %v4942_v23 = vpop.eup %3747 }
 0x336   :  { %1897 = vmatpush.msrb.mxu1 %v1866_v53  ;;  %5784 = vst [vmem:[#allocation7_spill] sm:$0xff] %v4942_v23 }
 0x337   :  { %1898 = vmatmul.f32.vlgmr.msrb.gmra.mxu1 %v4930_v12 }
 0x338   :  { %v1754_v20 = vpop.permute.xlu0 %1753  ;;  %v1627_v11 = vpop.permute.xlu1 %1626 }
 0x339   :  { %v4936_v24 = vpop.permute.xlu2 %1733  ;;  %3303 = vmatpush.xpose.msk.msra.mxu3 %vm60_vm0, %v4766_v58  ;;  %3328 = vmatpush.xpose.msk.msra.mxu0 %vm60_vm0, %v1754_v20 }
 0x33a   :  { %3315 = vmatpush.xpose.msk.msrb.mxu2 %vm60_vm0, %v1635_v52 }
 0x33b   :  { %v1267_v44 = vpop.f32.mrf.mxu2 }
 0x33c   :  { %v1822_v54 = vmul.f32 0.5, %v1267_v44 }
 0x33d   :  { %3304 = vmatpush.xpose.msk.msra.mxu3 %vm60_vm0, %v4823_v28  ;;  %v4954_v28 = vpop.eup %3749 }
 0x33e   :  { %3316 = vmatpush.xpose.msk.msrb.mxu2 %vm60_vm0, %v4799_v7  ;;  %5785 = vst [vmem:[#allocation8_spill] sm:$0xff] %v4954_v28  ;;  %v1842_v34 = vmul.f32 1.442695, %v1822_v54 }
 0x33f   :  { %1901 = vmatmul.f32.gmra.mxu1 %v4942_v23 }
 0x340   :  { %v1510_v58 = vpop.permute.xlu0 %1509  ;;  %v1752_v60 = vpop.permute.xlu1 %1751  ;;  %3753 = vpow2.f32 %v1842_v34 }
 0x341   :  { %v4949_v61 = vpop.permute.xlu2 %1727  ;;  %3305 = vmatpush.xpose.msk.msra.mxu3 %vm60_vm0, %v1510_v58  ;;  %3329 = vmatpush.xpose.msk.msra.mxu0 %vm60_vm0, %v1752_v60 }
 0x342   :  { %3317 = vmatpush.xpose.msk.msrb.mxu2 %vm60_vm0, %v1631_v16 }
 0x343   :  { %v1270_v1 = vpop.f32.mrf.mxu2 }
 0x344   :  { %v1823_v6 = vmul.f32 0.5, %v1270_v1 }
 0x345   :  { %3330 = vmatpush.xpose.msk.msra.mxu0 %vm60_vm0, %v4826_v18  ;;  %v4970_v18 = vpop.eup %3751 }
 0x346   :  { %3318 = vmatpush.xpose.msk.msrb.mxu2 %vm60_vm0, %v1629_v27  ;;  %5786 = vst [vmem:[#allocation9_spill] sm:$0xff] %v4970_v18  ;;  %v1844_v29 = vmul.f32 1.442695, %v1823_v6 }
 0x347   :  { %1904 = vmatmul.f32.gmra.mxu1 %v4954_v28 }
 0x348   :  { %v1508_v7 = vpop.permute.xlu0 %1507  ;;  %v1625_v46 = vpop.permute.xlu1 %1624  ;;  %3755 = vpow2.f32 %v1844_v29 }
 0x349   :  { %v4960_v40 = vpop.permute.xlu2 %806  ;;  %3306 = vmatpush.xpose.msk.msra.mxu3 %vm60_vm0, %v1508_v7  ;;  %3331 = vmatpush.xpose.msk.msra.mxu0 %vm60_vm0, %v4865_v57 }
 0x34a   :  { %3319 = vmatpush.xpose.msk.msrb.mxu2 %vm60_vm0, %v1627_v11  ;;  %v830_v43 = vmul.f32 %v4960_v40, %v4189_v22  ;;  %v831_v17 = vmul.f32 %v4960_v40, %v4205_v33  ;;  %v4990_v21 = vmul.f32 %v4960_v40, %v4426_v26  ;;  %v5013_v8 = vmul.f32 %v4960_v40, %v4632_v42 }
 0x34b   :  { %v5026_v9 = vmul.f32 %v4960_v40, %v4654_v0 }
 0x34c   :  { %3307 = vmatmul.msk.f32.vlgmr.msra.gmra.mxu3 %vm60_vm0, %v4510_v45  ;;  %v3396_v38 = vpack.i.bf16 %v830_v43, %v831_v17  ;;  %5789 = vst [vmem:[#allocation12_spill] sm:$0xff] %v5013_v8 }
 0x34d   :  { %3332 = vmatpush.xpose.msk.msra.mxu0 %vm60_vm0, %v4847_v39  ;;  %v4992_v39 = vpop.eup %3753  ;;  %5791 = vst [vmem:[#allocation14_spill] sm:$0xff] %v5026_v9 }
 0x34e   :  { %3320 = vmatpush.xpose.msk.msrb.mxu2 %vm60_vm0, %v1625_v46  ;;  %3397 = vrot.lane.b32.xlu1 %v3396_v38, %s3837_s21  ;;  %5787 = vst [vmem:[#allocation10_spill] sm:$0xff] %v4992_v39  ;;  %v5034_v53 = vpop.eup %3755 }
 0x34f   :  { %1907 = vmatmul.f32.gmra.mxu1 %v4970_v18  ;;  %5792 = vst [vmem:[#allocation15_spill] sm:$0xff] %v5034_v53 }
 0x350   :  { %v1623_v57 = vpop.permute.xlu0 %1622  ;;  %v1742_v3 = vpop.permute.xlu1 %1741 }
 0x351   :  { %v4979_v50 = vpop.permute.xlu2 %800  ;;  %3333 = vmatpush.xpose.msk.msra.mxu0 %vm60_vm0, %v4883_v47  ;;  %v5002_v47 = vmul.f32 %v4960_v40, %v4477_v5 }
 0x352   :  { %3321 = vmatpush.xpose.msk.msrb.mxu2 %vm60_vm0, %v1623_v57  ;;  %v4986_v2 = vmul.f32 %v4979_v50, %v4354_v4  ;;  %v4998_v27 = vmul.f32 %v4979_v50, %v4381_v41  ;;  %v5009_v62 = vmul.f32 %v4979_v50, %v4578_v59  ;;  %v5022_v48 = vmul.f32 %v4979_v50, %v4612_v36 }
 0x353   :  { %v825_v46 = vmul.f32 %v4979_v50, %v4205_v33  ;;  %v5066_v1 = vmul.f32 %v4979_v50, %v4510_v45  ;;  %v5076_v38 = vmul.f32 %v4979_v50, %v4528_v55 }
 0x354   :  { %3308 = vmatmul.msk.f32.gmra.mxu3 %vm60_vm0, %v4528_v55  ;;  %5788 = vst [vmem:[#allocation11_spill] sm:$0xff] %v5009_v62 }
 0x355   :  { %3334 = vmatpush.xpose.msk.msra.mxu0 %vm60_vm0, %v1742_v3  ;;  %5790 = vst [vmem:[#allocation13_spill] sm:$0xff] %v5022_v48 }
 0x356   :  { %3322 = vmatpush.xpose.msk.msrb.mxu2 %vm60_vm0, %v4903_v14 }
 0x357   :  { %1910 = vmatmul.f32.gmra.mxu1 %v4992_v39 }
 0x358   :  { %v1740_v16 = vpop.permute.xlu0 %1739  ;;  %v1619_v52 = vpop.permute.xlu1 %1618 }
 0x359   :  { %3335 = vmatpush.xpose.msk.msra.mxu0 %vm60_vm0, %v1740_v16 }
 0x35a   :  { %3323 = vmatpush.xpose.msk.msrb.mxu2 %vm60_vm0, %v1619_v52 }
 0x35d   :  { %3336 = vmatpush.xpose.msk.msra.mxu0 %vm60_vm0, %v4922_v30 }
 0x35f   :  { %1913 = vmatmul.f32.gmra.mxu1 %v5034_v53  ;;  %v841_v53 = vmul.f32 %v4979_v50, %v4258_v63 }
 0x360   :  { %v1617_v25 = vpop.permute.xlu0 %1616  ;;  %v1736_v32 = vpop.permute.xlu1 %1735 }
 0x361   :  { %3324 = vmatpush.xpose.msk.msrb.mxu2 %vm60_vm0, %v1617_v25  ;;  %3337 = vmatpush.xpose.msk.msra.mxu0 %vm60_vm0, %v1736_v32 }
 0x364   :  { %3325 = vmatmul.msk.f32.vlgmr.msrb.gmra.mxu2 %vm60_vm0, %v4578_v59  ;;  %v1376_v20 = vpop.f32.mrf.mxu0 }
 0x365   :  { %v1824_v11 = vmul.f32 0.5, %v1376_v20  ;;  %3338 = vmatpush.xpose.msk.msra.mxu0 %vm60_vm0, %v4936_v24 }
 0x367   :  { %v1846_v35 = vmul.f32 1.442695, %v1824_v11 }
 0x368   :  { %v1732_v31 = vpop.permute.xlu0 %1731  ;;  %v1730_v49 = vpop.permute.xlu1 %1729 }
 0x369   :  { %3757 = vpow2.f32 %v1846_v35  ;;  %3339 = vmatpush.xpose.msk.msra.mxu0 %vm60_vm0, %v1732_v31 }
 0x36c   :  { %3326 = vmatmul.msk.f32.gmra.mxu2 %vm60_vm0, %v4612_v36  ;;  %v1379_v30 = vpop.f32.mrf.mxu0 }
 0x36d   :  { %v1825_v44 = vmul.f32 0.5, %v1379_v30  ;;  %3340 = vmatpush.xpose.msk.msra.mxu0 %vm60_vm0, %v1730_v49 }
 0x36f   :  { %v5049_v58 = vpop.eup %3757  ;;  %v1848_v60 = vmul.f32 1.442695, %v1825_v44 }
 0x370   :  { %5793 = vst [vmem:[#allocation16_spill] sm:$0xff] %v5049_v58  ;;  %v1726_v56 = vpop.permute.xlu0 %1725  ;;  %1916 = vmatmul.f32.gmra.mxu1 %v5049_v58  ;;  %v5052_v24 = vpop.permute.xlu1 %808 }
 0x371   :  { %3759 = vpow2.f32 %v1848_v60  ;;  %3341 = vmatpush.xpose.msk.msra.mxu0 %vm60_vm0, %v4949_v61  ;;  %v832_v54 = vmul.f32 %v5052_v24, %v4189_v22  ;;  %v833_v7 = vmul.f32 %v5052_v24, %v4205_v33  ;;  %v849_v34 = vmul.f32 %v5052_v24, %v4258_v63 }
 0x372   :  { %v5072_v61 = vmul.f32 %v5052_v24, %v4578_v59  ;;  %v5080_v6 = vmul.f32 %v5052_v24, %v4612_v36  ;;  %v5111_v30 = vmul.f32 %v5052_v24, %v4477_v5  ;;  %v848_v44 = vmul.f32 %v5052_v24, %v4237_v51 }
 0x373   :  { %v3391_v43 = vpack.i.bf16 %v832_v54, %v833_v7  ;;  %v3411_v17 = vpack.i.bf16 %v849_v34, %v825_v46  ;;  %v847_v54 = vmul.f32 %v4960_v40, %v4258_v63  ;;  %v846_v34 = vmul.f32 %v4960_v40, %v4237_v51 }
 0x374   :  { %v5183_v16 = vmul.f32 %v5052_v24, %v4528_v55  ;;  %v865_v10 = vmul.f32 %v5052_v24, %v4309_v37 }
 0x375   :  { %3392 = vrot.lane.b32.xlu0 %v3391_v43, %s3837_s21  ;;  %3342 = vmatpush.xpose.msk.msra.mxu0 %vm60_vm0, %v1726_v56  ;;  %v824_v43 = vmul.f32 %v4979_v50, %v4189_v22 }
 0x376   :  { %3412 = vrot.lane.b32.xlu1 %v3411_v17, %s3837_s21 }
 0x377   :  { %v5082_v57 = vpop.eup %3759 }
 0x378   :  { %5794 = vst [vmem:[#allocation17_spill] sm:$0xff] %v5082_v57  ;;  %v5085_v3 = vpop.permute.xlu0 %804  ;;  %1919 = vmatmul.f32.gmra.mxu1 %v5082_v57  ;;  %v5092_v52 = vpop.permute.xlu1 %802  ;;  %3343 = vmatmul.msk.f32.vlgmr.msra.gmra.mxu0 %vm60_vm0, %v4632_v42 }
 0x379   :  { %v828_v25 = vmul.f32 %v5085_v3, %v4189_v22  ;;  %v829_v32 = vmul.f32 %v5085_v3, %v4205_v33  ;;  %v826_v20 = vmul.f32 %v5092_v52, %v4189_v22  ;;  %v827_v11 = vmul.f32 %v5092_v52, %v4205_v33 }
 0x37a   :  { %v5107_v49 = vmul.f32 %v5092_v52, %v4381_v41  ;;  %v845_v14 = vmul.f32 %v5085_v3, %v4258_v63  ;;  %v844_v29 = vmul.f32 %v5085_v3, %v4237_v51  ;;  %v5197_v18 = vmul.f32 %v5085_v3, %v4612_v36 }
 0x37b   :  { %v3401_v35 = vpack.i.bf16 %v828_v25, %v829_v32  ;;  %v3406_v31 = vpack.i.bf16 %v826_v20, %v827_v11  ;;  %v3416_v20 = vpack.i.bf16 %v848_v44, %v824_v43  ;;  %v5134_v11 = vpop.permute.xlu2 %794  ;;  %v5244_v60 = vmul.f32 %v5092_v52, %v4632_v42 }
 0x37c   :  { %v818_v58 = vmul.f32 %v5134_v11, %v4189_v22 }
 0x37d   :  { %3402 = vrot.lane.b32.xlu2 %v3401_v35, %s3837_s21  ;;  %3407 = vrot.lane.b32.xlu0 %v3406_v31, %s3837_s21  ;;  %v843_v35 = vmul.f32 %v5092_v52, %v4258_v63 }
 0x380   :  { %v5118_v56 = vpop.permute.xlu0 %798  ;;  %3344 = vmatmul.msk.f32.gmra.mxu0 %vm60_vm0, %v4654_v0  ;;  %v5132_v17 = vpop.permute.xlu1 %796 }
 0x381   :  { %v823_v7 = vmul.f32 %v5118_v56, %v4205_v33  ;;  %v822_v46 = vmul.f32 %v5118_v56, %v4189_v22  ;;  %v5143_v31 = vmul.f32 %v5132_v17, %v4381_v41  ;;  %v5151_v44 = vmul.f32 %v5132_v17, %v4354_v4 }
 0x382   :  { %v820_v43 = vmul.f32 %v5132_v17, %v4189_v22  ;;  %v5175_v15 = vmul.f32 %v5132_v17, %v4426_v26  ;;  %v5201_v57 = vmul.f32 %v5132_v17, %v4510_v45  ;;  %v837_v62 = vmul.f32 %v5132_v17, %v4258_v63 }
 0x383   :  { %v3421_v25 = vpack.i.bf16 %v847_v54, %v823_v7  ;;  %v3426_v32 = vpack.i.bf16 %v846_v34, %v822_v46  ;;  %v5147_v54 = vmul.f32 %v5092_v52, %v4477_v5  ;;  %v5155_v7 = vmul.f32 %v5092_v52, %v4426_v26 }
 0x384   :  { %v821_v46 = vmul.f32 %v5132_v17, %v4205_v33  ;;  %v819_v34 = vmul.f32 %v5134_v11, %v4205_v33  ;;  %v5179_v33 = vmul.f32 %v5132_v17, %v4477_v5  ;;  %v3436_v28 = vpack.i.bf16 %v844_v29, %v820_v43 }
 0x385   :  { %3427 = vrot.lane.b32.xlu1 %v3426_v32, %s3837_s21  ;;  %3417 = vrot.lane.b32.xlu2 %v3416_v20, %s3837_s21  ;;  %v5169_v20 = vmul.f32 %v5052_v24, %v4510_v45  ;;  %v5189_v32 = vmul.f32 %v5132_v17, %v4528_v55  ;;  %v5217_v29 = vmul.f32 %v5052_v24, %v4632_v42 }
 0x386   :  { %3422 = vrot.lane.b32.xlu0 %v3421_v25, %s3837_s21  ;;  %v3441_v25 = vpack.i.bf16 %v843_v35, %v819_v34  ;;  %v3431_v19 = vpack.i.bf16 %v845_v14, %v821_v46  ;;  %v5205_v35 = vmul.f32 %v5085_v3, %v4578_v59  ;;  %v5213_v46 = vmul.f32 %v5092_v52, %v4612_v36 }
 0x387   :  { %v842_v43 = vmul.f32 %v5092_v52, %v4237_v51  ;;  %v5230_v14 = vmul.f32 %v5132_v17, %v4612_v36  ;;  %v5240_v34 = vmul.f32 %v5132_v17, %v4578_v59  ;;  %v3451_v42 = vpack.i.bf16 %v865_v10, %v841_v53 }
 0x388   :  { %v839_v39 = vmul.f32 %v5118_v56, %v4258_v63  ;;  %v861_v10 = vmul.f32 %v5085_v3, %v4309_v37  ;;  %v836_v23 = vmul.f32 %v5132_v17, %v4237_v51 }
 0x389   :  { %v3446_v9 = vpack.i.bf16 %v842_v43, %v818_v58 }
 0x38d   :  { %3432 = vrot.lane.b32.xlu2 %v3431_v19, %s3837_s21  ;;  %3442 = vrot.lane.b32.xlu1 %v3441_v25, %s3837_s21  ;;  %v864_v19 = vmul.f32 %v5052_v24, %v4279_v13  ;;  %v840_v25 = vmul.f32 %v4979_v50, %v4237_v51 }
 0x38e   :  { %3437 = vrot.lane.b32.xlu0 %v3436_v28, %s3837_s21  ;;  %v5236_v28 = vmul.f32 %v5092_v52, %v4654_v0 }
 0x38f   :  { %v3456_v12 = vpack.i.bf16 %v864_v19, %v840_v25  ;;  %v838_v19 = vmul.f32 %v5118_v56, %v4237_v51 }
 0x394   :  { %v1485_v48 = vpop.f32.mrf.mxu1 }
 0x395   :  { %v1826_v8 = vmul.f32 0.5, %v1485_v48  ;;  %3457 = vrot.lane.b32.xlu1 %v3456_v12, %s3837_s21  ;;  %3447 = vrot.lane.b32.xlu2 %v3446_v9, %s3837_s21  ;;  %v863_v12 = vmul.f32 %v4960_v40, %v4309_v37 }
 0x396   :  { %3452 = vrot.lane.b32.xlu0 %v3451_v42, %s3837_s21  ;;  %v862_v42 = vmul.f32 %v4960_v40, %v4279_v13 }
 0x397   :  { %v1850_v22 = vmul.f32 1.442695, %v1826_v8  ;;  %v3471_v8 = vpack.i.bf16 %v861_v10, %v837_v62  ;;  %v3461_v48 = vpack.i.bf16 %v863_v12, %v839_v39  ;;  %v859_v39 = vmul.f32 %v5092_v52, %v4309_v37 }
 0x398   :  { %v3466_v53 = vpack.i.bf16 %v862_v42, %v838_v19  ;;  %v834_v62 = vmul.f32 %v5134_v11, %v4237_v51  ;;  %v860_v19 = vmul.f32 %v5085_v3, %v4279_v13  ;;  %v835_v10 = vmul.f32 %v5134_v11, %v4258_v63 }
 0x399   :  { %3761 = vpow2.f32 %v1850_v22  ;;  %v858_v22 = vmul.f32 %v5092_v52, %v4279_v13  ;;  %v853_v51 = vmul.f32 %v5132_v17, %v4309_v37  ;;  %v857_v63 = vmul.f32 %v4979_v50, %v4309_v37 }
 0x39a   :  { %v3476_v42 = vpack.i.bf16 %v860_v19, %v836_v23  ;;  %v2171_v23 = vld [vmem:[%s5766_s9] sm:$0xff]  ;;  %v850_v19 = vmul.f32 %v5134_v11, %v4279_v13 }
 0x39b   :  { %v3486_v12 = vpack.i.bf16 %v858_v22, %v834_v62  ;;  %2236 = vmatpush.msrb.mxu3 %v2171_v23 }
 0x39c   :  { %v1488_v9 = vpop.f32.mrf.mxu1 }
 0x39d   :  { %v1827_v58 = vmul.f32 0.5, %v1488_v9  ;;  %3472 = vrot.lane.b32.xlu1 %v3471_v8, %s3837_s21  ;;  %3462 = vrot.lane.b32.xlu2 %v3461_v48, %s3837_s21  ;;  %v3481_v8 = vpack.i.bf16 %v859_v39, %v835_v10  ;;  %v856_v9 = vmul.f32 %v4979_v50, %v4279_v13  ;;  %v852_v10 = vmul.f32 %v5132_v17, %v4279_v13 }
 0x39e   :  { %3467 = vrot.lane.b32.xlu0 %v3466_v53, %s3837_s21  ;;  %v854_v53 = vmul.f32 %v5118_v56, %v4279_v13  ;;  %v874_v13 = vmul.f32 %v5092_v52, %v4354_v4 }
 0x39f   :  { %v5274_v43 = vpop.eup %3761  ;;  %v1852_v25 = vmul.f32 1.442695, %v1827_v58  ;;  %v855_v58 = vmul.f32 %v5118_v56, %v4309_v37  ;;  %v3491_v39 = vpack.i.bf16 %v856_v9, %v857_v63  ;;  %v879_v9 = vmul.f32 %v4960_v40, %v4381_v41 }
 0x3a0   :  { %1922 = vmatmul.f32.gmra.mxu1 %v5274_v43 }
 0x3a1   :  { %3763 = vpow2.f32 %v1852_v25  ;;  %v881_v25 = vmul.f32 %v5052_v24, %v4381_v41  ;;  %v3496_v62 = vpack.i.bf16 %v854_v53, %v855_v58  ;;  %v877_v58 = vmul.f32 %v5085_v3, %v4381_v41 }
 0x3a3   :  { %v3501_v22 = vpack.i.bf16 %v853_v51, %v881_v25 }
 0x3a5   :  { %3487 = vrot.lane.b32.xlu1 %v3486_v12, %s3837_s21  ;;  %3477 = vrot.lane.b32.xlu2 %v3476_v42, %s3837_s21  ;;  %v851_v12 = vmul.f32 %v5134_v11, %v4309_v37  ;;  %v878_v42 = vmul.f32 %v4960_v40, %v4354_v4  ;;  %v876_v37 = vmul.f32 %v5085_v3, %v4354_v4 }
 0x3a6   :  { %3482 = vrot.lane.b32.xlu0 %v3481_v8, %s3837_s21  ;;  %v880_v8 = vmul.f32 %v5052_v24, %v4354_v4 }
 0x3a7   :  { %v5292_v48 = vpop.eup %3763  ;;  %v3516_v63 = vpack.i.bf16 %v850_v19, %v878_v42  ;;  %v3511_v53 = vpack.i.bf16 %v851_v12, %v879_v9  ;;  %v5795_v9 = vpack.i.bf16 %v5107_v49, %v5111_v30 }
 0x3a8   :  { %1925 = vmatmul.f32.gmra.mxu1 %v5292_v48  ;;  %v3506_v23 = vpack.i.bf16 %v852_v10, %v880_v8  ;;  %v3521_v10 = vpack.i.bf16 %v876_v37, %v877_v58  ;;  %v893_v58 = vmul.f32 %v5085_v3, %v4477_v5 }
 0x3ad   :  { %3502 = vrot.lane.b32.xlu1 %v3501_v22, %s3837_s21  ;;  %3492 = vrot.lane.b32.xlu2 %v3491_v39, %s3837_s21  ;;  %v896_v22 = vmul.f32 %v5052_v24, %v4426_v26 }
 0x3ae   :  { %3497 = vrot.lane.b32.xlu0 %v3496_v62, %s3837_s21 }
 0x3af   :  { %v3531_v19 = vpack.i.bf16 %v874_v13, %v896_v22 }
 0x3b4   :  { %v1899_v51 = vpop.f32.mrf.mxu1 }
 0x3b5   :  { %3765 = vrcp.f32 %v1899_v51  ;;  %3517 = vrot.lane.b32.xlu1 %v3516_v63, %s3837_s21  ;;  %3507 = vrot.lane.b32.xlu2 %v3506_v23, %s3837_s21  ;;  %v1958_v42 = vand.u32 2147483648, %v1899_v51  ;;  %v1956_v63 = vand.u32 2147483647, %v1899_v51  ;;  %v871_v23 = vmul.f32 %v5118_v56, %v4381_v41 }
 0x3b6   :  { %3512 = vrot.lane.b32.xlu0 %v3511_v53, %s3837_s21  ;;  %vm1952_vm9 = vweird.f32 %v1899_v51 }
 0x3b7   :  { %v1959_v37 = vor.u32 1.1754944e-38, %v1958_v42  ;;  %vm1957_vm12 = vcmp.eq.f32.partialorder %v1956_v63, 8.507059e+37  ;;  %v3546_v30 = vpack.i.bf16 %v871_v23, %v893_v58  ;;  %v5797_v42 = vpack.i.bf16 %v4986_v2, %v4990_v21 }
 0x3bb   :  { %v3766_v25 = vpop.eup %3765 }
 0x3bc   :  { %v1948_v39 = vmul.f32 %v3766_v25, %v1899_v51  ;;  %v1902_v62 = vpop.f32.mrf.mxu1  ;;  %vm1953_vm4 = vweird.f32 %v3766_v25  ;;  %v5796_v51 = vpack.i.bf16 %v4998_v27, %v5002_v47  ;;  %v892_v27 = vmul.f32 %v5085_v3, %v4426_v26 }
 0x3bd   :  { %3767 = vrcp.f32 %v1902_v62  ;;  %3532 = vrot.lane.b32.xlu1 %v3531_v19, %s3837_s21  ;;  %3522 = vrot.lane.b32.xlu2 %v3521_v10, %s3837_s21  ;;  %vm1954_vm10 = vmor %vm1952_vm9, %vm1953_vm4  ;;  %vm1966_vm14 = vweird.f32 %v1902_v62 }
 0x3be   :  { %v1949_v12 = vsub.f32 1.0, %v1948_v39  ;;  %3527 = vrot.lane.b32.xlu0 %v5795_v9, %s3837_s21  ;;  %v870_v9 = vmul.f32 %v5118_v56, %v4354_v4 }
 0x3c0   :  { %v1950_v8 = vmul.f32 %v3766_v25, %v1949_v12  ;;  %v1972_v12 = vand.u32 2147483648, %v1902_v62  ;;  %v3551_v21 = vpack.i.bf16 %v870_v9, %v892_v27  ;;  %v889_v9 = vmul.f32 %v4979_v50, %v4477_v5 }
 0x3c2   :  { %v1951_v53 = vadd.f32 %v3766_v25, %v1950_v8  ;;  %v1970_v8 = vand.u32 2147483647, %v1902_v62 }
 0x3c3   :  { %v3768_v13 = vpop.eup %3767 }
 0x3c4   :  { %v1962_v22 = vmul.f32 %v3768_v13, %v1902_v62  ;;  %v1905_v39 = vpop.f32.mrf.mxu1  ;;  %v1955_v19 = vsel %vm1954_vm10, %v3766_v25, %v1951_v53  ;;  %vm1967_vm13 = vweird.f32 %v3768_v13  ;;  %v1973_v53 = vor.u32 1.1754944e-38, %v1972_v12 }
 0x3c5   :  { %3769 = vrcp.f32 %v1905_v39  ;;  %v1960_v49 = vsel %vm1957_vm12, %v1959_v37, %v1955_v19  ;;  %3547 = vrot.lane.b32.xlu1 %v3546_v30, %s3837_s21  ;;  %3537 = vrot.lane.b32.xlu2 %v5796_v51, %s3837_s21  ;;  %vm1968_vm15 = vmor %vm1966_vm14, %vm1967_vm13  ;;  %vm1971_vm1 = vcmp.eq.f32.partialorder %v1970_v8, 8.507059e+37  ;;  %v5798_v62 = vpack.i.bf16 %v5151_v44, %v5155_v7 }
 0x3c6   :  { %v1963_v10 = vsub.f32 1.0, %v1962_v22  ;;  %3345 = vmatmul.msk.f32.vlgmr.msrb.gmra.mxu3 %vm2172_vm11, %v1960_v49  ;;  %3542 = vrot.lane.b32.xlu0 %v5797_v42, %s3837_s21  ;;  %v1986_v19 = vand.u32 2147483648, %v1905_v39  ;;  %v1984_v30 = vand.u32 2147483647, %v1905_v39  ;;  %v886_v51 = vmul.f32 %v5118_v56, %v4426_v26 }
 0x3c7   :  { %v887_v12 = vmul.f32 %v5118_v56, %v4477_v5  ;;  %v867_v44 = vmul.f32 %v5134_v11, %v4381_v41  ;;  %vm1980_vm3 = vweird.f32 %v1905_v39  ;;  %v888_v8 = vmul.f32 %v4979_v50, %v4426_v26 }
 0x3c8   :  { %v1964_v25 = vmul.f32 %v3768_v13, %v1963_v10  ;;  %vm1985_vm6 = vcmp.eq.f32.partialorder %v1984_v30, 8.507059e+37 }
 0x3ca   :  { %v1965_v63 = vadd.f32 %v3768_v13, %v1964_v25  ;;  %v1987_v25 = vor.u32 1.1754944e-38, %v1986_v19 }
 0x3cb   :  { %v3770_v23 = vpop.eup %3769 }
 0x3cc   :  { %v1976_v47 = vmul.f32 %v3770_v23, %v1905_v39  ;;  %v5360_v37 = vpop.f32.mrf.mxu1  ;;  %v1969_v58 = vsel %vm1968_vm15, %v3768_v13, %v1965_v63  ;;  %v5799_v13 = vpack.i.bf16 %v5143_v31, %v5147_v54  ;;  %vm1981_vm2 = vweird.f32 %v3770_v23 }
 0x3cd   :  { %3771 = vrcp.f32 %v5360_v37  ;;  %v1974_v2 = vsel %vm1971_vm1, %v1973_v53, %v1969_v58  ;;  %3562 = vrot.lane.b32.xlu1 %v5798_v62, %s3837_s21  ;;  %3552 = vrot.lane.b32.xlu2 %v3551_v21, %s3837_s21  ;;  %v866_v31 = vmul.f32 %v5134_v11, %v4354_v4  ;;  %vm1982_vm5 = vmor %vm1980_vm3, %vm1981_vm2  ;;  %v3576_v4 = vpack.i.bf16 %v886_v51, %v887_v12 }
 0x3ce   :  { %v1977_v22 = vsub.f32 1.0, %v1976_v47  ;;  %3346 = vmatmul.msk.f32.gmra.mxu3 %vm2172_vm11, %v1974_v2  ;;  %3557 = vrot.lane.b32.xlu0 %v5799_v13, %s3837_s21  ;;  %v3566_v47 = vpack.i.bf16 %v867_v44, %v889_v9  ;;  %v2000_v21 = vand.u32 2147483648, %v5360_v37  ;;  %v883_v13 = vmul.f32 %v5134_v11, %v4477_v5 }
 0x3cf   :  { %v1594_v10 = vpop.f32.mrf.mxu3  ;;  %v3571_v2 = vpack.i.bf16 %v866_v31, %v888_v8  ;;  %vm1994_vm8 = vweird.f32 %v5360_v37  ;;  %v911_v12 = vmul.f32 %v4960_v40, %v4528_v55  ;;  %v5800_v9 = vpack.i.bf16 %v5179_v33, %v5183_v16 }
 0x3d0   :  { %v1978_v49 = vmul.f32 %v3770_v23, %v1977_v22  ;;  %v1828_v7 = vmul.f32 0.5, %v1594_v10  ;;  %v1998_v22 = vand.u32 2147483647, %v5360_v37  ;;  %v2001_v51 = vor.u32 1.1754944e-38, %v2000_v21 }
 0x3d1   :  { %v907_v16 = vmul.f32 %v5092_v52, %v4528_v55  ;;  %v882_v33 = vmul.f32 %v5134_v11, %v4426_v26 }
 0x3d2   :  { %v1979_v42 = vadd.f32 %v3770_v23, %v1978_v49  ;;  %v1854_v53 = vmul.f32 1.442695, %v1828_v7  ;;  %vm1999_vm9 = vcmp.eq.f32.partialorder %v1998_v22, 8.507059e+37 }
 0x3d3   :  { %v3772_v54 = vpop.eup %3771 }
 0x3d4   :  { %v1990_v63 = vmul.f32 %v3772_v54, %v5360_v37  ;;  %v5386_v27 = vpop.f32.mrf.mxu1  ;;  %v1983_v41 = vsel %vm1982_vm5, %v3770_v23, %v1979_v42  ;;  %vm1995_vm7 = vweird.f32 %v3772_v54  ;;  %v3591_v37 = vpack.i.bf16 %v883_v13, %v911_v12 }
 0x3d5   :  { %3773 = vrcp.f32 %v5386_v27  ;;  %v1988_v39 = vsel %vm1985_vm6, %v1987_v25, %v1983_v41  ;;  %3577 = vrot.lane.b32.xlu1 %v3576_v4, %s3837_s21  ;;  %3567 = vrot.lane.b32.xlu2 %v3566_v47, %s3837_s21  ;;  %vm1996_vm4 = vmor %vm1994_vm8, %vm1995_vm7  ;;  %v2012_v41 = vand.u32 2147483647, %v5386_v27  ;;  %v906_v4 = vmul.f32 %v5092_v52, %v4510_v45 }
 0x3d6   :  { %v1991_v58 = vsub.f32 1.0, %v1990_v63  ;;  %3775 = vpow2.f32 %v1854_v53  ;;  %3347 = vmatmul.msk.f32.gmra.mxu3 %vm2172_vm11, %v1988_v39  ;;  %3572 = vrot.lane.b32.xlu0 %v3571_v2, %s3837_s21  ;;  %v5801_v63 = vpack.i.bf16 %v5175_v15, %v5169_v20  ;;  %vm2008_vm12 = vweird.f32 %v5386_v27  ;;  %v5434_v2 = vpop.permute.xlu1 %3397 }
 0x3d7   :  { %v1597_v62 = vpop.f32.mrf.mxu3  ;;  %v5395_v19 = vpop.permute.xlu2 %3402  ;;  %v908_v15 = vmul.f32 %v5085_v3, %v4510_v45  ;;  %v909_v20 = vmul.f32 %v5085_v3, %v4528_v55  ;;  %vm2013_vm14 = vcmp.eq.f32.partialorder %v2012_v41, 8.507059e+37  ;;  %v3606_v13 = vpack.i.bf16 %v906_v4, %v907_v16 }
 0x3d8   :  { %v1992_v23 = vmul.f32 %v3772_v54, %v1991_v58  ;;  %v1829_v49 = vmul.f32 0.5, %v1597_v62 }
 0x3da   :  { %v1993_v30 = vadd.f32 %v3772_v54, %v1992_v23  ;;  %v1856_v42 = vmul.f32 1.442695, %v1829_v49  ;;  %v910_v23 = vmul.f32 %v4960_v40, %v4510_v45 }
 0x3db   :  { %v3774_v10 = vpop.eup %3773 }
 0x3dc   :  { %v5402_v44 = vpop.eup %3775  ;;  %v2004_v7 = vmul.f32 %v3774_v10, %v5386_v27  ;;  %v5405_v31 = vpop.f32.mrf.mxu1  ;;  %v1997_v25 = vsel %vm1996_vm4, %v3772_v54, %v1993_v30  ;;  %v2014_v54 = vand.u32 2147483648, %v5386_v27  ;;  %vm2009_vm10 = vweird.f32 %v3774_v10 }
 0x3dd   :  { %3777 = vrcp.f32 %v5405_v31  ;;  %1928 = vmatmul.f32.gmra.mxu1 %v5402_v44  ;;  %v2002_v5 = vsel %vm1999_vm9, %v2001_v51, %v1997_v25  ;;  %3592 = vrot.lane.b32.xlu1 %v3591_v37, %s3837_s21  ;;  %vm2010_vm13 = vmor %vm2008_vm12, %vm2009_vm10  ;;  %v3596_v49 = vpack.i.bf16 %v882_v33, %v910_v23  ;;  %v3601_v51 = vpack.i.bf16 %v908_v15, %v909_v20 }
 0x3de   :  { %v2005_v8 = vsub.f32 1.0, %v2004_v7  ;;  %3779 = vpow2.f32 %v1856_v42  ;;  %3348 = vmatmul.msk.f32.gmra.mxu3 %vm2172_vm11, %v2002_v5  ;;  %3582 = vrot.lane.b32.xlu2 %v5800_v9, %s3837_s21  ;;  %v2015_v21 = vor.u32 1.1754944e-38, %v2014_v54  ;;  %v2028_v12 = vand.u32 2147483648, %v5405_v31 }
 0x3df   :  { %3587 = vrot.lane.b32.xlu0 %v5801_v63, %s3837_s21  ;;  %v5421_v39 = vpop.permute.xlu2 %3417  ;;  %vm2022_vm1 = vweird.f32 %v5405_v31  ;;  %v927_v15 = vmul.f32 %v4960_v40, %v4612_v36  ;;  %v3399_v23 = vunpack.i.l.bf16 %v5434_v2 }
 0x3e0   :  { %v2006_v53 = vmul.f32 %v3774_v10, %v2005_v8  ;;  %v2029_v63 = vor.u32 1.1754944e-38, %v2028_v12 }
 0x3e2   :  { %v2007_v47 = vadd.f32 %v3774_v10, %v2006_v53  ;;  %v903_v53 = vmul.f32 %v5118_v56, %v4528_v55 }
 0x3e3   :  { %v3778_v58 = vpop.eup %3777 }
 0x3e4   :  { %v5438_v22 = vpop.eup %3779  ;;  %v2018_v26 = vmul.f32 %v3778_v58, %v5405_v31  ;;  %v2011_v62 = vsel %vm2010_vm13, %v3774_v10, %v2007_v47  ;;  %vm2023_vm15 = vweird.f32 %v3778_v58  ;;  %v2026_v10 = vand.u32 2147483647, %v5405_v31 }
 0x3e5   :  { %1931 = vmatmul.f32.gmra.mxu1 %v5438_v22  ;;  %v2016_v27 = vsel %vm2013_vm14, %v2015_v21, %v2011_v62  ;;  %3607 = vrot.lane.b32.xlu1 %v3606_v13, %s3837_s21  ;;  %vm2024_vm2 = vmor %vm2022_vm1, %vm2023_vm15  ;;  %v3420_v31 = vunpack.i.h.bf16 %v5421_v39  ;;  %v3621_v20 = vpack.i.bf16 %v927_v15, %v903_v53  ;;  %v3400_v13 = vunpack.i.h.bf16 %v5434_v2 }
 0x3e6   :  { %v2019_v30 = vsub.f32 1.0, %v2018_v26  ;;  %3349 = vmatmul.msk.f32.gmra.mxu3 %vm2172_vm11, %v2016_v27  ;;  %3597 = vrot.lane.b32.xlu2 %v3596_v49, %s3837_s21  ;;  %vm2027_vm3 = vcmp.eq.f32.partialorder %v2026_v10, 8.507059e+37  ;;  %v5803_v26 = vpack.i.bf16 %v5080_v6, %v5076_v38  ;;  %v926_v38 = vmul.f32 %v4960_v40, %v4578_v59 }
 0x3e7   :  { %3602 = vrot.lane.b32.xlu0 %v3601_v51, %s3837_s21  ;;  %v1703_v42 = vpop.f32.mrf.mxu2  ;;  %v5448_v25 = vpop.permute.xlu2 %3432  ;;  %v3404_v51 = vunpack.i.l.bf16 %v5395_v19  ;;  %v3405_v2 = vunpack.i.h.bf16 %v5395_v19  ;;  %v5805_v19 = vpack.i.bf16 %v5205_v35, %v5201_v57 }
 0x3e8   :  { %v2020_v7 = vmul.f32 %v3778_v58, %v2019_v30  ;;  %v1830_v5 = vmul.f32 0.5, %v1703_v42  ;;  %v3393_v37 = vpop.permute.xlu0 %3392  ;;  %v5451_v54 = vpop.permute.xlu1 %3412 }
 0x3e9   :  { %v3394_v9 = vunpack.i.l.bf16 %v3393_v37  ;;  %v3415_v4 = vunpack.i.h.bf16 %v5451_v54  ;;  %v3395_v33 = vunpack.i.h.bf16 %v3393_v37 }
 0x3ea   :  { %v2021_v8 = vadd.f32 %v3778_v58, %v2020_v7  ;;  %v1858_v41 = vmul.f32 1.442695, %v1830_v5 }
 0x3eb   :  { %2366 = vmatpush.msra.mxu2 %v3394_v9  ;;  %2453 = vmatpush.msra.mxu3 %v3415_v4 }
 0x3ec   :  { %v2025_v16 = vsel %vm2024_vm2, %v3778_v58, %v2021_v8  ;;  %3781 = vpow2.f32 %v1858_v41  ;;  %v5802_v58 = vpack.i.bf16 %v5072_v61, %v5066_v1  ;;  %v902_v1 = vmul.f32 %v5118_v56, %v4510_v45 }
 0x3ed   :  { %v2030_v47 = vsel %vm2027_vm3, %v2029_v63, %v2025_v16  ;;  %2367 = vmatpush.msra.mxu2 %v3395_v33  ;;  %v5460_v21 = vpop.f32.mrf.mxu1  ;;  %2454 = vmatpush.msra.mxu3 %v3420_v31  ;;  %v5804_v8 = vpack.i.bf16 %v5197_v18, %v5189_v32  ;;  %v945_v41 = vmul.f32 %v5052_v24, %v4654_v0  ;;  %v3414_v31 = vunpack.i.l.bf16 %v5451_v54 }
 0x3ee   :  { %3350 = vmatmul.msk.f32.gmra.mxu3 %vm2172_vm11, %v2030_v47  ;;  %3783 = vrcp.f32 %v5460_v21  ;;  %3622 = vrot.lane.b32.xlu1 %v3621_v20, %s3837_s21  ;;  %v3626_v10 = vpack.i.bf16 %v926_v38, %v902_v1  ;;  %v922_v32 = vmul.f32 %v5092_v52, %v4578_v59  ;;  %v2040_v16 = vand.u32 2147483647, %v5460_v21 }
 0x3ef   :  { %3617 = vrot.lane.b32.xlu0 %v5802_v58, %s3837_s21  ;;  %3612 = vrot.lane.b32.xlu2 %v5803_v26, %s3837_s21  ;;  %v1706_v62 = vpop.f32.mrf.mxu2  ;;  %v5473_v27 = vpop.permute.xlu2 %3447  ;;  %v2042_v33 = vand.u32 2147483648, %v5460_v21  ;;  %v899_v24 = vmul.f32 %v5134_v11, %v4528_v55  ;;  %v898_v52 = vmul.f32 %v5134_v11, %v4510_v45  ;;  %vm2036_vm6 = vweird.f32 %v5460_v21 }
 0x3f0   :  { %2368 = vmatpush.msra.mxu2 %v3399_v23  ;;  %v1831_v49 = vmul.f32 0.5, %v1706_v62  ;;  %v3408_v30 = vpop.permute.xlu0 %3407  ;;  %v3419_v26 = vunpack.i.l.bf16 %v5421_v39  ;;  %vm2041_vm8 = vcmp.eq.f32.partialorder %v2040_v16, 8.507059e+37  ;;  %v3435_v45 = vunpack.i.h.bf16 %v5448_v25 }
 0x3f1   :  { %v3409_v5 = vunpack.i.l.bf16 %v3408_v30  ;;  %v3410_v4 = vunpack.i.h.bf16 %v3408_v30  ;;  %v3656_v54 = vpack.i.bf16 %v899_v24, %v945_v41  ;;  %v2043_v62 = vor.u32 1.1754944e-38, %v2042_v33  ;;  %v5811_v24 = vld [vmem:[#allocation14_spill] sm:$0xff] }
 0x3f2   :  { %v5478_v61 = vpop.eup %3781  ;;  %v1860_v12 = vmul.f32 1.442695, %v1831_v49  ;;  %2369 = vmatpush.msra.mxu2 %v3400_v13  ;;  %v3646_v13 = vpack.i.bf16 %v922_v32, %v898_v52  ;;  %v5806_v39 = vpack.i.bf16 %v5217_v29, %v5213_v46 }
 0x3f3   :  { %1934 = vmatmul.f32.gmra.mxu1 %v5478_v61 }
 0x3f4   :  { %v3784_v6 = vpop.eup %3783  ;;  %3785 = vpow2.f32 %v1860_v12  ;;  %2370 = vmatpush.msra.mxu2 %v3404_v51 }
 0x3f5   :  { %v2032_v7 = vmul.f32 %v3784_v6, %v5460_v21  ;;  %v5486_v42 = vpop.f32.mrf.mxu1  ;;  %v1812_v37 = vpop.f32.mrf.mxu0  ;;  %vm2037_vm5 = vweird.f32 %v3784_v6 }
 0x3f6   :  { %2371 = vmatpush.msra.mxu2 %v3405_v2  ;;  %3787 = vrcp.f32 %v5486_v42  ;;  %v1832_v9 = vmul.f32 0.5, %v1812_v37  ;;  %3637 = vrot.lane.b32.xlu1 %v5805_v19, %s3837_s21  ;;  %vm2038_vm7 = vmor %vm2036_vm6, %vm2037_vm5  ;;  %v2054_v46 = vand.u32 2147483647, %v5486_v42  ;;  %v2056_v29 = vand.u32 2147483648, %v5486_v42 }
 0x3f7   :  { %3632 = vrot.lane.b32.xlu0 %v5804_v8, %s3837_s21  ;;  %v2033_v40 = vsub.f32 1.0, %v2032_v7  ;;  %3627 = vrot.lane.b32.xlu2 %v3626_v10, %s3837_s21  ;;  %v3428_v63 = vpop.permute.xlu1 %3427  ;;  %v5498_v53 = vpop.permute.xlu2 %3462  ;;  %v919_v10 = vmul.f32 %v5118_v56, %v4612_v36  ;;  %vm2050_vm9 = vweird.f32 %v5486_v42 }
 0x3f8   :  { %2372 = vmatpush.msra.mxu2 %v3409_v5  ;;  %v3423_v18 = vpop.permute.xlu0 %3422  ;;  %v1862_v57 = vmul.f32 1.442695, %v1832_v9  ;;  %v3430_v20 = vunpack.i.h.bf16 %v3428_v63  ;;  %v3429_v2 = vunpack.i.l.bf16 %v3428_v63  ;;  %v3434_v9 = vunpack.i.l.bf16 %v5448_v25 }
 0x3f9   :  { %v3425_v35 = vunpack.i.h.bf16 %v3423_v18  ;;  %v2034_v47 = vmul.f32 %v3784_v6, %v2033_v40  ;;  %v3424_v30 = vunpack.i.l.bf16 %v3423_v18  ;;  %v941_v63 = vmul.f32 %v5085_v3, %v4654_v0 }
 0x3fa   :  { %v5506_v15 = vpop.eup %3785  ;;  %2373 = vmatpush.msra.mxu2 %v3410_v4  ;;  %3789 = vpow2.f32 %v1862_v57  ;;  %v2057_v18 = vor.u32 1.1754944e-38, %v2056_v29  ;;  %vm2055_vm12 = vcmp.eq.f32.partialorder %v2054_v46, 8.507059e+37  ;;  %v3450_v25 = vunpack.i.h.bf16 %v5473_v27  ;;  %v5807_v57 = vld [vmem:[#allocation11_spill] sm:$0xff] }
 0x3fb   :  { %2455 = vmatpush.msra.mxu3 %v3425_v35  ;;  %1937 = vmatmul.f32.gmra.mxu1 %v5506_v15  ;;  %v2035_v23 = vadd.f32 %v3784_v6, %v2034_v47  ;;  %v3671_v32 = vpack.i.bf16 %v919_v10, %v941_v63  ;;  %v5808_v35 = vld [vmem:[#allocation12_spill] sm:$0xff] }
 0x3fc   :  { %v3788_v58 = vpop.eup %3787  ;;  %2374 = vmatpush.msra.mxu2 %v3414_v31  ;;  %v5809_v47 = vpack.i.bf16 %v5807_v57, %v5808_v35 }
 0x3fd   :  { %v2046_v55 = vmul.f32 %v3788_v58, %v5486_v42  ;;  %2456 = vmatpush.msra.mxu3 %v3430_v20  ;;  %v2039_v49 = vsel %vm2038_vm7, %v3784_v6, %v2035_v23  ;;  %v1815_v21 = vpop.f32.mrf.mxu0  ;;  %vm2051_vm4 = vweird.f32 %v3788_v58  ;;  %v5810_v42 = vld [vmem:[#allocation13_spill] sm:$0xff] }
 0x3fe   :  { %2375 = vmatpush.msra.mxu2 %v3419_v26  ;;  %v2044_v1 = vsel %vm2041_vm8, %v2043_v62, %v2039_v49  ;;  %v1833_v12 = vmul.f32 0.5, %v1815_v21  ;;  %3647 = vrot.lane.b32.xlu1 %v3646_v13, %s3837_s21  ;;  %vm2052_vm10 = vmor %vm2050_vm9, %vm2051_vm4  ;;  %v5812_v20 = vpack.i.bf16 %v5810_v42, %v5811_v24 }
 0x3ff   :  { %3642 = vrot.lane.b32.xlu0 %v5806_v39, %s3837_s21  ;;  %v2047_v51 = vsub.f32 1.0, %v2046_v55  ;;  %3657 = vrot.lane.b32.xlu2 %v3656_v54, %s3837_s21  ;;  %v3443_v38 = vpop.permute.xlu1 %3442  ;;  %v5525_v6 = vpop.permute.xlu2 %3477  ;;  %v918_v55 = vmul.f32 %v5118_v56, %v4578_v59  ;;  %v3465_v39 = vunpack.i.h.bf16 %v5498_v53 }
 0x400   :  { %2376 = vmatpush.msra.mxu2 %v3424_v30  ;;  %2457 = vmatpush.msra.mxu3 %v3435_v45  ;;  %v3438_v7 = vpop.permute.xlu0 %3437  ;;  %v1864_v5 = vmul.f32 1.442695, %v1833_v12  ;;  %v5532_v40 = vpop.eup %3789  ;;  %v3445_v19 = vunpack.i.h.bf16 %v3443_v38  ;;  %v3444_v33 = vunpack.i.l.bf16 %v3443_v38  ;;  %v5813_v30 = vld [vmem:[#allocation5_spill] sm:$0xff]  ;;  %v5815_v12 = vpack.i.bf16 %v5240_v34, %v5244_v60 }
 0x401   :  { %v3440_v37 = vunpack.i.h.bf16 %v3438_v7  ;;  %3351 = vmatmul.msk.f32.gmra.mxu3 %vm2172_vm11, %v2044_v1  ;;  %v2048_v8 = vmul.f32 %v3788_v58, %v2047_v51  ;;  %v3439_v4 = vunpack.i.l.bf16 %v3438_v7  ;;  %v3464_v1 = vunpack.i.l.bf16 %v5498_v53 }
 0x402   :  { %2377 = vmatpush.msra.mxu2 %v3429_v2  ;;  %3791 = vpow2.f32 %v1864_v5  ;;  %v5814_v51 = vpack.i.bf16 %v5230_v14, %v5236_v28  ;;  %v914_v53 = vmul.f32 %v5134_v11, %v4578_v59  ;;  %v915_v14 = vmul.f32 %v5134_v11, %v4612_v36 }
 0x403   :  { %2458 = vmatpush.msra.mxu3 %v3440_v37  ;;  %1940 = vmatmul.f32.gmra.mxu1 %v5532_v40  ;;  %v2049_v41 = vadd.f32 %v3788_v58, %v2048_v8  ;;  %v934_v60 = vmul.f32 %v5118_v56, %v5813_v30  ;;  %v935_v34 = vmul.f32 %v5118_v56, %v4654_v0  ;;  %v3480_v8 = vunpack.i.h.bf16 %v5525_v6 }
 0x404   :  { %2378 = vmatpush.msra.mxu2 %v3434_v9  ;;  %v936_v10 = vmul.f32 %v4979_v50, %v5813_v30  ;;  %v937_v59 = vmul.f32 %v4979_v50, %v4654_v0  ;;  %v3479_v9 = vunpack.i.l.bf16 %v5525_v6  ;;  %v930_v63 = vmul.f32 %v5134_v11, %v5813_v30 }
 0x405   :  { %2459 = vmatpush.msra.mxu3 %v3445_v19  ;;  %v2053_v16 = vsel %vm2052_vm10, %v3788_v58, %v2049_v41  ;;  %v3449_v58 = vunpack.i.l.bf16 %v5473_v27  ;;  %v940_v27 = vmul.f32 %v5085_v3, %v5813_v30  ;;  %v3696_v36 = vpack.i.bf16 %v934_v60, %v935_v34 }
 0x406   :  { %2379 = vmatpush.msra.mxu2 %v3439_v4  ;;  %v2058_v31 = vsel %vm2055_vm12, %v2057_v18, %v2053_v16  ;;  %3672 = vrot.lane.b32.xlu1 %v3671_v32, %s3837_s21  ;;  %v3686_v5 = vpack.i.bf16 %v914_v53, %v936_v10  ;;  %v3691_v37 = vpack.i.bf16 %v915_v14, %v937_v59 }
 0x407   :  { %3652 = vrot.lane.b32.xlu0 %v5809_v47, %s3837_s21  ;;  %3662 = vrot.lane.b32.xlu2 %v5812_v20, %s3837_s21  ;;  %v3458_v52 = vpop.permute.xlu1 %3457  ;;  %v5549_v23 = vpop.permute.xlu2 %3492  ;;  %v3666_v21 = vpack.i.bf16 %v918_v55, %v940_v27  ;;  %v931_v41 = vmul.f32 %v5134_v11, %v4654_v0  ;;  %v932_v18 = vmul.f32 %v5132_v17, %v5813_v30 }
 0x408   :  { %2380 = vmatpush.msra.mxu2 %v3444_v33  ;;  %2460 = vmatpush.msra.mxu3 %v3450_v25  ;;  %v3453_v26 = vpop.permute.xlu0 %3452  ;;  %v5555_v13 = vpop.eup %3791  ;;  %v3460_v49 = vunpack.i.h.bf16 %v3458_v52  ;;  %v3459_v45 = vunpack.i.l.bf16 %v3458_v52  ;;  %v933_v32 = vmul.f32 %v5132_v17, %v4654_v0  ;;  %v3494_v57 = vunpack.i.l.bf16 %v5549_v23 }
 0x409   :  { %v3455_v54 = vunpack.i.h.bf16 %v3453_v26  ;;  %v3454_v62 = vunpack.i.l.bf16 %v3453_v26  ;;  %3352 = vmatmul.msk.f32.gmra.mxu3 %vm2172_vm11, %v2058_v31  ;;  %v3706_v33 = vpack.i.bf16 %v930_v63, %v931_v41  ;;  %v3495_v11 = vunpack.i.h.bf16 %v5549_v23 }
 0x40a   :  { %2381 = vmatpush.msra.mxu2 %v3449_v58  ;;  %v3701_v35 = vpack.i.bf16 %v932_v18, %v933_v32 }
 0x40b   :  { %2461 = vmatpush.msra.mxu3 %v3454_v62  ;;  %1943 = vmatmul.f32.gmra.mxu1 %v5555_v13 }
 0x40c   :  { %2540 = vmatpush.msrb.mxu2 %v3455_v54 }
 0x40d   :  { %2462 = vmatpush.msra.mxu3 %v3459_v45 }
 0x40e   :  { %2541 = vmatpush.msrb.mxu2 %v3460_v49  ;;  %3677 = vrot.lane.b32.xlu1 %v5815_v12, %s3837_s21 }
 0x40f   :  { %3682 = vrot.lane.b32.xlu0 %v5814_v51, %s3837_s21  ;;  %3667 = vrot.lane.b32.xlu2 %v3666_v21, %s3837_s21  ;;  %v3473_v3 = vpop.permute.xlu1 %3472  ;;  %v5571_v38 = vpop.permute.xlu2 %3507 }
 0x410   :  { %2463 = vmatpush.msra.mxu3 %v3464_v1  ;;  %2542 = vmatpush.msrb.mxu2 %v3465_v39  ;;  %v3468_v2 = vpop.permute.xlu0 %3467  ;;  %v3475_v46 = vunpack.i.h.bf16 %v3473_v3  ;;  %v3474_v29 = vunpack.i.l.bf16 %v3473_v3  ;;  %v3509_v20 = vunpack.i.l.bf16 %v5571_v38  ;;  %v3510_v62 = vunpack.i.h.bf16 %v5571_v38 }
 0x411   :  { %v3470_v28 = vunpack.i.h.bf16 %v3468_v2  ;;  %v3469_v7 = vunpack.i.l.bf16 %v3468_v2 }
 0x413   :  { %2464 = vmatpush.msra.mxu3 %v3469_v7  ;;  %2543 = vmatpush.msrb.mxu2 %v3470_v28 }
 0x415   :  { %2465 = vmatpush.msra.mxu3 %v3474_v29  ;;  %2544 = vmatpush.msrb.mxu2 %v3475_v46 }
 0x416   :  { %3697 = vrot.lane.b32.xlu1 %v3696_v36, %s3837_s21 }
 0x417   :  { %3687 = vrot.lane.b32.xlu0 %v3686_v5, %s3837_s21  ;;  %3692 = vrot.lane.b32.xlu2 %v3691_v37, %s3837_s21  ;;  %v3488_v56 = vpop.permute.xlu1 %3487  ;;  %v5590_v19 = vpop.permute.xlu2 %3522 }
 0x418   :  { %2466 = vmatpush.msra.mxu3 %v3479_v9  ;;  %2545 = vmatpush.msrb.mxu2 %v3480_v8  ;;  %v3483_v50 = vpop.permute.xlu0 %3482  ;;  %v3490_v16 = vunpack.i.h.bf16 %v3488_v56  ;;  %v3489_v25 = vunpack.i.l.bf16 %v3488_v56  ;;  %v3524_v14 = vunpack.i.l.bf16 %v5590_v19  ;;  %v3525_v34 = vunpack.i.h.bf16 %v5590_v19 }
 0x419   :  { %v3485_v4 = vunpack.i.h.bf16 %v3483_v50  ;;  %v3484_v6 = vunpack.i.l.bf16 %v3483_v50 }
 0x41b   :  { %2467 = vmatpush.msra.mxu3 %v3484_v6  ;;  %2546 = vmatpush.msrb.mxu2 %v3485_v4 }
 0x41d   :  { %2468 = vmatpush.msra.mxu3 %v3489_v25  ;;  %2547 = vmatpush.msrb.mxu2 %v3490_v16  ;;  %v1923_v47 = vpop.f32.mrf.mxu1 }
 0x41e   :  { %3793 = vrcp.f32 %v1923_v47  ;;  %v2068_v27 = vand.u32 2147483647, %v1923_v47  ;;  %v2070_v21 = vand.u32 2147483648, %v1923_v47  ;;  %vm2064_vm14 = vweird.f32 %v1923_v47 }
 0x41f   :  { %3707 = vrot.lane.b32.xlu0 %v3706_v33, %s3837_s21  ;;  %3702 = vrot.lane.b32.xlu2 %v3701_v35, %s3837_s21  ;;  %v3503_v0 = vpop.permute.xlu1 %3502  ;;  %v5604_v17 = vpop.permute.xlu2 %3537 }
 0x420   :  { %2548 = vmatpush.msrb.mxu2 %v3494_v57  ;;  %v3498_v31 = vpop.permute.xlu0 %3497  ;;  %v3504_v42 = vunpack.i.l.bf16 %v3503_v0  ;;  %v3505_v54 = vunpack.i.h.bf16 %v3503_v0  ;;  %v2071_v53 = vor.u32 1.1754944e-38, %v2070_v21  ;;  %vm2069_vm1 = vcmp.eq.f32.partialorder %v2068_v27, 8.507059e+37 }
 0x421   :  { %v3499_v24 = vunpack.i.l.bf16 %v3498_v31  ;;  %v3500_v52 = vunpack.i.h.bf16 %v3498_v31  ;;  %v3540_v50 = vunpack.i.h.bf16 %v5604_v17 }
 0x422   :  { %2549 = vmatpush.msrb.mxu2 %v3495_v11  ;;  %2627 = vmatpush.msrb.mxu0 %v3504_v42 }
 0x424   :  { %2550 = vmatpush.msrb.mxu2 %v3499_v24  ;;  %v3794_v58 = vpop.eup %3793  ;;  %2628 = vmatpush.msrb.mxu0 %v3509_v20  ;;  %v5816_v24 = vld [vmem:[#allocation6_spill] sm:$0xff] }
 0x425   :  { %v2060_v26 = vmul.f32 %v3794_v58, %v1923_v47  ;;  %v1926_v23 = vpop.f32.mrf.mxu1  ;;  %vm2065_vm13 = vweird.f32 %v3794_v58 }
 0x426   :  { %2551 = vmatpush.msrb.mxu2 %v3500_v52  ;;  %3795 = vrcp.f32 %v1926_v23  ;;  %vm2066_vm15 = vmor %vm2064_vm14, %vm2065_vm13  ;;  %v2084_v5 = vand.u32 2147483648, %v1926_v23  ;;  %v2082_v8 = vand.u32 2147483647, %v1926_v23  ;;  %vm2078_vm3 = vweird.f32 %v1926_v23 }
 0x427   :  { %v2061_v55 = vsub.f32 1.0, %v2060_v26  ;;  %v3518_v49 = vpop.permute.xlu1 %3517  ;;  %v5608_v45 = vpop.permute.xlu2 %3552 }
 0x428   :  { %2552 = vmatpush.msrb.mxu2 %v3505_v54  ;;  %v3513_v30 = vpop.permute.xlu0 %3512  ;;  %v3520_v12 = vunpack.i.h.bf16 %v3518_v49  ;;  %v3519_v3 = vunpack.i.l.bf16 %v3518_v49  ;;  %v2085_v19 = vor.u32 1.1754944e-38, %v2084_v5  ;;  %vm2083_vm6 = vcmp.eq.f32.partialorder %v2082_v8, 8.507059e+37 }
 0x429   :  { %v3515_v39 = vunpack.i.h.bf16 %v3513_v30  ;;  %v3514_v1 = vunpack.i.l.bf16 %v3513_v30  ;;  %v2062_v51 = vmul.f32 %v3794_v58, %v2061_v55  ;;  %v3555_v25 = vunpack.i.h.bf16 %v5608_v45 }
 0x42a   :  { %2553 = vmatpush.msrb.mxu2 %v3510_v62  ;;  %v3539_v49 = vunpack.i.l.bf16 %v5604_v17 }
 0x42b   :  { %2629 = vmatpush.msrb.mxu0 %v3514_v1  ;;  %v2063_v2 = vadd.f32 %v3794_v58, %v2062_v51 }
 0x42c   :  { %2554 = vmatpush.msrb.mxu2 %v3515_v39  ;;  %v3796_v38 = vpop.eup %3795  ;;  %v5817_v39 = vld [vmem:[#allocation7_spill] sm:$0xff] }
 0x42d   :  { %v2074_v28 = vmul.f32 %v3796_v38, %v1926_v23  ;;  %2630 = vmatpush.msrb.mxu0 %v3519_v3  ;;  %v2067_v7 = vsel %vm2066_vm15, %v3794_v58, %v2063_v2  ;;  %vm2079_vm2 = vweird.f32 %v3796_v38  ;;  %v3554_v2 = vunpack.i.l.bf16 %v5608_v45 }
 0x42e   :  { %2555 = vmatpush.msrb.mxu2 %v3520_v12  ;;  %v2072_v60 = vsel %vm2069_vm1, %v2071_v53, %v2067_v7  ;;  %vm2080_vm5 = vmor %vm2078_vm3, %vm2079_vm2 }
 0x42f   :  { %v2075_v10 = vsub.f32 1.0, %v2074_v28  ;;  %2631 = vmatpush.msrb.mxu0 %v3524_v14  ;;  %v3533_v46 = vpop.permute.xlu1 %3532  ;;  %v5612_v29 = vpop.permute.xlu2 %3567  ;;  %3353 = vmatmul.msk.f32.gmra.mxu3 %vm2172_vm11, %v2072_v60 }
 0x430   :  { %v3528_v59 = vpop.permute.xlu0 %3527  ;;  %v3535_v9 = vunpack.i.h.bf16 %v3533_v46  ;;  %v3570_v0 = vunpack.i.h.bf16 %v5612_v29  ;;  %v3534_v55 = vunpack.i.l.bf16 %v3533_v46  ;;  %v3569_v45 = vunpack.i.l.bf16 %v5612_v29 }
 0x431   :  { %v3530_v36 = vunpack.i.h.bf16 %v3528_v59  ;;  %2632 = vmatpush.msrb.mxu0 %v3525_v34  ;;  %v2076_v37 = vmul.f32 %v3796_v38, %v2075_v10  ;;  %v3529_v58 = vunpack.i.l.bf16 %v3528_v59 }
 0x433   :  { %2633 = vmatpush.msrb.mxu0 %v3530_v36  ;;  %v2077_v56 = vadd.f32 %v3796_v38, %v2076_v37 }
 0x435   :  { %2634 = vmatpush.msrb.mxu0 %v3535_v9  ;;  %v2081_v63 = vsel %vm2080_vm5, %v3796_v38, %v2077_v56 }
 0x436   :  { %v2086_v41 = vsel %vm2083_vm6, %v2085_v19, %v2081_v63 }
 0x437   :  { %2635 = vmatpush.msrb.mxu0 %v3540_v50  ;;  %v3548_v4 = vpop.permute.xlu1 %3547  ;;  %3354 = vmatmul.msk.f32.gmra.mxu3 %vm2172_vm11, %v2086_v41 }
 0x438   :  { %v5616_v6 = vpop.permute.xlu2 %3582  ;;  %v3543_v18 = vpop.permute.xlu0 %3542  ;;  %v3550_v16 = vunpack.i.h.bf16 %v3548_v4  ;;  %v3549_v12 = vunpack.i.l.bf16 %v3548_v4 }
 0x439   :  { %v3545_v32 = vunpack.i.h.bf16 %v3543_v18  ;;  %v3584_v23 = vunpack.i.l.bf16 %v5616_v6  ;;  %v3544_v30 = vunpack.i.l.bf16 %v3543_v18  ;;  %v3585_v41 = vunpack.i.h.bf16 %v5616_v6 }
 0x43b   :  { %2636 = vmatpush.msrb.mxu0 %v3545_v32 }
 0x43d   :  { %2637 = vmatpush.msrb.mxu0 %v3550_v16 }
 0x43f   :  { %2638 = vmatpush.msrb.mxu0 %v3555_v25  ;;  %v3563_v33 = vpop.permute.xlu1 %3562 }
 0x440   :  { %v5620_v57 = vpop.permute.xlu2 %3597  ;;  %v3558_v35 = vpop.permute.xlu0 %3557  ;;  %v3565_v11 = vunpack.i.h.bf16 %v3563_v33  ;;  %v3564_v14 = vunpack.i.l.bf16 %v3563_v33 }
 0x441   :  { %v3560_v47 = vunpack.i.h.bf16 %v3558_v35  ;;  %v3559_v17 = vunpack.i.l.bf16 %v3558_v35  ;;  %v3599_v53 = vunpack.i.l.bf16 %v5620_v57 }
 0x443   :  { %2639 = vmatpush.msrb.mxu0 %v3560_v47 }
 0x445   :  { %2640 = vmatpush.msrb.mxu0 %v3565_v11 }
 0x447   :  { %2641 = vmatpush.msrb.mxu0 %v3570_v0  ;;  %v5623_v42 = vpop.permute.xlu1 %3577 }
 0x448   :  { %v3573_v52 = vpop.permute.xlu0 %3572  ;;  %v3579_v36 = vunpack.i.l.bf16 %v5623_v42  ;;  %v3580_v9 = vunpack.i.h.bf16 %v5623_v42 }
 0x449   :  { %v2238_v31 = vpop.f32.mrf.mxu3  ;;  %v3575_v26 = vunpack.i.h.bf16 %v3573_v52  ;;  %v5626_v54 = vpop.permute.xlu2 %3612  ;;  %v3574_v59 = vunpack.i.l.bf16 %v3573_v52 }
 0x44a   :  { %v2286_v20 = vmul.f32 %v5816_v24, %v2238_v31  ;;  %v3615_v62 = vunpack.i.h.bf16 %v5626_v54  ;;  %v3614_v4 = vunpack.i.l.bf16 %v5626_v54 }
 0x44b   :  { %2642 = vmatpush.msrb.mxu0 %v3575_v26 }
 0x44c   :  { %2382 = vmatmul.f32.vlgmr.msra.gmra.mxu2 %v2286_v20  ;;  %2888 = vmatpush.msra.mxu1 %v3615_v62 }
 0x44d   :  { %2714 = vmatpush.msra.mxu2 %v3529_v58  ;;  %2801 = vmatpush.msra.mxu0 %v3584_v23  ;;  %v3600_v58 = vunpack.i.h.bf16 %v5620_v57 }
 0x44f   :  { %2715 = vmatpush.msra.mxu2 %v3534_v55  ;;  %v5631_v21 = vpop.permute.xlu1 %3592  ;;  %v5818_v55 = vld [vmem:[#allocation10_spill] sm:$0xff] }
 0x450   :  { %v3594_v38 = vunpack.i.l.bf16 %v5631_v21  ;;  %v3595_v31 = vunpack.i.h.bf16 %v5631_v21 }
 0x451   :  { %2716 = vmatpush.msra.mxu2 %v3539_v49  ;;  %v2241_v27 = vpop.f32.mrf.mxu3  ;;  %v5634_v51 = vpop.permute.xlu0 %3587 }
 0x452   :  { %v2287_v1 = vmul.f32 %v5817_v39, %v2241_v27  ;;  %v3589_v3 = vunpack.i.l.bf16 %v5634_v51  ;;  %v5646_v46 = vpop.permute.xlu2 %3627  ;;  %v3590_v25 = vunpack.i.h.bf16 %v5634_v51 }
 0x453   :  { %2717 = vmatpush.msra.mxu2 %v3544_v30  ;;  %v3630_v24 = vunpack.i.h.bf16 %v5646_v46  ;;  %v3629_v26 = vunpack.i.l.bf16 %v5646_v46 }
 0x454   :  { %2385 = vmatmul.f32.gmra.mxu2 %v2287_v1  ;;  %2802 = vmatpush.msra.mxu0 %v3589_v3 }
 0x455   :  { %2718 = vmatpush.msra.mxu2 %v3549_v12 }
 0x456   :  { %2803 = vmatpush.msra.mxu0 %v3594_v38 }
 0x457   :  { %2719 = vmatpush.msra.mxu2 %v3554_v2  ;;  %v3608_v7 = vpop.permute.xlu1 %3607 }
 0x458   :  { %2804 = vmatpush.msra.mxu0 %v3599_v53  ;;  %v3609_v37 = vunpack.i.l.bf16 %v3608_v7  ;;  %v3610_v56 = vunpack.i.h.bf16 %v3608_v7 }
 0x459   :  { %2720 = vmatpush.msra.mxu2 %v3559_v17  ;;  %v5640_v28 = vpop.f32.mrf.mxu3  ;;  %v3603_v60 = vpop.permute.xlu0 %3602 }
 0x45a   :  { %v5642_v34 = vpop.f32.mrf.mxu1  ;;  %v3604_v10 = vunpack.i.l.bf16 %v3603_v60  ;;  %v3605_v5 = vunpack.i.h.bf16 %v3603_v60  ;;  %v3658_v47 = vpop.permute.xlu2 %3657 }
 0x45b   :  { %3797 = vrcp.f32 %v5642_v34  ;;  %2721 = vmatpush.msra.mxu2 %v3564_v14  ;;  %v2098_v35 = vand.u32 2147483648, %v5642_v34  ;;  %v2096_v0 = vand.u32 2147483647, %v5642_v34  ;;  %vm2092_vm8 = vweird.f32 %v5642_v34 }
 0x45c   :  { %2805 = vmatpush.msra.mxu0 %v3604_v10  ;;  %v3659_v51 = vunpack.i.l.bf16 %v3658_v47  ;;  %v3660_v14 = vunpack.i.h.bf16 %v3658_v47 }
 0x45d   :  { %2722 = vmatpush.msra.mxu2 %v3569_v45  ;;  %v2099_v23 = vor.u32 1.1754944e-38, %v2098_v35  ;;  %vm2097_vm9 = vcmp.eq.f32.partialorder %v2096_v0, 8.507059e+37 }
 0x45e   :  { %2806 = vmatpush.msra.mxu0 %v3605_v5 }
 0x45f   :  { %2723 = vmatpush.msra.mxu2 %v3574_v59  ;;  %v5819_v59 = vld [vmem:[#allocation15_spill] sm:$0xff] }
 0x460   :  { %2807 = vmatpush.msra.mxu0 %v3609_v37  ;;  %v3623_v32 = vpop.permute.xlu1 %3622 }
 0x461   :  { %v3798_v8 = vpop.eup %3797  ;;  %2724 = vmatpush.msra.mxu2 %v3579_v36  ;;  %v5650_v29 = vpop.f32.mrf.mxu3  ;;  %v3625_v11 = vunpack.i.h.bf16 %v3623_v32  ;;  %v3624_v42 = vunpack.i.l.bf16 %v3623_v32 }
 0x462   :  { %v2088_v19 = vmul.f32 %v3798_v8, %v5642_v34  ;;  %v3618_v50 = vpop.permute.xlu0 %3617  ;;  %v5653_v63 = vpop.f32.mrf.mxu1  ;;  %2808 = vmatpush.msra.mxu0 %v3610_v56  ;;  %vm2093_vm7 = vweird.f32 %v3798_v8 }
 0x463   :  { %v3620_v18 = vunpack.i.h.bf16 %v3618_v50  ;;  %3799 = vrcp.f32 %v5653_v63  ;;  %2725 = vmatpush.msra.mxu2 %v3580_v9  ;;  %v3619_v33 = vunpack.i.l.bf16 %v3618_v50  ;;  %vm2094_vm4 = vmor %vm2092_vm8, %vm2093_vm7  ;;  %v2112_v38 = vand.u32 2147483648, %v5653_v63  ;;  %v3663_v7 = vpop.permute.xlu2 %3662 }
 0x464   :  { %v2089_v16 = vsub.f32 1.0, %v2088_v19  ;;  %2809 = vmatpush.msra.mxu0 %v3614_v4  ;;  %v2110_v53 = vand.u32 2147483647, %v5653_v63  ;;  %vm2106_vm12 = vweird.f32 %v5653_v63 }
 0x465   :  { %2726 = vmatpush.msra.mxu2 %v3585_v41  ;;  %2889 = vmatpush.msra.mxu1 %v3620_v18  ;;  %v2113_v34 = vor.u32 1.1754944e-38, %v2112_v38  ;;  %v3665_v41 = vunpack.i.h.bf16 %v3663_v7  ;;  %v5820_v38 = vld [vmem:[#allocation16_spill] sm:$0xff] }
 0x466   :  { %v2090_v6 = vmul.f32 %v3798_v8, %v2089_v16  ;;  %2810 = vmatpush.msra.mxu0 %v3619_v33  ;;  %vm2111_vm14 = vcmp.eq.f32.partialorder %v2110_v53, 8.507059e+37 }
 0x467   :  { %2727 = vmatpush.msra.mxu2 %v3590_v25  ;;  %2890 = vmatpush.msra.mxu1 %v3625_v11 }
 0x468   :  { %v2091_v20 = vadd.f32 %v3798_v8, %v2090_v6  ;;  %2811 = vmatpush.msra.mxu0 %v3624_v42  ;;  %v3638_v1 = vpop.permute.xlu1 %3637 }
 0x469   :  { %v3800_v52 = vpop.eup %3799  ;;  %2728 = vmatpush.msra.mxu2 %v3595_v31  ;;  %v2250_v54 = vpop.f32.mrf.mxu3  ;;  %2891 = vmatpush.msra.mxu1 %v3630_v24  ;;  %v3640_v3 = vunpack.i.h.bf16 %v3638_v1  ;;  %v3639_v2 = vunpack.i.l.bf16 %v3638_v1 }
 0x46a   :  { %v2102_v62 = vmul.f32 %v3800_v52, %v5653_v63  ;;  %v2290_v49 = vmul.f32 %v5818_v55, %v2250_v54  ;;  %v3633_v30 = vpop.permute.xlu0 %3632  ;;  %v2095_v27 = vsel %vm2094_vm4, %v3798_v8, %v2091_v20  ;;  %2812 = vmatpush.msra.mxu0 %v3629_v26  ;;  %vm2107_vm10 = vweird.f32 %v3800_v52 }
 0x46b   :  { %v3635_v21 = vunpack.i.h.bf16 %v3633_v30  ;;  %v3634_v39 = vunpack.i.l.bf16 %v3633_v30  ;;  %2729 = vmatpush.msra.mxu2 %v3600_v58  ;;  %v2100_v57 = vsel %vm2097_vm9, %v2099_v23, %v2095_v27  ;;  %vm2108_vm13 = vmor %vm2106_vm12, %vm2107_vm10  ;;  %v3664_v63 = vunpack.i.l.bf16 %v3663_v7  ;;  %v3668_v4 = vpop.permute.xlu2 %3667 }
 0x46c   :  { %v2103_v12 = vsub.f32 1.0, %v2102_v62  ;;  %3355 = vmatmul.msk.f32.gmra.mxu3 %vm2172_vm11, %v2100_v57  ;;  %2556 = vmatmul.f32.vlgmr.msrb.gmra.mxu2 %v2290_v49  ;;  %v3670_v31 = vunpack.i.h.bf16 %v3668_v4  ;;  %v3669_v42 = vunpack.i.l.bf16 %v3668_v4 }
 0x46d   :  { %2813 = vmatpush.msra.mxu0 %v3634_v39  ;;  %2892 = vmatpush.msra.mxu1 %v3635_v21 }
 0x46e   :  { %2975 = vmatpush.msrb.mxu2 %v3659_v51  ;;  %v2104_v17 = vmul.f32 %v3800_v52, %v2103_v12 }
 0x46f   :  { %2814 = vmatpush.msra.mxu0 %v3639_v2  ;;  %2893 = vmatpush.msra.mxu1 %v3640_v3 }
 0x470   :  { %v2105_v60 = vadd.f32 %v3800_v52, %v2104_v17  ;;  %v3648_v8 = vpop.permute.xlu1 %3647  ;;  %v1935_v19 = vpop.f32.mrf.mxu1 }
 0x471   :  { %2815 = vmatpush.msra.mxu0 %v3660_v14  ;;  %v2253_v45 = vpop.f32.mrf.mxu3  ;;  %v3649_v56 = vunpack.i.l.bf16 %v3648_v8  ;;  %v3650_v50 = vunpack.i.h.bf16 %v3648_v8  ;;  %3801 = vrcp.f32 %v1935_v19  ;;  %v2126_v24 = vand.u32 2147483648, %v1935_v19 }
 0x472   :  { %v3643_v10 = vpop.permute.xlu0 %3642  ;;  %v2109_v46 = vsel %vm2108_vm13, %v3800_v52, %v2105_v60  ;;  %v2291_v5 = vmul.f32 %v5819_v59, %v2253_v45  ;;  %v2124_v52 = vand.u32 2147483647, %v1935_v19  ;;  %vm2120_vm1 = vweird.f32 %v1935_v19 }
 0x473   :  { %v3645_v36 = vunpack.i.h.bf16 %v3643_v10  ;;  %v3644_v37 = vunpack.i.l.bf16 %v3643_v10  ;;  %v2114_v9 = vsel %vm2111_vm14, %v2113_v34, %v2109_v46  ;;  %2816 = vmatpush.msra.mxu0 %v3649_v56  ;;  %v2127_v49 = vor.u32 1.1754944e-38, %v2126_v24  ;;  %v3693_v30 = vpop.permute.xlu2 %3692 }
 0x474   :  { %3356 = vmatmul.msk.f32.gmra.mxu3 %vm2172_vm11, %v2114_v9  ;;  %2559 = vmatmul.f32.gmra.mxu2 %v2291_v5  ;;  %vm2125_vm3 = vcmp.eq.f32.partialorder %v2124_v52, 8.507059e+37  ;;  %v3695_v2 = vunpack.i.h.bf16 %v3693_v30  ;;  %v3694_v14 = vunpack.i.l.bf16 %v3693_v30 }
 0x475   :  { %2894 = vmatpush.msra.mxu1 %v3644_v37  ;;  %2976 = vmatpush.msrb.mxu2 %v3645_v36 }
 0x477   :  { %2895 = vmatpush.msra.mxu1 %v3650_v50  ;;  %2977 = vmatpush.msrb.mxu2 %v3664_v63  ;;  %v3802_v32 = vpop.eup %3801 }
 0x478   :  { %v3673_v33 = vpop.permute.xlu1 %3672  ;;  %v2116_v35 = vmul.f32 %v3802_v32, %v1935_v19  ;;  %v5675_v47 = vpop.f32.mrf.mxu1  ;;  %vm2121_vm15 = vweird.f32 %v3802_v32 }
 0x479   :  { %2896 = vmatpush.msra.mxu1 %v3665_v41  ;;  %v3675_v11 = vunpack.i.h.bf16 %v3673_v33  ;;  %v3674_v6 = vunpack.i.l.bf16 %v3673_v33  ;;  %3803 = vrcp.f32 %v5675_v47  ;;  %vm2122_vm2 = vmor %vm2120_vm1, %vm2121_vm15  ;;  %v2140_v53 = vand.u32 2147483648, %v5675_v47 }
 0x47a   :  { %v3653_v18 = vpop.permute.xlu0 %3652  ;;  %v2117_v0 = vsub.f32 1.0, %v2116_v35  ;;  %v2138_v60 = vand.u32 2147483647, %v5675_v47  ;;  %vm2134_vm6 = vweird.f32 %v5675_v47 }
 0x47b   :  { %v3655_v16 = vunpack.i.h.bf16 %v3653_v18  ;;  %v3654_v25 = vunpack.i.l.bf16 %v3653_v18  ;;  %v2141_v36 = vor.u32 1.1754944e-38, %v2140_v53  ;;  %v3703_v50 = vpop.permute.xlu2 %3702  ;;  %v5821_v18 = vld [vmem:[#allocation17_spill] sm:$0xff] }
 0x47c   :  { %v2118_v20 = vmul.f32 %v3802_v32, %v2117_v0  ;;  %vm2139_vm8 = vcmp.eq.f32.partialorder %v2138_v60, 8.507059e+37  ;;  %v3704_v35 = vunpack.i.l.bf16 %v3703_v50  ;;  %v3705_v0 = vunpack.i.h.bf16 %v3703_v50  ;;  %v3712_v50 = vld [vmem:[%s5761_s4] ss:$0 sm:$0xff]  ;;  %s3838_s4 = smov [#allocation2]  }
 0x47d   :  { %2897 = vmatpush.msra.mxu1 %v3655_v16  ;;  %2978 = vmatpush.msrb.mxu2 %v3654_v25  ;;  %s3139_s0 = sshll.u32 %s3838_s4, 4  ;;  %s3140_s0 = int_to_ptr.vmem [resolvable:$true] %s3139_s0 }
 0x47e   :  { %v2119_v26 = vadd.f32 %v3802_v32, %v2118_v20 }
 0x47f   :  { %2898 = vmatpush.msra.mxu1 %v3675_v11  ;;  %2979 = vmatpush.msrb.mxu2 %v3674_v6  ;;  %v3804_v54 = vpop.eup %3803 }
 0x480   :  { %v3678_v55 = vpop.permute.xlu1 %3677  ;;  %v2130_v27 = vmul.f32 %v3804_v54, %v5675_v47  ;;  %v5679_v21 = vpop.f32.mrf.mxu1  ;;  %v2123_v39 = vsel %vm2122_vm2, %v3802_v32, %v2119_v26  ;;  %vm2135_vm5 = vweird.f32 %v3804_v54 }
 0x481   :  { %2899 = vmatpush.msra.mxu1 %v3670_v31  ;;  %2980 = vmatpush.msrb.mxu2 %v3669_v42  ;;  %v3680_v1 = vunpack.i.h.bf16 %v3678_v55  ;;  %v3679_v57 = vunpack.i.l.bf16 %v3678_v55  ;;  %3805 = vrcp.f32 %v5679_v21  ;;  %v2128_v51 = vsel %vm2125_vm3, %v2127_v49, %v2123_v39  ;;  %vm2136_vm7 = vmor %vm2134_vm6, %vm2135_vm5 }
 0x482   :  { %v3683_v58 = vpop.permute.xlu0 %3682  ;;  %v2131_v12 = vsub.f32 1.0, %v2130_v27  ;;  %3357 = vmatmul.msk.f32.gmra.mxu3 %vm2172_vm11, %v2128_v51  ;;  %v2154_v16 = vand.u32 2147483648, %v5679_v21  ;;  %v2152_v33 = vand.u32 2147483647, %v5679_v21  ;;  %vm2148_vm9 = vweird.f32 %v5679_v21 }
 0x483   :  { %v3685_v23 = vunpack.i.h.bf16 %v3683_v58  ;;  %v3684_v62 = vunpack.i.l.bf16 %v3683_v58 }
 0x484   :  { %v2256_v3 = vpop.f32.mrf.mxu3  ;;  %v2132_v7 = vmul.f32 %v3804_v54, %v2131_v12  ;;  %v2155_v31 = vor.u32 1.1754944e-38, %v2154_v16  ;;  %vm2153_vm12 = vcmp.eq.f32.partialorder %v2152_v33, 8.507059e+37 }
 0x485   :  { %2900 = vmatpush.msra.mxu1 %v3685_v23  ;;  %2981 = vmatpush.msrb.mxu2 %v3684_v62  ;;  %v2292_v17 = vmul.f32 %v5820_v38, %v2256_v3  ;;  %v3001_v38 = vld [vmem:[%s5759_s2 + $0x18] sm:$0xff] }
 0x486   :  { %v2133_v45 = vadd.f32 %v3804_v54, %v2132_v7 }
 0x487   :  { %2901 = vmatpush.msra.mxu1 %v3680_v1  ;;  %2982 = vmatpush.msrb.mxu2 %v3679_v57  ;;  %v3806_v10 = vpop.eup %3805  ;;  %v5823_v1 = vld [vmem:[#allocation9_spill] sm:$0xff] }
 0x488   :  { %2643 = vmatmul.f32.vlgmr.msrb.gmra.mxu0 %v2292_v17  ;;  %v3698_v5 = vpop.permute.xlu1 %3697  ;;  %v2144_v37 = vmul.f32 %v3806_v10, %v5679_v21  ;;  %v1944_v8 = vpop.f32.mrf.mxu1  ;;  %v2137_v9 = vsel %vm2136_vm7, %v3804_v54, %v2133_v45  ;;  %vm2149_vm4 = vweird.f32 %v3806_v10  ;;  %v5822_v21 = vld [vmem:[#allocation8_spill] sm:$0xff]  ;;  %v2289_v57 = vmul.f32 %v5823_v1, %v5650_v29  ;;  %v2999_v29 = vld [vmem:[%s5759_s2 + $0x8] sm:$0xff] }
 0x489   :  { %2902 = vmatpush.msra.mxu1 %v3695_v2  ;;  %2983 = vmatpush.msrb.mxu2 %v3694_v14  ;;  %v3699_v56 = vunpack.i.l.bf16 %v3698_v5  ;;  %3807 = vrcp.f32 %v1944_v8  ;;  %v2142_v19 = vsel %vm2139_vm8, %v2141_v36, %v2137_v9  ;;  %v3700_v4 = vunpack.i.h.bf16 %v3698_v5  ;;  %vm2150_vm10 = vmor %vm2148_vm9, %vm2149_vm4 }
 0x48a   :  { %v3688_v34 = vpop.permute.xlu0 %3687  ;;  %v2145_v63 = vsub.f32 1.0, %v2144_v37  ;;  %3358 = vmatmul.msk.f32.gmra.mxu3 %vm2172_vm11, %v2142_v19  ;;  %v2168_v54 = vand.u32 2147483648, %v1944_v8  ;;  %v2166_v62 = vand.u32 2147483647, %v1944_v8  ;;  %vm2162_vm14 = vweird.f32 %v1944_v8  ;;  %3066 = vmatpush.msrb.mxu0 %v3001_v38 }
 0x48b   :  { %v3690_v46 = vunpack.i.h.bf16 %v3688_v34  ;;  %v3689_v59 = vunpack.i.l.bf16 %v3688_v34  ;;  %v2288_v39 = vmul.f32 %v5822_v21, %v5640_v28  ;;  %v3000_v28 = vld [vmem:[%s5759_s2 + $0x10] sm:$0xff] }
 0x48c   :  { %v2259_v41 = vpop.f32.mrf.mxu3  ;;  %v2146_v25 = vmul.f32 %v3806_v10, %v2145_v63  ;;  %v2169_v49 = vor.u32 1.1754944e-38, %v2168_v54  ;;  %vm2167_vm1 = vcmp.eq.f32.partialorder %v2166_v62, 8.507059e+37  ;;  %3067 = vmatpush.msrb.mxu0 %v3000_v28 }
 0x48d   :  { %2903 = vmatpush.msra.mxu1 %v3690_v46  ;;  %2984 = vmatpush.msrb.mxu2 %v3689_v59  ;;  %v2293_v32 = vmul.f32 %v5821_v18, %v2259_v41 }
 0x48e   :  { %v2147_v11 = vadd.f32 %v3806_v10, %v2146_v25  ;;  %3068 = vmatpush.msrb.mxu0 %v2999_v29 }
 0x48f   :  { %2985 = vmatpush.msrb.mxu2 %v3699_v56  ;;  %v3808_v6 = vpop.eup %3807 }
 0x490   :  { %2646 = vmatmul.f32.gmra.mxu0 %v2293_v32  ;;  %v2158_v42 = vmul.f32 %v3808_v6, %v1944_v8  ;;  %v2151_v24 = vsel %vm2150_vm10, %v3806_v10, %v2147_v11  ;;  %vm2163_vm13 = vweird.f32 %v3808_v6 }
 0x491   :  { %2986 = vmatpush.msrb.mxu2 %v3700_v4  ;;  %v2156_v52 = vsel %vm2153_vm12, %v2155_v31, %v2151_v24  ;;  %vm2164_vm15 = vmor %vm2162_vm14, %vm2163_vm13 }
 0x492   :  { %v3708_v47 = vpop.permute.xlu0 %3707  ;;  %v2159_v58 = vsub.f32 1.0, %v2158_v42  ;;  %3359 = vmatmul.msk.f32.gmra.mxu3 %vm2172_vm11, %v2156_v52 }
 0x493   :  { %2987 = vmatpush.msrb.mxu2 %v3704_v35  ;;  %v3709_v20 = vunpack.i.l.bf16 %v3708_v47  ;;  %v3710_v26 = vunpack.i.h.bf16 %v3708_v47 }
 0x494   :  { %v2160_v23 = vmul.f32 %v3808_v6, %v2159_v58 }
 0x495   :  { %2988 = vmatpush.msrb.mxu2 %v3705_v0 }
 0x496   :  { %v2161_v55 = vadd.f32 %v3808_v6, %v2160_v23 }
 0x497   :  { %2989 = vmatpush.msrb.mxu2 %v3709_v20 }
 0x498   :  { %v2165_v30 = vsel %vm2164_vm15, %v3808_v6, %v2161_v55 }
 0x499   :  { %2990 = vmatpush.msrb.mxu2 %v3710_v26  ;;  %v2170_v27 = vsel %vm2167_vm1, %v2169_v49, %v2165_v30 }
 0x49a   :  { %3360 = vmatmul.msk.f32.gmra.mxu3 %vm2172_vm11, %v2170_v27 }
 0x4a2   :  { %2469 = vmatmul.f32.vlgmr.msra.gmra.mxu3 %v2288_v39 }
 0x4aa   :  { %2472 = vmatmul.f32.gmra.mxu3 %v2289_v57 }
 0x4b2   :  { %v2262_v51 = vpop.f32.mrf.mxu3 }
 0x4b3   :  { %v2294_v12 = vmul.f32 %v5274_v43, %v2262_v51  ;;  %v2998_v43 = vld [vmem:[%s5759_s2] sm:$0xff] }
 0x4b4   :  { %3069 = vmatpush.msrb.mxu0 %v2998_v43 }
 0x4b5   :  { %2730 = vmatmul.f32.vlgmr.msra.gmra.mxu2 %v2294_v12 }
 0x4ba   :  { %v2265_v3 = vpop.f32.mrf.mxu3 }
 0x4bb   :  { %v2295_v2 = vmul.f32 %v5292_v48, %v2265_v3 }
 0x4bd   :  { %2733 = vmatmul.f32.gmra.mxu2 %v2295_v2 }
 0x4cf   :  { %v2383_v7 = vpop.f32.mrf.mxu2 }
 0x4d7   :  { %v2386_v60 = vpop.f32.mrf.mxu2 }
 0x4ef   :  { %v2268_v48 = vpop.f32.mrf.mxu3 }
 0x4f0   :  { %v2296_v17 = vmul.f32 %v5402_v44, %v2268_v48 }
 0x4f2   :  { %2817 = vmatmul.f32.vlgmr.msra.gmra.mxu0 %v2296_v17 }
 0x4f7   :  { %v2271_v53 = vpop.f32.mrf.mxu3 }
 0x4f8   :  { %v2297_v14 = vmul.f32 %v5438_v22, %v2271_v53 }
 0x4fa   :  { %2820 = vmatmul.f32.gmra.mxu0 %v2297_v14 }
 0x502   :  { %3361 = vmatmul.msk.f32.vlgmr.msrb.gmra.mxu0 %vm60_vm0, %v2383_v7 }
 0x505   :  { %v2274_v34 = vpop.f32.mrf.mxu3 }
 0x506   :  { %v2298_v45 = vmul.f32 %v5478_v61, %v2274_v34  ;;  %v2557_v61 = vpop.f32.mrf.mxu2 }
 0x508   :  { %2904 = vmatmul.f32.vlgmr.msra.gmra.mxu1 %v2298_v45 }
 0x50a   :  { %3362 = vmatmul.msk.f32.gmra.mxu0 %vm60_vm0, %v2386_v60 }
 0x50d   :  { %v2277_v10 = vpop.f32.mrf.mxu3 }
 0x50e   :  { %v2299_v46 = vmul.f32 %v5506_v15, %v2277_v10  ;;  %v2560_v8 = vpop.f32.mrf.mxu2  ;;  %v2644_v15 = vpop.f32.mrf.mxu0 }
 0x510   :  { %2907 = vmatmul.f32.gmra.mxu1 %v2299_v46 }
 0x515   :  { %v2280_v44 = vpop.f32.mrf.mxu3 }
 0x516   :  { %v2300_v59 = vmul.f32 %v5532_v40, %v2280_v44  ;;  %v2647_v40 = vpop.f32.mrf.mxu0 }
 0x518   :  { %2991 = vmatmul.f32.vlgmr.msrb.gmra.mxu2 %v2300_v59 }
 0x51d   :  { %v2283_v22 = vpop.f32.mrf.mxu3 }
 0x51e   :  { %v2301_v5 = vmul.f32 %v5555_v13, %v2283_v22 }
 0x520   :  { %2994 = vmatmul.f32.gmra.mxu2 %v2301_v5 }
 0x525   :  { %v2470_v36 = vpop.f32.mrf.mxu3 }
 0x526   :  { %3363 = vmatmul.msk.f32.gmra.mxu0 %vm60_vm0, %v2470_v36 }
 0x52d   :  { %v2473_v37 = vpop.f32.mrf.mxu3 }
 0x52e   :  { %3364 = vmatmul.msk.f32.gmra.mxu0 %vm60_vm0, %v2473_v37 }
 0x536   :  { %3365 = vmatmul.msk.f32.gmra.mxu0 %vm60_vm0, %v2557_v61 }
 0x538   :  { %v2731_v13 = vpop.f32.mrf.mxu2 }
 0x53e   :  { %3366 = vmatmul.msk.f32.gmra.mxu0 %vm60_vm0, %v2560_v8 }
 0x540   :  { %v2734_v9 = vpop.f32.mrf.mxu2 }
 0x546   :  { %3367 = vmatmul.msk.f32.gmra.mxu0 %vm60_vm0, %v2644_v15 }
 0x54e   :  { %3368 = vmatmul.msk.f32.gmra.mxu0 %vm60_vm0, %v2647_v40 }
 0x556   :  { %3369 = vmatmul.msk.f32.gmra.mxu0 %vm60_vm0, %v2731_v13 }
 0x55e   :  { %3370 = vmatmul.msk.f32.gmra.mxu0 %vm60_vm0, %v2734_v9 }
 0x56f   :  { %v2818_v56 = vpop.f32.mrf.mxu0 }
 0x570   :  { %3371 = vmatmul.msk.f32.gmra.mxu0 %vm60_vm0, %v2818_v56 }
 0x577   :  { %v2821_v19 = vpop.f32.mrf.mxu0 }
 0x578   :  { %3372 = vmatmul.msk.f32.gmra.mxu0 %vm60_vm0, %v2821_v19 }
 0x57f   :  { %v3071_v63 = vpop.f32.mrf.mxu0 }
 0x580   :  { %v3072_v41 = vadd.f32 %v3712_v50, %v3071_v63 }
 0x582   :  { %3119 = vst.msk [vmem:[#allocation2] sm:$0xff] %vm60_vm0, %v3072_v41 }
 0x585   :  { %v2905_v32 = vpop.f32.mrf.mxu1 }
 0x586   :  { %3373 = vmatmul.msk.f32.gmra.mxu0 %vm60_vm0, %v2905_v32 }
 0x587   :  { %v3074_v4 = vpop.f32.mrf.mxu0 }
 0x588   :  { %v3075_v18 = vadd.f32 %v3712_v50, %v3074_v4 }
 0x58a   :  { %3120 = vst.msk [vmem:[#allocation2 + $0x8] sm:$0xff] %vm60_vm0, %v3075_v18 }
 0x58d   :  { %v2908_v16 = vpop.f32.mrf.mxu1 }
 0x58e   :  { %3374 = vmatmul.msk.f32.gmra.mxu0 %vm60_vm0, %v2908_v16 }
 0x59b   :  { %v2992_v25 = vpop.f32.mrf.mxu2 }
 0x59c   :  { %3375 = vmatmul.msk.f32.gmra.mxu0 %vm60_vm0, %v2992_v25 }
 0x5a3   :  { %v2995_v33 = vpop.f32.mrf.mxu2  ;;  %v3077_v35 = vpop.f32.mrf.mxu0 }
 0x5a4   :  { %v3078_v47 = vadd.f32 %v3712_v50, %v3077_v35  ;;  %3376 = vmatmul.msk.f32.gmra.mxu0 %vm60_vm0, %v2995_v33 }
 0x5a6   :  { %3121 = vst.msk [vmem:[#allocation2 + $0x10] sm:$0xff] %vm60_vm0, %v3078_v47 }
 0x5ab   :  { %v3080_v11 = vpop.f32.mrf.mxu0 }
 0x5ac   :  { %v3081_v6 = vadd.f32 %v3712_v50, %v3080_v11 }
 0x5ae   :  { %3122 = vst.msk [vmem:[#allocation2 + $0x18] sm:$0xff] %vm60_vm0, %v3081_v6 }
 0x5b3   :  { %v3083_v0 = vpop.f32.mrf.mxu0 }
 0x5b4   :  { %v3084_v31 = vadd.f32 %v3712_v50, %v3083_v0 }
 0x5b6   :  { %3123 = vst.msk [vmem:[#allocation2 + $0x20] sm:$0xff] %vm60_vm0, %v3084_v31 }
 0x5bb   :  { %v3086_v42 = vpop.f32.mrf.mxu0 }
 0x5bc   :  { %v3087_v24 = vadd.f32 %v3712_v50, %v3086_v42 }
 0x5be   :  { %3124 = vst.msk [vmem:[#allocation2 + $0x28] sm:$0xff] %vm60_vm0, %v3087_v24 }
 0x5c3   :  { %v3089_v20 = vpop.f32.mrf.mxu0 }
 0x5c4   :  { %v3090_v52 = vadd.f32 %v3712_v50, %v3089_v20 }
 0x5c6   :  { %3125 = vst.msk [vmem:[#allocation2 + $0x30] sm:$0xff] %vm60_vm0, %v3090_v52 }
 0x5cb   :  { %v3092_v58 = vpop.f32.mrf.mxu0 }
 0x5cc   :  { %v3093_v26 = vadd.f32 %v3712_v50, %v3092_v58 }
 0x5ce   :  { %3126 = vst.msk [vmem:[#allocation2 + $0x38] sm:$0xff] %vm60_vm0, %v3093_v26 }
 0x5d3   :  { %v3095_v54 = vpop.f32.mrf.mxu0 }
 0x5d4   :  { %v3096_v23 = vadd.f32 %v3712_v50, %v3095_v54 }
 0x5d6   :  { %3127 = vst.msk [vmem:[#allocation2 + $0x40] sm:$0xff] %vm60_vm0, %v3096_v23 }
 0x5db   :  { %v3098_v62 = vpop.f32.mrf.mxu0 }
 0x5dc   :  { %v3099_v55 = vadd.f32 %v3712_v50, %v3098_v62 }
 0x5de   :  { %3128 = vst.msk [vmem:[#allocation2 + $0x48] sm:$0xff] %vm60_vm0, %v3099_v55 }
 0x5ed   :  { %v3101_v49 = vpop.f32.mrf.mxu0 }
 0x5ee   :  { %v3102_v30 = vadd.f32 %v3712_v50, %v3101_v49 }
 0x5f0   :  { %3129 = vst.msk [vmem:[#allocation2 + $0x50] sm:$0xff] %vm60_vm0, %v3102_v30 }
 0x5f5   :  { %v3104_v27 = vpop.f32.mrf.mxu0 }
 0x5f6   :  { %v3105_v21 = vadd.f32 %v3712_v50, %v3104_v27 }
 0x5f8   :  { %3130 = vst.msk [vmem:[#allocation2 + $0x58] sm:$0xff] %vm60_vm0, %v3105_v21 }
 0x603   :  { %v3107_v39 = vpop.f32.mrf.mxu0 }
 0x604   :  { %v3108_v1 = vadd.f32 %v3712_v50, %v3107_v39 }
 0x606   :  { %3131 = vst.msk [vmem:[#allocation2 + $0x60] sm:$0xff] %vm60_vm0, %v3108_v1 }
 0x60b   :  { %v3110_v57 = vpop.f32.mrf.mxu0 }
 0x60c   :  { %v3111_v51 = vadd.f32 %v3712_v50, %v3110_v57 }
 0x60e   :  { %3132 = vst.msk [vmem:[#allocation2 + $0x68] sm:$0xff] %vm60_vm0, %v3111_v51 }
 0x619   :  { %v3113_v12 = vpop.f32.mrf.mxu0 }
 0x61a   :  { %v3114_v3 = vadd.f32 %v3712_v50, %v3113_v12 }
 0x61c   :  { %3133 = vst.msk [vmem:[#allocation2 + $0x70] sm:$0xff] %vm60_vm0, %v3114_v3 }
 0x621   :  { %v3116_v2 = vpop.f32.mrf.mxu0 }
 0x622   :  { %v3117_v38 = vadd.f32 %v3712_v50, %v3116_v2 }
 0x624   :  { %3134 = vst.msk [vmem:[#allocation2 + $0x78] sm:$0xff] %vm60_vm0, %v3117_v38 }
 0x625   :  { %3147 = dma.vmem_to_hbm [thread:$0]  %s3140_s0, 2048, %s3142_s16, [#allocation3], %s3839_s17, %s3839_s17, %s3840_s18  }
 0x626   :  { %3833 = dma.done.wait [#allocation3], 2048  }
 0x627   :  { %3834 = vsyncadd [#allocation3], 4294965248 }
 0x628   :  { %3152 = vsyncpa [#allocation3], 1 }

// kernel: tpu_custom_call.1
= control target key start
LH: loop header
LB: loop body
LE: loop exit
PB: predicated region body
PF: predicated region fallthrough
CT: control target
= control target key end

     0   :  { %s5757_s0 = inlined_call_operand.vmem [shape: f32[8,16,32], index: 0, kind: input, shape index: {}]   ;;  %s5758_s1 = inlined_call_operand.vmem [shape: f32[32,96], index: 1, kind: input, shape index: {}]   ;;  %s5759_s2 = inlined_call_operand.vmem [shape: f32[32,32], index: 2, kind: input, shape index: {}]   ;;  %s5760_s3 = inlined_call_operand.vmem [shape: f32[1,96], index: 3, kind: input, shape index: {}]   ;;  %s5761_s4 = inlined_call_operand.vmem [shape: f32[1,32], index: 4, kind: input, shape index: {}]   ;;  %s5762_s5 = inlined_call_operand.vmem [shape: f32[96,24], index: 5, kind: input, shape index: {}]   ;;  %s5763_s6 = inlined_call_operand.vmem [shape: f32[24,96], index: 6, kind: input, shape index: {}]   ;;  %s5764_s7 = inlined_call_operand.vmem [shape: f32[8,32], index: 7, kind: input, shape index: {}]   ;;  %s5765_s8 = inlined_call_operand.vmem [shape: f32[128,8], index: 8, kind: input, shape index: {}]   ;;  %s5766_s9 = inlined_call_operand.vmem [shape: f32[8,128], index: 9, kind: input, shape index: {}]   ;;  %s5767_s10 = inlined_call_operand.hbm [shape: f32[8,16,32], index: 10, kind: output, shape index: {}]  }
   0x1   :  { %v55_v0 = vld [vmem:[%s5758_s1 + $0x18] sm:$0xff]  ;;  %v54_v1 = vld [vmem:[%s5758_s1 + $0x10] sm:$0xff]  ;;  %v53_v2 = vld [vmem:[%s5758_s1 + $0x8] sm:$0xff] }
   0x2   :  { %121 = vmatpush.msra.mxu0 %v55_v0  ;;  %3377 = vmatpush.msra.mxu1 %v55_v0 }
   0x3   :  { %3378 = vmatpush.msra.mxu2 %v55_v0 }
   0x4   :  { %122 = vmatpush.msra.mxu0 %v54_v1  ;;  %3379 = vmatpush.msra.mxu1 %v54_v1 }
   0x5   :  { %15 = vsyncpa [#allocation3], 0  ;;  %v52_v3 = vld [vmem:[%s5758_s1] sm:$0xff]  ;;  %3380 = vmatpush.msra.mxu2 %v54_v1  ;;  %vm60_vm0 = vcmask 261120   ;;  %v37_v5 = vld [vmem:[%s5757_s0 + $0x8] sm:$0xff]  ;;  %vm202_vm1 = vcmask 785408  }
   0x6   :  { %123 = vmatpush.msra.mxu0 %v53_v2  ;;  %v36_v4 = vld [vmem:[%s5757_s0] sm:$0xff]  ;;  %3381 = vmatpush.msra.mxu1 %v53_v2  ;;  %v38_v6 = vld [vmem:[%s5757_s0 + $0x10] sm:$0xff]  ;;  %v39_v7 = vld [vmem:[%s5757_s0 + $0x18] sm:$0xff]  ;;  %vm495_vm4 = vcmask 195584   ;;  %s3837_s21 = smov 64   ;;  %s3141_s16 = sshll.u32 %s5767_s10, 4  ;;  %s3142_s16 = int_to_ptr.hbm [resolvable:$true] %s3141_s16 }
   0x7   :  { %3382 = vmatpush.msra.mxu2 %v53_v2  ;;  %v44_v8 = vld [vmem:[%s5757_s0 + $0x40] sm:$0xff]  ;;  %v201_v9 = vld [vmem:[%s5762_s5 + $0x58] sm:$0xff]  ;;  %v200_v10 = vld [vmem:[%s5762_s5 + $0x50] sm:$0xff]  ;;  %s3839_s17 = smov 128   ;;  %s3840_s18 = smov 8  }
   0x8   :  { %124 = vmatpush.msra.mxu0 %v52_v3  ;;  %3383 = vmatpush.msra.mxu1 %v52_v3  ;;  %v199_v11 = vld [vmem:[%s5762_s5 + $0x48] sm:$0xff]  ;;  %v40_v12 = vld [vmem:[%s5757_s0 + $0x20] sm:$0xff]  ;;  %v197_v15 = vld [vmem:[%s5762_s5 + $0x38] sm:$0xff] }
   0x9   :  { %3153 = vmatmul.msk.f32.vlgmr.msra.gmra.mxu0 %vm60_vm0, %v36_v4  ;;  %3384 = vmatpush.msra.mxu2 %v52_v3  ;;  %v198_v13 = vld [vmem:[%s5762_s5 + $0x40] sm:$0xff]  ;;  %v45_v14 = vld [vmem:[%s5757_s0 + $0x48] sm:$0xff]  ;;  %v50_v16 = vld [vmem:[%s5757_s0 + $0x70] sm:$0xff] }
   0xa   :  { %3161 = vmatmul.msk.f32.vlgmr.msra.gmra.mxu1 %vm60_vm0, %v44_v8  ;;  %v196_v17 = vld [vmem:[%s5762_s5 + $0x30] sm:$0xff]  ;;  %3167 = vmatmul.msk.f32.vlgmr.msra.gmra.mxu2 %vm60_vm0, %v50_v16  ;;  %v195_v18 = vld [vmem:[%s5762_s5 + $0x28] sm:$0xff]  ;;  %v194_v20 = vld [vmem:[%s5762_s5 + $0x20] sm:$0xff] }
   0xb   :  { %255 = vmatpush.msrb.mxu1 %v201_v9  ;;  %v41_v19 = vld [vmem:[%s5757_s0 + $0x28] sm:$0xff]  ;;  %v46_v21 = vld [vmem:[%s5757_s0 + $0x50] sm:$0xff]  ;;  %v51_v22 = vld [vmem:[%s5757_s0 + $0x78] sm:$0xff] }
   0xc   :  { %v193_v23 = vld [vmem:[%s5762_s5 + $0x18] sm:$0xff]  ;;  %v42_v24 = vld [vmem:[%s5757_s0 + $0x30] sm:$0xff]  ;;  %v48_v27 = vld [vmem:[%s5757_s0 + $0x60] sm:$0xff] }
   0xd   :  { %256 = vmatpush.msrb.mxu1 %v200_v10  ;;  %v47_v25 = vld [vmem:[%s5757_s0 + $0x58] sm:$0xff]  ;;  %v49_v28 = vld [vmem:[%s5757_s0 + $0x68] sm:$0xff]  ;;  %v192_v29 = vld [vmem:[%s5762_s5 + $0x10] sm:$0xff] }
   0xe   :  { %v43_v26 = vld [vmem:[%s5757_s0 + $0x38] sm:$0xff]  ;;  %v191_v30 = vld [vmem:[%s5762_s5 + $0x8] sm:$0xff]  ;;  %v190_v31 = vld [vmem:[%s5762_s5] sm:$0xff] }
   0xf   :  { %257 = vmatpush.msrb.mxu1 %v199_v11  ;;  %v4011_v32 = vld [vmem:[%s5760_s3] ss:$0 sm:$0xff]  ;;  %v493_v16 = vld [vmem:[%s5763_s6 + $0x8] sm:$0xff] }
  0x11   :  { %3154 = vmatmul.msk.f32.gmra.mxu0 %vm60_vm0, %v37_v5  ;;  %258 = vmatpush.msrb.mxu1 %v198_v13 }
  0x12   :  { %3162 = vmatmul.msk.f32.gmra.mxu1 %vm60_vm0, %v45_v14  ;;  %3168 = vmatmul.msk.f32.gmra.mxu2 %vm60_vm0, %v51_v22  ;;  %v494_v14 = vld [vmem:[%s5763_s6 + $0x10] sm:$0xff] }
  0x13   :  { %259 = vmatpush.msrb.mxu1 %v197_v15  ;;  %557 = vmatpush.msrb.mxu2 %v494_v14 }
  0x15   :  { %260 = vmatpush.msrb.mxu1 %v196_v17  ;;  %558 = vmatpush.msrb.mxu2 %v493_v16 }
  0x17   :  { %261 = vmatpush.msrb.mxu1 %v195_v18  ;;  %v492_v18 = vld [vmem:[%s5763_s6] sm:$0xff]  ;;  %s3835_s6 = smov 32  }
  0x18   :  { %559 = vmatpush.msrb.mxu2 %v492_v18 }
  0x19   :  { %3155 = vmatmul.msk.f32.gmra.mxu0 %vm60_vm0, %v38_v6  ;;  %262 = vmatpush.msrb.mxu1 %v194_v20  ;;  %v4121_v20 = vld [vmem:[%s5764_s7] sm:$0xff]  ;;  %s3836_s7 = smov 96  }
  0x1a   :  { %3163 = vmatmul.msk.f32.gmra.mxu1 %vm60_vm0, %v46_v21  ;;  %v633_v21 = vrot.slane %v4121_v20, 7  ;;  %v631_v22 = vrot.slane %v4121_v20, 5 }
  0x1b   :  { %263 = vmatpush.msrb.mxu1 %v193_v23 }
  0x1c   :  { %v4125_v23 = vperm.slane %v633_v21, 0 }
  0x1d   :  { %264 = vmatpush.msrb.mxu1 %v192_v29  ;;  %v629_v29 = vrot.slane %v4121_v20, 3 }
  0x1e   :  { %656 = vrot.lane.b32.xlu0 %v4125_v23, %s3835_s6 }
  0x1f   :  { %265 = vmatpush.msrb.mxu1 %v191_v30 }
  0x21   :  { %3156 = vmatmul.msk.f32.gmra.mxu0 %vm60_vm0, %v39_v7  ;;  %266 = vmatpush.msrb.mxu1 %v190_v31 }
  0x22   :  { %3164 = vmatmul.msk.f32.gmra.mxu1 %vm60_vm0, %v47_v25 }
  0x29   :  { %3157 = vmatmul.msk.f32.gmra.mxu0 %vm60_vm0, %v40_v12 }
  0x2a   :  { %3165 = vmatmul.msk.f32.gmra.mxu1 %vm60_vm0, %v48_v27  ;;  %v632_v27 = vrot.slane %v4121_v20, 6 }
  0x2c   :  { %v4136_v30 = vperm.slane %v632_v27, 0 }
  0x2e   :  { %654 = vrot.lane.b32.xlu0 %v4136_v30, %s3835_s6 }
  0x31   :  { %3158 = vmatmul.msk.f32.gmra.mxu0 %vm60_vm0, %v41_v19 }
  0x32   :  { %3166 = vmatmul.msk.f32.gmra.mxu1 %vm60_vm0, %v49_v28  ;;  %v630_v28 = vrot.slane %v4121_v20, 4 }
  0x34   :  { %v4138_v31 = vperm.slane %v630_v28, 0 }
  0x39   :  { %3159 = vmatmul.msk.f32.gmra.mxu0 %vm60_vm0, %v42_v24  ;;  %v4127_v24 = vperm.slane %v631_v22, 0 }
  0x3b   :  { %652 = vrot.lane.b32.xlu1 %v4127_v24, %s3835_s6 }
  0x41   :  { %3160 = vmatmul.msk.f32.gmra.mxu0 %vm60_vm0, %v43_v26 }
  0x43   :  { %650 = vrot.lane.b32.xlu1 %v4138_v31, %s3835_s6 }
  0x86   :  { %v126_v33 = vpop.f32.mrf.mxu0 }
  0x87   :  { %v4014_v34 = vadd.f32 %v4011_v32, %v126_v33  ;;  %v150_v52 = vpop.f32.mrf.mxu1 }
  0x88   :  { %v4062_v59 = vadd.f32 %v4011_v32, %v150_v52 }
  0x89   :  { %v174_v35 = vmul.f32 %v4014_v34, %v4014_v34 }
  0x8a   :  { %v182_v60 = vmul.f32 %v4062_v59, %v4062_v59 }
  0x8b   :  { %3169 = vmatmul.msk.f32.vlgmr.msrb.gmra.mxu1 %vm202_vm1, %v174_v35 }
  0x8d   :  { %v168_v10 = vpop.f32.mrf.mxu2 }
  0x8e   :  { %v129_v36 = vpop.f32.mrf.mxu0  ;;  %v4098_v12 = vadd.f32 %v4011_v32, %v168_v10 }
  0x8f   :  { %v4020_v37 = vadd.f32 %v4011_v32, %v129_v36  ;;  %v153_v57 = vpop.f32.mrf.mxu1 }
  0x90   :  { %v4068_v62 = vadd.f32 %v4011_v32, %v153_v57  ;;  %v188_v13 = vmul.f32 %v4098_v12, %v4098_v12  ;;  %v627_v57 = vrot.slane %v4121_v20, 1 }
  0x91   :  { %v175_v38 = vmul.f32 %v4020_v37, %v4020_v37 }
  0x92   :  { %v183_v63 = vmul.f32 %v4068_v62, %v4068_v62 }
  0x93   :  { %3170 = vmatmul.msk.f32.gmra.mxu1 %vm202_vm1, %v175_v38 }
  0x95   :  { %v171_v15 = vpop.f32.mrf.mxu2 }
  0x96   :  { %v132_v39 = vpop.f32.mrf.mxu0  ;;  %v4110_v17 = vadd.f32 %v4011_v32, %v171_v15 }
  0x97   :  { %v4026_v40 = vadd.f32 %v4011_v32, %v132_v39  ;;  %v156_v61 = vpop.f32.mrf.mxu1 }
  0x98   :  { %v4074_v0 = vadd.f32 %v4011_v32, %v156_v61  ;;  %v189_v19 = vmul.f32 %v4110_v17, %v4110_v17 }
  0x99   :  { %v176_v41 = vmul.f32 %v4026_v40, %v4026_v40 }
  0x9a   :  { %v184_v2 = vmul.f32 %v4074_v0, %v4074_v0 }
  0x9b   :  { %3171 = vmatmul.msk.f32.gmra.mxu1 %vm202_vm1, %v176_v41  ;;  %v628_v41 = vrot.slane %v4121_v20, 2 }
  0x9e   :  { %v135_v42 = vpop.f32.mrf.mxu0 }
  0x9f   :  { %v4032_v43 = vadd.f32 %v4011_v32, %v135_v42  ;;  %v159_v1 = vpop.f32.mrf.mxu1 }
  0xa0   :  { %v4080_v3 = vadd.f32 %v4011_v32, %v159_v1 }
  0xa1   :  { %v177_v44 = vmul.f32 %v4032_v43, %v4032_v43 }
  0xa2   :  { %v185_v5 = vmul.f32 %v4080_v3, %v4080_v3 }
  0xa3   :  { %3172 = vmatmul.msk.f32.gmra.mxu1 %vm202_vm1, %v177_v44  ;;  %v4149_v44 = vperm.slane %v628_v41, 0 }
  0xa6   :  { %v138_v45 = vpop.f32.mrf.mxu0 }
  0xa7   :  { %v4038_v46 = vadd.f32 %v4011_v32, %v138_v45  ;;  %v162_v4 = vpop.f32.mrf.mxu1 }
  0xa8   :  { %v4086_v6 = vadd.f32 %v4011_v32, %v162_v4 }
  0xa9   :  { %v178_v47 = vmul.f32 %v4038_v46, %v4038_v46 }
  0xaa   :  { %v186_v7 = vmul.f32 %v4086_v6, %v4086_v6 }
  0xab   :  { %3173 = vmatmul.msk.f32.gmra.mxu1 %vm202_vm1, %v178_v47 }
  0xae   :  { %v141_v48 = vpop.f32.mrf.mxu0 }
  0xaf   :  { %v4044_v49 = vadd.f32 %v4011_v32, %v141_v48  ;;  %v165_v8 = vpop.f32.mrf.mxu1 }
  0xb0   :  { %v4092_v9 = vadd.f32 %v4011_v32, %v165_v8 }
  0xb1   :  { %v179_v50 = vmul.f32 %v4044_v49, %v4044_v49 }
  0xb2   :  { %v187_v11 = vmul.f32 %v4092_v9, %v4092_v9 }
  0xb3   :  { %3174 = vmatmul.msk.f32.gmra.mxu1 %vm202_vm1, %v179_v50 }
  0xb6   :  { %v144_v51 = vpop.f32.mrf.mxu0 }
  0xb7   :  { %v4050_v53 = vadd.f32 %v4011_v32, %v144_v51 }
  0xb9   :  { %v180_v54 = vmul.f32 %v4050_v53, %v4050_v53 }
  0xbb   :  { %3175 = vmatmul.msk.f32.gmra.mxu1 %vm202_vm1, %v180_v54 }
  0xbe   :  { %v147_v55 = vpop.f32.mrf.mxu0 }
  0xbf   :  { %v4056_v56 = vadd.f32 %v4011_v32, %v147_v55  ;;  %v4140_v32 = vperm.slane %v629_v29, 0 }
  0xc1   :  { %v181_v58 = vmul.f32 %v4056_v56, %v4056_v56  ;;  %648 = vrot.lane.b32.xlu2 %v4140_v32, %s3835_s6 }
  0xc3   :  { %3176 = vmatmul.msk.f32.gmra.mxu1 %vm202_vm1, %v181_v58 }
  0xc9   :  { %646 = vrot.lane.b32.xlu2 %v4149_v44, %s3835_s6 }
  0xcb   :  { %3177 = vmatmul.msk.f32.gmra.mxu1 %vm202_vm1, %v182_v60  ;;  %v4155_v60 = vperm.slane %v627_v57, 0 }
  0xd1   :  { %644 = vrot.lane.b32.xlu2 %v4155_v60, %s3835_s6 }
  0xd3   :  { %3178 = vmatmul.msk.f32.gmra.mxu1 %vm202_vm1, %v183_v63 }
  0xdb   :  { %3179 = vmatmul.msk.f32.gmra.mxu1 %vm202_vm1, %v184_v2 }
  0xe3   :  { %3180 = vmatmul.msk.f32.gmra.mxu1 %vm202_vm1, %v185_v5 }
  0xeb   :  { %3181 = vmatmul.msk.f32.gmra.mxu1 %vm202_vm1, %v186_v7 }
  0xf3   :  { %3182 = vmatmul.msk.f32.gmra.mxu1 %vm202_vm1, %v187_v11  ;;  %v634_v11 = vperm.slane %v4121_v20, 0 }
  0xf5   :  { %642 = vrot.lane.b32.xlu2 %v634_v11, %s3835_s6 }
  0xfb   :  { %3183 = vmatmul.msk.f32.gmra.mxu1 %vm202_vm1, %v188_v13 }
 0x103   :  { %3184 = vmatmul.msk.f32.gmra.mxu1 %vm202_vm1, %v189_v19 }
 0x108   :  { %v268_v25 = vpop.f32.mrf.mxu1 }
 0x109   :  { %v316_v26 = vmax.f32 %v268_v25, 1e-24 }
 0x10b   :  { %3713 = vrsqrt.f32 %v316_v26  ;;  %vm338_vm3 = vweird.f32 %v316_v26 }
 0x110   :  { %v271_v33 = vpop.f32.mrf.mxu1 }
 0x111   :  { %v3714_v35 = vpop.eup %3713  ;;  %v317_v36 = vmax.f32 %v271_v33, 1e-24 }
 0x112   :  { %v333_v38 = vmul.f32 %v3714_v35, %v316_v26  ;;  %vm339_vm2 = vweird.f32 %v3714_v35 }
 0x113   :  { %3715 = vrsqrt.f32 %v317_v36  ;;  %vm340_vm5 = vmor %vm338_vm3, %vm339_vm2  ;;  %vm348_vm7 = vweird.f32 %v317_v36 }
 0x114   :  { %v334_v39 = vmul.f32 %v3714_v35, %v333_v38 }
 0x116   :  { %v335_v42 = vmul.f32 0.5, %v334_v39 }
 0x118   :  { %v336_v45 = vsub.f32 1.5, %v335_v42  ;;  %v274_v47 = vpop.f32.mrf.mxu1 }
 0x119   :  { %v3716_v48 = vpop.eup %3715  ;;  %v318_v50 = vmax.f32 %v274_v47, 1e-24 }
 0x11a   :  { %v343_v51 = vmul.f32 %v3716_v48, %v317_v36  ;;  %v337_v52 = vmul.f32 %v3714_v35, %v336_v45  ;;  %vm349_vm6 = vweird.f32 %v3716_v48 }
 0x11b   :  { %3717 = vrsqrt.f32 %v318_v50  ;;  %vm350_vm8 = vmor %vm348_vm7, %vm349_vm6  ;;  %vm358_vm9 = vweird.f32 %v318_v50 }
 0x11c   :  { %v344_v54 = vmul.f32 %v3716_v48, %v343_v51  ;;  %v341_v55 = vsel %vm340_vm5, %v3714_v35, %v337_v52 }
 0x11d   :  { %3185 = vmatmul.msk.f32.vlgmr.msrb.gmra.mxu2 %vm495_vm4, %v341_v55 }
 0x11e   :  { %v345_v58 = vmul.f32 0.5, %v344_v54 }
 0x120   :  { %v277_v61 = vpop.f32.mrf.mxu1  ;;  %v346_v63 = vsub.f32 1.5, %v345_v58 }
 0x121   :  { %v3718_v1 = vpop.eup %3717  ;;  %v319_v2 = vmax.f32 %v277_v61, 1e-24 }
 0x122   :  { %v353_v4 = vmul.f32 %v3718_v1, %v318_v50  ;;  %v347_v5 = vmul.f32 %v3716_v48, %v346_v63  ;;  %vm359_vm10 = vweird.f32 %v3718_v1 }
 0x123   :  { %3719 = vrsqrt.f32 %v319_v2  ;;  %vm360_vm11 = vmor %vm358_vm9, %vm359_vm10  ;;  %vm368_vm12 = vweird.f32 %v319_v2 }
 0x124   :  { %v354_v7 = vmul.f32 %v3718_v1, %v353_v4  ;;  %v351_v8 = vsel %vm350_vm8, %v3716_v48, %v347_v5 }
 0x125   :  { %3186 = vmatmul.msk.f32.gmra.mxu2 %vm495_vm4, %v351_v8 }
 0x126   :  { %v355_v10 = vmul.f32 0.5, %v354_v7 }
 0x128   :  { %v280_v13 = vpop.f32.mrf.mxu1  ;;  %v356_v14 = vsub.f32 1.5, %v355_v10 }
 0x129   :  { %v3720_v15 = vpop.eup %3719  ;;  %v320_v16 = vmax.f32 %v280_v13, 1e-24 }
 0x12a   :  { %v363_v18 = vmul.f32 %v3720_v15, %v319_v2  ;;  %v357_v19 = vmul.f32 %v3718_v1, %v356_v14  ;;  %vm369_vm13 = vweird.f32 %v3720_v15 }
 0x12b   :  { %3721 = vrsqrt.f32 %v320_v16  ;;  %vm370_vm14 = vmor %vm368_vm12, %vm369_vm13  ;;  %vm378_vm15 = vweird.f32 %v320_v16 }
 0x12c   :  { %v364_v21 = vmul.f32 %v3720_v15, %v363_v18  ;;  %v361_v22 = vsel %vm360_vm11, %v3718_v1, %v357_v19 }
 0x12d   :  { %3187 = vmatmul.msk.f32.gmra.mxu2 %vm495_vm4, %v361_v22 }
 0x12e   :  { %v365_v25 = vmul.f32 0.5, %v364_v21 }
 0x130   :  { %v283_v26 = vpop.f32.mrf.mxu1  ;;  %v366_v27 = vsub.f32 1.5, %v365_v25 }
 0x131   :  { %v3722_v28 = vpop.eup %3721  ;;  %v321_v29 = vmax.f32 %v283_v26, 1e-24 }
 0x132   :  { %v373_v33 = vmul.f32 %v3722_v28, %v320_v16  ;;  %v367_v35 = vmul.f32 %v3720_v15, %v366_v27  ;;  %vm379_vm1 = vweird.f32 %v3722_v28 }
 0x133   :  { %3723 = vrsqrt.f32 %v321_v29  ;;  %vm380_vm2 = vmor %vm378_vm15, %vm379_vm1  ;;  %vm388_vm3 = vweird.f32 %v321_v29 }
 0x134   :  { %v374_v36 = vmul.f32 %v3722_v28, %v373_v33  ;;  %v371_v38 = vsel %vm370_vm14, %v3720_v15, %v367_v35 }
 0x135   :  { %3188 = vmatmul.msk.f32.gmra.mxu2 %vm495_vm4, %v371_v38 }
 0x136   :  { %v375_v39 = vmul.f32 0.5, %v374_v36 }
 0x138   :  { %v286_v41 = vpop.f32.mrf.mxu1  ;;  %v376_v42 = vsub.f32 1.5, %v375_v39 }
 0x139   :  { %v3724_v45 = vpop.eup %3723  ;;  %v322_v47 = vmax.f32 %v286_v41, 1e-24 }
 0x13a   :  { %v383_v48 = vmul.f32 %v3724_v45, %v321_v29  ;;  %v377_v50 = vmul.f32 %v3722_v28, %v376_v42  ;;  %vm389_vm5 = vweird.f32 %v3724_v45 }
 0x13b   :  { %3725 = vrsqrt.f32 %v322_v47  ;;  %vm390_vm6 = vmor %vm388_vm3, %vm389_vm5  ;;  %vm398_vm7 = vweird.f32 %v322_v47 }
 0x13c   :  { %v384_v51 = vmul.f32 %v3724_v45, %v383_v48  ;;  %v381_v52 = vsel %vm380_vm2, %v3722_v28, %v377_v50 }
 0x13d   :  { %3189 = vmatmul.msk.f32.gmra.mxu2 %vm495_vm4, %v381_v52 }
 0x13e   :  { %v385_v54 = vmul.f32 0.5, %v384_v51 }
 0x140   :  { %v289_v55 = vpop.f32.mrf.mxu1  ;;  %v386_v57 = vsub.f32 1.5, %v385_v54 }
 0x141   :  { %v3726_v58 = vpop.eup %3725  ;;  %v323_v61 = vmax.f32 %v289_v55, 1e-24 }
 0x142   :  { %v393_v63 = vmul.f32 %v3726_v58, %v322_v47  ;;  %v387_v1 = vmul.f32 %v3724_v45, %v386_v57  ;;  %vm399_vm8 = vweird.f32 %v3726_v58 }
 0x143   :  { %3727 = vrsqrt.f32 %v323_v61  ;;  %vm400_vm9 = vmor %vm398_vm7, %vm399_vm8  ;;  %vm408_vm10 = vweird.f32 %v323_v61 }
 0x144   :  { %v394_v2 = vmul.f32 %v3726_v58, %v393_v63  ;;  %v391_v4 = vsel %vm390_vm6, %v3724_v45, %v387_v1 }
 0x145   :  { %3190 = vmatmul.msk.f32.gmra.mxu2 %vm495_vm4, %v391_v4 }
 0x146   :  { %v395_v5 = vmul.f32 0.5, %v394_v2 }
 0x148   :  { %v292_v7 = vpop.f32.mrf.mxu1  ;;  %v396_v8 = vsub.f32 1.5, %v395_v5 }
 0x149   :  { %v3728_v10 = vpop.eup %3727  ;;  %v324_v13 = vmax.f32 %v292_v7, 1e-24 }
 0x14a   :  { %v403_v14 = vmul.f32 %v3728_v10, %v323_v61  ;;  %v397_v15 = vmul.f32 %v3726_v58, %v396_v8  ;;  %vm409_vm11 = vweird.f32 %v3728_v10 }
 0x14b   :  { %3729 = vrsqrt.f32 %v324_v13  ;;  %vm410_vm12 = vmor %vm408_vm10, %vm409_vm11  ;;  %vm418_vm13 = vweird.f32 %v324_v13 }
 0x14c   :  { %v404_v16 = vmul.f32 %v3728_v10, %v403_v14  ;;  %v401_v18 = vsel %vm400_vm9, %v3726_v58, %v397_v15 }
 0x14d   :  { %3191 = vmatmul.msk.f32.gmra.mxu2 %vm495_vm4, %v401_v18 }
 0x14e   :  { %v405_v19 = vmul.f32 0.5, %v404_v16 }
 0x150   :  { %v295_v21 = vpop.f32.mrf.mxu1  ;;  %v406_v22 = vsub.f32 1.5, %v405_v19 }
 0x151   :  { %v3730_v25 = vpop.eup %3729  ;;  %v325_v26 = vmax.f32 %v295_v21, 1e-24 }
 0x152   :  { %v413_v27 = vmul.f32 %v3730_v25, %v324_v13  ;;  %v407_v28 = vmul.f32 %v3728_v10, %v406_v22  ;;  %vm419_vm14 = vweird.f32 %v3730_v25 }
 0x153   :  { %3731 = vrsqrt.f32 %v325_v26  ;;  %vm420_vm15 = vmor %vm418_vm13, %vm419_vm14  ;;  %vm428_vm1 = vweird.f32 %v325_v26 }
 0x154   :  { %v414_v29 = vmul.f32 %v3730_v25, %v413_v27  ;;  %v411_v33 = vsel %vm410_vm12, %v3728_v10, %v407_v28 }
 0x155   :  { %3192 = vmatmul.msk.f32.gmra.mxu2 %vm495_vm4, %v411_v33 }
 0x156   :  { %v415_v35 = vmul.f32 0.5, %v414_v29 }
 0x158   :  { %v298_v36 = vpop.f32.mrf.mxu1  ;;  %v416_v38 = vsub.f32 1.5, %v415_v35 }
 0x159   :  { %v3732_v39 = vpop.eup %3731  ;;  %v326_v41 = vmax.f32 %v298_v36, 1e-24 }
 0x15a   :  { %v423_v42 = vmul.f32 %v3732_v39, %v325_v26  ;;  %v417_v45 = vmul.f32 %v3730_v25, %v416_v38  ;;  %vm429_vm2 = vweird.f32 %v3732_v39 }
 0x15b   :  { %3733 = vrsqrt.f32 %v326_v41  ;;  %vm430_vm3 = vmor %vm428_vm1, %vm429_vm2  ;;  %vm438_vm5 = vweird.f32 %v326_v41 }
 0x15c   :  { %v424_v47 = vmul.f32 %v3732_v39, %v423_v42  ;;  %v421_v48 = vsel %vm420_vm15, %v3730_v25, %v417_v45 }
 0x15d   :  { %3193 = vmatmul.msk.f32.gmra.mxu2 %vm495_vm4, %v421_v48 }
 0x15e   :  { %v425_v50 = vmul.f32 0.5, %v424_v47 }
 0x160   :  { %v301_v51 = vpop.f32.mrf.mxu1  ;;  %v426_v52 = vsub.f32 1.5, %v425_v50 }
 0x161   :  { %v3734_v54 = vpop.eup %3733  ;;  %v327_v55 = vmax.f32 %v301_v51, 1e-24 }
 0x162   :  { %v433_v57 = vmul.f32 %v3734_v54, %v326_v41  ;;  %v427_v58 = vmul.f32 %v3732_v39, %v426_v52  ;;  %vm439_vm6 = vweird.f32 %v3734_v54 }
 0x163   :  { %3735 = vrsqrt.f32 %v327_v55  ;;  %vm440_vm7 = vmor %vm438_vm5, %vm439_vm6  ;;  %vm448_vm8 = vweird.f32 %v327_v55 }
 0x164   :  { %v434_v61 = vmul.f32 %v3734_v54, %v433_v57  ;;  %v431_v63 = vsel %vm430_vm3, %v3732_v39, %v427_v58 }
 0x165   :  { %3194 = vmatmul.msk.f32.gmra.mxu2 %vm495_vm4, %v431_v63 }
 0x166   :  { %v435_v1 = vmul.f32 0.5, %v434_v61 }
 0x168   :  { %v304_v2 = vpop.f32.mrf.mxu1  ;;  %v436_v4 = vsub.f32 1.5, %v435_v1 }
 0x169   :  { %v3736_v5 = vpop.eup %3735  ;;  %v328_v7 = vmax.f32 %v304_v2, 1e-24 }
 0x16a   :  { %v443_v8 = vmul.f32 %v3736_v5, %v327_v55  ;;  %v437_v10 = vmul.f32 %v3734_v54, %v436_v4  ;;  %vm449_vm9 = vweird.f32 %v3736_v5 }
 0x16b   :  { %3737 = vrsqrt.f32 %v328_v7  ;;  %vm450_vm10 = vmor %vm448_vm8, %vm449_vm9  ;;  %vm458_vm11 = vweird.f32 %v328_v7 }
 0x16c   :  { %v444_v13 = vmul.f32 %v3736_v5, %v443_v8  ;;  %v441_v14 = vsel %vm440_vm7, %v3734_v54, %v437_v10  ;;  %v4177_v10 = vpop.permute.xlu2 %648 }
 0x16d   :  { %3195 = vmatmul.msk.f32.gmra.mxu2 %vm495_vm4, %v441_v14 }
 0x16e   :  { %v445_v15 = vmul.f32 0.5, %v444_v13 }
 0x170   :  { %v307_v16 = vpop.f32.mrf.mxu1  ;;  %v446_v18 = vsub.f32 1.5, %v445_v15  ;;  %v4180_v15 = vpop.permute.xlu1 %652 }
 0x171   :  { %v3738_v19 = vpop.eup %3737  ;;  %v329_v21 = vmax.f32 %v307_v16, 1e-24 }
 0x172   :  { %v453_v22 = vmul.f32 %v3738_v19, %v328_v7  ;;  %v447_v25 = vmul.f32 %v3736_v5, %v446_v18  ;;  %vm459_vm12 = vweird.f32 %v3738_v19  ;;  %v4184_v18 = vpop.permute.xlu0 %656 }
 0x173   :  { %3739 = vrsqrt.f32 %v329_v21  ;;  %vm460_vm13 = vmor %vm458_vm11, %vm459_vm12  ;;  %vm468_vm14 = vweird.f32 %v329_v21  ;;  %vm2172_vm11 = vcmask 64512  }
 0x174   :  { %v454_v26 = vmul.f32 %v3738_v19, %v453_v22  ;;  %v451_v27 = vsel %vm450_vm10, %v3736_v5, %v447_v25  ;;  %v4182_v16 = vpop.permute.xlu2 %646 }
 0x175   :  { %3196 = vmatmul.msk.f32.gmra.mxu2 %vm495_vm4, %v451_v27 }
 0x176   :  { %v455_v28 = vmul.f32 0.5, %v454_v26 }
 0x178   :  { %v456_v29 = vsub.f32 1.5, %v455_v28  ;;  %v310_v33 = vpop.f32.mrf.mxu1 }
 0x179   :  { %v3740_v35 = vpop.eup %3739  ;;  %v330_v36 = vmax.f32 %v310_v33, 1e-24 }
 0x17a   :  { %v463_v38 = vmul.f32 %v3740_v35, %v329_v21  ;;  %v457_v39 = vmul.f32 %v3738_v19, %v456_v29  ;;  %vm469_vm15 = vweird.f32 %v3740_v35  ;;  %v4186_v21 = vpop.permute.xlu1 %650 }
 0x17b   :  { %3741 = vrsqrt.f32 %v330_v36  ;;  %vm470_vm1 = vmor %vm468_vm14, %vm469_vm15  ;;  %vm478_vm2 = vweird.f32 %v330_v36 }
 0x17c   :  { %v464_v41 = vmul.f32 %v3740_v35, %v463_v38  ;;  %v461_v42 = vsel %vm460_vm13, %v3738_v19, %v457_v39  ;;  %v4199_v28 = vpop.permute.xlu2 %644 }
 0x17d   :  { %3197 = vmatmul.msk.f32.gmra.mxu2 %vm495_vm4, %v461_v42 }
 0x17e   :  { %v465_v45 = vmul.f32 0.5, %v464_v41 }
 0x180   :  { %v466_v47 = vsub.f32 1.5, %v465_v45  ;;  %v313_v48 = vpop.f32.mrf.mxu1 }
 0x181   :  { %v3742_v50 = vpop.eup %3741  ;;  %v331_v51 = vmax.f32 %v313_v48, 1e-24 }
 0x182   :  { %v473_v52 = vmul.f32 %v3742_v50, %v330_v36  ;;  %v467_v54 = vmul.f32 %v3740_v35, %v466_v47  ;;  %vm479_vm3 = vweird.f32 %v3742_v50 }
 0x183   :  { %3743 = vrsqrt.f32 %v331_v51  ;;  %vm480_vm5 = vmor %vm478_vm2, %vm479_vm3  ;;  %vm488_vm6 = vweird.f32 %v331_v51 }
 0x184   :  { %v474_v55 = vmul.f32 %v3742_v50, %v473_v52  ;;  %v471_v57 = vsel %vm470_vm1, %v3740_v35, %v467_v54  ;;  %v4216_v39 = vpop.permute.xlu2 %642 }
 0x185   :  { %3198 = vmatmul.msk.f32.gmra.mxu2 %vm495_vm4, %v471_v57 }
 0x186   :  { %v475_v58 = vmul.f32 0.5, %v474_v55 }
 0x188   :  { %v476_v61 = vsub.f32 1.5, %v475_v58 }
 0x189   :  { %v3744_v63 = vpop.eup %3743 }
 0x18a   :  { %v483_v1 = vmul.f32 %v3744_v63, %v331_v51  ;;  %v477_v2 = vmul.f32 %v3742_v50, %v476_v61  ;;  %vm489_vm7 = vweird.f32 %v3744_v63 }
 0x18b   :  { %vm490_vm8 = vmor %vm488_vm6, %vm489_vm7 }
 0x18c   :  { %v484_v4 = vmul.f32 %v3744_v63, %v483_v1  ;;  %v481_v5 = vsel %vm480_vm5, %v3742_v50, %v477_v2 }
 0x18d   :  { %3199 = vmatmul.msk.f32.gmra.mxu2 %vm495_vm4, %v481_v5 }
 0x18e   :  { %v485_v7 = vmul.f32 0.5, %v484_v4 }
 0x190   :  { %v486_v8 = vsub.f32 1.5, %v485_v7 }
 0x192   :  { %v487_v13 = vmul.f32 %v3744_v63, %v486_v8 }
 0x194   :  { %v491_v14 = vsel %vm490_vm8, %v3744_v63, %v487_v13 }
 0x195   :  { %3200 = vmatmul.msk.f32.gmra.mxu2 %vm495_vm4, %v491_v14 }
 0x1a0   :  { %v561_v19 = vpop.f32.mrf.mxu2 }
 0x1a1   :  { %v4189_v22 = vmul.f32 %v561_v19, %v4014_v34  ;;  %v4202_v34 = vpop.permute.xlu0 %654 }
 0x1a3   :  { %v680_v25 = vmul.f32 %v4184_v18, %v4189_v22  ;;  %v676_v26 = vmul.f32 %v4180_v15, %v4189_v22  ;;  %v674_v27 = vmul.f32 %v4186_v21, %v4189_v22  ;;  %v678_v35 = vmul.f32 %v4202_v34, %v4189_v22 }
 0x1a4   :  { %v672_v36 = vmul.f32 %v4177_v10, %v4189_v22  ;;  %v666_v41 = vmul.f32 %v4216_v39, %v4189_v22  ;;  %v668_v45 = vmul.f32 %v4199_v28, %v4189_v22 }
 0x1a5   :  { %990 = vrot.lane.b32.xlu1 %v680_v25, %s3836_s7  ;;  %982 = vrot.lane.b32.xlu2 %v676_v26, %s3836_s7 }
 0x1a6   :  { %978 = vrot.lane.b32.xlu0 %v674_v27, %s3836_s7 }
 0x1a8   :  { %v564_v29 = vpop.f32.mrf.mxu2 }
 0x1a9   :  { %v4205_v33 = vmul.f32 %v564_v29, %v4020_v37  ;;  %v670_v37 = vmul.f32 %v4182_v16, %v4189_v22 }
 0x1ab   :  { %v681_v38 = vmul.f32 %v4184_v18, %v4205_v33  ;;  %v679_v42 = vmul.f32 %v4202_v34, %v4205_v33  ;;  %v675_v47 = vmul.f32 %v4186_v21, %v4205_v33  ;;  %v677_v50 = vmul.f32 %v4180_v15, %v4205_v33 }
 0x1ac   :  { %v673_v52 = vmul.f32 %v4177_v10, %v4205_v33  ;;  %v667_v55 = vmul.f32 %v4216_v39, %v4205_v33  ;;  %v671_v57 = vmul.f32 %v4182_v16, %v4205_v33  ;;  %v669_v1 = vmul.f32 %v4199_v28, %v4205_v33 }
 0x1ad   :  { %986 = vrot.lane.b32.xlu1 %v678_v35, %s3836_s7  ;;  %974 = vrot.lane.b32.xlu2 %v672_v36, %s3836_s7 }
 0x1ae   :  { %992 = vrot.lane.b32.xlu0 %v681_v38, %s3836_s7 }
 0x1b0   :  { %v567_v48 = vpop.f32.mrf.mxu2 }
 0x1b1   :  { %v4237_v51 = vmul.f32 %v567_v48, %v4026_v40 }
 0x1b3   :  { %v694_v54 = vmul.f32 %v4202_v34, %v4237_v51  ;;  %v682_v40 = vmul.f32 %v4216_v39, %v4237_v51  ;;  %v696_v61 = vmul.f32 %v4184_v18, %v4237_v51  ;;  %v692_v4 = vmul.f32 %v4180_v15, %v4237_v51 }
 0x1b4   :  { %v686_v5 = vmul.f32 %v4182_v16, %v4237_v51  ;;  %v690_v8 = vmul.f32 %v4186_v21, %v4237_v51  ;;  %v684_v14 = vmul.f32 %v4199_v28, %v4237_v51  ;;  %v688_v25 = vmul.f32 %v4177_v10, %v4237_v51 }
 0x1b5   :  { %970 = vrot.lane.b32.xlu2 %v670_v37, %s3836_s7  ;;  %962 = vrot.lane.b32.xlu1 %v666_v41, %s3836_s7 }
 0x1b6   :  { %988 = vrot.lane.b32.xlu0 %v679_v42, %s3836_s7 }
 0x1b8   :  { %v570_v58 = vpop.f32.mrf.mxu2 }
 0x1b9   :  { %v4258_v63 = vmul.f32 %v570_v58, %v4032_v43 }
 0x1bb   :  { %v697_v2 = vmul.f32 %v4184_v18, %v4258_v63  ;;  %v687_v43 = vmul.f32 %v4182_v16, %v4258_v63  ;;  %v695_v26 = vmul.f32 %v4202_v34, %v4258_v63  ;;  %v693_v27 = vmul.f32 %v4180_v15, %v4258_v63 }
 0x1bc   :  { %v685_v29 = vmul.f32 %v4199_v28, %v4258_v63  ;;  %v691_v38 = vmul.f32 %v4186_v21, %v4258_v63 }
 0x1bd   :  { %966 = vrot.lane.b32.xlu2 %v668_v45, %s3836_s7  ;;  %980 = vrot.lane.b32.xlu1 %v675_v47, %s3836_s7  ;;  %v689_v45 = vmul.f32 %v4177_v10, %v4258_v63 }
 0x1be   :  { %984 = vrot.lane.b32.xlu0 %v677_v50, %s3836_s7  ;;  %v683_v50 = vmul.f32 %v4216_v39, %v4258_v63 }
 0x1c0   :  { %v573_v7 = vpop.f32.mrf.mxu2 }
 0x1c1   :  { %v4279_v13 = vmul.f32 %v573_v7, %v4038_v46 }
 0x1c3   :  { %v712_v19 = vmul.f32 %v4184_v18, %v4279_v13  ;;  %v710_v46 = vmul.f32 %v4202_v34, %v4279_v13  ;;  %v708_v35 = vmul.f32 %v4180_v15, %v4279_v13  ;;  %v702_v41 = vmul.f32 %v4182_v16, %v4279_v13 }
 0x1c5   :  { %976 = vrot.lane.b32.xlu2 %v673_v52, %s3836_s7  ;;  %1095 = vrot.lane.b32.xlu1 %v694_v54, %s3836_s7 }
 0x1c6   :  { %964 = vrot.lane.b32.xlu0 %v667_v55, %s3836_s7 }
 0x1c8   :  { %v576_v36 = vpop.f32.mrf.mxu2 }
 0x1c9   :  { %v4309_v37 = vmul.f32 %v576_v36, %v4044_v49  ;;  %v698_v49 = vmul.f32 %v4216_v39, %v4279_v13 }
 0x1cb   :  { %v713_v42 = vmul.f32 %v4184_v18, %v4309_v37  ;;  %v711_v48 = vmul.f32 %v4202_v34, %v4309_v37  ;;  %v709_v54 = vmul.f32 %v4180_v15, %v4309_v37  ;;  %v707_v55 = vmul.f32 %v4186_v21, %v4309_v37 }
 0x1cc   :  { %v703_v58 = vmul.f32 %v4182_v16, %v4309_v37 }
 0x1cd   :  { %972 = vrot.lane.b32.xlu2 %v671_v57, %s3836_s7  ;;  %1071 = vrot.lane.b32.xlu1 %v682_v40, %s3836_s7  ;;  %v706_v57 = vmul.f32 %v4186_v21, %v4279_v13 }
 0x1ce   :  { %1099 = vrot.lane.b32.xlu0 %v696_v61, %s3836_s7  ;;  %v701_v61 = vmul.f32 %v4199_v28, %v4309_v37 }
 0x1d5   :  { %968 = vrot.lane.b32.xlu2 %v669_v1, %s3836_s7  ;;  %1101 = vrot.lane.b32.xlu1 %v697_v2, %s3836_s7  ;;  %v579_v1 = vpop.f32.mrf.mxu2  ;;  %v704_v2 = vmul.f32 %v4177_v10, %v4279_v13 }
 0x1d6   :  { %1091 = vrot.lane.b32.xlu0 %v692_v4, %s3836_s7  ;;  %v4354_v4 = vmul.f32 %v579_v1, %v4050_v53 }
 0x1dd   :  { %1079 = vrot.lane.b32.xlu2 %v686_v5, %s3836_s7  ;;  %1081 = vrot.lane.b32.xlu1 %v687_v43, %s3836_s7 }
 0x1de   :  { %1087 = vrot.lane.b32.xlu0 %v690_v8, %s3836_s7  ;;  %v699_v8 = vmul.f32 %v4216_v39, %v4309_v37 }
 0x1e5   :  { %1075 = vrot.lane.b32.xlu2 %v684_v14, %s3836_s7  ;;  %1208 = vrot.lane.b32.xlu1 %v712_v19, %s3836_s7  ;;  %v724_v14 = vmul.f32 %v4180_v15, %v4354_v4  ;;  %v700_v19 = vmul.f32 %v4199_v28, %v4279_v13 }
 0x1e6   :  { %1083 = vrot.lane.b32.xlu0 %v688_v25, %s3836_s7 }
 0x1ed   :  { %1097 = vrot.lane.b32.xlu2 %v695_v26, %s3836_s7  ;;  %1204 = vrot.lane.b32.xlu1 %v710_v46, %s3836_s7  ;;  %v726_v46 = vmul.f32 %v4202_v34, %v4354_v4 }
 0x1ee   :  { %1093 = vrot.lane.b32.xlu0 %v693_v27, %s3836_s7  ;;  %v705_v27 = vmul.f32 %v4177_v10, %v4309_v37 }
 0x1f5   :  { %1077 = vrot.lane.b32.xlu2 %v685_v29, %s3836_s7  ;;  %1200 = vrot.lane.b32.xlu1 %v708_v35, %s3836_s7  ;;  %v718_v29 = vmul.f32 %v4182_v16, %v4354_v4  ;;  %v582_v35 = vpop.f32.mrf.mxu2 }
 0x1f6   :  { %1089 = vrot.lane.b32.xlu0 %v691_v38, %s3836_s7 }
 0x1fd   :  { %1188 = vrot.lane.b32.xlu2 %v702_v41, %s3836_s7  ;;  %1210 = vrot.lane.b32.xlu1 %v713_v42, %s3836_s7  ;;  %v4381_v41 = vmul.f32 %v582_v35, %v4056_v56 }
 0x1fe   :  { %1085 = vrot.lane.b32.xlu0 %v689_v45, %s3836_s7  ;;  %v722_v45 = vmul.f32 %v4186_v21, %v4354_v4 }
 0x1ff   :  { %v4320_v47 = vpop.permute.xlu2 %982 }
 0x205   :  { %1180 = vrot.lane.b32.xlu2 %v698_v49, %s3836_s7  ;;  %1206 = vrot.lane.b32.xlu1 %v711_v48, %s3836_s7  ;;  %v728_v49 = vmul.f32 %v4184_v18, %v4354_v4  ;;  %v729_v48 = vmul.f32 %v4184_v18, %v4381_v41 }
 0x206   :  { %1073 = vrot.lane.b32.xlu0 %v683_v50, %s3836_s7 }
 0x207   :  { %v4331_v52 = vpop.permute.xlu2 %974 }
 0x20d   :  { %1202 = vrot.lane.b32.xlu1 %v709_v54, %s3836_s7  ;;  %1198 = vrot.lane.b32.xlu2 %v707_v55, %s3836_s7  ;;  %v716_v55 = vmul.f32 %v4199_v28, %v4354_v4 }
 0x20e   :  { %1196 = vrot.lane.b32.xlu0 %v706_v57, %s3836_s7  ;;  %v720_v57 = vmul.f32 %v4177_v10, %v4354_v4 }
 0x20f   :  { %v4342_v40 = vpop.permute.xlu2 %970 }
 0x215   :  { %1190 = vrot.lane.b32.xlu1 %v703_v58, %s3836_s7  ;;  %1186 = vrot.lane.b32.xlu2 %v701_v61, %s3836_s7  ;;  %v721_v58 = vmul.f32 %v4177_v10, %v4381_v41 }
 0x216   :  { %1192 = vrot.lane.b32.xlu0 %v704_v2, %s3836_s7 }
 0x217   :  { %v991_v5 = vpop.permute.xlu1 %990  ;;  %v4356_v43 = vpop.permute.xlu2 %966 }
 0x218   :  { %v979_v7 = vpop.permute.xlu0 %978 }
 0x21d   :  { %1182 = vrot.lane.b32.xlu1 %v699_v8, %s3836_s7  ;;  %1309 = vrot.lane.b32.xlu2 %v724_v14, %s3836_s7  ;;  %v714_v8 = vmul.f32 %v4216_v39, %v4354_v4  ;;  %v585_v14 = vpop.f32.mrf.mxu2 }
 0x21e   :  { %1184 = vrot.lane.b32.xlu0 %v700_v19, %s3836_s7 }
 0x21f   :  { %v987_v53 = vpop.permute.xlu1 %986  ;;  %v977_v25 = vpop.permute.xlu2 %976 }
 0x220   :  { %v993_v26 = vpop.permute.xlu0 %992 }
 0x221   :  { %3201 = vmatpush.xpose.msk.msra.mxu3 %vm60_vm0, %v993_v26  ;;  %v4426_v26 = vmul.f32 %v585_v14, %v4062_v59 }
 0x225   :  { %3202 = vmatpush.xpose.msk.msra.mxu3 %vm60_vm0, %v991_v5  ;;  %1313 = vrot.lane.b32.xlu1 %v726_v46, %s3836_s7  ;;  %v727_v5 = vmul.f32 %v4202_v34, %v4381_v41 }
 0x226   :  { %1194 = vrot.lane.b32.xlu0 %v705_v27, %s3836_s7  ;;  %1297 = vrot.lane.b32.xlu2 %v718_v29, %s3836_s7  ;;  %v725_v27 = vmul.f32 %v4180_v15, %v4381_v41  ;;  %v742_v29 = vmul.f32 %v4202_v34, %v4426_v26 }
 0x227   :  { %v4378_v36 = vpop.permute.xlu1 %962  ;;  %v973_v38 = vpop.permute.xlu2 %972 }
 0x228   :  { %v989_v42 = vpop.permute.xlu0 %988 }
 0x229   :  { %3203 = vmatpush.xpose.msk.msra.mxu3 %vm60_vm0, %v989_v42  ;;  %v719_v42 = vmul.f32 %v4182_v16, %v4381_v41 }
 0x22d   :  { %3204 = vmatpush.xpose.msk.msra.mxu3 %vm60_vm0, %v987_v53  ;;  %1305 = vrot.lane.b32.xlu1 %v722_v45, %s3836_s7  ;;  %v717_v45 = vmul.f32 %v4199_v28, %v4381_v41 }
 0x22e   :  { %1317 = vrot.lane.b32.xlu0 %v728_v49, %s3836_s7  ;;  %1319 = vrot.lane.b32.xlu2 %v729_v48, %s3836_s7 }
 0x22f   :  { %v981_v56 = vpop.permute.xlu1 %980  ;;  %v969_v50 = vpop.permute.xlu2 %968 }
 0x230   :  { %v985_v54 = vpop.permute.xlu0 %984 }
 0x231   :  { %3205 = vmatpush.xpose.msk.msra.mxu3 %vm60_vm0, %v985_v54  ;;  %v732_v54 = vmul.f32 %v4199_v28, %v4426_v26 }
 0x235   :  { %3206 = vmatpush.xpose.msk.msra.mxu3 %vm60_vm0, %v4320_v47  ;;  %1293 = vrot.lane.b32.xlu1 %v716_v55, %s3836_s7  ;;  %v715_v47 = vmul.f32 %v4216_v39, %v4381_v41  ;;  %v588_v55 = vpop.f32.mrf.mxu2 }
 0x236   :  { %1301 = vrot.lane.b32.xlu0 %v720_v57, %s3836_s7  ;;  %1303 = vrot.lane.b32.xlu2 %v721_v58, %s3836_s7 }
 0x237   :  { %v4406_v61 = vpop.permute.xlu1 %1095  ;;  %v4408_v1 = vpop.permute.xlu2 %1079 }
 0x238   :  { %v965_v2 = vpop.permute.xlu0 %964 }
 0x239   :  { %3207 = vmatpush.xpose.msk.msra.mxu3 %vm60_vm0, %v981_v56  ;;  %v740_v56 = vmul.f32 %v4180_v15, %v4426_v26 }
 0x23d   :  { %3208 = vmatpush.xpose.msk.msra.mxu3 %vm60_vm0, %v979_v7  ;;  %1315 = vrot.lane.b32.xlu1 %v727_v5, %s3836_s7  ;;  %v723_v7 = vmul.f32 %v4186_v21, %v4381_v41  ;;  %v4477_v5 = vmul.f32 %v588_v55, %v4068_v62 }
 0x23e   :  { %1289 = vrot.lane.b32.xlu0 %v714_v8, %s3836_s7  ;;  %1291 = vrot.lane.b32.xlu2 %v715_v47, %s3836_s7  ;;  %v738_v8 = vmul.f32 %v4186_v21, %v4426_v26 }
 0x23f   :  { %v4421_v19 = vpop.permute.xlu2 %1075  ;;  %v4423_v53 = vpop.permute.xlu1 %1071  ;;  %v745_v47 = vmul.f32 %v4184_v18, %v4477_v5 }
 0x240   :  { %v1100_v46 = vpop.permute.xlu0 %1099 }
 0x241   :  { %3209 = vmatpush.xpose.msk.msra.mxu3 %vm60_vm0, %v977_v25 }
 0x245   :  { %3210 = vmatpush.xpose.msk.msra.mxu3 %vm60_vm0, %v4331_v52  ;;  %1311 = vrot.lane.b32.xlu1 %v725_v27, %s3836_s7  ;;  %v736_v52 = vmul.f32 %v4177_v10, %v4426_v26  ;;  %v591_v27 = vpop.f32.mrf.mxu2 }
 0x246   :  { %1307 = vrot.lane.b32.xlu0 %v723_v7, %s3836_s7  ;;  %1422 = vrot.lane.b32.xlu2 %v742_v29, %s3836_s7  ;;  %v741_v7 = vmul.f32 %v4180_v15, %v4477_v5  ;;  %v739_v29 = vmul.f32 %v4186_v21, %v4477_v5 }
 0x247   :  { %v1102_v59 = vpop.permute.xlu1 %1101  ;;  %v1098_v25 = vpop.permute.xlu2 %1097 }
 0x248   :  { %v4440_v35 = vpop.permute.xlu0 %1091 }
 0x249   :  { %3211 = vmatpush.xpose.msk.msra.mxu3 %vm60_vm0, %v973_v38 }
 0x24d   :  { %3212 = vmatpush.xpose.msk.msra.mxu3 %vm60_vm0, %v4342_v40  ;;  %1299 = vrot.lane.b32.xlu1 %v719_v42, %s3836_s7  ;;  %v744_v40 = vmul.f32 %v4184_v18, %v4426_v26 }
 0x24e   :  { %1295 = vrot.lane.b32.xlu0 %v717_v45, %s3836_s7  ;;  %1410 = vrot.lane.b32.xlu2 %v736_v52, %s3836_s7  ;;  %v4510_v45 = vmul.f32 %v591_v27, %v4074_v0  ;;  %v743_v52 = vmul.f32 %v4202_v34, %v4477_v5 }
 0x24f   :  { %v4454_v49 = vpop.permute.xlu1 %1081  ;;  %v4456_v38 = vpop.permute.xlu2 %1077 }
 0x250   :  { %v4458_v48 = vpop.permute.xlu0 %1087 }
 0x251   :  { %3213 = vmatpush.xpose.msk.msra.mxu3 %vm60_vm0, %v969_v50 }
 0x255   :  { %3214 = vmatpush.xpose.msk.msra.mxu3 %vm60_vm0, %v4356_v43  ;;  %1418 = vrot.lane.b32.xlu1 %v740_v56, %s3836_s7  ;;  %v734_v43 = vmul.f32 %v4182_v16, %v4426_v26  ;;  %v752_v56 = vmul.f32 %v4177_v10, %v4510_v45 }
 0x256   :  { %1426 = vrot.lane.b32.xlu0 %v744_v40, %s3836_s7  ;;  %1402 = vrot.lane.b32.xlu2 %v732_v54, %s3836_s7  ;;  %v594_v40 = vpop.f32.mrf.mxu2 }
 0x257   :  { %v1209_v50 = vpop.permute.xlu1 %1208  ;;  %v4472_v57 = vpop.permute.xlu2 %1188  ;;  %v4528_v55 = vmul.f32 %v594_v40, %v4080_v3 }
 0x258   :  { %v4474_v58 = vpop.permute.xlu0 %1083 }
 0x259   :  { %3215 = vmatpush.xpose.msk.msra.mxu3 %vm60_vm0, %v965_v2  ;;  %v755_v27 = vmul.f32 %v4186_v21, %v4528_v55 }
 0x25d   :  { %3216 = vmatpush.xpose.msk.msra.mxu3 %vm60_vm0, %v4378_v36  ;;  %1406 = vrot.lane.b32.xlu1 %v734_v43, %s3836_s7  ;;  %v730_v36 = vmul.f32 %v4216_v39, %v4426_v26  ;;  %v737_v43 = vmul.f32 %v4177_v10, %v4477_v5 }
 0x25e   :  { %1414 = vrot.lane.b32.xlu0 %v738_v8, %s3836_s7  ;;  %1428 = vrot.lane.b32.xlu2 %v745_v47, %s3836_s7  ;;  %v731_v8 = vmul.f32 %v4216_v39, %v4477_v5  ;;  %v759_v47 = vmul.f32 %v4202_v34, %v4528_v55 }
 0x25f   :  { %v1205_v62 = vpop.permute.xlu1 %1204  ;;  %v4492_v2 = vpop.permute.xlu2 %1180 }
 0x260   :  { %3217 = vmatmul.msk.f32.vlgmr.msra.gmra.mxu3 %vm60_vm0, %v4189_v22  ;;  %v1094_v14 = vpop.permute.xlu0 %1093 }
 0x261   :  { %3219 = vmatpush.xpose.msk.msrb.mxu3 %vm60_vm0, %v1102_v59 }
 0x265   :  { %3220 = vmatpush.xpose.msk.msrb.mxu3 %vm60_vm0, %v1100_v46  ;;  %1398 = vrot.lane.b32.xlu1 %v730_v36, %s3836_s7  ;;  %v758_v36 = vmul.f32 %v4202_v34, %v4510_v45 }
 0x266   :  { %1420 = vrot.lane.b32.xlu0 %v741_v7, %s3836_s7  ;;  %1416 = vrot.lane.b32.xlu2 %v739_v29, %s3836_s7 }
 0x267   :  { %v1201_v59 = vpop.permute.xlu1 %1200  ;;  %v1199_v46 = vpop.permute.xlu2 %1198 }
 0x268   :  { %3218 = vmatmul.msk.f32.gmra.mxu3 %vm60_vm0, %v4205_v33  ;;  %v1090_v42 = vpop.permute.xlu0 %1089 }
 0x269   :  { %3221 = vmatpush.xpose.msk.msrb.mxu3 %vm60_vm0, %v1098_v25  ;;  %v735_v25 = vmul.f32 %v4182_v16, %v4477_v5 }
 0x26d   :  { %3222 = vmatpush.xpose.msk.msrb.mxu3 %vm60_vm0, %v4406_v61  ;;  %1424 = vrot.lane.b32.xlu1 %v743_v52, %s3836_s7  ;;  %v749_v52 = vmul.f32 %v4199_v28, %v4528_v55 }
 0x26e   :  { %1408 = vrot.lane.b32.xlu0 %v735_v25, %s3836_s7  ;;  %1519 = vrot.lane.b32.xlu2 %v752_v56, %s3836_s7  ;;  %v597_v25 = vpop.f32.mrf.mxu2 }
 0x26f   :  { %v1211_v0 = vpop.permute.xlu1 %1210  ;;  %v4524_v61 = vpop.permute.xlu2 %1186 }
 0x270   :  { %v1086_v54 = vpop.permute.xlu0 %1085  ;;  %3237 = vmatpush.xpose.msk.msra.mxu2 %vm60_vm0, %v1211_v0  ;;  %v748_v0 = vmul.f32 %v4199_v28, %v4510_v45 }
 0x271   :  { %3223 = vmatpush.xpose.msk.msrb.mxu3 %vm60_vm0, %v1094_v14 }
 0x274   :  { %3238 = vmatpush.xpose.msk.msra.mxu2 %vm60_vm0, %v1209_v50  ;;  %v733_v50 = vmul.f32 %v4199_v28, %v4477_v5 }
 0x275   :  { %3224 = vmatpush.xpose.msk.msrb.mxu3 %vm60_vm0, %v4440_v35  ;;  %1412 = vrot.lane.b32.xlu1 %v737_v43, %s3836_s7 }
 0x276   :  { %1400 = vrot.lane.b32.xlu0 %v731_v8, %s3836_s7  ;;  %1533 = vrot.lane.b32.xlu2 %v759_v47, %s3836_s7  ;;  %v600_v43 = vpop.f32.mrf.mxu2  ;;  %v750_v8 = vmul.f32 %v4182_v16, %v4510_v45  ;;  %v761_v47 = vmul.f32 %v4184_v18, %v4528_v55 }
 0x277   :  { %v1207_v3 = vpop.permute.xlu1 %1206  ;;  %v4543_v35 = vpop.permute.xlu2 %1309 }
 0x278   :  { %v1074_v14 = vpop.permute.xlu0 %1073  ;;  %3239 = vmatpush.xpose.msk.msra.mxu2 %vm60_vm0, %v1207_v3 }
 0x279   :  { %3225 = vmatpush.xpose.msk.msrb.mxu3 %vm60_vm0, %v1090_v42  ;;  %v754_v42 = vmul.f32 %v4186_v21, %v4510_v45 }
 0x27c   :  { %3240 = vmatpush.xpose.msk.msra.mxu2 %vm60_vm0, %v1205_v62  ;;  %v760_v62 = vmul.f32 %v4184_v18, %v4510_v45 }
 0x27d   :  { %3226 = vmatpush.xpose.msk.msrb.mxu3 %vm60_vm0, %v4458_v48  ;;  %1404 = vrot.lane.b32.xlu1 %v733_v50, %s3836_s7 }
 0x27e   :  { %1531 = vrot.lane.b32.xlu0 %v758_v36, %s3836_s7  ;;  %1525 = vrot.lane.b32.xlu2 %v755_v27, %s3836_s7  ;;  %v4612_v36 = vmul.f32 %v600_v43, %v4092_v9  ;;  %v603_v27 = vpop.f32.mrf.mxu2 }
 0x27f   :  { %v1203_v48 = vpop.permute.xlu1 %1202 }
 0x280   :  { %v1197_v7 = vpop.permute.xlu0 %1196  ;;  %v4559_v29 = vpop.permute.xlu2 %1297  ;;  %3241 = vmatpush.xpose.msk.msra.mxu2 %vm60_vm0, %v1203_v48  ;;  %v753_v48 = vmul.f32 %v4177_v10, %v4528_v55  ;;  %v773_v9 = vmul.f32 %v4180_v15, %v4612_v36 }
 0x281   :  { %3227 = vmatpush.xpose.msk.msrb.mxu3 %vm60_vm0, %v1086_v54 }
 0x284   :  { %3242 = vmatpush.xpose.msk.msra.mxu2 %vm60_vm0, %v1201_v59  ;;  %v4578_v59 = vmul.f32 %v597_v25, %v4086_v6 }
 0x285   :  { %3228 = vmatpush.xpose.msk.msrb.mxu3 %vm60_vm0, %v4474_v58  ;;  %1535 = vrot.lane.b32.xlu1 %v760_v62, %s3836_s7 }
 0x286   :  { %1523 = vrot.lane.b32.xlu0 %v754_v42, %s3836_s7  ;;  %1513 = vrot.lane.b32.xlu2 %v749_v52, %s3836_s7  ;;  %v4632_v42 = vmul.f32 %v603_v27, %v4098_v12  ;;  %v751_v52 = vmul.f32 %v4182_v16, %v4528_v55  ;;  %v774_v25 = vmul.f32 %v4202_v34, %v4578_v59 }
 0x287   :  { %v1191_v58 = vpop.permute.xlu1 %1190  ;;  %v769_v27 = vmul.f32 %v4177_v10, %v4612_v36 }
 0x288   :  { %v1193_v56 = vpop.permute.xlu0 %1192  ;;  %v1320_v40 = vpop.permute.xlu2 %1319  ;;  %3243 = vmatpush.xpose.msk.msra.mxu2 %vm60_vm0, %v1199_v46  ;;  %v776_v46 = vmul.f32 %v4184_v18, %v4578_v59  ;;  %5782 = vst [vmem:[#allocation5_spill] sm:$0xff] %v4632_v42  ;;  %v790_v12 = vmul.f32 %v4202_v34, %v4632_v42 }
 0x289   :  { %3229 = vmatpush.xpose.msk.msrb.mxu3 %vm60_vm0, %v4454_v49  ;;  %3255 = vmatpush.xpose.msk.msrb.mxu0 %vm60_vm0, %v1320_v40  ;;  %v756_v49 = vmul.f32 %v4180_v15, %v4510_v45 }
 0x28c   :  { %3244 = vmatpush.xpose.msk.msra.mxu2 %vm60_vm0, %v1197_v7 }
 0x28d   :  { %3230 = vmatpush.xpose.msk.msrb.mxu3 %vm60_vm0, %v4408_v1  ;;  %1527 = vrot.lane.b32.xlu1 %v756_v49, %s3836_s7 }
 0x28e   :  { %1511 = vrot.lane.b32.xlu0 %v748_v0, %s3836_s7  ;;  %1644 = vrot.lane.b32.xlu2 %v776_v46, %s3836_s7  ;;  %v777_v46 = vmul.f32 %v4184_v18, %v4612_v36 }
 0x28f   :  { %v1183_v6 = vpop.permute.xlu1 %1182 }
 0x290   :  { %v1185_v1 = vpop.permute.xlu0 %1184  ;;  %v4595_v54 = vpop.permute.xlu2 %1303 }
 0x291   :  { %3231 = vmatpush.xpose.msk.msrb.mxu3 %vm60_vm0, %v4456_v38  ;;  %v770_v38 = vmul.f32 %v4186_v21, %v4578_v59 }
 0x295   :  { %3232 = vmatpush.xpose.msk.msrb.mxu3 %vm60_vm0, %v4421_v19  ;;  %1515 = vrot.lane.b32.xlu1 %v750_v8, %s3836_s7 }
 0x296   :  { %1537 = vrot.lane.b32.xlu0 %v761_v47, %s3836_s7  ;;  %1632 = vrot.lane.b32.xlu2 %v770_v38, %s3836_s7  ;;  %v775_v47 = vmul.f32 %v4202_v34, %v4612_v36  ;;  %v788_v38 = vmul.f32 %v4180_v15, %v4632_v42 }
 0x297   :  { %v1314_v3 = vpop.permute.xlu1 %1313 }
 0x298   :  { %v1195_v50 = vpop.permute.xlu0 %1194  ;;  %v4609_v19 = vpop.permute.xlu2 %1291 }
 0x299   :  { %3233 = vmatpush.xpose.msk.msrb.mxu3 %vm60_vm0, %v1074_v14  ;;  %3245 = vmatpush.xpose.msk.msra.mxu2 %vm60_vm0, %v1195_v50  ;;  %v757_v14 = vmul.f32 %v4180_v15, %v4528_v55 }
 0x29d   :  { %3234 = vmatpush.xpose.msk.msrb.mxu3 %vm60_vm0, %v4423_v53  ;;  %3246 = vmatpush.xpose.msk.msra.mxu2 %vm60_vm0, %v1193_v56  ;;  %v606_v56 = vpop.f32.mrf.mxu2 }
 0x29e   :  { %1529 = vrot.lane.b32.xlu0 %v757_v14, %s3836_s7  ;;  %1521 = vrot.lane.b32.xlu1 %v753_v48, %s3836_s7  ;;  %v4654_v0 = vmul.f32 %v606_v56, %v4110_v17 }
 0x29f   :  { %1638 = vrot.lane.b32.xlu2 %v773_v9, %s3836_s7  ;;  %v1306_v53 = vpop.permute.xlu1 %1305 }
 0x2a0   :  { %3235 = vmatmul.msk.f32.vlgmr.msrb.gmra.mxu3 %vm60_vm0, %v4237_v51  ;;  %v1318_v7 = vpop.permute.xlu0 %1317  ;;  %v4629_v62 = vpop.permute.xlu2 %1422  ;;  %v793_v43 = vmul.f32 %v4184_v18, %v4654_v0  ;;  %v789_v14 = vmul.f32 %v4180_v15, %v4654_v0  ;;  %v791_v56 = vmul.f32 %v4202_v34, %v4654_v0  ;;  %v746_v34 = vmul.f32 %v4216_v39, %v4510_v45 }
 0x2a1   :  { %3247 = vmatpush.xpose.msk.msra.mxu2 %vm60_vm0, %v1191_v58  ;;  %3256 = vmatpush.xpose.msk.msrb.mxu0 %vm60_vm0, %v1318_v7  ;;  %v792_v7 = vmul.f32 %v4184_v18, %v4632_v42  ;;  %v747_v18 = vmul.f32 %v4216_v39, %v4528_v55 }
 0x2a5   :  { %3248 = vmatpush.xpose.msk.msra.mxu2 %vm60_vm0, %v4472_v57  ;;  %v772_v57 = vmul.f32 %v4180_v15, %v4578_v59  ;;  %v767_v15 = vmul.f32 %v4182_v16, %v4612_v36 }
 0x2a6   :  { %1517 = vrot.lane.b32.xlu0 %v751_v52, %s3836_s7  ;;  %1640 = vrot.lane.b32.xlu1 %v774_v25, %s3836_s7  ;;  %v787_v52 = vmul.f32 %v4186_v21, %v4654_v0 }
 0x2a7   :  { %1749 = vrot.lane.b32.xlu2 %v790_v12, %s3836_s7  ;;  %v4649_v58 = vpop.permute.xlu1 %1293 }
 0x2a8   :  { %3236 = vmatmul.msk.f32.gmra.mxu3 %vm60_vm0, %v4258_v63  ;;  %v1302_v40 = vpop.permute.xlu0 %1301  ;;  %v4651_v49 = vpop.permute.xlu2 %1410 }
 0x2a9   :  { %3249 = vmatpush.xpose.msk.msra.mxu2 %vm60_vm0, %v4524_v61 }
 0x2ad   :  { %3250 = vmatpush.xpose.msk.msra.mxu2 %vm60_vm0, %v1185_v1  ;;  %v768_v1 = vmul.f32 %v4177_v10, %v4578_v59 }
 0x2ae   :  { %1636 = vrot.lane.b32.xlu0 %v772_v57, %s3836_s7  ;;  %1646 = vrot.lane.b32.xlu1 %v777_v46, %s3836_s7  ;;  %v764_v57 = vmul.f32 %v4199_v28, %v4578_v59 }
 0x2af   :  { %1755 = vrot.lane.b32.xlu2 %v793_v43, %s3836_s7  ;;  %v1316_v17 = vpop.permute.xlu1 %1315  ;;  %v766_v43 = vmul.f32 %v4182_v16, %v4578_v59 }
 0x2b0   :  { %v4668_v8 = vpop.permute.xlu0 %1289  ;;  %v4670_v61 = vpop.permute.xlu2 %1402  ;;  %3257 = vmatpush.xpose.msk.msrb.mxu0 %vm60_vm0, %v1316_v17  ;;  %v784_v17 = vmul.f32 %v4177_v10, %v4632_v42 }
 0x2b1   :  { %3251 = vmatpush.xpose.msk.msra.mxu2 %vm60_vm0, %v1183_v6 }
 0x2b4   :  { %3258 = vmatpush.xpose.msk.msrb.mxu0 %vm60_vm0, %v1314_v3 }
 0x2b5   :  { %3252 = vmatpush.xpose.msk.msra.mxu2 %vm60_vm0, %v4492_v2  ;;  %v771_v2 = vmul.f32 %v4186_v21, %v4612_v36 }
 0x2b6   :  { %1628 = vrot.lane.b32.xlu1 %v768_v1, %s3836_s7  ;;  %1642 = vrot.lane.b32.xlu0 %v775_v47, %s3836_s7 }
 0x2b7   :  { %1745 = vrot.lane.b32.xlu2 %v788_v38, %s3836_s7  ;;  %v1312_v6 = vpop.permute.xlu1 %1311  ;;  %v765_v38 = vmul.f32 %v4199_v28, %v4612_v36 }
 0x2b8   :  { %v1308_v3 = vpop.permute.xlu0 %1307  ;;  %3253 = vmatmul.msk.f32.vlgmr.msra.gmra.mxu2 %vm60_vm0, %v4279_v13  ;;  %3259 = vmatpush.xpose.msk.msrb.mxu0 %vm60_vm0, %v1312_v6  ;;  %v1429_v50 = vpop.permute.xlu2 %1428  ;;  %v786_v6 = vmul.f32 %v4186_v21, %v4632_v42  ;;  %v763_v21 = vmul.f32 %v4216_v39, %v4612_v36 }
 0x2b9   :  { %3273 = vmatpush.xpose.msk.msra.mxu1 %vm60_vm0, %v1429_v50 }
 0x2bc   :  { %3260 = vmatpush.xpose.msk.msrb.mxu0 %vm60_vm0, %v4543_v35 }
 0x2be   :  { %1634 = vrot.lane.b32.xlu1 %v771_v2, %s3836_s7  ;;  %1630 = vrot.lane.b32.xlu0 %v769_v27, %s3836_s7  ;;  %v785_v27 = vmul.f32 %v4177_v10, %v4654_v0  ;;  %v762_v10 = vmul.f32 %v4216_v39, %v4578_v59 }
 0x2bf   :  { %1747 = vrot.lane.b32.xlu2 %v789_v14, %s3836_s7  ;;  %v1300_v48 = vpop.permute.xlu1 %1299  ;;  %v779_v14 = vmul.f32 %v4216_v39, %v4654_v0 }
 0x2c0   :  { %v1296_v9 = vpop.permute.xlu0 %1295  ;;  %3254 = vmatmul.msk.f32.gmra.mxu2 %vm60_vm0, %v4309_v37  ;;  %3261 = vmatpush.xpose.msk.msrb.mxu0 %vm60_vm0, %v1308_v3  ;;  %v4704_v35 = vpop.permute.xlu2 %1416  ;;  %v782_v3 = vmul.f32 %v4182_v16, %v4632_v42 }
 0x2c4   :  { %3262 = vmatpush.xpose.msk.msrb.mxu0 %vm60_vm0, %v1306_v53 }
 0x2c6   :  { %1626 = vrot.lane.b32.xlu1 %v767_v15, %s3836_s7  ;;  %1753 = vrot.lane.b32.xlu0 %v792_v7, %s3836_s7 }
 0x2c7   :  { %1743 = vrot.lane.b32.xlu2 %v787_v52, %s3836_s7  ;;  %v1419_v25 = vpop.permute.xlu1 %1418  ;;  %v781_v52 = vmul.f32 %v4199_v28, %v4654_v0 }
 0x2c8   :  { %v1427_v12 = vpop.permute.xlu0 %1426  ;;  %3263 = vmatpush.xpose.msk.msrb.mxu0 %vm60_vm0, %v4595_v54  ;;  %v4718_v53 = vpop.permute.xlu2 %1519 }
 0x2c9   :  { %3274 = vmatpush.xpose.msk.msra.mxu1 %vm60_vm0, %v1427_v12  ;;  %v778_v12 = vmul.f32 %v4216_v39, %v4632_v42 }
 0x2cc   :  { %3264 = vmatpush.xpose.msk.msrb.mxu0 %vm60_vm0, %v1302_v40 }
 0x2ce   :  { %1509 = vrot.lane.b32.xlu0 %v747_v18, %s3836_s7  ;;  %1751 = vrot.lane.b32.xlu1 %v791_v56, %s3836_s7 }
 0x2cf   :  { %1620 = vrot.lane.b32.xlu2 %v764_v57, %s3836_s7  ;;  %v4731_v54 = vpop.permute.xlu1 %1406 }
 0x2d0   :  { %v1415_v46 = vpop.permute.xlu0 %1414  ;;  %3265 = vmatpush.xpose.msk.msrb.mxu0 %vm60_vm0, %v1300_v48  ;;  %v4734_v40 = vpop.permute.xlu2 %1533  ;;  %v783_v48 = vmul.f32 %v4182_v16, %v4654_v0  ;;  %v780_v16 = vmul.f32 %v4199_v28, %v4632_v42 }
 0x2d4   :  { %3266 = vmatpush.xpose.msk.msrb.mxu0 %vm60_vm0, %v4559_v29 }
 0x2d6   :  { %1507 = vrot.lane.b32.xlu0 %v746_v34, %s3836_s7  ;;  %1624 = vrot.lane.b32.xlu1 %v766_v43, %s3836_s7  ;;  %v1875_v43 = vld [vmem:[%s5765_s8 + $0x48] sm:$0xff] }
 0x2d7   :  { %1737 = vrot.lane.b32.xlu2 %v784_v17, %s3836_s7  ;;  %v4747_v1 = vpop.permute.xlu1 %1398 }
 0x2d8   :  { %v1421_v47 = vpop.permute.xlu0 %1420  ;;  %3267 = vmatpush.xpose.msk.msrb.mxu0 %vm60_vm0, %v1296_v9  ;;  %v4750_v29 = vpop.permute.xlu2 %1525 }
 0x2dc   :  { %3268 = vmatpush.xpose.msk.msrb.mxu0 %vm60_vm0, %v4649_v58 }
 0x2de   :  { %1622 = vrot.lane.b32.xlu0 %v765_v38, %s3836_s7  ;;  %1741 = vrot.lane.b32.xlu1 %v786_v6, %s3836_s7  ;;  %v1874_v38 = vld [vmem:[%s5765_s8 + $0x40] sm:$0xff]  ;;  %v1873_v6 = vld [vmem:[%s5765_s8 + $0x38] sm:$0xff] }
 0x2df   :  { %1733 = vrot.lane.b32.xlu2 %v782_v3, %s3836_s7  ;;  %v1425_v50 = vpop.permute.xlu1 %1424  ;;  %v1872_v3 = vld [vmem:[%s5765_s8 + $0x30] sm:$0xff] }
 0x2e0   :  { %v1409_v2 = vpop.permute.xlu0 %1408  ;;  %3269 = vmatpush.xpose.msk.msrb.mxu0 %vm60_vm0, %v4609_v19  ;;  %3275 = vmatpush.xpose.msk.msra.mxu1 %vm60_vm0, %v1425_v50  ;;  %v4766_v58 = vpop.permute.xlu2 %1513 }
 0x2e3   :  { %v1049_v34 = vpop.f32.mrf.mxu3 }
 0x2e4   :  { %3270 = vmatpush.xpose.msk.msrb.mxu0 %vm60_vm0, %v4668_v8  ;;  %3276 = vmatpush.xpose.msk.msra.mxu1 %vm60_vm0, %v4629_v62  ;;  %v1818_v50 = vmul.f32 0.5, %v1049_v34 }
 0x2e6   :  { %1618 = vrot.lane.b32.xlu1 %v763_v21, %s3836_s7  ;;  %1739 = vrot.lane.b32.xlu0 %v785_v27, %s3836_s7 }
 0x2e7   :  { %1727 = vrot.lane.b32.xlu2 %v779_v14, %s3836_s7  ;;  %3271 = vmatmul.msk.f32.vlgmr.msrb.gmra.mxu0 %vm60_vm0, %v4354_v4  ;;  %v1413_v19 = vpop.permute.xlu1 %1412 }
 0x2e8   :  { %v1401_v62 = vpop.permute.xlu0 %1400  ;;  %3277 = vmatpush.xpose.msk.msra.mxu1 %vm60_vm0, %v1421_v47  ;;  %v4784_v8 = vpop.permute.xlu2 %1644 }
 0x2ec   :  { %3278 = vmatpush.xpose.msk.msra.mxu1 %vm60_vm0, %v1419_v25 }
 0x2ee   :  { %1616 = vrot.lane.b32.xlu0 %v762_v10, %s3836_s7  ;;  %1735 = vrot.lane.b32.xlu1 %v783_v48, %s3836_s7  ;;  %v1868_v10 = vld [vmem:[%s5765_s8 + $0x10] sm:$0xff] }
 0x2ef   :  { %806 = vrot.lane.b32.xlu2 %v4136_v30, %s3837_s21  ;;  %3272 = vmatmul.msk.f32.gmra.mxu0 %vm60_vm0, %v4381_v41  ;;  %v1405_v9 = vpop.permute.xlu1 %1404 }
 0x2f0   :  { %v1532_v15 = vpop.permute.xlu0 %1531  ;;  %3279 = vmatpush.xpose.msk.msra.mxu1 %vm60_vm0, %v4704_v35  ;;  %v4799_v7 = vpop.permute.xlu2 %1632 }
 0x2f4   :  { %3280 = vmatpush.xpose.msk.msra.mxu1 %vm60_vm0, %v1415_v46  ;;  %v1877_v46 = vld [vmem:[%s5765_s8 + $0x58] sm:$0xff] }
 0x2f6   :  { %1729 = vrot.lane.b32.xlu1 %v780_v16, %s3836_s7  ;;  %1731 = vrot.lane.b32.xlu0 %v781_v52, %s3836_s7 }
 0x2f7   :  { %800 = vrot.lane.b32.xlu2 %v4140_v32, %s3837_s21  ;;  %v1536_v30 = vpop.permute.xlu1 %1535 }
 0x2f8   :  { %v1524_v25 = vpop.permute.xlu0 %1523  ;;  %3281 = vmatpush.xpose.msk.msra.mxu1 %vm60_vm0, %v1413_v19  ;;  %v1870_v19 = vld [vmem:[%s5765_s8 + $0x20] sm:$0xff] }
 0x2f9   :  { %v4811_v35 = vpop.permute.xlu2 %1638 }
 0x2fc   :  { %3282 = vmatpush.xpose.msk.msra.mxu1 %vm60_vm0, %v4651_v49  ;;  %v1881_v49 = vld [vmem:[%s5765_s8 + $0x78] sm:$0xff] }
 0x2fe   :  { %808 = vrot.lane.b32.xlu1 %v4125_v23, %s3837_s21  ;;  %1725 = vrot.lane.b32.xlu0 %v778_v12, %s3836_s7 }
 0x2ff   :  { %794 = vrot.lane.b32.xlu2 %v634_v11, %s3837_s21  ;;  %v1528_v32 = vpop.permute.xlu1 %1527 }
 0x300   :  { %v4823_v28 = vpop.permute.xlu0 %1511  ;;  %3283 = vmatpush.xpose.msk.msra.mxu1 %vm60_vm0, %v1409_v2  ;;  %v1052_v2 = vpop.f32.mrf.mxu3 }
 0x301   :  { %v4826_v18 = vpop.permute.xlu2 %1749  ;;  %v1819_v48 = vmul.f32 0.5, %v1052_v2 }
 0x304   :  { %3284 = vmatpush.xpose.msk.msra.mxu1 %vm60_vm0, %v4731_v54  ;;  %v1878_v54 = vld [vmem:[%s5765_s8 + $0x60] sm:$0xff] }
 0x306   :  { %802 = vrot.lane.b32.xlu1 %v4138_v31, %s3837_s21  ;;  %804 = vrot.lane.b32.xlu0 %v4127_v24, %s3837_s21 }
 0x307   :  { %v4834_v23 = vpop.permute.xlu1 %1515 }
 0x308   :  { %v1538_v20 = vpop.permute.xlu0 %1537  ;;  %3285 = vmatpush.xpose.msk.msra.mxu1 %vm60_vm0, %v1405_v9  ;;  %v1867_v9 = vld [vmem:[%s5765_s8 + $0x8] sm:$0xff] }
 0x309   :  { %v1756_v11 = vpop.permute.xlu2 %1755  ;;  %3291 = vmatpush.xpose.msk.msra.mxu3 %vm60_vm0, %v1538_v20 }
 0x30a   :  { %3327 = vmatpush.xpose.msk.msra.mxu0 %vm60_vm0, %v1756_v11 }
 0x30c   :  { %3286 = vmatpush.xpose.msk.msra.mxu1 %vm60_vm0, %v4670_v61 }
 0x30d   :  { %3292 = vmatpush.xpose.msk.msra.mxu3 %vm60_vm0, %v1536_v30 }
 0x30e   :  { %796 = vrot.lane.b32.xlu1 %v4155_v60, %s3837_s21  ;;  %798 = vrot.lane.b32.xlu0 %v4149_v44, %s3837_s21  ;;  %v1880_v44 = vld [vmem:[%s5765_s8 + $0x70] sm:$0xff]  ;;  %v1879_v60 = vld [vmem:[%s5765_s8 + $0x68] sm:$0xff] }
 0x310   :  { %v1530_v24 = vpop.permute.xlu0 %1529  ;;  %v1522_v31 = vpop.permute.xlu1 %1521  ;;  %3287 = vmatpush.xpose.msk.msra.mxu1 %vm60_vm0, %v1401_v62  ;;  %v1834_v62 = vmul.f32 1.442695, %v1818_v50 }
 0x311   :  { %v4847_v39 = vpop.permute.xlu2 %1745  ;;  %3293 = vmatpush.xpose.msk.msra.mxu3 %vm60_vm0, %v4734_v40  ;;  %v1876_v40 = vld [vmem:[%s5765_s8 + $0x50] sm:$0xff] }
 0x312   :  { %3745 = vpow2.f32 %v1834_v62 }
 0x314   :  { %3288 = vmatpush.xpose.msk.msra.mxu1 %vm60_vm0, %v4747_v1 }
 0x315   :  { %3294 = vmatpush.xpose.msk.msra.mxu3 %vm60_vm0, %v1532_v15 }
 0x317   :  { %3289 = vmatmul.msk.f32.vlgmr.msra.gmra.mxu1 %vm60_vm0, %v4426_v26 }
 0x318   :  { %1882 = vmatpush.msrb.mxu1 %v1881_v49  ;;  %v1518_v61 = vpop.permute.xlu0 %1517  ;;  %v1641_v56 = vpop.permute.xlu1 %1640 }
 0x319   :  { %v4865_v57 = vpop.permute.xlu2 %1747  ;;  %3295 = vmatpush.xpose.msk.msra.mxu3 %vm60_vm0, %v1530_v24  ;;  %v4930_v12 = vpop.eup %3745 }
 0x31a   :  { %1883 = vmatpush.msrb.mxu1 %v1880_v44  ;;  %5783 = vst [vmem:[#allocation6_spill] sm:$0xff] %v4930_v12 }
 0x31c   :  { %1884 = vmatpush.msrb.mxu1 %v1879_v60 }
 0x31d   :  { %3296 = vmatpush.xpose.msk.msra.mxu3 %vm60_vm0, %v1528_v32 }
 0x31e   :  { %1885 = vmatpush.msrb.mxu1 %v1878_v54 }
 0x31f   :  { %3290 = vmatmul.msk.f32.gmra.mxu1 %vm60_vm0, %v4477_v5 }
 0x320   :  { %1886 = vmatpush.msrb.mxu1 %v1877_v46  ;;  %v1637_v17 = vpop.permute.xlu0 %1636  ;;  %v1647_v1 = vpop.permute.xlu1 %1646 }
 0x321   :  { %v4883_v47 = vpop.permute.xlu2 %1743  ;;  %3297 = vmatpush.xpose.msk.msra.mxu3 %vm60_vm0, %v4750_v29  ;;  %3309 = vmatpush.xpose.msk.msrb.mxu2 %vm60_vm0, %v1647_v1  ;;  %v1871_v29 = vld [vmem:[%s5765_s8 + $0x28] sm:$0xff] }
 0x322   :  { %1887 = vmatpush.msrb.mxu1 %v1876_v40 }
 0x323   :  { %v1158_v15 = vpop.f32.mrf.mxu3 }
 0x324   :  { %1888 = vmatpush.msrb.mxu1 %v1875_v43  ;;  %v1820_v32 = vmul.f32 0.5, %v1158_v15 }
 0x325   :  { %3298 = vmatpush.xpose.msk.msra.mxu3 %vm60_vm0, %v1524_v25  ;;  %3310 = vmatpush.xpose.msk.msrb.mxu2 %vm60_vm0, %v4784_v8  ;;  %v1869_v8 = vld [vmem:[%s5765_s8 + $0x18] sm:$0xff]  ;;  %v1836_v25 = vmul.f32 1.442695, %v1819_v48 }
 0x326   :  { %1889 = vmatpush.msrb.mxu1 %v1874_v38 }
 0x327   :  { %3747 = vpow2.f32 %v1836_v25 }
 0x328   :  { %1890 = vmatpush.msrb.mxu1 %v1873_v6  ;;  %v1643_v21 = vpop.permute.xlu0 %1642  ;;  %v1629_v27 = vpop.permute.xlu1 %1628 }
 0x329   :  { %v4903_v14 = vpop.permute.xlu2 %1620  ;;  %3299 = vmatpush.xpose.msk.msra.mxu3 %vm60_vm0, %v1522_v31  ;;  %3311 = vmatpush.xpose.msk.msrb.mxu2 %vm60_vm0, %v1643_v21 }
 0x32a   :  { %1891 = vmatpush.msrb.mxu1 %v1872_v3 }
 0x32b   :  { %v1161_v31 = vpop.f32.mrf.mxu3 }
 0x32c   :  { %1892 = vmatpush.msrb.mxu1 %v1871_v29  ;;  %v1821_v49 = vmul.f32 0.5, %v1161_v31 }
 0x32d   :  { %3300 = vmatpush.xpose.msk.msra.mxu3 %vm60_vm0, %v4718_v53  ;;  %3312 = vmatpush.xpose.msk.msrb.mxu2 %vm60_vm0, %v1641_v56  ;;  %v1866_v53 = vld [vmem:[%s5765_s8] sm:$0xff] }
 0x32e   :  { %1893 = vmatpush.msrb.mxu1 %v1870_v19  ;;  %v1840_v56 = vmul.f32 1.442695, %v1821_v49 }
 0x330   :  { %1894 = vmatpush.msrb.mxu1 %v1869_v8  ;;  %v1631_v16 = vpop.permute.xlu0 %1630  ;;  %v1635_v52 = vpop.permute.xlu1 %1634 }
 0x331   :  { %v4922_v30 = vpop.permute.xlu2 %1737  ;;  %3301 = vmatpush.xpose.msk.msra.mxu3 %vm60_vm0, %v1518_v61  ;;  %3313 = vmatpush.xpose.msk.msrb.mxu2 %vm60_vm0, %v4811_v35  ;;  %v1838_v35 = vmul.f32 1.442695, %v1820_v32 }
 0x332   :  { %1895 = vmatpush.msrb.mxu1 %v1868_v10 }
 0x333   :  { %3749 = vpow2.f32 %v1838_v35 }
 0x334   :  { %1896 = vmatpush.msrb.mxu1 %v1867_v9  ;;  %3751 = vpow2.f32 %v1840_v56 }
 0x335   :  { %3302 = vmatpush.xpose.msk.msra.mxu3 %vm60_vm0, %v4834_v23  ;;  %3314 = vmatpush.xpose.msk.msrb.mxu2 %vm60_vm0, %v1637_v17  ;;  %v4942_v23 = vpop.eup %3747 }
 0x336   :  { %1897 = vmatpush.msrb.mxu1 %v1866_v53  ;;  %5784 = vst [vmem:[#allocation7_spill] sm:$0xff] %v4942_v23 }
 0x337   :  { %1898 = vmatmul.f32.vlgmr.msrb.gmra.mxu1 %v4930_v12 }
 0x338   :  { %v1754_v20 = vpop.permute.xlu0 %1753  ;;  %v1627_v11 = vpop.permute.xlu1 %1626 }
 0x339   :  { %v4936_v24 = vpop.permute.xlu2 %1733  ;;  %3303 = vmatpush.xpose.msk.msra.mxu3 %vm60_vm0, %v4766_v58  ;;  %3328 = vmatpush.xpose.msk.msra.mxu0 %vm60_vm0, %v1754_v20 }
 0x33a   :  { %3315 = vmatpush.xpose.msk.msrb.mxu2 %vm60_vm0, %v1635_v52 }
 0x33b   :  { %v1267_v44 = vpop.f32.mrf.mxu2 }
 0x33c   :  { %v1822_v54 = vmul.f32 0.5, %v1267_v44 }
 0x33d   :  { %3304 = vmatpush.xpose.msk.msra.mxu3 %vm60_vm0, %v4823_v28  ;;  %v4954_v28 = vpop.eup %3749 }
 0x33e   :  { %3316 = vmatpush.xpose.msk.msrb.mxu2 %vm60_vm0, %v4799_v7  ;;  %5785 = vst [vmem:[#allocation8_spill] sm:$0xff] %v4954_v28  ;;  %v1842_v34 = vmul.f32 1.442695, %v1822_v54 }
 0x33f   :  { %1901 = vmatmul.f32.gmra.mxu1 %v4942_v23 }
 0x340   :  { %v1510_v58 = vpop.permute.xlu0 %1509  ;;  %v1752_v60 = vpop.permute.xlu1 %1751  ;;  %3753 = vpow2.f32 %v1842_v34 }
 0x341   :  { %v4949_v61 = vpop.permute.xlu2 %1727  ;;  %3305 = vmatpush.xpose.msk.msra.mxu3 %vm60_vm0, %v1510_v58  ;;  %3329 = vmatpush.xpose.msk.msra.mxu0 %vm60_vm0, %v1752_v60 }
 0x342   :  { %3317 = vmatpush.xpose.msk.msrb.mxu2 %vm60_vm0, %v1631_v16 }
 0x343   :  { %v1270_v1 = vpop.f32.mrf.mxu2 }
 0x344   :  { %v1823_v6 = vmul.f32 0.5, %v1270_v1 }
 0x345   :  { %3330 = vmatpush.xpose.msk.msra.mxu0 %vm60_vm0, %v4826_v18  ;;  %v4970_v18 = vpop.eup %3751 }
 0x346   :  { %3318 = vmatpush.xpose.msk.msrb.mxu2 %vm60_vm0, %v1629_v27  ;;  %5786 = vst [vmem:[#allocation9_spill] sm:$0xff] %v4970_v18  ;;  %v1844_v29 = vmul.f32 1.442695, %v1823_v6 }
 0x347   :  { %1904 = vmatmul.f32.gmra.mxu1 %v4954_v28 }
 0x348   :  { %v1508_v7 = vpop.permute.xlu0 %1507  ;;  %v1625_v46 = vpop.permute.xlu1 %1624  ;;  %3755 = vpow2.f32 %v1844_v29 }
 0x349   :  { %v4960_v40 = vpop.permute.xlu2 %806  ;;  %3306 = vmatpush.xpose.msk.msra.mxu3 %vm60_vm0, %v1508_v7  ;;  %3331 = vmatpush.xpose.msk.msra.mxu0 %vm60_vm0, %v4865_v57 }
 0x34a   :  { %3319 = vmatpush.xpose.msk.msrb.mxu2 %vm60_vm0, %v1627_v11  ;;  %v830_v43 = vmul.f32 %v4960_v40, %v4189_v22  ;;  %v831_v17 = vmul.f32 %v4960_v40, %v4205_v33  ;;  %v4990_v21 = vmul.f32 %v4960_v40, %v4426_v26  ;;  %v5013_v8 = vmul.f32 %v4960_v40, %v4632_v42 }
 0x34b   :  { %v5026_v9 = vmul.f32 %v4960_v40, %v4654_v0 }
 0x34c   :  { %3307 = vmatmul.msk.f32.vlgmr.msra.gmra.mxu3 %vm60_vm0, %v4510_v45  ;;  %v3396_v38 = vpack.i.bf16 %v830_v43, %v831_v17  ;;  %5789 = vst [vmem:[#allocation12_spill] sm:$0xff] %v5013_v8 }
 0x34d   :  { %3332 = vmatpush.xpose.msk.msra.mxu0 %vm60_vm0, %v4847_v39  ;;  %v4992_v39 = vpop.eup %3753  ;;  %5791 = vst [vmem:[#allocation14_spill] sm:$0xff] %v5026_v9 }
 0x34e   :  { %3320 = vmatpush.xpose.msk.msrb.mxu2 %vm60_vm0, %v1625_v46  ;;  %3397 = vrot.lane.b32.xlu1 %v3396_v38, %s3837_s21  ;;  %5787 = vst [vmem:[#allocation10_spill] sm:$0xff] %v4992_v39  ;;  %v5034_v53 = vpop.eup %3755 }
 0x34f   :  { %1907 = vmatmul.f32.gmra.mxu1 %v4970_v18  ;;  %5792 = vst [vmem:[#allocation15_spill] sm:$0xff] %v5034_v53 }
 0x350   :  { %v1623_v57 = vpop.permute.xlu0 %1622  ;;  %v1742_v3 = vpop.permute.xlu1 %1741 }
 0x351   :  { %v4979_v50 = vpop.permute.xlu2 %800  ;;  %3333 = vmatpush.xpose.msk.msra.mxu0 %vm60_vm0, %v4883_v47  ;;  %v5002_v47 = vmul.f32 %v4960_v40, %v4477_v5 }
 0x352   :  { %3321 = vmatpush.xpose.msk.msrb.mxu2 %vm60_vm0, %v1623_v57  ;;  %v4986_v2 = vmul.f32 %v4979_v50, %v4354_v4  ;;  %v4998_v27 = vmul.f32 %v4979_v50, %v4381_v41  ;;  %v5009_v62 = vmul.f32 %v4979_v50, %v4578_v59  ;;  %v5022_v48 = vmul.f32 %v4979_v50, %v4612_v36 }
 0x353   :  { %v825_v46 = vmul.f32 %v4979_v50, %v4205_v33  ;;  %v5066_v1 = vmul.f32 %v4979_v50, %v4510_v45  ;;  %v5076_v38 = vmul.f32 %v4979_v50, %v4528_v55 }
 0x354   :  { %3308 = vmatmul.msk.f32.gmra.mxu3 %vm60_vm0, %v4528_v55  ;;  %5788 = vst [vmem:[#allocation11_spill] sm:$0xff] %v5009_v62 }
 0x355   :  { %3334 = vmatpush.xpose.msk.msra.mxu0 %vm60_vm0, %v1742_v3  ;;  %5790 = vst [vmem:[#allocation13_spill] sm:$0xff] %v5022_v48 }
 0x356   :  { %3322 = vmatpush.xpose.msk.msrb.mxu2 %vm60_vm0, %v4903_v14 }
 0x357   :  { %1910 = vmatmul.f32.gmra.mxu1 %v4992_v39 }
 0x358   :  { %v1740_v16 = vpop.permute.xlu0 %1739  ;;  %v1619_v52 = vpop.permute.xlu1 %1618 }
 0x359   :  { %3335 = vmatpush.xpose.msk.msra.mxu0 %vm60_vm0, %v1740_v16 }
 0x35a   :  { %3323 = vmatpush.xpose.msk.msrb.mxu2 %vm60_vm0, %v1619_v52 }
 0x35d   :  { %3336 = vmatpush.xpose.msk.msra.mxu0 %vm60_vm0, %v4922_v30 }
 0x35f   :  { %1913 = vmatmul.f32.gmra.mxu1 %v5034_v53  ;;  %v841_v53 = vmul.f32 %v4979_v50, %v4258_v63 }
 0x360   :  { %v1617_v25 = vpop.permute.xlu0 %1616  ;;  %v1736_v32 = vpop.permute.xlu1 %1735 }
 0x361   :  { %3324 = vmatpush.xpose.msk.msrb.mxu2 %vm60_vm0, %v1617_v25  ;;  %3337 = vmatpush.xpose.msk.msra.mxu0 %vm60_vm0, %v1736_v32 }
 0x364   :  { %3325 = vmatmul.msk.f32.vlgmr.msrb.gmra.mxu2 %vm60_vm0, %v4578_v59  ;;  %v1376_v20 = vpop.f32.mrf.mxu0 }
 0x365   :  { %v1824_v11 = vmul.f32 0.5, %v1376_v20  ;;  %3338 = vmatpush.xpose.msk.msra.mxu0 %vm60_vm0, %v4936_v24 }
 0x367   :  { %v1846_v35 = vmul.f32 1.442695, %v1824_v11 }
 0x368   :  { %v1732_v31 = vpop.permute.xlu0 %1731  ;;  %v1730_v49 = vpop.permute.xlu1 %1729 }
 0x369   :  { %3757 = vpow2.f32 %v1846_v35  ;;  %3339 = vmatpush.xpose.msk.msra.mxu0 %vm60_vm0, %v1732_v31 }
 0x36c   :  { %3326 = vmatmul.msk.f32.gmra.mxu2 %vm60_vm0, %v4612_v36  ;;  %v1379_v30 = vpop.f32.mrf.mxu0 }
 0x36d   :  { %v1825_v44 = vmul.f32 0.5, %v1379_v30  ;;  %3340 = vmatpush.xpose.msk.msra.mxu0 %vm60_vm0, %v1730_v49 }
 0x36f   :  { %v5049_v58 = vpop.eup %3757  ;;  %v1848_v60 = vmul.f32 1.442695, %v1825_v44 }
 0x370   :  { %5793 = vst [vmem:[#allocation16_spill] sm:$0xff] %v5049_v58  ;;  %v1726_v56 = vpop.permute.xlu0 %1725  ;;  %1916 = vmatmul.f32.gmra.mxu1 %v5049_v58  ;;  %v5052_v24 = vpop.permute.xlu1 %808 }
 0x371   :  { %3759 = vpow2.f32 %v1848_v60  ;;  %3341 = vmatpush.xpose.msk.msra.mxu0 %vm60_vm0, %v4949_v61  ;;  %v832_v54 = vmul.f32 %v5052_v24, %v4189_v22  ;;  %v833_v7 = vmul.f32 %v5052_v24, %v4205_v33  ;;  %v849_v34 = vmul.f32 %v5052_v24, %v4258_v63 }
 0x372   :  { %v5072_v61 = vmul.f32 %v5052_v24, %v4578_v59  ;;  %v5080_v6 = vmul.f32 %v5052_v24, %v4612_v36  ;;  %v5111_v30 = vmul.f32 %v5052_v24, %v4477_v5  ;;  %v848_v44 = vmul.f32 %v5052_v24, %v4237_v51 }
 0x373   :  { %v3391_v43 = vpack.i.bf16 %v832_v54, %v833_v7  ;;  %v3411_v17 = vpack.i.bf16 %v849_v34, %v825_v46  ;;  %v847_v54 = vmul.f32 %v4960_v40, %v4258_v63  ;;  %v846_v34 = vmul.f32 %v4960_v40, %v4237_v51 }
 0x374   :  { %v5183_v16 = vmul.f32 %v5052_v24, %v4528_v55  ;;  %v865_v10 = vmul.f32 %v5052_v24, %v4309_v37 }
 0x375   :  { %3392 = vrot.lane.b32.xlu0 %v3391_v43, %s3837_s21  ;;  %3342 = vmatpush.xpose.msk.msra.mxu0 %vm60_vm0, %v1726_v56  ;;  %v824_v43 = vmul.f32 %v4979_v50, %v4189_v22 }
 0x376   :  { %3412 = vrot.lane.b32.xlu1 %v3411_v17, %s3837_s21 }
 0x377   :  { %v5082_v57 = vpop.eup %3759 }
 0x378   :  { %5794 = vst [vmem:[#allocation17_spill] sm:$0xff] %v5082_v57  ;;  %v5085_v3 = vpop.permute.xlu0 %804  ;;  %1919 = vmatmul.f32.gmra.mxu1 %v5082_v57  ;;  %v5092_v52 = vpop.permute.xlu1 %802  ;;  %3343 = vmatmul.msk.f32.vlgmr.msra.gmra.mxu0 %vm60_vm0, %v4632_v42 }
 0x379   :  { %v828_v25 = vmul.f32 %v5085_v3, %v4189_v22  ;;  %v829_v32 = vmul.f32 %v5085_v3, %v4205_v33  ;;  %v826_v20 = vmul.f32 %v5092_v52, %v4189_v22  ;;  %v827_v11 = vmul.f32 %v5092_v52, %v4205_v33 }
 0x37a   :  { %v5107_v49 = vmul.f32 %v5092_v52, %v4381_v41  ;;  %v845_v14 = vmul.f32 %v5085_v3, %v4258_v63  ;;  %v844_v29 = vmul.f32 %v5085_v3, %v4237_v51  ;;  %v5197_v18 = vmul.f32 %v5085_v3, %v4612_v36 }
 0x37b   :  { %v3401_v35 = vpack.i.bf16 %v828_v25, %v829_v32  ;;  %v3406_v31 = vpack.i.bf16 %v826_v20, %v827_v11  ;;  %v3416_v20 = vpack.i.bf16 %v848_v44, %v824_v43  ;;  %v5134_v11 = vpop.permute.xlu2 %794  ;;  %v5244_v60 = vmul.f32 %v5092_v52, %v4632_v42 }
 0x37c   :  { %v818_v58 = vmul.f32 %v5134_v11, %v4189_v22 }
 0x37d   :  { %3402 = vrot.lane.b32.xlu2 %v3401_v35, %s3837_s21  ;;  %3407 = vrot.lane.b32.xlu0 %v3406_v31, %s3837_s21  ;;  %v843_v35 = vmul.f32 %v5092_v52, %v4258_v63 }
 0x380   :  { %v5118_v56 = vpop.permute.xlu0 %798  ;;  %3344 = vmatmul.msk.f32.gmra.mxu0 %vm60_vm0, %v4654_v0  ;;  %v5132_v17 = vpop.permute.xlu1 %796 }
 0x381   :  { %v823_v7 = vmul.f32 %v5118_v56, %v4205_v33  ;;  %v822_v46 = vmul.f32 %v5118_v56, %v4189_v22  ;;  %v5143_v31 = vmul.f32 %v5132_v17, %v4381_v41  ;;  %v5151_v44 = vmul.f32 %v5132_v17, %v4354_v4 }
 0x382   :  { %v820_v43 = vmul.f32 %v5132_v17, %v4189_v22  ;;  %v5175_v15 = vmul.f32 %v5132_v17, %v4426_v26  ;;  %v5201_v57 = vmul.f32 %v5132_v17, %v4510_v45  ;;  %v837_v62 = vmul.f32 %v5132_v17, %v4258_v63 }
 0x383   :  { %v3421_v25 = vpack.i.bf16 %v847_v54, %v823_v7  ;;  %v3426_v32 = vpack.i.bf16 %v846_v34, %v822_v46  ;;  %v5147_v54 = vmul.f32 %v5092_v52, %v4477_v5  ;;  %v5155_v7 = vmul.f32 %v5092_v52, %v4426_v26 }
 0x384   :  { %v821_v46 = vmul.f32 %v5132_v17, %v4205_v33  ;;  %v819_v34 = vmul.f32 %v5134_v11, %v4205_v33  ;;  %v5179_v33 = vmul.f32 %v5132_v17, %v4477_v5  ;;  %v3436_v28 = vpack.i.bf16 %v844_v29, %v820_v43 }
 0x385   :  { %3427 = vrot.lane.b32.xlu1 %v3426_v32, %s3837_s21  ;;  %3417 = vrot.lane.b32.xlu2 %v3416_v20, %s3837_s21  ;;  %v5169_v20 = vmul.f32 %v5052_v24, %v4510_v45  ;;  %v5189_v32 = vmul.f32 %v5132_v17, %v4528_v55  ;;  %v5217_v29 = vmul.f32 %v5052_v24, %v4632_v42 }
 0x386   :  { %3422 = vrot.lane.b32.xlu0 %v3421_v25, %s3837_s21  ;;  %v3441_v25 = vpack.i.bf16 %v843_v35, %v819_v34  ;;  %v3431_v19 = vpack.i.bf16 %v845_v14, %v821_v46  ;;  %v5205_v35 = vmul.f32 %v5085_v3, %v4578_v59  ;;  %v5213_v46 = vmul.f32 %v5092_v52, %v4612_v36 }
 0x387   :  { %v842_v43 = vmul.f32 %v5092_v52, %v4237_v51  ;;  %v5230_v14 = vmul.f32 %v5132_v17, %v4612_v36  ;;  %v5240_v34 = vmul.f32 %v5132_v17, %v4578_v59  ;;  %v3451_v42 = vpack.i.bf16 %v865_v10, %v841_v53 }
 0x388   :  { %v839_v39 = vmul.f32 %v5118_v56, %v4258_v63  ;;  %v861_v10 = vmul.f32 %v5085_v3, %v4309_v37  ;;  %v836_v23 = vmul.f32 %v5132_v17, %v4237_v51 }
 0x389   :  { %v3446_v9 = vpack.i.bf16 %v842_v43, %v818_v58 }
 0x38d   :  { %3432 = vrot.lane.b32.xlu2 %v3431_v19, %s3837_s21  ;;  %3442 = vrot.lane.b32.xlu1 %v3441_v25, %s3837_s21  ;;  %v864_v19 = vmul.f32 %v5052_v24, %v4279_v13  ;;  %v840_v25 = vmul.f32 %v4979_v50, %v4237_v51 }
 0x38e   :  { %3437 = vrot.lane.b32.xlu0 %v3436_v28, %s3837_s21  ;;  %v5236_v28 = vmul.f32 %v5092_v52, %v4654_v0 }
 0x38f   :  { %v3456_v12 = vpack.i.bf16 %v864_v19, %v840_v25  ;;  %v838_v19 = vmul.f32 %v5118_v56, %v4237_v51 }
 0x394   :  { %v1485_v48 = vpop.f32.mrf.mxu1 }
 0x395   :  { %v1826_v8 = vmul.f32 0.5, %v1485_v48  ;;  %3457 = vrot.lane.b32.xlu1 %v3456_v12, %s3837_s21  ;;  %3447 = vrot.lane.b32.xlu2 %v3446_v9, %s3837_s21  ;;  %v863_v12 = vmul.f32 %v4960_v40, %v4309_v37 }
 0x396   :  { %3452 = vrot.lane.b32.xlu0 %v3451_v42, %s3837_s21  ;;  %v862_v42 = vmul.f32 %v4960_v40, %v4279_v13 }
 0x397   :  { %v1850_v22 = vmul.f32 1.442695, %v1826_v8  ;;  %v3471_v8 = vpack.i.bf16 %v861_v10, %v837_v62  ;;  %v3461_v48 = vpack.i.bf16 %v863_v12, %v839_v39  ;;  %v859_v39 = vmul.f32 %v5092_v52, %v4309_v37 }
 0x398   :  { %v3466_v53 = vpack.i.bf16 %v862_v42, %v838_v19  ;;  %v834_v62 = vmul.f32 %v5134_v11, %v4237_v51  ;;  %v860_v19 = vmul.f32 %v5085_v3, %v4279_v13  ;;  %v835_v10 = vmul.f32 %v5134_v11, %v4258_v63 }
 0x399   :  { %3761 = vpow2.f32 %v1850_v22  ;;  %v858_v22 = vmul.f32 %v5092_v52, %v4279_v13  ;;  %v853_v51 = vmul.f32 %v5132_v17, %v4309_v37  ;;  %v857_v63 = vmul.f32 %v4979_v50, %v4309_v37 }
 0x39a   :  { %v3476_v42 = vpack.i.bf16 %v860_v19, %v836_v23  ;;  %v2171_v23 = vld [vmem:[%s5766_s9] sm:$0xff]  ;;  %v850_v19 = vmul.f32 %v5134_v11, %v4279_v13 }
 0x39b   :  { %v3486_v12 = vpack.i.bf16 %v858_v22, %v834_v62  ;;  %2236 = vmatpush.msrb.mxu3 %v2171_v23 }
 0x39c   :  { %v1488_v9 = vpop.f32.mrf.mxu1 }
 0x39d   :  { %v1827_v58 = vmul.f32 0.5, %v1488_v9  ;;  %3472 = vrot.lane.b32.xlu1 %v3471_v8, %s3837_s21  ;;  %3462 = vrot.lane.b32.xlu2 %v3461_v48, %s3837_s21  ;;  %v3481_v8 = vpack.i.bf16 %v859_v39, %v835_v10  ;;  %v856_v9 = vmul.f32 %v4979_v50, %v4279_v13  ;;  %v852_v10 = vmul.f32 %v5132_v17, %v4279_v13 }
 0x39e   :  { %3467 = vrot.lane.b32.xlu0 %v3466_v53, %s3837_s21  ;;  %v854_v53 = vmul.f32 %v5118_v56, %v4279_v13  ;;  %v874_v13 = vmul.f32 %v5092_v52, %v4354_v4 }
 0x39f   :  { %v5274_v43 = vpop.eup %3761  ;;  %v1852_v25 = vmul.f32 1.442695, %v1827_v58  ;;  %v855_v58 = vmul.f32 %v5118_v56, %v4309_v37  ;;  %v3491_v39 = vpack.i.bf16 %v856_v9, %v857_v63  ;;  %v879_v9 = vmul.f32 %v4960_v40, %v4381_v41 }
 0x3a0   :  { %1922 = vmatmul.f32.gmra.mxu1 %v5274_v43 }
 0x3a1   :  { %3763 = vpow2.f32 %v1852_v25  ;;  %v881_v25 = vmul.f32 %v5052_v24, %v4381_v41  ;;  %v3496_v62 = vpack.i.bf16 %v854_v53, %v855_v58  ;;  %v877_v58 = vmul.f32 %v5085_v3, %v4381_v41 }
 0x3a3   :  { %v3501_v22 = vpack.i.bf16 %v853_v51, %v881_v25 }
 0x3a5   :  { %3487 = vrot.lane.b32.xlu1 %v3486_v12, %s3837_s21  ;;  %3477 = vrot.lane.b32.xlu2 %v3476_v42, %s3837_s21  ;;  %v851_v12 = vmul.f32 %v5134_v11, %v4309_v37  ;;  %v878_v42 = vmul.f32 %v4960_v40, %v4354_v4  ;;  %v876_v37 = vmul.f32 %v5085_v3, %v4354_v4 }
 0x3a6   :  { %3482 = vrot.lane.b32.xlu0 %v3481_v8, %s3837_s21  ;;  %v880_v8 = vmul.f32 %v5052_v24, %v4354_v4 }
 0x3a7   :  { %v5292_v48 = vpop.eup %3763  ;;  %v3516_v63 = vpack.i.bf16 %v850_v19, %v878_v42  ;;  %v3511_v53 = vpack.i.bf16 %v851_v12, %v879_v9  ;;  %v5795_v9 = vpack.i.bf16 %v5107_v49, %v5111_v30 }
 0x3a8   :  { %1925 = vmatmul.f32.gmra.mxu1 %v5292_v48  ;;  %v3506_v23 = vpack.i.bf16 %v852_v10, %v880_v8  ;;  %v3521_v10 = vpack.i.bf16 %v876_v37, %v877_v58  ;;  %v893_v58 = vmul.f32 %v5085_v3, %v4477_v5 }
 0x3ad   :  { %3502 = vrot.lane.b32.xlu1 %v3501_v22, %s3837_s21  ;;  %3492 = vrot.lane.b32.xlu2 %v3491_v39, %s3837_s21  ;;  %v896_v22 = vmul.f32 %v5052_v24, %v4426_v26 }
 0x3ae   :  { %3497 = vrot.lane.b32.xlu0 %v3496_v62, %s3837_s21 }
 0x3af   :  { %v3531_v19 = vpack.i.bf16 %v874_v13, %v896_v22 }
 0x3b4   :  { %v1899_v51 = vpop.f32.mrf.mxu1 }
 0x3b5   :  { %3765 = vrcp.f32 %v1899_v51  ;;  %3517 = vrot.lane.b32.xlu1 %v3516_v63, %s3837_s21  ;;  %3507 = vrot.lane.b32.xlu2 %v3506_v23, %s3837_s21  ;;  %v1958_v42 = vand.u32 2147483648, %v1899_v51  ;;  %v1956_v63 = vand.u32 2147483647, %v1899_v51  ;;  %v871_v23 = vmul.f32 %v5118_v56, %v4381_v41 }
 0x3b6   :  { %3512 = vrot.lane.b32.xlu0 %v3511_v53, %s3837_s21  ;;  %vm1952_vm9 = vweird.f32 %v1899_v51 }
 0x3b7   :  { %v1959_v37 = vor.u32 1.1754944e-38, %v1958_v42  ;;  %vm1957_vm12 = vcmp.eq.f32.partialorder %v1956_v63, 8.507059e+37  ;;  %v3546_v30 = vpack.i.bf16 %v871_v23, %v893_v58  ;;  %v5797_v42 = vpack.i.bf16 %v4986_v2, %v4990_v21 }
 0x3bb   :  { %v3766_v25 = vpop.eup %3765 }
 0x3bc   :  { %v1948_v39 = vmul.f32 %v3766_v25, %v1899_v51  ;;  %v1902_v62 = vpop.f32.mrf.mxu1  ;;  %vm1953_vm4 = vweird.f32 %v3766_v25  ;;  %v5796_v51 = vpack.i.bf16 %v4998_v27, %v5002_v47  ;;  %v892_v27 = vmul.f32 %v5085_v3, %v4426_v26 }
 0x3bd   :  { %3767 = vrcp.f32 %v1902_v62  ;;  %3532 = vrot.lane.b32.xlu1 %v3531_v19, %s3837_s21  ;;  %3522 = vrot.lane.b32.xlu2 %v3521_v10, %s3837_s21  ;;  %vm1954_vm10 = vmor %vm1952_vm9, %vm1953_vm4  ;;  %vm1966_vm14 = vweird.f32 %v1902_v62 }
 0x3be   :  { %v1949_v12 = vsub.f32 1.0, %v1948_v39  ;;  %3527 = vrot.lane.b32.xlu0 %v5795_v9, %s3837_s21  ;;  %v870_v9 = vmul.f32 %v5118_v56, %v4354_v4 }
 0x3c0   :  { %v1950_v8 = vmul.f32 %v3766_v25, %v1949_v12  ;;  %v1972_v12 = vand.u32 2147483648, %v1902_v62  ;;  %v3551_v21 = vpack.i.bf16 %v870_v9, %v892_v27  ;;  %v889_v9 = vmul.f32 %v4979_v50, %v4477_v5 }
 0x3c2   :  { %v1951_v53 = vadd.f32 %v3766_v25, %v1950_v8  ;;  %v1970_v8 = vand.u32 2147483647, %v1902_v62 }
 0x3c3   :  { %v3768_v13 = vpop.eup %3767 }
 0x3c4   :  { %v1962_v22 = vmul.f32 %v3768_v13, %v1902_v62  ;;  %v1905_v39 = vpop.f32.mrf.mxu1  ;;  %v1955_v19 = vsel %vm1954_vm10, %v3766_v25, %v1951_v53  ;;  %vm1967_vm13 = vweird.f32 %v3768_v13  ;;  %v1973_v53 = vor.u32 1.1754944e-38, %v1972_v12 }
 0x3c5   :  { %3769 = vrcp.f32 %v1905_v39  ;;  %v1960_v49 = vsel %vm1957_vm12, %v1959_v37, %v1955_v19  ;;  %3547 = vrot.lane.b32.xlu1 %v3546_v30, %s3837_s21  ;;  %3537 = vrot.lane.b32.xlu2 %v5796_v51, %s3837_s21  ;;  %vm1968_vm15 = vmor %vm1966_vm14, %vm1967_vm13  ;;  %vm1971_vm1 = vcmp.eq.f32.partialorder %v1970_v8, 8.507059e+37  ;;  %v5798_v62 = vpack.i.bf16 %v5151_v44, %v5155_v7 }
 0x3c6   :  { %v1963_v10 = vsub.f32 1.0, %v1962_v22  ;;  %3345 = vmatmul.msk.f32.vlgmr.msrb.gmra.mxu3 %vm2172_vm11, %v1960_v49  ;;  %3542 = vrot.lane.b32.xlu0 %v5797_v42, %s3837_s21  ;;  %v1986_v19 = vand.u32 2147483648, %v1905_v39  ;;  %v1984_v30 = vand.u32 2147483647, %v1905_v39  ;;  %v886_v51 = vmul.f32 %v5118_v56, %v4426_v26 }
 0x3c7   :  { %v887_v12 = vmul.f32 %v5118_v56, %v4477_v5  ;;  %v867_v44 = vmul.f32 %v5134_v11, %v4381_v41  ;;  %vm1980_vm3 = vweird.f32 %v1905_v39  ;;  %v888_v8 = vmul.f32 %v4979_v50, %v4426_v26 }
 0x3c8   :  { %v1964_v25 = vmul.f32 %v3768_v13, %v1963_v10  ;;  %vm1985_vm6 = vcmp.eq.f32.partialorder %v1984_v30, 8.507059e+37 }
 0x3ca   :  { %v1965_v63 = vadd.f32 %v3768_v13, %v1964_v25  ;;  %v1987_v25 = vor.u32 1.1754944e-38, %v1986_v19 }
 0x3cb   :  { %v3770_v23 = vpop.eup %3769 }
 0x3cc   :  { %v1976_v47 = vmul.f32 %v3770_v23, %v1905_v39  ;;  %v5360_v37 = vpop.f32.mrf.mxu1  ;;  %v1969_v58 = vsel %vm1968_vm15, %v3768_v13, %v1965_v63  ;;  %v5799_v13 = vpack.i.bf16 %v5143_v31, %v5147_v54  ;;  %vm1981_vm2 = vweird.f32 %v3770_v23 }
 0x3cd   :  { %3771 = vrcp.f32 %v5360_v37  ;;  %v1974_v2 = vsel %vm1971_vm1, %v1973_v53, %v1969_v58  ;;  %3562 = vrot.lane.b32.xlu1 %v5798_v62, %s3837_s21  ;;  %3552 = vrot.lane.b32.xlu2 %v3551_v21, %s3837_s21  ;;  %v866_v31 = vmul.f32 %v5134_v11, %v4354_v4  ;;  %vm1982_vm5 = vmor %vm1980_vm3, %vm1981_vm2  ;;  %v3576_v4 = vpack.i.bf16 %v886_v51, %v887_v12 }
 0x3ce   :  { %v1977_v22 = vsub.f32 1.0, %v1976_v47  ;;  %3346 = vmatmul.msk.f32.gmra.mxu3 %vm2172_vm11, %v1974_v2  ;;  %3557 = vrot.lane.b32.xlu0 %v5799_v13, %s3837_s21  ;;  %v3566_v47 = vpack.i.bf16 %v867_v44, %v889_v9  ;;  %v2000_v21 = vand.u32 2147483648, %v5360_v37  ;;  %v883_v13 = vmul.f32 %v5134_v11, %v4477_v5 }
 0x3cf   :  { %v1594_v10 = vpop.f32.mrf.mxu3  ;;  %v3571_v2 = vpack.i.bf16 %v866_v31, %v888_v8  ;;  %vm1994_vm8 = vweird.f32 %v5360_v37  ;;  %v911_v12 = vmul.f32 %v4960_v40, %v4528_v55  ;;  %v5800_v9 = vpack.i.bf16 %v5179_v33, %v5183_v16 }
 0x3d0   :  { %v1978_v49 = vmul.f32 %v3770_v23, %v1977_v22  ;;  %v1828_v7 = vmul.f32 0.5, %v1594_v10  ;;  %v1998_v22 = vand.u32 2147483647, %v5360_v37  ;;  %v2001_v51 = vor.u32 1.1754944e-38, %v2000_v21 }
 0x3d1   :  { %v907_v16 = vmul.f32 %v5092_v52, %v4528_v55  ;;  %v882_v33 = vmul.f32 %v5134_v11, %v4426_v26 }
 0x3d2   :  { %v1979_v42 = vadd.f32 %v3770_v23, %v1978_v49  ;;  %v1854_v53 = vmul.f32 1.442695, %v1828_v7  ;;  %vm1999_vm9 = vcmp.eq.f32.partialorder %v1998_v22, 8.507059e+37 }
 0x3d3   :  { %v3772_v54 = vpop.eup %3771 }
 0x3d4   :  { %v1990_v63 = vmul.f32 %v3772_v54, %v5360_v37  ;;  %v5386_v27 = vpop.f32.mrf.mxu1  ;;  %v1983_v41 = vsel %vm1982_vm5, %v3770_v23, %v1979_v42  ;;  %vm1995_vm7 = vweird.f32 %v3772_v54  ;;  %v3591_v37 = vpack.i.bf16 %v883_v13, %v911_v12 }
 0x3d5   :  { %3773 = vrcp.f32 %v5386_v27  ;;  %v1988_v39 = vsel %vm1985_vm6, %v1987_v25, %v1983_v41  ;;  %3577 = vrot.lane.b32.xlu1 %v3576_v4, %s3837_s21  ;;  %3567 = vrot.lane.b32.xlu2 %v3566_v47, %s3837_s21  ;;  %vm1996_vm4 = vmor %vm1994_vm8, %vm1995_vm7  ;;  %v2012_v41 = vand.u32 2147483647, %v5386_v27  ;;  %v906_v4 = vmul.f32 %v5092_v52, %v4510_v45 }
 0x3d6   :  { %v1991_v58 = vsub.f32 1.0, %v1990_v63  ;;  %3775 = vpow2.f32 %v1854_v53  ;;  %3347 = vmatmul.msk.f32.gmra.mxu3 %vm2172_vm11, %v1988_v39  ;;  %3572 = vrot.lane.b32.xlu0 %v3571_v2, %s3837_s21  ;;  %v5801_v63 = vpack.i.bf16 %v5175_v15, %v5169_v20  ;;  %vm2008_vm12 = vweird.f32 %v5386_v27  ;;  %v5434_v2 = vpop.permute.xlu1 %3397 }
 0x3d7   :  { %v1597_v62 = vpop.f32.mrf.mxu3  ;;  %v5395_v19 = vpop.permute.xlu2 %3402  ;;  %v908_v15 = vmul.f32 %v5085_v3, %v4510_v45  ;;  %v909_v20 = vmul.f32 %v5085_v3, %v4528_v55  ;;  %vm2013_vm14 = vcmp.eq.f32.partialorder %v2012_v41, 8.507059e+37  ;;  %v3606_v13 = vpack.i.bf16 %v906_v4, %v907_v16 }
 0x3d8   :  { %v1992_v23 = vmul.f32 %v3772_v54, %v1991_v58  ;;  %v1829_v49 = vmul.f32 0.5, %v1597_v62 }
 0x3da   :  { %v1993_v30 = vadd.f32 %v3772_v54, %v1992_v23  ;;  %v1856_v42 = vmul.f32 1.442695, %v1829_v49  ;;  %v910_v23 = vmul.f32 %v4960_v40, %v4510_v45 }
 0x3db   :  { %v3774_v10 = vpop.eup %3773 }
 0x3dc   :  { %v5402_v44 = vpop.eup %3775  ;;  %v2004_v7 = vmul.f32 %v3774_v10, %v5386_v27  ;;  %v5405_v31 = vpop.f32.mrf.mxu1  ;;  %v1997_v25 = vsel %vm1996_vm4, %v3772_v54, %v1993_v30  ;;  %v2014_v54 = vand.u32 2147483648, %v5386_v27  ;;  %vm2009_vm10 = vweird.f32 %v3774_v10 }
 0x3dd   :  { %3777 = vrcp.f32 %v5405_v31  ;;  %1928 = vmatmul.f32.gmra.mxu1 %v5402_v44  ;;  %v2002_v5 = vsel %vm1999_vm9, %v2001_v51, %v1997_v25  ;;  %3592 = vrot.lane.b32.xlu1 %v3591_v37, %s3837_s21  ;;  %vm2010_vm13 = vmor %vm2008_vm12, %vm2009_vm10  ;;  %v3596_v49 = vpack.i.bf16 %v882_v33, %v910_v23  ;;  %v3601_v51 = vpack.i.bf16 %v908_v15, %v909_v20 }
 0x3de   :  { %v2005_v8 = vsub.f32 1.0, %v2004_v7  ;;  %3779 = vpow2.f32 %v1856_v42  ;;  %3348 = vmatmul.msk.f32.gmra.mxu3 %vm2172_vm11, %v2002_v5  ;;  %3582 = vrot.lane.b32.xlu2 %v5800_v9, %s3837_s21  ;;  %v2015_v21 = vor.u32 1.1754944e-38, %v2014_v54  ;;  %v2028_v12 = vand.u32 2147483648, %v5405_v31 }
 0x3df   :  { %3587 = vrot.lane.b32.xlu0 %v5801_v63, %s3837_s21  ;;  %v5421_v39 = vpop.permute.xlu2 %3417  ;;  %vm2022_vm1 = vweird.f32 %v5405_v31  ;;  %v927_v15 = vmul.f32 %v4960_v40, %v4612_v36  ;;  %v3399_v23 = vunpack.i.l.bf16 %v5434_v2 }
 0x3e0   :  { %v2006_v53 = vmul.f32 %v3774_v10, %v2005_v8  ;;  %v2029_v63 = vor.u32 1.1754944e-38, %v2028_v12 }
 0x3e2   :  { %v2007_v47 = vadd.f32 %v3774_v10, %v2006_v53  ;;  %v903_v53 = vmul.f32 %v5118_v56, %v4528_v55 }
 0x3e3   :  { %v3778_v58 = vpop.eup %3777 }
 0x3e4   :  { %v5438_v22 = vpop.eup %3779  ;;  %v2018_v26 = vmul.f32 %v3778_v58, %v5405_v31  ;;  %v2011_v62 = vsel %vm2010_vm13, %v3774_v10, %v2007_v47  ;;  %vm2023_vm15 = vweird.f32 %v3778_v58  ;;  %v2026_v10 = vand.u32 2147483647, %v5405_v31 }
 0x3e5   :  { %1931 = vmatmul.f32.gmra.mxu1 %v5438_v22  ;;  %v2016_v27 = vsel %vm2013_vm14, %v2015_v21, %v2011_v62  ;;  %3607 = vrot.lane.b32.xlu1 %v3606_v13, %s3837_s21  ;;  %vm2024_vm2 = vmor %vm2022_vm1, %vm2023_vm15  ;;  %v3420_v31 = vunpack.i.h.bf16 %v5421_v39  ;;  %v3621_v20 = vpack.i.bf16 %v927_v15, %v903_v53  ;;  %v3400_v13 = vunpack.i.h.bf16 %v5434_v2 }
 0x3e6   :  { %v2019_v30 = vsub.f32 1.0, %v2018_v26  ;;  %3349 = vmatmul.msk.f32.gmra.mxu3 %vm2172_vm11, %v2016_v27  ;;  %3597 = vrot.lane.b32.xlu2 %v3596_v49, %s3837_s21  ;;  %vm2027_vm3 = vcmp.eq.f32.partialorder %v2026_v10, 8.507059e+37  ;;  %v5803_v26 = vpack.i.bf16 %v5080_v6, %v5076_v38  ;;  %v926_v38 = vmul.f32 %v4960_v40, %v4578_v59 }
 0x3e7   :  { %3602 = vrot.lane.b32.xlu0 %v3601_v51, %s3837_s21  ;;  %v1703_v42 = vpop.f32.mrf.mxu2  ;;  %v5448_v25 = vpop.permute.xlu2 %3432  ;;  %v3404_v51 = vunpack.i.l.bf16 %v5395_v19  ;;  %v3405_v2 = vunpack.i.h.bf16 %v5395_v19  ;;  %v5805_v19 = vpack.i.bf16 %v5205_v35, %v5201_v57 }
 0x3e8   :  { %v2020_v7 = vmul.f32 %v3778_v58, %v2019_v30  ;;  %v1830_v5 = vmul.f32 0.5, %v1703_v42  ;;  %v3393_v37 = vpop.permute.xlu0 %3392  ;;  %v5451_v54 = vpop.permute.xlu1 %3412 }
 0x3e9   :  { %v3394_v9 = vunpack.i.l.bf16 %v3393_v37  ;;  %v3415_v4 = vunpack.i.h.bf16 %v5451_v54  ;;  %v3395_v33 = vunpack.i.h.bf16 %v3393_v37 }
 0x3ea   :  { %v2021_v8 = vadd.f32 %v3778_v58, %v2020_v7  ;;  %v1858_v41 = vmul.f32 1.442695, %v1830_v5 }
 0x3eb   :  { %2366 = vmatpush.msra.mxu2 %v3394_v9  ;;  %2453 = vmatpush.msra.mxu3 %v3415_v4 }
 0x3ec   :  { %v2025_v16 = vsel %vm2024_vm2, %v3778_v58, %v2021_v8  ;;  %3781 = vpow2.f32 %v1858_v41  ;;  %v5802_v58 = vpack.i.bf16 %v5072_v61, %v5066_v1  ;;  %v902_v1 = vmul.f32 %v5118_v56, %v4510_v45 }
 0x3ed   :  { %v2030_v47 = vsel %vm2027_vm3, %v2029_v63, %v2025_v16  ;;  %2367 = vmatpush.msra.mxu2 %v3395_v33  ;;  %v5460_v21 = vpop.f32.mrf.mxu1  ;;  %2454 = vmatpush.msra.mxu3 %v3420_v31  ;;  %v5804_v8 = vpack.i.bf16 %v5197_v18, %v5189_v32  ;;  %v945_v41 = vmul.f32 %v5052_v24, %v4654_v0  ;;  %v3414_v31 = vunpack.i.l.bf16 %v5451_v54 }
 0x3ee   :  { %3350 = vmatmul.msk.f32.gmra.mxu3 %vm2172_vm11, %v2030_v47  ;;  %3783 = vrcp.f32 %v5460_v21  ;;  %3622 = vrot.lane.b32.xlu1 %v3621_v20, %s3837_s21  ;;  %v3626_v10 = vpack.i.bf16 %v926_v38, %v902_v1  ;;  %v922_v32 = vmul.f32 %v5092_v52, %v4578_v59  ;;  %v2040_v16 = vand.u32 2147483647, %v5460_v21 }
 0x3ef   :  { %3617 = vrot.lane.b32.xlu0 %v5802_v58, %s3837_s21  ;;  %3612 = vrot.lane.b32.xlu2 %v5803_v26, %s3837_s21  ;;  %v1706_v62 = vpop.f32.mrf.mxu2  ;;  %v5473_v27 = vpop.permute.xlu2 %3447  ;;  %v2042_v33 = vand.u32 2147483648, %v5460_v21  ;;  %v899_v24 = vmul.f32 %v5134_v11, %v4528_v55  ;;  %v898_v52 = vmul.f32 %v5134_v11, %v4510_v45  ;;  %vm2036_vm6 = vweird.f32 %v5460_v21 }
 0x3f0   :  { %2368 = vmatpush.msra.mxu2 %v3399_v23  ;;  %v1831_v49 = vmul.f32 0.5, %v1706_v62  ;;  %v3408_v30 = vpop.permute.xlu0 %3407  ;;  %v3419_v26 = vunpack.i.l.bf16 %v5421_v39  ;;  %vm2041_vm8 = vcmp.eq.f32.partialorder %v2040_v16, 8.507059e+37  ;;  %v3435_v45 = vunpack.i.h.bf16 %v5448_v25 }
 0x3f1   :  { %v3409_v5 = vunpack.i.l.bf16 %v3408_v30  ;;  %v3410_v4 = vunpack.i.h.bf16 %v3408_v30  ;;  %v3656_v54 = vpack.i.bf16 %v899_v24, %v945_v41  ;;  %v2043_v62 = vor.u32 1.1754944e-38, %v2042_v33  ;;  %v5811_v24 = vld [vmem:[#allocation14_spill] sm:$0xff] }
 0x3f2   :  { %v5478_v61 = vpop.eup %3781  ;;  %v1860_v12 = vmul.f32 1.442695, %v1831_v49  ;;  %2369 = vmatpush.msra.mxu2 %v3400_v13  ;;  %v3646_v13 = vpack.i.bf16 %v922_v32, %v898_v52  ;;  %v5806_v39 = vpack.i.bf16 %v5217_v29, %v5213_v46 }
 0x3f3   :  { %1934 = vmatmul.f32.gmra.mxu1 %v5478_v61 }
 0x3f4   :  { %v3784_v6 = vpop.eup %3783  ;;  %3785 = vpow2.f32 %v1860_v12  ;;  %2370 = vmatpush.msra.mxu2 %v3404_v51 }
 0x3f5   :  { %v2032_v7 = vmul.f32 %v3784_v6, %v5460_v21  ;;  %v5486_v42 = vpop.f32.mrf.mxu1  ;;  %v1812_v37 = vpop.f32.mrf.mxu0  ;;  %vm2037_vm5 = vweird.f32 %v3784_v6 }
 0x3f6   :  { %2371 = vmatpush.msra.mxu2 %v3405_v2  ;;  %3787 = vrcp.f32 %v5486_v42  ;;  %v1832_v9 = vmul.f32 0.5, %v1812_v37  ;;  %3637 = vrot.lane.b32.xlu1 %v5805_v19, %s3837_s21  ;;  %vm2038_vm7 = vmor %vm2036_vm6, %vm2037_vm5  ;;  %v2054_v46 = vand.u32 2147483647, %v5486_v42  ;;  %v2056_v29 = vand.u32 2147483648, %v5486_v42 }
 0x3f7   :  { %3632 = vrot.lane.b32.xlu0 %v5804_v8, %s3837_s21  ;;  %v2033_v40 = vsub.f32 1.0, %v2032_v7  ;;  %3627 = vrot.lane.b32.xlu2 %v3626_v10, %s3837_s21  ;;  %v3428_v63 = vpop.permute.xlu1 %3427  ;;  %v5498_v53 = vpop.permute.xlu2 %3462  ;;  %v919_v10 = vmul.f32 %v5118_v56, %v4612_v36  ;;  %vm2050_vm9 = vweird.f32 %v5486_v42 }
 0x3f8   :  { %2372 = vmatpush.msra.mxu2 %v3409_v5  ;;  %v3423_v18 = vpop.permute.xlu0 %3422  ;;  %v1862_v57 = vmul.f32 1.442695, %v1832_v9  ;;  %v3430_v20 = vunpack.i.h.bf16 %v3428_v63  ;;  %v3429_v2 = vunpack.i.l.bf16 %v3428_v63  ;;  %v3434_v9 = vunpack.i.l.bf16 %v5448_v25 }
 0x3f9   :  { %v3425_v35 = vunpack.i.h.bf16 %v3423_v18  ;;  %v2034_v47 = vmul.f32 %v3784_v6, %v2033_v40  ;;  %v3424_v30 = vunpack.i.l.bf16 %v3423_v18  ;;  %v941_v63 = vmul.f32 %v5085_v3, %v4654_v0 }
 0x3fa   :  { %v5506_v15 = vpop.eup %3785  ;;  %2373 = vmatpush.msra.mxu2 %v3410_v4  ;;  %3789 = vpow2.f32 %v1862_v57  ;;  %v2057_v18 = vor.u32 1.1754944e-38, %v2056_v29  ;;  %vm2055_vm12 = vcmp.eq.f32.partialorder %v2054_v46, 8.507059e+37  ;;  %v3450_v25 = vunpack.i.h.bf16 %v5473_v27  ;;  %v5807_v57 = vld [vmem:[#allocation11_spill] sm:$0xff] }
 0x3fb   :  { %2455 = vmatpush.msra.mxu3 %v3425_v35  ;;  %1937 = vmatmul.f32.gmra.mxu1 %v5506_v15  ;;  %v2035_v23 = vadd.f32 %v3784_v6, %v2034_v47  ;;  %v3671_v32 = vpack.i.bf16 %v919_v10, %v941_v63  ;;  %v5808_v35 = vld [vmem:[#allocation12_spill] sm:$0xff] }
 0x3fc   :  { %v3788_v58 = vpop.eup %3787  ;;  %2374 = vmatpush.msra.mxu2 %v3414_v31  ;;  %v5809_v47 = vpack.i.bf16 %v5807_v57, %v5808_v35 }
 0x3fd   :  { %v2046_v55 = vmul.f32 %v3788_v58, %v5486_v42  ;;  %2456 = vmatpush.msra.mxu3 %v3430_v20  ;;  %v2039_v49 = vsel %vm2038_vm7, %v3784_v6, %v2035_v23  ;;  %v1815_v21 = vpop.f32.mrf.mxu0  ;;  %vm2051_vm4 = vweird.f32 %v3788_v58  ;;  %v5810_v42 = vld [vmem:[#allocation13_spill] sm:$0xff] }
 0x3fe   :  { %2375 = vmatpush.msra.mxu2 %v3419_v26  ;;  %v2044_v1 = vsel %vm2041_vm8, %v2043_v62, %v2039_v49  ;;  %v1833_v12 = vmul.f32 0.5, %v1815_v21  ;;  %3647 = vrot.lane.b32.xlu1 %v3646_v13, %s3837_s21  ;;  %vm2052_vm10 = vmor %vm2050_vm9, %vm2051_vm4  ;;  %v5812_v20 = vpack.i.bf16 %v5810_v42, %v5811_v24 }
 0x3ff   :  { %3642 = vrot.lane.b32.xlu0 %v5806_v39, %s3837_s21  ;;  %v2047_v51 = vsub.f32 1.0, %v2046_v55  ;;  %3657 = vrot.lane.b32.xlu2 %v3656_v54, %s3837_s21  ;;  %v3443_v38 = vpop.permute.xlu1 %3442  ;;  %v5525_v6 = vpop.permute.xlu2 %3477  ;;  %v918_v55 = vmul.f32 %v5118_v56, %v4578_v59  ;;  %v3465_v39 = vunpack.i.h.bf16 %v5498_v53 }
 0x400   :  { %2376 = vmatpush.msra.mxu2 %v3424_v30  ;;  %2457 = vmatpush.msra.mxu3 %v3435_v45  ;;  %v3438_v7 = vpop.permute.xlu0 %3437  ;;  %v1864_v5 = vmul.f32 1.442695, %v1833_v12  ;;  %v5532_v40 = vpop.eup %3789  ;;  %v3445_v19 = vunpack.i.h.bf16 %v3443_v38  ;;  %v3444_v33 = vunpack.i.l.bf16 %v3443_v38  ;;  %v5813_v30 = vld [vmem:[#allocation5_spill] sm:$0xff]  ;;  %v5815_v12 = vpack.i.bf16 %v5240_v34, %v5244_v60 }
 0x401   :  { %v3440_v37 = vunpack.i.h.bf16 %v3438_v7  ;;  %3351 = vmatmul.msk.f32.gmra.mxu3 %vm2172_vm11, %v2044_v1  ;;  %v2048_v8 = vmul.f32 %v3788_v58, %v2047_v51  ;;  %v3439_v4 = vunpack.i.l.bf16 %v3438_v7  ;;  %v3464_v1 = vunpack.i.l.bf16 %v5498_v53 }
 0x402   :  { %2377 = vmatpush.msra.mxu2 %v3429_v2  ;;  %3791 = vpow2.f32 %v1864_v5  ;;  %v5814_v51 = vpack.i.bf16 %v5230_v14, %v5236_v28  ;;  %v914_v53 = vmul.f32 %v5134_v11, %v4578_v59  ;;  %v915_v14 = vmul.f32 %v5134_v11, %v4612_v36 }
 0x403   :  { %2458 = vmatpush.msra.mxu3 %v3440_v37  ;;  %1940 = vmatmul.f32.gmra.mxu1 %v5532_v40  ;;  %v2049_v41 = vadd.f32 %v3788_v58, %v2048_v8  ;;  %v934_v60 = vmul.f32 %v5118_v56, %v5813_v30  ;;  %v935_v34 = vmul.f32 %v5118_v56, %v4654_v0  ;;  %v3480_v8 = vunpack.i.h.bf16 %v5525_v6 }
 0x404   :  { %2378 = vmatpush.msra.mxu2 %v3434_v9  ;;  %v936_v10 = vmul.f32 %v4979_v50, %v5813_v30  ;;  %v937_v59 = vmul.f32 %v4979_v50, %v4654_v0  ;;  %v3479_v9 = vunpack.i.l.bf16 %v5525_v6  ;;  %v930_v63 = vmul.f32 %v5134_v11, %v5813_v30 }
 0x405   :  { %2459 = vmatpush.msra.mxu3 %v3445_v19  ;;  %v2053_v16 = vsel %vm2052_vm10, %v3788_v58, %v2049_v41  ;;  %v3449_v58 = vunpack.i.l.bf16 %v5473_v27  ;;  %v940_v27 = vmul.f32 %v5085_v3, %v5813_v30  ;;  %v3696_v36 = vpack.i.bf16 %v934_v60, %v935_v34 }
 0x406   :  { %2379 = vmatpush.msra.mxu2 %v3439_v4  ;;  %v2058_v31 = vsel %vm2055_vm12, %v2057_v18, %v2053_v16  ;;  %3672 = vrot.lane.b32.xlu1 %v3671_v32, %s3837_s21  ;;  %v3686_v5 = vpack.i.bf16 %v914_v53, %v936_v10  ;;  %v3691_v37 = vpack.i.bf16 %v915_v14, %v937_v59 }
 0x407   :  { %3652 = vrot.lane.b32.xlu0 %v5809_v47, %s3837_s21  ;;  %3662 = vrot.lane.b32.xlu2 %v5812_v20, %s3837_s21  ;;  %v3458_v52 = vpop.permute.xlu1 %3457  ;;  %v5549_v23 = vpop.permute.xlu2 %3492  ;;  %v3666_v21 = vpack.i.bf16 %v918_v55, %v940_v27  ;;  %v931_v41 = vmul.f32 %v5134_v11, %v4654_v0  ;;  %v932_v18 = vmul.f32 %v5132_v17, %v5813_v30 }
 0x408   :  { %2380 = vmatpush.msra.mxu2 %v3444_v33  ;;  %2460 = vmatpush.msra.mxu3 %v3450_v25  ;;  %v3453_v26 = vpop.permute.xlu0 %3452  ;;  %v5555_v13 = vpop.eup %3791  ;;  %v3460_v49 = vunpack.i.h.bf16 %v3458_v52  ;;  %v3459_v45 = vunpack.i.l.bf16 %v3458_v52  ;;  %v933_v32 = vmul.f32 %v5132_v17, %v4654_v0  ;;  %v3494_v57 = vunpack.i.l.bf16 %v5549_v23 }
 0x409   :  { %v3455_v54 = vunpack.i.h.bf16 %v3453_v26  ;;  %v3454_v62 = vunpack.i.l.bf16 %v3453_v26  ;;  %3352 = vmatmul.msk.f32.gmra.mxu3 %vm2172_vm11, %v2058_v31  ;;  %v3706_v33 = vpack.i.bf16 %v930_v63, %v931_v41  ;;  %v3495_v11 = vunpack.i.h.bf16 %v5549_v23 }
 0x40a   :  { %2381 = vmatpush.msra.mxu2 %v3449_v58  ;;  %v3701_v35 = vpack.i.bf16 %v932_v18, %v933_v32 }
 0x40b   :  { %2461 = vmatpush.msra.mxu3 %v3454_v62  ;;  %1943 = vmatmul.f32.gmra.mxu1 %v5555_v13 }
 0x40c   :  { %2540 = vmatpush.msrb.mxu2 %v3455_v54 }
 0x40d   :  { %2462 = vmatpush.msra.mxu3 %v3459_v45 }
 0x40e   :  { %2541 = vmatpush.msrb.mxu2 %v3460_v49  ;;  %3677 = vrot.lane.b32.xlu1 %v5815_v12, %s3837_s21 }
 0x40f   :  { %3682 = vrot.lane.b32.xlu0 %v5814_v51, %s3837_s21  ;;  %3667 = vrot.lane.b32.xlu2 %v3666_v21, %s3837_s21  ;;  %v3473_v3 = vpop.permute.xlu1 %3472  ;;  %v5571_v38 = vpop.permute.xlu2 %3507 }
 0x410   :  { %2463 = vmatpush.msra.mxu3 %v3464_v1  ;;  %2542 = vmatpush.msrb.mxu2 %v3465_v39  ;;  %v3468_v2 = vpop.permute.xlu0 %3467  ;;  %v3475_v46 = vunpack.i.h.bf16 %v3473_v3  ;;  %v3474_v29 = vunpack.i.l.bf16 %v3473_v3  ;;  %v3509_v20 = vunpack.i.l.bf16 %v5571_v38  ;;  %v3510_v62 = vunpack.i.h.bf16 %v5571_v38 }
 0x411   :  { %v3470_v28 = vunpack.i.h.bf16 %v3468_v2  ;;  %v3469_v7 = vunpack.i.l.bf16 %v3468_v2 }
 0x413   :  { %2464 = vmatpush.msra.mxu3 %v3469_v7  ;;  %2543 = vmatpush.msrb.mxu2 %v3470_v28 }
 0x415   :  { %2465 = vmatpush.msra.mxu3 %v3474_v29  ;;  %2544 = vmatpush.msrb.mxu2 %v3475_v46 }
 0x416   :  { %3697 = vrot.lane.b32.xlu1 %v3696_v36, %s3837_s21 }
 0x417   :  { %3687 = vrot.lane.b32.xlu0 %v3686_v5, %s3837_s21  ;;  %3692 = vrot.lane.b32.xlu2 %v3691_v37, %s3837_s21  ;;  %v3488_v56 = vpop.permute.xlu1 %3487  ;;  %v5590_v19 = vpop.permute.xlu2 %3522 }
 0x418   :  { %2466 = vmatpush.msra.mxu3 %v3479_v9  ;;  %2545 = vmatpush.msrb.mxu2 %v3480_v8  ;;  %v3483_v50 = vpop.permute.xlu0 %3482  ;;  %v3490_v16 = vunpack.i.h.bf16 %v3488_v56  ;;  %v3489_v25 = vunpack.i.l.bf16 %v3488_v56  ;;  %v3524_v14 = vunpack.i.l.bf16 %v5590_v19  ;;  %v3525_v34 = vunpack.i.h.bf16 %v5590_v19 }
 0x419   :  { %v3485_v4 = vunpack.i.h.bf16 %v3483_v50  ;;  %v3484_v6 = vunpack.i.l.bf16 %v3483_v50 }
 0x41b   :  { %2467 = vmatpush.msra.mxu3 %v3484_v6  ;;  %2546 = vmatpush.msrb.mxu2 %v3485_v4 }
 0x41d   :  { %2468 = vmatpush.msra.mxu3 %v3489_v25  ;;  %2547 = vmatpush.msrb.mxu2 %v3490_v16  ;;  %v1923_v47 = vpop.f32.mrf.mxu1 }
 0x41e   :  { %3793 = vrcp.f32 %v1923_v47  ;;  %v2068_v27 = vand.u32 2147483647, %v1923_v47  ;;  %v2070_v21 = vand.u32 2147483648, %v1923_v47  ;;  %vm2064_vm14 = vweird.f32 %v1923_v47 }
 0x41f   :  { %3707 = vrot.lane.b32.xlu0 %v3706_v33, %s3837_s21  ;;  %3702 = vrot.lane.b32.xlu2 %v3701_v35, %s3837_s21  ;;  %v3503_v0 = vpop.permute.xlu1 %3502  ;;  %v5604_v17 = vpop.permute.xlu2 %3537 }
 0x420   :  { %2548 = vmatpush.msrb.mxu2 %v3494_v57  ;;  %v3498_v31 = vpop.permute.xlu0 %3497  ;;  %v3504_v42 = vunpack.i.l.bf16 %v3503_v0  ;;  %v3505_v54 = vunpack.i.h.bf16 %v3503_v0  ;;  %v2071_v53 = vor.u32 1.1754944e-38, %v2070_v21  ;;  %vm2069_vm1 = vcmp.eq.f32.partialorder %v2068_v27, 8.507059e+37 }
 0x421   :  { %v3499_v24 = vunpack.i.l.bf16 %v3498_v31  ;;  %v3500_v52 = vunpack.i.h.bf16 %v3498_v31  ;;  %v3540_v50 = vunpack.i.h.bf16 %v5604_v17 }
 0x422   :  { %2549 = vmatpush.msrb.mxu2 %v3495_v11  ;;  %2627 = vmatpush.msrb.mxu0 %v3504_v42 }
 0x424   :  { %2550 = vmatpush.msrb.mxu2 %v3499_v24  ;;  %v3794_v58 = vpop.eup %3793  ;;  %2628 = vmatpush.msrb.mxu0 %v3509_v20  ;;  %v5816_v24 = vld [vmem:[#allocation6_spill] sm:$0xff] }
 0x425   :  { %v2060_v26 = vmul.f32 %v3794_v58, %v1923_v47  ;;  %v1926_v23 = vpop.f32.mrf.mxu1  ;;  %vm2065_vm13 = vweird.f32 %v3794_v58 }
 0x426   :  { %2551 = vmatpush.msrb.mxu2 %v3500_v52  ;;  %3795 = vrcp.f32 %v1926_v23  ;;  %vm2066_vm15 = vmor %vm2064_vm14, %vm2065_vm13  ;;  %v2084_v5 = vand.u32 2147483648, %v1926_v23  ;;  %v2082_v8 = vand.u32 2147483647, %v1926_v23  ;;  %vm2078_vm3 = vweird.f32 %v1926_v23 }
 0x427   :  { %v2061_v55 = vsub.f32 1.0, %v2060_v26  ;;  %v3518_v49 = vpop.permute.xlu1 %3517  ;;  %v5608_v45 = vpop.permute.xlu2 %3552 }
 0x428   :  { %2552 = vmatpush.msrb.mxu2 %v3505_v54  ;;  %v3513_v30 = vpop.permute.xlu0 %3512  ;;  %v3520_v12 = vunpack.i.h.bf16 %v3518_v49  ;;  %v3519_v3 = vunpack.i.l.bf16 %v3518_v49  ;;  %v2085_v19 = vor.u32 1.1754944e-38, %v2084_v5  ;;  %vm2083_vm6 = vcmp.eq.f32.partialorder %v2082_v8, 8.507059e+37 }
 0x429   :  { %v3515_v39 = vunpack.i.h.bf16 %v3513_v30  ;;  %v3514_v1 = vunpack.i.l.bf16 %v3513_v30  ;;  %v2062_v51 = vmul.f32 %v3794_v58, %v2061_v55  ;;  %v3555_v25 = vunpack.i.h.bf16 %v5608_v45 }
 0x42a   :  { %2553 = vmatpush.msrb.mxu2 %v3510_v62  ;;  %v3539_v49 = vunpack.i.l.bf16 %v5604_v17 }
 0x42b   :  { %2629 = vmatpush.msrb.mxu0 %v3514_v1  ;;  %v2063_v2 = vadd.f32 %v3794_v58, %v2062_v51 }
 0x42c   :  { %2554 = vmatpush.msrb.mxu2 %v3515_v39  ;;  %v3796_v38 = vpop.eup %3795  ;;  %v5817_v39 = vld [vmem:[#allocation7_spill] sm:$0xff] }
 0x42d   :  { %v2074_v28 = vmul.f32 %v3796_v38, %v1926_v23  ;;  %2630 = vmatpush.msrb.mxu0 %v3519_v3  ;;  %v2067_v7 = vsel %vm2066_vm15, %v3794_v58, %v2063_v2  ;;  %vm2079_vm2 = vweird.f32 %v3796_v38  ;;  %v3554_v2 = vunpack.i.l.bf16 %v5608_v45 }
 0x42e   :  { %2555 = vmatpush.msrb.mxu2 %v3520_v12  ;;  %v2072_v60 = vsel %vm2069_vm1, %v2071_v53, %v2067_v7  ;;  %vm2080_vm5 = vmor %vm2078_vm3, %vm2079_vm2 }
 0x42f   :  { %v2075_v10 = vsub.f32 1.0, %v2074_v28  ;;  %2631 = vmatpush.msrb.mxu0 %v3524_v14  ;;  %v3533_v46 = vpop.permute.xlu1 %3532  ;;  %v5612_v29 = vpop.permute.xlu2 %3567  ;;  %3353 = vmatmul.msk.f32.gmra.mxu3 %vm2172_vm11, %v2072_v60 }
 0x430   :  { %v3528_v59 = vpop.permute.xlu0 %3527  ;;  %v3535_v9 = vunpack.i.h.bf16 %v3533_v46  ;;  %v3570_v0 = vunpack.i.h.bf16 %v5612_v29  ;;  %v3534_v55 = vunpack.i.l.bf16 %v3533_v46  ;;  %v3569_v45 = vunpack.i.l.bf16 %v5612_v29 }
 0x431   :  { %v3530_v36 = vunpack.i.h.bf16 %v3528_v59  ;;  %2632 = vmatpush.msrb.mxu0 %v3525_v34  ;;  %v2076_v37 = vmul.f32 %v3796_v38, %v2075_v10  ;;  %v3529_v58 = vunpack.i.l.bf16 %v3528_v59 }
 0x433   :  { %2633 = vmatpush.msrb.mxu0 %v3530_v36  ;;  %v2077_v56 = vadd.f32 %v3796_v38, %v2076_v37 }
 0x435   :  { %2634 = vmatpush.msrb.mxu0 %v3535_v9  ;;  %v2081_v63 = vsel %vm2080_vm5, %v3796_v38, %v2077_v56 }
 0x436   :  { %v2086_v41 = vsel %vm2083_vm6, %v2085_v19, %v2081_v63 }
 0x437   :  { %2635 = vmatpush.msrb.mxu0 %v3540_v50  ;;  %v3548_v4 = vpop.permute.xlu1 %3547  ;;  %3354 = vmatmul.msk.f32.gmra.mxu3 %vm2172_vm11, %v2086_v41 }
 0x438   :  { %v5616_v6 = vpop.permute.xlu2 %3582  ;;  %v3543_v18 = vpop.permute.xlu0 %3542  ;;  %v3550_v16 = vunpack.i.h.bf16 %v3548_v4  ;;  %v3549_v12 = vunpack.i.l.bf16 %v3548_v4 }
 0x439   :  { %v3545_v32 = vunpack.i.h.bf16 %v3543_v18  ;;  %v3584_v23 = vunpack.i.l.bf16 %v5616_v6  ;;  %v3544_v30 = vunpack.i.l.bf16 %v3543_v18  ;;  %v3585_v41 = vunpack.i.h.bf16 %v5616_v6 }
 0x43b   :  { %2636 = vmatpush.msrb.mxu0 %v3545_v32 }
 0x43d   :  { %2637 = vmatpush.msrb.mxu0 %v3550_v16 }
 0x43f   :  { %2638 = vmatpush.msrb.mxu0 %v3555_v25  ;;  %v3563_v33 = vpop.permute.xlu1 %3562 }
 0x440   :  { %v5620_v57 = vpop.permute.xlu2 %3597  ;;  %v3558_v35 = vpop.permute.xlu0 %3557  ;;  %v3565_v11 = vunpack.i.h.bf16 %v3563_v33  ;;  %v3564_v14 = vunpack.i.l.bf16 %v3563_v33 }
 0x441   :  { %v3560_v47 = vunpack.i.h.bf16 %v3558_v35  ;;  %v3559_v17 = vunpack.i.l.bf16 %v3558_v35  ;;  %v3599_v53 = vunpack.i.l.bf16 %v5620_v57 }
 0x443   :  { %2639 = vmatpush.msrb.mxu0 %v3560_v47 }
 0x445   :  { %2640 = vmatpush.msrb.mxu0 %v3565_v11 }
 0x447   :  { %2641 = vmatpush.msrb.mxu0 %v3570_v0  ;;  %v5623_v42 = vpop.permute.xlu1 %3577 }
 0x448   :  { %v3573_v52 = vpop.permute.xlu0 %3572  ;;  %v3579_v36 = vunpack.i.l.bf16 %v5623_v42  ;;  %v3580_v9 = vunpack.i.h.bf16 %v5623_v42 }
 0x449   :  { %v2238_v31 = vpop.f32.mrf.mxu3  ;;  %v3575_v26 = vunpack.i.h.bf16 %v3573_v52  ;;  %v5626_v54 = vpop.permute.xlu2 %3612  ;;  %v3574_v59 = vunpack.i.l.bf16 %v3573_v52 }
 0x44a   :  { %v2286_v20 = vmul.f32 %v5816_v24, %v2238_v31  ;;  %v3615_v62 = vunpack.i.h.bf16 %v5626_v54  ;;  %v3614_v4 = vunpack.i.l.bf16 %v5626_v54 }
 0x44b   :  { %2642 = vmatpush.msrb.mxu0 %v3575_v26 }
 0x44c   :  { %2382 = vmatmul.f32.vlgmr.msra.gmra.mxu2 %v2286_v20  ;;  %2888 = vmatpush.msra.mxu1 %v3615_v62 }
 0x44d   :  { %2714 = vmatpush.msra.mxu2 %v3529_v58  ;;  %2801 = vmatpush.msra.mxu0 %v3584_v23  ;;  %v3600_v58 = vunpack.i.h.bf16 %v5620_v57 }
 0x44f   :  { %2715 = vmatpush.msra.mxu2 %v3534_v55  ;;  %v5631_v21 = vpop.permute.xlu1 %3592  ;;  %v5818_v55 = vld [vmem:[#allocation10_spill] sm:$0xff] }
 0x450   :  { %v3594_v38 = vunpack.i.l.bf16 %v5631_v21  ;;  %v3595_v31 = vunpack.i.h.bf16 %v5631_v21 }
 0x451   :  { %2716 = vmatpush.msra.mxu2 %v3539_v49  ;;  %v2241_v27 = vpop.f32.mrf.mxu3  ;;  %v5634_v51 = vpop.permute.xlu0 %3587 }
 0x452   :  { %v2287_v1 = vmul.f32 %v5817_v39, %v2241_v27  ;;  %v3589_v3 = vunpack.i.l.bf16 %v5634_v51  ;;  %v5646_v46 = vpop.permute.xlu2 %3627  ;;  %v3590_v25 = vunpack.i.h.bf16 %v5634_v51 }
 0x453   :  { %2717 = vmatpush.msra.mxu2 %v3544_v30  ;;  %v3630_v24 = vunpack.i.h.bf16 %v5646_v46  ;;  %v3629_v26 = vunpack.i.l.bf16 %v5646_v46 }
 0x454   :  { %2385 = vmatmul.f32.gmra.mxu2 %v2287_v1  ;;  %2802 = vmatpush.msra.mxu0 %v3589_v3 }
 0x455   :  { %2718 = vmatpush.msra.mxu2 %v3549_v12 }
 0x456   :  { %2803 = vmatpush.msra.mxu0 %v3594_v38 }
 0x457   :  { %2719 = vmatpush.msra.mxu2 %v3554_v2  ;;  %v3608_v7 = vpop.permute.xlu1 %3607 }
 0x458   :  { %2804 = vmatpush.msra.mxu0 %v3599_v53  ;;  %v3609_v37 = vunpack.i.l.bf16 %v3608_v7  ;;  %v3610_v56 = vunpack.i.h.bf16 %v3608_v7 }
 0x459   :  { %2720 = vmatpush.msra.mxu2 %v3559_v17  ;;  %v5640_v28 = vpop.f32.mrf.mxu3  ;;  %v3603_v60 = vpop.permute.xlu0 %3602 }
 0x45a   :  { %v5642_v34 = vpop.f32.mrf.mxu1  ;;  %v3604_v10 = vunpack.i.l.bf16 %v3603_v60  ;;  %v3605_v5 = vunpack.i.h.bf16 %v3603_v60  ;;  %v3658_v47 = vpop.permute.xlu2 %3657 }
 0x45b   :  { %3797 = vrcp.f32 %v5642_v34  ;;  %2721 = vmatpush.msra.mxu2 %v3564_v14  ;;  %v2098_v35 = vand.u32 2147483648, %v5642_v34  ;;  %v2096_v0 = vand.u32 2147483647, %v5642_v34  ;;  %vm2092_vm8 = vweird.f32 %v5642_v34 }
 0x45c   :  { %2805 = vmatpush.msra.mxu0 %v3604_v10  ;;  %v3659_v51 = vunpack.i.l.bf16 %v3658_v47  ;;  %v3660_v14 = vunpack.i.h.bf16 %v3658_v47 }
 0x45d   :  { %2722 = vmatpush.msra.mxu2 %v3569_v45  ;;  %v2099_v23 = vor.u32 1.1754944e-38, %v2098_v35  ;;  %vm2097_vm9 = vcmp.eq.f32.partialorder %v2096_v0, 8.507059e+37 }
 0x45e   :  { %2806 = vmatpush.msra.mxu0 %v3605_v5 }
 0x45f   :  { %2723 = vmatpush.msra.mxu2 %v3574_v59  ;;  %v5819_v59 = vld [vmem:[#allocation15_spill] sm:$0xff] }
 0x460   :  { %2807 = vmatpush.msra.mxu0 %v3609_v37  ;;  %v3623_v32 = vpop.permute.xlu1 %3622 }
 0x461   :  { %v3798_v8 = vpop.eup %3797  ;;  %2724 = vmatpush.msra.mxu2 %v3579_v36  ;;  %v5650_v29 = vpop.f32.mrf.mxu3  ;;  %v3625_v11 = vunpack.i.h.bf16 %v3623_v32  ;;  %v3624_v42 = vunpack.i.l.bf16 %v3623_v32 }
 0x462   :  { %v2088_v19 = vmul.f32 %v3798_v8, %v5642_v34  ;;  %v3618_v50 = vpop.permute.xlu0 %3617  ;;  %v5653_v63 = vpop.f32.mrf.mxu1  ;;  %2808 = vmatpush.msra.mxu0 %v3610_v56  ;;  %vm2093_vm7 = vweird.f32 %v3798_v8 }
 0x463   :  { %v3620_v18 = vunpack.i.h.bf16 %v3618_v50  ;;  %3799 = vrcp.f32 %v5653_v63  ;;  %2725 = vmatpush.msra.mxu2 %v3580_v9  ;;  %v3619_v33 = vunpack.i.l.bf16 %v3618_v50  ;;  %vm2094_vm4 = vmor %vm2092_vm8, %vm2093_vm7  ;;  %v2112_v38 = vand.u32 2147483648, %v5653_v63  ;;  %v3663_v7 = vpop.permute.xlu2 %3662 }
 0x464   :  { %v2089_v16 = vsub.f32 1.0, %v2088_v19  ;;  %2809 = vmatpush.msra.mxu0 %v3614_v4  ;;  %v2110_v53 = vand.u32 2147483647, %v5653_v63  ;;  %vm2106_vm12 = vweird.f32 %v5653_v63 }
 0x465   :  { %2726 = vmatpush.msra.mxu2 %v3585_v41  ;;  %2889 = vmatpush.msra.mxu1 %v3620_v18  ;;  %v2113_v34 = vor.u32 1.1754944e-38, %v2112_v38  ;;  %v3665_v41 = vunpack.i.h.bf16 %v3663_v7  ;;  %v5820_v38 = vld [vmem:[#allocation16_spill] sm:$0xff] }
 0x466   :  { %v2090_v6 = vmul.f32 %v3798_v8, %v2089_v16  ;;  %2810 = vmatpush.msra.mxu0 %v3619_v33  ;;  %vm2111_vm14 = vcmp.eq.f32.partialorder %v2110_v53, 8.507059e+37 }
 0x467   :  { %2727 = vmatpush.msra.mxu2 %v3590_v25  ;;  %2890 = vmatpush.msra.mxu1 %v3625_v11 }
 0x468   :  { %v2091_v20 = vadd.f32 %v3798_v8, %v2090_v6  ;;  %2811 = vmatpush.msra.mxu0 %v3624_v42  ;;  %v3638_v1 = vpop.permute.xlu1 %3637 }
 0x469   :  { %v3800_v52 = vpop.eup %3799  ;;  %2728 = vmatpush.msra.mxu2 %v3595_v31  ;;  %v2250_v54 = vpop.f32.mrf.mxu3  ;;  %2891 = vmatpush.msra.mxu1 %v3630_v24  ;;  %v3640_v3 = vunpack.i.h.bf16 %v3638_v1  ;;  %v3639_v2 = vunpack.i.l.bf16 %v3638_v1 }
 0x46a   :  { %v2102_v62 = vmul.f32 %v3800_v52, %v5653_v63  ;;  %v2290_v49 = vmul.f32 %v5818_v55, %v2250_v54  ;;  %v3633_v30 = vpop.permute.xlu0 %3632  ;;  %v2095_v27 = vsel %vm2094_vm4, %v3798_v8, %v2091_v20  ;;  %2812 = vmatpush.msra.mxu0 %v3629_v26  ;;  %vm2107_vm10 = vweird.f32 %v3800_v52 }
 0x46b   :  { %v3635_v21 = vunpack.i.h.bf16 %v3633_v30  ;;  %v3634_v39 = vunpack.i.l.bf16 %v3633_v30  ;;  %2729 = vmatpush.msra.mxu2 %v3600_v58  ;;  %v2100_v57 = vsel %vm2097_vm9, %v2099_v23, %v2095_v27  ;;  %vm2108_vm13 = vmor %vm2106_vm12, %vm2107_vm10  ;;  %v3664_v63 = vunpack.i.l.bf16 %v3663_v7  ;;  %v3668_v4 = vpop.permute.xlu2 %3667 }
 0x46c   :  { %v2103_v12 = vsub.f32 1.0, %v2102_v62  ;;  %3355 = vmatmul.msk.f32.gmra.mxu3 %vm2172_vm11, %v2100_v57  ;;  %2556 = vmatmul.f32.vlgmr.msrb.gmra.mxu2 %v2290_v49  ;;  %v3670_v31 = vunpack.i.h.bf16 %v3668_v4  ;;  %v3669_v42 = vunpack.i.l.bf16 %v3668_v4 }
 0x46d   :  { %2813 = vmatpush.msra.mxu0 %v3634_v39  ;;  %2892 = vmatpush.msra.mxu1 %v3635_v21 }
 0x46e   :  { %2975 = vmatpush.msrb.mxu2 %v3659_v51  ;;  %v2104_v17 = vmul.f32 %v3800_v52, %v2103_v12 }
 0x46f   :  { %2814 = vmatpush.msra.mxu0 %v3639_v2  ;;  %2893 = vmatpush.msra.mxu1 %v3640_v3 }
 0x470   :  { %v2105_v60 = vadd.f32 %v3800_v52, %v2104_v17  ;;  %v3648_v8 = vpop.permute.xlu1 %3647  ;;  %v1935_v19 = vpop.f32.mrf.mxu1 }
 0x471   :  { %2815 = vmatpush.msra.mxu0 %v3660_v14  ;;  %v2253_v45 = vpop.f32.mrf.mxu3  ;;  %v3649_v56 = vunpack.i.l.bf16 %v3648_v8  ;;  %v3650_v50 = vunpack.i.h.bf16 %v3648_v8  ;;  %3801 = vrcp.f32 %v1935_v19  ;;  %v2126_v24 = vand.u32 2147483648, %v1935_v19 }
 0x472   :  { %v3643_v10 = vpop.permute.xlu0 %3642  ;;  %v2109_v46 = vsel %vm2108_vm13, %v3800_v52, %v2105_v60  ;;  %v2291_v5 = vmul.f32 %v5819_v59, %v2253_v45  ;;  %v2124_v52 = vand.u32 2147483647, %v1935_v19  ;;  %vm2120_vm1 = vweird.f32 %v1935_v19 }
 0x473   :  { %v3645_v36 = vunpack.i.h.bf16 %v3643_v10  ;;  %v3644_v37 = vunpack.i.l.bf16 %v3643_v10  ;;  %v2114_v9 = vsel %vm2111_vm14, %v2113_v34, %v2109_v46  ;;  %2816 = vmatpush.msra.mxu0 %v3649_v56  ;;  %v2127_v49 = vor.u32 1.1754944e-38, %v2126_v24  ;;  %v3693_v30 = vpop.permute.xlu2 %3692 }
 0x474   :  { %3356 = vmatmul.msk.f32.gmra.mxu3 %vm2172_vm11, %v2114_v9  ;;  %2559 = vmatmul.f32.gmra.mxu2 %v2291_v5  ;;  %vm2125_vm3 = vcmp.eq.f32.partialorder %v2124_v52, 8.507059e+37  ;;  %v3695_v2 = vunpack.i.h.bf16 %v3693_v30  ;;  %v3694_v14 = vunpack.i.l.bf16 %v3693_v30 }
 0x475   :  { %2894 = vmatpush.msra.mxu1 %v3644_v37  ;;  %2976 = vmatpush.msrb.mxu2 %v3645_v36 }
 0x477   :  { %2895 = vmatpush.msra.mxu1 %v3650_v50  ;;  %2977 = vmatpush.msrb.mxu2 %v3664_v63  ;;  %v3802_v32 = vpop.eup %3801 }
 0x478   :  { %v3673_v33 = vpop.permute.xlu1 %3672  ;;  %v2116_v35 = vmul.f32 %v3802_v32, %v1935_v19  ;;  %v5675_v47 = vpop.f32.mrf.mxu1  ;;  %vm2121_vm15 = vweird.f32 %v3802_v32 }
 0x479   :  { %2896 = vmatpush.msra.mxu1 %v3665_v41  ;;  %v3675_v11 = vunpack.i.h.bf16 %v3673_v33  ;;  %v3674_v6 = vunpack.i.l.bf16 %v3673_v33  ;;  %3803 = vrcp.f32 %v5675_v47  ;;  %vm2122_vm2 = vmor %vm2120_vm1, %vm2121_vm15  ;;  %v2140_v53 = vand.u32 2147483648, %v5675_v47 }
 0x47a   :  { %v3653_v18 = vpop.permute.xlu0 %3652  ;;  %v2117_v0 = vsub.f32 1.0, %v2116_v35  ;;  %v2138_v60 = vand.u32 2147483647, %v5675_v47  ;;  %vm2134_vm6 = vweird.f32 %v5675_v47 }
 0x47b   :  { %v3655_v16 = vunpack.i.h.bf16 %v3653_v18  ;;  %v3654_v25 = vunpack.i.l.bf16 %v3653_v18  ;;  %v2141_v36 = vor.u32 1.1754944e-38, %v2140_v53  ;;  %v3703_v50 = vpop.permute.xlu2 %3702  ;;  %v5821_v18 = vld [vmem:[#allocation17_spill] sm:$0xff] }
 0x47c   :  { %v2118_v20 = vmul.f32 %v3802_v32, %v2117_v0  ;;  %vm2139_vm8 = vcmp.eq.f32.partialorder %v2138_v60, 8.507059e+37  ;;  %v3704_v35 = vunpack.i.l.bf16 %v3703_v50  ;;  %v3705_v0 = vunpack.i.h.bf16 %v3703_v50  ;;  %v3712_v50 = vld [vmem:[%s5761_s4] ss:$0 sm:$0xff]  ;;  %s3838_s4 = smov [#allocation2]  }
 0x47d   :  { %2897 = vmatpush.msra.mxu1 %v3655_v16  ;;  %2978 = vmatpush.msrb.mxu2 %v3654_v25  ;;  %s3139_s0 = sshll.u32 %s3838_s4, 4  ;;  %s3140_s0 = int_to_ptr.vmem [resolvable:$true] %s3139_s0 }
 0x47e   :  { %v2119_v26 = vadd.f32 %v3802_v32, %v2118_v20 }
 0x47f   :  { %2898 = vmatpush.msra.mxu1 %v3675_v11  ;;  %2979 = vmatpush.msrb.mxu2 %v3674_v6  ;;  %v3804_v54 = vpop.eup %3803 }
 0x480   :  { %v3678_v55 = vpop.permute.xlu1 %3677  ;;  %v2130_v27 = vmul.f32 %v3804_v54, %v5675_v47  ;;  %v5679_v21 = vpop.f32.mrf.mxu1  ;;  %v2123_v39 = vsel %vm2122_vm2, %v3802_v32, %v2119_v26  ;;  %vm2135_vm5 = vweird.f32 %v3804_v54 }
 0x481   :  { %2899 = vmatpush.msra.mxu1 %v3670_v31  ;;  %2980 = vmatpush.msrb.mxu2 %v3669_v42  ;;  %v3680_v1 = vunpack.i.h.bf16 %v3678_v55  ;;  %v3679_v57 = vunpack.i.l.bf16 %v3678_v55  ;;  %3805 = vrcp.f32 %v5679_v21  ;;  %v2128_v51 = vsel %vm2125_vm3, %v2127_v49, %v2123_v39  ;;  %vm2136_vm7 = vmor %vm2134_vm6, %vm2135_vm5 }
 0x482   :  { %v3683_v58 = vpop.permute.xlu0 %3682  ;;  %v2131_v12 = vsub.f32 1.0, %v2130_v27  ;;  %3357 = vmatmul.msk.f32.gmra.mxu3 %vm2172_vm11, %v2128_v51  ;;  %v2154_v16 = vand.u32 2147483648, %v5679_v21  ;;  %v2152_v33 = vand.u32 2147483647, %v5679_v21  ;;  %vm2148_vm9 = vweird.f32 %v5679_v21 }
 0x483   :  { %v3685_v23 = vunpack.i.h.bf16 %v3683_v58  ;;  %v3684_v62 = vunpack.i.l.bf16 %v3683_v58 }
 0x484   :  { %v2256_v3 = vpop.f32.mrf.mxu3  ;;  %v2132_v7 = vmul.f32 %v3804_v54, %v2131_v12  ;;  %v2155_v31 = vor.u32 1.1754944e-38, %v2154_v16  ;;  %vm2153_vm12 = vcmp.eq.f32.partialorder %v2152_v33, 8.507059e+37 }
 0x485   :  { %2900 = vmatpush.msra.mxu1 %v3685_v23  ;;  %2981 = vmatpush.msrb.mxu2 %v3684_v62  ;;  %v2292_v17 = vmul.f32 %v5820_v38, %v2256_v3  ;;  %v3001_v38 = vld [vmem:[%s5759_s2 + $0x18] sm:$0xff] }
 0x486   :  { %v2133_v45 = vadd.f32 %v3804_v54, %v2132_v7 }
 0x487   :  { %2901 = vmatpush.msra.mxu1 %v3680_v1  ;;  %2982 = vmatpush.msrb.mxu2 %v3679_v57  ;;  %v3806_v10 = vpop.eup %3805  ;;  %v5823_v1 = vld [vmem:[#allocation9_spill] sm:$0xff] }
 0x488   :  { %2643 = vmatmul.f32.vlgmr.msrb.gmra.mxu0 %v2292_v17  ;;  %v3698_v5 = vpop.permute.xlu1 %3697  ;;  %v2144_v37 = vmul.f32 %v3806_v10, %v5679_v21  ;;  %v1944_v8 = vpop.f32.mrf.mxu1  ;;  %v2137_v9 = vsel %vm2136_vm7, %v3804_v54, %v2133_v45  ;;  %vm2149_vm4 = vweird.f32 %v3806_v10  ;;  %v5822_v21 = vld [vmem:[#allocation8_spill] sm:$0xff]  ;;  %v2289_v57 = vmul.f32 %v5823_v1, %v5650_v29  ;;  %v2999_v29 = vld [vmem:[%s5759_s2 + $0x8] sm:$0xff] }
 0x489   :  { %2902 = vmatpush.msra.mxu1 %v3695_v2  ;;  %2983 = vmatpush.msrb.mxu2 %v3694_v14  ;;  %v3699_v56 = vunpack.i.l.bf16 %v3698_v5  ;;  %3807 = vrcp.f32 %v1944_v8  ;;  %v2142_v19 = vsel %vm2139_vm8, %v2141_v36, %v2137_v9  ;;  %v3700_v4 = vunpack.i.h.bf16 %v3698_v5  ;;  %vm2150_vm10 = vmor %vm2148_vm9, %vm2149_vm4 }
 0x48a   :  { %v3688_v34 = vpop.permute.xlu0 %3687  ;;  %v2145_v63 = vsub.f32 1.0, %v2144_v37  ;;  %3358 = vmatmul.msk.f32.gmra.mxu3 %vm2172_vm11, %v2142_v19  ;;  %v2168_v54 = vand.u32 2147483648, %v1944_v8  ;;  %v2166_v62 = vand.u32 2147483647, %v1944_v8  ;;  %vm2162_vm14 = vweird.f32 %v1944_v8  ;;  %3066 = vmatpush.msrb.mxu0 %v3001_v38 }
 0x48b   :  { %v3690_v46 = vunpack.i.h.bf16 %v3688_v34  ;;  %v3689_v59 = vunpack.i.l.bf16 %v3688_v34  ;;  %v2288_v39 = vmul.f32 %v5822_v21, %v5640_v28  ;;  %v3000_v28 = vld [vmem:[%s5759_s2 + $0x10] sm:$0xff] }
 0x48c   :  { %v2259_v41 = vpop.f32.mrf.mxu3  ;;  %v2146_v25 = vmul.f32 %v3806_v10, %v2145_v63  ;;  %v2169_v49 = vor.u32 1.1754944e-38, %v2168_v54  ;;  %vm2167_vm1 = vcmp.eq.f32.partialorder %v2166_v62, 8.507059e+37  ;;  %3067 = vmatpush.msrb.mxu0 %v3000_v28 }
 0x48d   :  { %2903 = vmatpush.msra.mxu1 %v3690_v46  ;;  %2984 = vmatpush.msrb.mxu2 %v3689_v59  ;;  %v2293_v32 = vmul.f32 %v5821_v18, %v2259_v41 }
 0x48e   :  { %v2147_v11 = vadd.f32 %v3806_v10, %v2146_v25  ;;  %3068 = vmatpush.msrb.mxu0 %v2999_v29 }
 0x48f   :  { %2985 = vmatpush.msrb.mxu2 %v3699_v56  ;;  %v3808_v6 = vpop.eup %3807 }
 0x490   :  { %2646 = vmatmul.f32.gmra.mxu0 %v2293_v32  ;;  %v2158_v42 = vmul.f32 %v3808_v6, %v1944_v8  ;;  %v2151_v24 = vsel %vm2150_vm10, %v3806_v10, %v2147_v11  ;;  %vm2163_vm13 = vweird.f32 %v3808_v6 }
 0x491   :  { %2986 = vmatpush.msrb.mxu2 %v3700_v4  ;;  %v2156_v52 = vsel %vm2153_vm12, %v2155_v31, %v2151_v24  ;;  %vm2164_vm15 = vmor %vm2162_vm14, %vm2163_vm13 }
 0x492   :  { %v3708_v47 = vpop.permute.xlu0 %3707  ;;  %v2159_v58 = vsub.f32 1.0, %v2158_v42  ;;  %3359 = vmatmul.msk.f32.gmra.mxu3 %vm2172_vm11, %v2156_v52 }
 0x493   :  { %2987 = vmatpush.msrb.mxu2 %v3704_v35  ;;  %v3709_v20 = vunpack.i.l.bf16 %v3708_v47  ;;  %v3710_v26 = vunpack.i.h.bf16 %v3708_v47 }
 0x494   :  { %v2160_v23 = vmul.f32 %v3808_v6, %v2159_v58 }
 0x495   :  { %2988 = vmatpush.msrb.mxu2 %v3705_v0 }
 0x496   :  { %v2161_v55 = vadd.f32 %v3808_v6, %v2160_v23 }
 0x497   :  { %2989 = vmatpush.msrb.mxu2 %v3709_v20 }
 0x498   :  { %v2165_v30 = vsel %vm2164_vm15, %v3808_v6, %v2161_v55 }
 0x499   :  { %2990 = vmatpush.msrb.mxu2 %v3710_v26  ;;  %v2170_v27 = vsel %vm2167_vm1, %v2169_v49, %v2165_v30 }
 0x49a   :  { %3360 = vmatmul.msk.f32.gmra.mxu3 %vm2172_vm11, %v2170_v27 }
 0x4a2   :  { %2469 = vmatmul.f32.vlgmr.msra.gmra.mxu3 %v2288_v39 }
 0x4aa   :  { %2472 = vmatmul.f32.gmra.mxu3 %v2289_v57 }
 0x4b2   :  { %v2262_v51 = vpop.f32.mrf.mxu3 }
 0x4b3   :  { %v2294_v12 = vmul.f32 %v5274_v43, %v2262_v51  ;;  %v2998_v43 = vld [vmem:[%s5759_s2] sm:$0xff] }
 0x4b4   :  { %3069 = vmatpush.msrb.mxu0 %v2998_v43 }
 0x4b5   :  { %2730 = vmatmul.f32.vlgmr.msra.gmra.mxu2 %v2294_v12 }
 0x4ba   :  { %v2265_v3 = vpop.f32.mrf.mxu3 }
 0x4bb   :  { %v2295_v2 = vmul.f32 %v5292_v48, %v2265_v3 }
 0x4bd   :  { %2733 = vmatmul.f32.gmra.mxu2 %v2295_v2 }
 0x4cf   :  { %v2383_v7 = vpop.f32.mrf.mxu2 }
 0x4d7   :  { %v2386_v60 = vpop.f32.mrf.mxu2 }
 0x4ef   :  { %v2268_v48 = vpop.f32.mrf.mxu3 }
 0x4f0   :  { %v2296_v17 = vmul.f32 %v5402_v44, %v2268_v48 }
 0x4f2   :  { %2817 = vmatmul.f32.vlgmr.msra.gmra.mxu0 %v2296_v17 }
 0x4f7   :  { %v2271_v53 = vpop.f32.mrf.mxu3 }
 0x4f8   :  { %v2297_v14 = vmul.f32 %v5438_v22, %v2271_v53 }
 0x4fa   :  { %2820 = vmatmul.f32.gmra.mxu0 %v2297_v14 }
 0x502   :  { %3361 = vmatmul.msk.f32.vlgmr.msrb.gmra.mxu0 %vm60_vm0, %v2383_v7 }
 0x505   :  { %v2274_v34 = vpop.f32.mrf.mxu3 }
 0x506   :  { %v2298_v45 = vmul.f32 %v5478_v61, %v2274_v34  ;;  %v2557_v61 = vpop.f32.mrf.mxu2 }
 0x508   :  { %2904 = vmatmul.f32.vlgmr.msra.gmra.mxu1 %v2298_v45 }
 0x50a   :  { %3362 = vmatmul.msk.f32.gmra.mxu0 %vm60_vm0, %v2386_v60 }
 0x50d   :  { %v2277_v10 = vpop.f32.mrf.mxu3 }
 0x50e   :  { %v2299_v46 = vmul.f32 %v5506_v15, %v2277_v10  ;;  %v2560_v8 = vpop.f32.mrf.mxu2  ;;  %v2644_v15 = vpop.f32.mrf.mxu0 }
 0x510   :  { %2907 = vmatmul.f32.gmra.mxu1 %v2299_v46 }
 0x515   :  { %v2280_v44 = vpop.f32.mrf.mxu3 }
 0x516   :  { %v2300_v59 = vmul.f32 %v5532_v40, %v2280_v44  ;;  %v2647_v40 = vpop.f32.mrf.mxu0 }
 0x518   :  { %2991 = vmatmul.f32.vlgmr.msrb.gmra.mxu2 %v2300_v59 }
 0x51d   :  { %v2283_v22 = vpop.f32.mrf.mxu3 }
 0x51e   :  { %v2301_v5 = vmul.f32 %v5555_v13, %v2283_v22 }
 0x520   :  { %2994 = vmatmul.f32.gmra.mxu2 %v2301_v5 }
 0x525   :  { %v2470_v36 = vpop.f32.mrf.mxu3 }
 0x526   :  { %3363 = vmatmul.msk.f32.gmra.mxu0 %vm60_vm0, %v2470_v36 }
 0x52d   :  { %v2473_v37 = vpop.f32.mrf.mxu3 }
 0x52e   :  { %3364 = vmatmul.msk.f32.gmra.mxu0 %vm60_vm0, %v2473_v37 }
 0x536   :  { %3365 = vmatmul.msk.f32.gmra.mxu0 %vm60_vm0, %v2557_v61 }
 0x538   :  { %v2731_v13 = vpop.f32.mrf.mxu2 }
 0x53e   :  { %3366 = vmatmul.msk.f32.gmra.mxu0 %vm60_vm0, %v2560_v8 }
 0x540   :  { %v2734_v9 = vpop.f32.mrf.mxu2 }
 0x546   :  { %3367 = vmatmul.msk.f32.gmra.mxu0 %vm60_vm0, %v2644_v15 }
 0x54e   :  { %3368 = vmatmul.msk.f32.gmra.mxu0 %vm60_vm0, %v2647_v40 }
 0x556   :  { %3369 = vmatmul.msk.f32.gmra.mxu0 %vm60_vm0, %v2731_v13 }
 0x55e   :  { %3370 = vmatmul.msk.f32.gmra.mxu0 %vm60_vm0, %v2734_v9 }
 0x56f   :  { %v2818_v56 = vpop.f32.mrf.mxu0 }
 0x570   :  { %3371 = vmatmul.msk.f32.gmra.mxu0 %vm60_vm0, %v2818_v56 }
 0x577   :  { %v2821_v19 = vpop.f32.mrf.mxu0 }
 0x578   :  { %3372 = vmatmul.msk.f32.gmra.mxu0 %vm60_vm0, %v2821_v19 }
 0x57f   :  { %v3071_v63 = vpop.f32.mrf.mxu0 }
 0x580   :  { %v3072_v41 = vadd.f32 %v3712_v50, %v3071_v63 }
 0x582   :  { %3119 = vst.msk [vmem:[#allocation2] sm:$0xff] %vm60_vm0, %v3072_v41 }
 0x585   :  { %v2905_v32 = vpop.f32.mrf.mxu1 }
 0x586   :  { %3373 = vmatmul.msk.f32.gmra.mxu0 %vm60_vm0, %v2905_v32 }
 0x587   :  { %v3074_v4 = vpop.f32.mrf.mxu0 }
 0x588   :  { %v3075_v18 = vadd.f32 %v3712_v50, %v3074_v4 }
 0x58a   :  { %3120 = vst.msk [vmem:[#allocation2 + $0x8] sm:$0xff] %vm60_vm0, %v3075_v18 }
 0x58d   :  { %v2908_v16 = vpop.f32.mrf.mxu1 }
 0x58e   :  { %3374 = vmatmul.msk.f32.gmra.mxu0 %vm60_vm0, %v2908_v16 }
 0x59b   :  { %v2992_v25 = vpop.f32.mrf.mxu2 }
 0x59c   :  { %3375 = vmatmul.msk.f32.gmra.mxu0 %vm60_vm0, %v2992_v25 }
 0x5a3   :  { %v2995_v33 = vpop.f32.mrf.mxu2  ;;  %v3077_v35 = vpop.f32.mrf.mxu0 }
 0x5a4   :  { %v3078_v47 = vadd.f32 %v3712_v50, %v3077_v35  ;;  %3376 = vmatmul.msk.f32.gmra.mxu0 %vm60_vm0, %v2995_v33 }
 0x5a6   :  { %3121 = vst.msk [vmem:[#allocation2 + $0x10] sm:$0xff] %vm60_vm0, %v3078_v47 }
 0x5ab   :  { %v3080_v11 = vpop.f32.mrf.mxu0 }
 0x5ac   :  { %v3081_v6 = vadd.f32 %v3712_v50, %v3080_v11 }
 0x5ae   :  { %3122 = vst.msk [vmem:[#allocation2 + $0x18] sm:$0xff] %vm60_vm0, %v3081_v6 }
 0x5b3   :  { %v3083_v0 = vpop.f32.mrf.mxu0 }
 0x5b4   :  { %v3084_v31 = vadd.f32 %v3712_v50, %v3083_v0 }
 0x5b6   :  { %3123 = vst.msk [vmem:[#allocation2 + $0x20] sm:$0xff] %vm60_vm0, %v3084_v31 }
 0x5bb   :  { %v3086_v42 = vpop.f32.mrf.mxu0 }
 0x5bc   :  { %v3087_v24 = vadd.f32 %v3712_v50, %v3086_v42 }
 0x5be   :  { %3124 = vst.msk [vmem:[#allocation2 + $0x28] sm:$0xff] %vm60_vm0, %v3087_v24 }
 0x5c3   :  { %v3089_v20 = vpop.f32.mrf.mxu0 }
 0x5c4   :  { %v3090_v52 = vadd.f32 %v3712_v50, %v3089_v20 }
 0x5c6   :  { %3125 = vst.msk [vmem:[#allocation2 + $0x30] sm:$0xff] %vm60_vm0, %v3090_v52 }
 0x5cb   :  { %v3092_v58 = vpop.f32.mrf.mxu0 }
 0x5cc   :  { %v3093_v26 = vadd.f32 %v3712_v50, %v3092_v58 }
 0x5ce   :  { %3126 = vst.msk [vmem:[#allocation2 + $0x38] sm:$0xff] %vm60_vm0, %v3093_v26 }
 0x5d3   :  { %v3095_v54 = vpop.f32.mrf.mxu0 }
 0x5d4   :  { %v3096_v23 = vadd.f32 %v3712_v50, %v3095_v54 }
 0x5d6   :  { %3127 = vst.msk [vmem:[#allocation2 + $0x40] sm:$0xff] %vm60_vm0, %v3096_v23 }
 0x5db   :  { %v3098_v62 = vpop.f32.mrf.mxu0 }
 0x5dc   :  { %v3099_v55 = vadd.f32 %v3712_v50, %v3098_v62 }
 0x5de   :  { %3128 = vst.msk [vmem:[#allocation2 + $0x48] sm:$0xff] %vm60_vm0, %v3099_v55 }
 0x5ed   :  { %v3101_v49 = vpop.f32.mrf.mxu0 }
 0x5ee   :  { %v3102_v30 = vadd.f32 %v3712_v50, %v3101_v49 }
 0x5f0   :  { %3129 = vst.msk [vmem:[#allocation2 + $0x50] sm:$0xff] %vm60_vm0, %v3102_v30 }
 0x5f5   :  { %v3104_v27 = vpop.f32.mrf.mxu0 }
 0x5f6   :  { %v3105_v21 = vadd.f32 %v3712_v50, %v3104_v27 }
 0x5f8   :  { %3130 = vst.msk [vmem:[#allocation2 + $0x58] sm:$0xff] %vm60_vm0, %v3105_v21 }
 0x603   :  { %v3107_v39 = vpop.f32.mrf.mxu0 }
 0x604   :  { %v3108_v1 = vadd.f32 %v3712_v50, %v3107_v39 }
 0x606   :  { %3131 = vst.msk [vmem:[#allocation2 + $0x60] sm:$0xff] %vm60_vm0, %v3108_v1 }
 0x60b   :  { %v3110_v57 = vpop.f32.mrf.mxu0 }
 0x60c   :  { %v3111_v51 = vadd.f32 %v3712_v50, %v3110_v57 }
 0x60e   :  { %3132 = vst.msk [vmem:[#allocation2 + $0x68] sm:$0xff] %vm60_vm0, %v3111_v51 }
 0x619   :  { %v3113_v12 = vpop.f32.mrf.mxu0 }
 0x61a   :  { %v3114_v3 = vadd.f32 %v3712_v50, %v3113_v12 }
 0x61c   :  { %3133 = vst.msk [vmem:[#allocation2 + $0x70] sm:$0xff] %vm60_vm0, %v3114_v3 }
 0x621   :  { %v3116_v2 = vpop.f32.mrf.mxu0 }
 0x622   :  { %v3117_v38 = vadd.f32 %v3712_v50, %v3116_v2 }
 0x624   :  { %3134 = vst.msk [vmem:[#allocation2 + $0x78] sm:$0xff] %vm60_vm0, %v3117_v38 }
 0x625   :  { %3147 = dma.vmem_to_hbm [thread:$0]  %s3140_s0, 2048, %s3142_s16, [#allocation3], %s3839_s17, %s3839_s17, %s3840_s18  }
 0x626   :  { %3833 = dma.done.wait [#allocation3], 2048  }
 0x627   :  { %3834 = vsyncadd [#allocation3], 4294965248 }
 0x628   :  { %3152 = vsyncpa [#allocation3], 1 }

</bundles_post_ra>
